<compile_context>
chip_gen: v5e
topology: v5e:2x2
jax: 0.10.0
libtpu: 0.0.40
codegen_flags: <defaults>
</compile_context>

<pallas_src>
import functools

import numpy as np
import jax
import jax.numpy as jnp
from jax import lax
from jax.experimental import pallas as pl
from jax.experimental.pallas import tpu as pltpu


_VMEM = pl.BlockSpec(memory_space=pltpu.MemorySpace.VMEM)


# ---------------------------------------------------------------------------
# Fused bidirectional LSTM (+ optional Linear head) kernel
# ---------------------------------------------------------------------------
def fused_bilstm_kernel(x_ref, wih_ref, whhf_ref, whhb_ref, b_ref,
                        *rest, T, B, HP, with_head):
    """One bidirectional LSTM layer, fully fused.

    x_ref:   [T*B, Din]   flattened time-major input (row = t*B + b)
    wih_ref: [Din, 8*HP]  input->gates weights, fwd cols 0:4HP, bwd cols 4HP:8HP
                          (gate-block padded, PyTorch i,f,g,o order)
    whh*:    [HP, 4*HP]   hidden->gates weights per direction (padded)
    b_ref:   [1, 8*HP]    b_ih + b_hh for both directions (padded)
    with_head=True:  rest = (lw [2HP,LP], lb [1,LP], logits_ref [T*B,LP],
                             xg_scr [T*B,8HP], hcat_scr [T*B,2HP])
    with_head=False: rest = (hcat_ref [T*B,2HP], xg_scr [T*B,8HP])
    """
    if with_head:
        lw_ref, lb_ref, logits_ref, xg_scr, hcat_scr = rest
    else:
        hcat_scr, xg_scr = rest          # write hidden slab straight to output

    G = 4 * HP

    # ---- hoisted input projection: ONE MXU matmul for both directions, all T
    xg_scr[...] = (jnp.dot(x_ref[...], wih_ref[...],
                           preferred_element_type=jnp.float32) + b_ref[...])

    def cell(gates, c_prev):
        # HP = 128 -> each gate slice is a whole vreg lane group (no shuffles).
        i = jax.nn.sigmoid(gates[:, 0 * HP:1 * HP])
        f = jax.nn.sigmoid(gates[:, 1 * HP:2 * HP])
        g = jnp.tanh(gates[:, 2 * HP:3 * HP])
        o = jax.nn.sigmoid(gates[:, 3 * HP:4 * HP])
        c = f * c_prev + i * g
        h = o * jnp.tanh(c)
        return h, c

    z = jnp.zeros((B, HP), jnp.float32)
    h_f, c_f, h_b, c_b = z, z, z, z

    # Fully unrolled fused forward+backward recurrence (static trip count).
    # Only h @ W_hh + gate math remains on the serial path; the two directions
    # are independent each step so the LLO can interleave their MXU/EUP work.
    for t in range(T):
        tb = T - 1 - t
        g_f = xg_scr[t * B:(t + 1) * B, 0:G] + jnp.dot(
            h_f, whhf_ref[...], preferred_element_type=jnp.float32)
        g_b = xg_scr[tb * B:(tb + 1) * B, G:2 * G] + jnp.dot(
            h_b, whhb_ref[...], preferred_element_type=jnp.float32)
        h_f, c_f = cell(g_f, c_f)
        h_b, c_b = cell(g_b, c_b)
        hcat_scr[t * B:(t + 1) * B, 0:HP] = h_f
        hcat_scr[tb * B:(tb + 1) * B, HP:2 * HP] = h_b

    if with_head:
        # Fused Linear head: ONE matmul on the lane-dense [T*B, 2HP] slab,
        # producing a lane-dense [T*B, LP] logits slab.
        logits_ref[...] = (jnp.dot(hcat_scr[...], lw_ref[...],
                                   preferred_element_type=jnp.float32)
                           + lb_ref[...])


def run_fused_layer(x_flat, layer, head, *, with_head, T, B):
    wih, whhf, whhb, b = layer
    HP = whhf.shape[0]
    N = T * B
    kernel = functools.partial(fused_bilstm_kernel,
                               T=T, B=B, HP=HP, with_head=with_head)
    if with_head:
        lw, lb = head
        LP = lb.shape[1]
        return pl.pallas_call(
            kernel,
            out_shape=jax.ShapeDtypeStruct((N, LP), jnp.float32),
            in_specs=[_VMEM] * 7,
            out_specs=_VMEM,
            scratch_shapes=[pltpu.VMEM((N, 8 * HP), jnp.float32),
                            pltpu.VMEM((N, 2 * HP), jnp.float32)],
        )(x_flat, wih, whhf, whhb, b, lw, lb)
    return pl.pallas_call(
        kernel,
        out_shape=jax.ShapeDtypeStruct((N, 2 * HP), jnp.float32),
        in_specs=[_VMEM] * 5,
        out_specs=_VMEM,
        scratch_shapes=[pltpu.VMEM((N, 8 * HP), jnp.float32)],
    )(x_flat, wih, whhf, whhb, b)


# ---------------------------------------------------------------------------
# Jitted forward wrapper (embedding gather + fused kernel + tiny epilogue)
# ---------------------------------------------------------------------------
@functools.partial(jax.jit, static_argnames=("num_labels",))
def model_forward_eval(padded, word_ids, tag_ids, *, num_labels):
    B, T = word_ids.shape
    # Gather directly in time-major layout (ids transposed, not the embeddings).
    we = jnp.take(padded["word_emb"], word_ids.T, axis=0)        # [T, B, wd]
    te = jnp.take(padded["tag_emb"], tag_ids.T, axis=0)          # [T, B, pd]
    x = jnp.concatenate([we, te], axis=-1).reshape(T * B, -1)    # [T*B, D]
    # F.dropout(..., training=False) is the identity in eval mode.
    layers = padded["lstm"]
    for li in range(len(layers) - 1):
        x = run_fused_layer(x, layers[li], None, with_head=False, T=T, B=B)
        # TODO(synk): inter-layer dropout only applies in training mode.
    logits_p = run_fused_layer(x, layers[-1], padded["head"],
                               with_head=True, T=T, B=B)         # [T*B, LP]
    LP = logits_p.shape[1]
    logits = logits_p.reshape(T, B, LP)[:, :, :num_labels].transpose(1, 0, 2)
    preds = jnp.argmax(logits, axis=-1).astype(jnp.int32)        # [B, T]
    return logits, preds


# ---------------------------------------------------------------------------
# Parameter init (PyTorch-like logical layout) + exact zero-padding to HP/LP
# ---------------------------------------------------------------------------
def init_params(key, n_words, n_tags, n_labels, word_dim, pos_dim, hidden, layers):
    keys = iter(jax.random.split(key, 4 + 6 * layers))
    p = {
        "word_emb": 0.1 * jax.random.normal(next(keys), (n_words, word_dim), jnp.float32),
        "tag_emb": 0.1 * jax.random.normal(next(keys), (n_tags, pos_dim), jnp.float32),
    }
    lstm = []
    in_dim = word_dim + pos_dim
    for _ in range(layers):
        dirs = []
        for _direction in range(2):
            # stored pre-transposed: [in_dim, 4H], [H, 4H]; bias = b_ih + b_hh
            w_ih = 0.1 * jax.random.normal(next(keys), (in_dim, 4 * hidden), jnp.float32)
            w_hh = 0.1 * jax.random.normal(next(keys), (hidden, 4 * hidden), jnp.float32)
            b = 0.1 * jax.random.normal(next(keys), (1, 4 * hidden), jnp.float32)
            dirs.append((w_ih, w_hh, b))
        lstm.append(tuple(dirs))
        in_dim = 2 * hidden
    p["lstm"] = lstm
    p["lin_w"] = 0.1 * jax.random.normal(next(keys), (2 * hidden, n_labels), jnp.float32)
    p["lin_b"] = jnp.zeros((1, n_labels), jnp.float32)
    return p


def _pad_gate_cols(w, H, HP):
    """[X, 4H] -> [X, 4HP]: gate k's columns land at [k*HP : k*HP+H], rest 0."""
    out = jnp.zeros((w.shape[0], 4 * HP), w.dtype)
    for k in range(4):
        out = out.at[:, k * HP:k * HP + H].set(w[:, k * H:(k + 1) * H])
    return out


def prepare_padded_params(params, H, HP, L, LP):
    """Zero-pad weights so padded hidden units / labels stay exactly zero."""
    padded_layers = []
    for li, (fwd, bwd) in enumerate(params["lstm"]):
        wih_parts, whh_parts, b_parts = [], [], []
        for (w_ih, w_hh, b) in (fwd, bwd):
            w_ih_p = _pad_gate_cols(w_ih, H, HP)                     # [Din, 4HP]
            if li > 0:
                # stacked layer: input is padded [2*HP] bi-hidden; remap rows.
                w_full = jnp.zeros((2 * HP, 4 * HP), w_ih.dtype)
                w_full = w_full.at[:H, :].set(w_ih_p[:H, :])
                w_full = w_full.at[HP:HP + H, :].set(w_ih_p[H:2 * H, :])
                w_ih_p = w_full
            wih_parts.append(w_ih_p)
            whh_parts.append(jnp.zeros((HP, 4 * HP), w_hh.dtype).at[:H, :].set(
                _pad_gate_cols(w_hh, H, HP)))
            b_parts.append(_pad_gate_cols(b, H, HP))                 # [1, 4HP]
        wih_c = jnp.concatenate(wih_parts, axis=1)                   # [Din, 8HP]
        b_c = jnp.concatenate(b_parts, axis=1)                       # [1, 8HP]
        padded_layers.append((wih_c, whh_parts[0], whh_parts[1], b_c))
    lw = params["lin_w"]                                             # [2H, L]
    lw_p = jnp.zeros((2 * HP, LP), lw.dtype)
    lw_p = lw_p.at[:H, :L].set(lw[:H])
    lw_p = lw_p.at[HP:HP + H, :L].set(lw[H:2 * H])
    lb_p = jnp.zeros((1, LP), lw.dtype).at[:, :L].set(params["lin_b"])
    return {"word_emb": params["word_emb"], "tag_emb": params["tag_emb"],
            "lstm": padded_layers, "head": (lw_p, lb_p)}


# ---------------------------------------------------------------------------
# Pure-JAX reference (matches nn.LSTM on a padded batch, no packing)
# ---------------------------------------------------------------------------
def _lstm_dir_ref(x_tbd, w_ih, w_hh, b):
    T, B, _ = x_tbd.shape
    H = w_hh.shape[0]

    def step(carry, x_t):
        h, c = carry
        gates = x_t @ w_ih + h @ w_hh + b
        i = jax.nn.sigmoid(gates[:, 0 * H:1 * H])
        f = jax.nn.sigmoid(gates[:, 1 * H:2 * H])
        g = jnp.tanh(gates[:, 2 * H:3 * H])
        o = jax.nn.sigmoid(gates[:, 3 * H:4 * H])
        c = f * c + i * g
        h = o * jnp.tanh(c)
        return (h, c), h

    init = (jnp.zeros((B, H), jnp.float32), jnp.zeros((B, H), jnp.float32))
    _, hs = lax.scan(step, init, x_tbd)
    return hs


def reference_forward(params, word_ids, tag_ids):
    we = jnp.take(params["word_emb"], word_ids, axis=0)
    te = jnp.take(params["tag_emb"], tag_ids, axis=0)
    x = jnp.transpose(jnp.concatenate([we, te], axis=-1), (1, 0, 2))   # [T,B,D]
    for (fwd, bwd) in params["lstm"]:
        hf = _lstm_dir_ref(x, *fwd)
        hb = _lstm_dir_ref(x[::-1], *bwd)[::-1]
        x = jnp.concatenate([hf, hb], axis=-1)
    h = jnp.transpose(x, (1, 0, 2))                                    # [B,T,2H]
    logits = h @ params["lin_w"] + params["lin_b"]
    return logits, jnp.argmax(logits, axis=-1).astype(jnp.int32)


# ---------------------------------------------------------------------------
if __name__ == "__main__":
    B, T = 2, 8
    word_dim, pos_dim, hidden, rnn_layers = 16, 16, 32, 1
    n_words, n_tags, n_labels = 50, 12, 8
    HP, LP = 128, 128          # padded hidden / label lane extents

    key = jax.random.PRNGKey(0)
    pkey, k1, k2, k3 = jax.random.split(key, 4)
    params = init_params(pkey, n_words, n_tags, n_labels,
                         word_dim, pos_dim, hidden, rnn_layers)
    padded = prepare_padded_params(params, hidden, HP, n_labels, LP)

    word_ids = jax.random.randint(k1, (B, T), 1, n_words, dtype=jnp.int32)
    word_ids = word_ids.at[1, 5:].set(0)          # pad id 0 -> masked positions
    tag_ids = jax.random.randint(k2, (B, T), 0, n_tags, dtype=jnp.int32)
    label_ids = jax.random.randint(k3, (B, T), 0, n_labels, dtype=jnp.int32)

    logits, batch_preds = model_forward_eval(padded, word_ids, tag_ids,
                                             num_labels=n_labels)
    jax.block_until_ready((logits, batch_preds))

    # correctness check against the pure-JAX reference
    logits_r, preds_r = reference_forward(params, word_ids, tag_ids)
    np.testing.assert_allclose(np.asarray(logits), np.asarray(logits_r),
                               rtol=2e-2, atol=2e-2)
    srt = np.sort(np.asarray(logits_r), axis=-1)
    gap = srt[..., -1] - srt[..., -2]
    assert np.all((np.asarray(batch_preds) == np.asarray(preds_r)) | (gap < 1e-3))

    # eval-branch glue: answers / predictions truncated to true lengths
    mask = np.asarray(word_ids != 0)
    lengths = mask.sum(axis=1).tolist()
    answers = [row[:l] for row, l in zip(np.asarray(label_ids).tolist(), lengths)]
    predictions = [row[:l] for row, l in zip(np.asarray(batch_preds).tolist(), lengths)]

    assert logits.shape == (B, T, n_labels)
    assert len(answers) == len(predictions) == B
    assert all(len(a) == l and len(p) == l
               for a, p, l in zip(answers, predictions, lengths))
    print("KERNEL_OK")
</pallas_src>

<mosaic_0001>
module attributes {stable_mosaic.version = 11 : i64} {
  func.func @fused_bilstm_kernel(%arg0: memref<16x32xf32, #tpu.memory_space<vmem>>, %arg1: memref<32x1024xf32, #tpu.memory_space<vmem>>, %arg2: memref<128x512xf32, #tpu.memory_space<vmem>>, %arg3: memref<128x512xf32, #tpu.memory_space<vmem>>, %arg4: memref<1x1024xf32, #tpu.memory_space<vmem>>, %arg5: memref<256x128xf32, #tpu.memory_space<vmem>>, %arg6: memref<1x128xf32, #tpu.memory_space<vmem>>, %arg7: memref<16x128xf32, #tpu.memory_space<vmem>>, %arg8: memref<16x1024xf32, #tpu.memory_space<vmem>>, %arg9: memref<16x256xf32, #tpu.memory_space<vmem>>) attributes {dimension_semantics = [], scalar_prefetch = 0 : i64, scratch_operands = 2 : i64, tpu.core_type = #tpu.core_type<tc>} {
    %c0 = arith.constant 0 : index
    %c0_0 = arith.constant 0 : index
    %0 = vector.load %arg0[%c0, %c0_0] : memref<16x32xf32, #tpu.memory_space<vmem>>, vector<16x32xf32>
    %c0_1 = arith.constant 0 : index
    %c0_2 = arith.constant 0 : index
    %1 = vector.load %arg1[%c0_1, %c0_2] : memref<32x1024xf32, #tpu.memory_space<vmem>>, vector<32x1024xf32>
    %cst = arith.constant dense<0.000000e+00> : vector<16x1024xf32>
    %2 = tpu.matmul %0, %1, %cst {dimension_numbers = #tpu.dot_dimension_numbers<[1], [0], [0], [1], [0, 0, 1, 1], [], []>} : vector<16x32xf32>, vector<32x1024xf32>, vector<16x1024xf32> -> vector<16x1024xf32>
    %c0_3 = arith.constant 0 : index
    %c0_4 = arith.constant 0 : index
    %3 = vector.load %arg4[%c0_3, %c0_4] : memref<1x1024xf32, #tpu.memory_space<vmem>>, vector<1x1024xf32>
    %4 = vector.broadcast %3 : vector<1x1024xf32> to vector<16x1024xf32>
    %5 = arith.addf %2, %4 : vector<16x1024xf32>
    %c0_5 = arith.constant 0 : index
    %c0_6 = arith.constant 0 : index
    %6 = vector.load %arg8[%c0_5, %c0_6] : memref<16x1024xf32, #tpu.memory_space<vmem>>, vector<16x1024xf32>
    tpu.vector_store %arg8[%c0_5, %c0_6], %5 {strides = array<i32>} : memref<16x1024xf32, #tpu.memory_space<vmem>>, vector<16x1024xf32>,
    %cst_7 = arith.constant 0.000000e+00 : f32
    %7 = vector.broadcast %cst_7 : f32 to vector<2x128xf32>
    %c0_8 = arith.constant 0 : index
    %c0_9 = arith.constant 0 : index
    %8 = vector.load %arg8[%c0_8, %c0_9] : memref<16x1024xf32, #tpu.memory_space<vmem>>, vector<2x512xf32>
    %c0_10 = arith.constant 0 : index
    %c0_11 = arith.constant 0 : index
    %9 = vector.load %arg2[%c0_10, %c0_11] : memref<128x512xf32, #tpu.memory_space<vmem>>, vector<128x512xf32>
    %cst_12 = arith.constant dense<0.000000e+00> : vector<2x512xf32>
    %10 = tpu.matmul %7, %9, %cst_12 {dimension_numbers = #tpu.dot_dimension_numbers<[1], [0], [0], [1], [0, 0, 1, 1], [], []>} : vector<2x128xf32>, vector<128x512xf32>, vector<2x512xf32> -> vector<2x512xf32>
    %11 = arith.addf %8, %10 : vector<2x512xf32>
    %c14 = arith.constant 14 : index
    %c512 = arith.constant 512 : index
    %12 = vector.load %arg8[%c14, %c512] : memref<16x1024xf32, #tpu.memory_space<vmem>>, vector<2x512xf32>
    %c0_13 = arith.constant 0 : index
    %c0_14 = arith.constant 0 : index
    %13 = vector.load %arg3[%c0_13, %c0_14] : memref<128x512xf32, #tpu.memory_space<vmem>>, vector<128x512xf32>
    %cst_15 = arith.constant dense<0.000000e+00> : vector<2x512xf32>
    %14 = tpu.matmul %7, %13, %cst_15 {dimension_numbers = #tpu.dot_dimension_numbers<[1], [0], [0], [1], [0, 0, 1, 1], [], []>} : vector<2x128xf32>, vector<128x512xf32>, vector<2x512xf32> -> vector<2x512xf32>
    %15 = arith.addf %12, %14 : vector<2x512xf32>
    %16 = vector.extract_strided_slice %11 {offsets = [0, 0], sizes = [2, 128], strides = [1, 1]} : vector<2x512xf32> to vector<2x128xf32>
    %17 = arith.negf %16 : vector<2x128xf32>
    %18 = math.exp %17 : vector<2x128xf32>
    %cst_16 = arith.constant 1.000000e+00 : f32
    %19 = vector.broadcast %cst_16 : f32 to vector<2x128xf32>
    %20 = arith.addf %19, %18 : vector<2x128xf32>
    %21 = arith.divf %19, %20 : vector<2x128xf32>
    %22 = vector.extract_strided_slice %11 {offsets = [0, 128], sizes = [2, 128], strides = [1, 1]} : vector<2x512xf32> to vector<2x128xf32>
    %23 = arith.negf %22 : vector<2x128xf32>
    %24 = math.exp %23 : vector<2x128xf32>
    %cst_17 = arith.constant 1.000000e+00 : f32
    %25 = vector.broadcast %cst_17 : f32 to vector<2x128xf32>
    %26 = arith.addf %25, %24 : vector<2x128xf32>
    %27 = arith.divf %25, %26 : vector<2x128xf32>
    %28 = vector.extract_strided_slice %11 {offsets = [0, 256], sizes = [2, 128], strides = [1, 1]} : vector<2x512xf32> to vector<2x128xf32>
    %29 = math.tanh %28 : vector<2x128xf32>
    %30 = vector.extract_strided_slice %11 {offsets = [0, 384], sizes = [2, 128], strides = [1, 1]} : vector<2x512xf32> to vector<2x128xf32>
    %31 = arith.negf %30 : vector<2x128xf32>
    %32 = math.exp %31 : vector<2x128xf32>
    %cst_18 = arith.constant 1.000000e+00 : f32
    %33 = vector.broadcast %cst_18 : f32 to vector<2x128xf32>
    %34 = arith.addf %33, %32 : vector<2x128xf32>
    %35 = arith.divf %33, %34 : vector<2x128xf32>
    %36 = arith.mulf %27, %7 : vector<2x128xf32>
    %37 = arith.mulf %21, %29 : vector<2x128xf32>
    %38 = arith.addf %36, %37 : vector<2x128xf32>
    %39 = math.tanh %38 : vector<2x128xf32>
    %40 = arith.mulf %35, %39 : vector<2x128xf32>
    %41 = vector.extract_strided_slice %15 {offsets = [0, 0], sizes = [2, 128], strides = [1, 1]} : vector<2x512xf32> to vector<2x128xf32>
    %42 = arith.negf %41 : vector<2x128xf32>
    %43 = math.exp %42 : vector<2x128xf32>
    %cst_19 = arith.constant 1.000000e+00 : f32
    %44 = vector.broadcast %cst_19 : f32 to vector<2x128xf32>
    %45 = arith.addf %44, %43 : vector<2x128xf32>
    %46 = arith.divf %44, %45 : vector<2x128xf32>
    %47 = vector.extract_strided_slice %15 {offsets = [0, 128], sizes = [2, 128], strides = [1, 1]} : vector<2x512xf32> to vector<2x128xf32>
    %48 = arith.negf %47 : vector<2x128xf32>
    %49 = math.exp %48 : vector<2x128xf32>
    %cst_20 = arith.constant 1.000000e+00 : f32
    %50 = vector.broadcast %cst_20 : f32 to vector<2x128xf32>
    %51 = arith.addf %50, %49 : vector<2x128xf32>
    %52 = arith.divf %50, %51 : vector<2x128xf32>
    %53 = vector.extract_strided_slice %15 {offsets = [0, 256], sizes = [2, 128], strides = [1, 1]} : vector<2x512xf32> to vector<2x128xf32>
    %54 = math.tanh %53 : vector<2x128xf32>
    %55 = vector.extract_strided_slice %15 {offsets = [0, 384], sizes = [2, 128], strides = [1, 1]} : vector<2x512xf32> to vector<2x128xf32>
    %56 = arith.negf %55 : vector<2x128xf32>
    %57 = math.exp %56 : vector<2x128xf32>
    %cst_21 = arith.constant 1.000000e+00 : f32
    %58 = vector.broadcast %cst_21 : f32 to vector<2x128xf32>
    %59 = arith.addf %58, %57 : vector<2x128xf32>
    %60 = arith.divf %58, %59 : vector<2x128xf32>
    %61 = arith.mulf %52, %7 : vector<2x128xf32>
    %62 = arith.mulf %46, %54 : vector<2x128xf32>
    %63 = arith.addf %61, %62 : vector<2x128xf32>
    %64 = math.tanh %63 : vector<2x128xf32>
    %65 = arith.mulf %60, %64 : vector<2x128xf32>
    %c0_22 = arith.constant 0 : index
    %c0_23 = arith.constant 0 : index
    %66 = vector.load %arg9[%c0_22, %c0_23] : memref<16x256xf32, #tpu.memory_space<vmem>>, vector<2x128xf32>
    tpu.vector_store %arg9[%c0_22, %c0_23], %40 {strides = array<i32>} : memref<16x256xf32, #tpu.memory_space<vmem>>, vector<2x128xf32>,
    %c14_24 = arith.constant 14 : index
    %c128 = arith.constant 128 : index
    %67 = vector.load %arg9[%c14_24, %c128] : memref<16x256xf32, #tpu.memory_space<vmem>>, vector<2x128xf32>
    tpu.vector_store %arg9[%c14_24, %c128], %65 {strides = array<i32>} : memref<16x256xf32, #tpu.memory_space<vmem>>, vector<2x128xf32>,
    %c2 = arith.constant 2 : index
    %c0_25 = arith.constant 0 : index
    %68 = vector.load %arg8[%c2, %c0_25] : memref<16x1024xf32, #tpu.memory_space<vmem>>, vector<2x512xf32>
    %c0_26 = arith.constant 0 : index
    %c0_27 = arith.constant 0 : index
    %69 = vector.load %arg2[%c0_26, %c0_27] : memref<128x512xf32, #tpu.memory_space<vmem>>, vector<128x512xf32>
    %cst_28 = arith.constant dense<0.000000e+00> : vector<2x512xf32>
    %70 = tpu.matmul %40, %69, %cst_28 {dimension_numbers = #tpu.dot_dimension_numbers<[1], [0], [0], [1], [0, 0, 1, 1], [], []>} : vector<2x128xf32>, vector<128x512xf32>, vector<2x512xf32> -> vector<2x512xf32>
    %71 = arith.addf %68, %70 : vector<2x512xf32>
    %c12 = arith.constant 12 : index
    %c512_29 = arith.constant 512 : index
    %72 = vector.load %arg8[%c12, %c512_29] : memref<16x1024xf32, #tpu.memory_space<vmem>>, vector<2x512xf32>
    %c0_30 = arith.constant 0 : index
    %c0_31 = arith.constant 0 : index
    %73 = vector.load %arg3[%c0_30, %c0_31] : memref<128x512xf32, #tpu.memory_space<vmem>>, vector<128x512xf32>
    %cst_32 = arith.constant dense<0.000000e+00> : vector<2x512xf32>
    %74 = tpu.matmul %65, %73, %cst_32 {dimension_numbers = #tpu.dot_dimension_numbers<[1], [0], [0], [1], [0, 0, 1, 1], [], []>} : vector<2x128xf32>, vector<128x512xf32>, vector<2x512xf32> -> vector<2x512xf32>
    %75 = arith.addf %72, %74 : vector<2x512xf32>
    %76 = vector.extract_strided_slice %71 {offsets = [0, 0], sizes = [2, 128], strides = [1, 1]} : vector<2x512xf32> to vector<2x128xf32>
    %77 = arith.negf %76 : vector<2x128xf32>
    %78 = math.exp %77 : vector<2x128xf32>
    %cst_33 = arith.constant 1.000000e+00 : f32
    %79 = vector.broadcast %cst_33 : f32 to vector<2x128xf32>
    %80 = arith.addf %79, %78 : vector<2x128xf32>
    %81 = arith.divf %79, %80 : vector<2x128xf32>
    %82 = vector.extract_strided_slice %71 {offsets = [0, 128], sizes = [2, 128], strides = [1, 1]} : vector<2x512xf32> to vector<2x128xf32>
    %83 = arith.negf %82 : vector<2x128xf32>
    %84 = math.exp %83 : vector<2x128xf32>
    %cst_34 = arith.constant 1.000000e+00 : f32
    %85 = vector.broadcast %cst_34 : f32 to vector<2x128xf32>
    %86 = arith.addf %85, %84 : vector<2x128xf32>
    %87 = arith.divf %85, %86 : vector<2x128xf32>
    %88 = vector.extract_strided_slice %71 {offsets = [0, 256], sizes = [2, 128], strides = [1, 1]} : vector<2x512xf32> to vector<2x128xf32>
    %89 = math.tanh %88 : vector<2x128xf32>
    %90 = vector.extract_strided_slice %71 {offsets = [0, 384], sizes = [2, 128], strides = [1, 1]} : vector<2x512xf32> to vector<2x128xf32>
    %91 = arith.negf %90 : vector<2x128xf32>
    %92 = math.exp %91 : vector<2x128xf32>
    %cst_35 = arith.constant 1.000000e+00 : f32
    %93 = vector.broadcast %cst_35 : f32 to vector<2x128xf32>
    %94 = arith.addf %93, %92 : vector<2x128xf32>
    %95 = arith.divf %93, %94 : vector<2x128xf32>
    %96 = arith.mulf %87, %38 : vector<2x128xf32>
    %97 = arith.mulf %81, %89 : vector<2x128xf32>
    %98 = arith.addf %96, %97 : vector<2x128xf32>
    %99 = math.tanh %98 : vector<2x128xf32>
    %100 = arith.mulf %95, %99 : vector<2x128xf32>
    %101 = vector.extract_strided_slice %75 {offsets = [0, 0], sizes = [2, 128], strides = [1, 1]} : vector<2x512xf32> to vector<2x128xf32>
    %102 = arith.negf %101 : vector<2x128xf32>
    %103 = math.exp %102 : vector<2x128xf32>
    %cst_36 = arith.constant 1.000000e+00 : f32
    %104 = vector.broadcast %cst_36 : f32 to vector<2x128xf32>
    %105 = arith.addf %104, %103 : vector<2x128xf32>
    %106 = arith.divf %104, %105 : vector<2x128xf32>
    %107 = vector.extract_strided_slice %75 {offsets = [0, 128], sizes = [2, 128], strides = [1, 1]} : vector<2x512xf32> to vector<2x128xf32>
    %108 = arith.negf %107 : vector<2x128xf32>
    %109 = math.exp %108 : vector<2x128xf32>
    %cst_37 = arith.constant 1.000000e+00 : f32
    %110 = vector.broadcast %cst_37 : f32 to vector<2x128xf32>
    %111 = arith.addf %110, %109 : vector<2x128xf32>
    %112 = arith.divf %110, %111 : vector<2x128xf32>
    %113 = vector.extract_strided_slice %75 {offsets = [0, 256], sizes = [2, 128], strides = [1, 1]} : vector<2x512xf32> to vector<2x128xf32>
    %114 = math.tanh %113 : vector<2x128xf32>
    %115 = vector.extract_strided_slice %75 {offsets = [0, 384], sizes = [2, 128], strides = [1, 1]} : vector<2x512xf32> to vector<2x128xf32>
    %116 = arith.negf %115 : vector<2x128xf32>
    %117 = math.exp %116 : vector<2x128xf32>
    %cst_38 = arith.constant 1.000000e+00 : f32
    %118 = vector.broadcast %cst_38 : f32 to vector<2x128xf32>
    %119 = arith.addf %118, %117 : vector<2x128xf32>
    %120 = arith.divf %118, %119 : vector<2x128xf32>
    %121 = arith.mulf %112, %63 : vector<2x128xf32>
    %122 = arith.mulf %106, %114 : vector<2x128xf32>
    %123 = arith.addf %121, %122 : vector<2x128xf32>
    %124 = math.tanh %123 : vector<2x128xf32>
    %125 = arith.mulf %120, %124 : vector<2x128xf32>
    %c2_39 = arith.constant 2 : index
    %c0_40 = arith.constant 0 : index
    %126 = vector.load %arg9[%c2_39, %c0_40] : memref<16x256xf32, #tpu.memory_space<vmem>>, vector<2x128xf32>
    tpu.vector_store %arg9[%c2_39, %c0_40], %100 {strides = array<i32>} : memref<16x256xf32, #tpu.memory_space<vmem>>, vector<2x128xf32>,
    %c12_41 = arith.constant 12 : index
    %c128_42 = arith.constant 128 : index
    %127 = vector.load %arg9[%c12_41, %c128_42] : memref<16x256xf32, #tpu.memory_space<vmem>>, vector<2x128xf32>
    tpu.vector_store %arg9[%c12_41, %c128_42], %125 {strides = array<i32>} : memref<16x256xf32, #tpu.memory_space<vmem>>, vector<2x128xf32>,
    %c4 = arith.constant 4 : index
    %c0_43 = arith.constant 0 : index
    %128 = vector.load %arg8[%c4, %c0_43] : memref<16x1024xf32, #tpu.memory_space<vmem>>, vector<2x512xf32>
    %c0_44 = arith.constant 0 : index
    %c0_45 = arith.constant 0 : index
    %129 = vector.load %arg2[%c0_44, %c0_45] : memref<128x512xf32, #tpu.memory_space<vmem>>, vector<128x512xf32>
    %cst_46 = arith.constant dense<0.000000e+00> : vector<2x512xf32>
    %130 = tpu.matmul %100, %129, %cst_46 {dimension_numbers = #tpu.dot_dimension_numbers<[1], [0], [0], [1], [0, 0, 1, 1], [], []>} : vector<2x128xf32>, vector<128x512xf32>, vector<2x512xf32> -> vector<2x512xf32>
    %131 = arith.addf %128, %130 : vector<2x512xf32>
    %c10 = arith.constant 10 : index
    %c512_47 = arith.constant 512 : index
    %132 = vector.load %arg8[%c10, %c512_47] : memref<16x1024xf32, #tpu.memory_space<vmem>>, vector<2x512xf32>
    %c0_48 = arith.constant 0 : index
    %c0_49 = arith.constant 0 : index
    %133 = vector.load %arg3[%c0_48, %c0_49] : memref<128x512xf32, #tpu.memory_space<vmem>>, vector<128x512xf32>
    %cst_50 = arith.constant dense<0.000000e+00> : vector<2x512xf32>
    %134 = tpu.matmul %125, %133, %cst_50 {dimension_numbers = #tpu.dot_dimension_numbers<[1], [0], [0], [1], [0, 0, 1, 1], [], []>} : vector<2x128xf32>, vector<128x512xf32>, vector<2x512xf32> -> vector<2x512xf32>
    %135 = arith.addf %132, %134 : vector<2x512xf32>
    %136 = vector.extract_strided_slice %131 {offsets = [0, 0], sizes = [2, 128], strides = [1, 1]} : vector<2x512xf32> to vector<2x128xf32>
    %137 = arith.negf %136 : vector<2x128xf32>
    %138 = math.exp %137 : vector<2x128xf32>
    %cst_51 = arith.constant 1.000000e+00 : f32
    %139 = vector.broadcast %cst_51 : f32 to vector<2x128xf32>
    %140 = arith.addf %139, %138 : vector<2x128xf32>
    %141 = arith.divf %139, %140 : vector<2x128xf32>
    %142 = vector.extract_strided_slice %131 {offsets = [0, 128], sizes = [2, 128], strides = [1, 1]} : vector<2x512xf32> to vector<2x128xf32>
    %143 = arith.negf %142 : vector<2x128xf32>
    %144 = math.exp %143 : vector<2x128xf32>
    %cst_52 = arith.constant 1.000000e+00 : f32
    %145 = vector.broadcast %cst_52 : f32 to vector<2x128xf32>
    %146 = arith.addf %145, %144 : vector<2x128xf32>
    %147 = arith.divf %145, %146 : vector<2x128xf32>
    %148 = vector.extract_strided_slice %131 {offsets = [0, 256], sizes = [2, 128], strides = [1, 1]} : vector<2x512xf32> to vector<2x128xf32>
    %149 = math.tanh %148 : vector<2x128xf32>
    %150 = vector.extract_strided_slice %131 {offsets = [0, 384], sizes = [2, 128], strides = [1, 1]} : vector<2x512xf32> to vector<2x128xf32>
    %151 = arith.negf %150 : vector<2x128xf32>
    %152 = math.exp %151 : vector<2x128xf32>
    %cst_53 = arith.constant 1.000000e+00 : f32
    %153 = vector.broadcast %cst_53 : f32 to vector<2x128xf32>
    %154 = arith.addf %153, %152 : vector<2x128xf32>
    %155 = arith.divf %153, %154 : vector<2x128xf32>
    %156 = arith.mulf %147, %98 : vector<2x128xf32>
    %157 = arith.mulf %141, %149 : vector<2x128xf32>
    %158 = arith.addf %156, %157 : vector<2x128xf32>
    %159 = math.tanh %158 : vector<2x128xf32>
    %160 = arith.mulf %155, %159 : vector<2x128xf32>
    %161 = vector.extract_strided_slice %135 {offsets = [0, 0], sizes = [2, 128], strides = [1, 1]} : vector<2x512xf32> to vector<2x128xf32>
    %162 = arith.negf %161 : vector<2x128xf32>
    %163 = math.exp %162 : vector<2x128xf32>
    %cst_54 = arith.constant 1.000000e+00 : f32
    %164 = vector.broadcast %cst_54 : f32 to vector<2x128xf32>
    %165 = arith.addf %164, %163 : vector<2x128xf32>
    %166 = arith.divf %164, %165 : vector<2x128xf32>
    %167 = vector.extract_strided_slice %135 {offsets = [0, 128], sizes = [2, 128], strides = [1, 1]} : vector<2x512xf32> to vector<2x128xf32>
    %168 = arith.negf %167 : vector<2x128xf32>
    %169 = math.exp %168 : vector<2x128xf32>
    %cst_55 = arith.constant 1.000000e+00 : f32
    %170 = vector.broadcast %cst_55 : f32 to vector<2x128xf32>
    %171 = arith.addf %170, %169 : vector<2x128xf32>
    %172 = arith.divf %170, %171 : vector<2x128xf32>
    %173 = vector.extract_strided_slice %135 {offsets = [0, 256], sizes = [2, 128], strides = [1, 1]} : vector<2x512xf32> to vector<2x128xf32>
    %174 = math.tanh %173 : vector<2x128xf32>
    %175 = vector.extract_strided_slice %135 {offsets = [0, 384], sizes = [2, 128], strides = [1, 1]} : vector<2x512xf32> to vector<2x128xf32>
    %176 = arith.negf %175 : vector<2x128xf32>
    %177 = math.exp %176 : vector<2x128xf32>
    %cst_56 = arith.constant 1.000000e+00 : f32
    %178 = vector.broadcast %cst_56 : f32 to vector<2x128xf32>
    %179 = arith.addf %178, %177 : vector<2x128xf32>
    %180 = arith.divf %178, %179 : vector<2x128xf32>
    %181 = arith.mulf %172, %123 : vector<2x128xf32>
    %182 = arith.mulf %166, %174 : vector<2x128xf32>
    %183 = arith.addf %181, %182 : vector<2x128xf32>
    %184 = math.tanh %183 : vector<2x128xf32>
    %185 = arith.mulf %180, %184 : vector<2x128xf32>
    %c4_57 = arith.constant 4 : index
    %c0_58 = arith.constant 0 : index
    %186 = vector.load %arg9[%c4_57, %c0_58] : memref<16x256xf32, #tpu.memory_space<vmem>>, vector<2x128xf32>
    tpu.vector_store %arg9[%c4_57, %c0_58], %160 {strides = array<i32>} : memref<16x256xf32, #tpu.memory_space<vmem>>, vector<2x128xf32>,
    %c10_59 = arith.constant 10 : index
    %c128_60 = arith.constant 128 : index
    %187 = vector.load %arg9[%c10_59, %c128_60] : memref<16x256xf32, #tpu.memory_space<vmem>>, vector<2x128xf32>
    tpu.vector_store %arg9[%c10_59, %c128_60], %185 {strides = array<i32>} : memref<16x256xf32, #tpu.memory_space<vmem>>, vector<2x128xf32>,
    %c6 = arith.constant 6 : index
    %c0_61 = arith.constant 0 : index
    %188 = vector.load %arg8[%c6, %c0_61] : memref<16x1024xf32, #tpu.memory_space<vmem>>, vector<2x512xf32>
    %c0_62 = arith.constant 0 : index
    %c0_63 = arith.constant 0 : index
    %189 = vector.load %arg2[%c0_62, %c0_63] : memref<128x512xf32, #tpu.memory_space<vmem>>, vector<128x512xf32>
    %cst_64 = arith.constant dense<0.000000e+00> : vector<2x512xf32>
    %190 = tpu.matmul %160, %189, %cst_64 {dimension_numbers = #tpu.dot_dimension_numbers<[1], [0], [0], [1], [0, 0, 1, 1], [], []>} : vector<2x128xf32>, vector<128x512xf32>, vector<2x512xf32> -> vector<2x512xf32>
    %191 = arith.addf %188, %190 : vector<2x512xf32>
    %c8 = arith.constant 8 : index
    %c512_65 = arith.constant 512 : index
    %192 = vector.load %arg8[%c8, %c512_65] : memref<16x1024xf32, #tpu.memory_space<vmem>>, vector<2x512xf32>
    %c0_66 = arith.constant 0 : index
    %c0_67 = arith.constant 0 : index
    %193 = vector.load %arg3[%c0_66, %c0_67] : memref<128x512xf32, #tpu.memory_space<vmem>>, vector<128x512xf32>
    %cst_68 = arith.constant dense<0.000000e+00> : vector<2x512xf32>
    %194 = tpu.matmul %185, %193, %cst_68 {dimension_numbers = #tpu.dot_dimension_numbers<[1], [0], [0], [1], [0, 0, 1, 1], [], []>} : vector<2x128xf32>, vector<128x512xf32>, vector<2x512xf32> -> vector<2x512xf32>
    %195 = arith.addf %192, %194 : vector<2x512xf32>
    %196 = vector.extract_strided_slice %191 {offsets = [0, 0], sizes = [2, 128], strides = [1, 1]} : vector<2x512xf32> to vector<2x128xf32>
    %197 = arith.negf %196 : vector<2x128xf32>
    %198 = math.exp %197 : vector<2x128xf32>
    %cst_69 = arith.constant 1.000000e+00 : f32
    %199 = vector.broadcast %cst_69 : f32 to vector<2x128xf32>
    %200 = arith.addf %199, %198 : vector<2x128xf32>
    %201 = arith.divf %199, %200 : vector<2x128xf32>
    %202 = vector.extract_strided_slice %191 {offsets = [0, 128], sizes = [2, 128], strides = [1, 1]} : vector<2x512xf32> to vector<2x128xf32>
    %203 = arith.negf %202 : vector<2x128xf32>
    %204 = math.exp %203 : vector<2x128xf32>
    %cst_70 = arith.constant 1.000000e+00 : f32
    %205 = vector.broadcast %cst_70 : f32 to vector<2x128xf32>
    %206 = arith.addf %205, %204 : vector<2x128xf32>
    %207 = arith.divf %205, %206 : vector<2x128xf32>
    %208 = vector.extract_strided_slice %191 {offsets = [0, 256], sizes = [2, 128], strides = [1, 1]} : vector<2x512xf32> to vector<2x128xf32>
    %209 = math.tanh %208 : vector<2x128xf32>
    %210 = vector.extract_strided_slice %191 {offsets = [0, 384], sizes = [2, 128], strides = [1, 1]} : vector<2x512xf32> to vector<2x128xf32>
    %211 = arith.negf %210 : vector<2x128xf32>
    %212 = math.exp %211 : vector<2x128xf32>
    %cst_71 = arith.constant 1.000000e+00 : f32
    %213 = vector.broadcast %cst_71 : f32 to vector<2x128xf32>
    %214 = arith.addf %213, %212 : vector<2x128xf32>
    %215 = arith.divf %213, %214 : vector<2x128xf32>
    %216 = arith.mulf %207, %158 : vector<2x128xf32>
    %217 = arith.mulf %201, %209 : vector<2x128xf32>
    %218 = arith.addf %216, %217 : vector<2x128xf32>
    %219 = math.tanh %218 : vector<2x128xf32>
    %220 = arith.mulf %215, %219 : vector<2x128xf32>
    %221 = vector.extract_strided_slice %195 {offsets = [0, 0], sizes = [2, 128], strides = [1, 1]} : vector<2x512xf32> to vector<2x128xf32>
    %222 = arith.negf %221 : vector<2x128xf32>
    %223 = math.exp %222 : vector<2x128xf32>
    %cst_72 = arith.constant 1.000000e+00 : f32
    %224 = vector.broadcast %cst_72 : f32 to vector<2x128xf32>
    %225 = arith.addf %224, %223 : vector<2x128xf32>
    %226 = arith.divf %224, %225 : vector<2x128xf32>
    %227 = vector.extract_strided_slice %195 {offsets = [0, 128], sizes = [2, 128], strides = [1, 1]} : vector<2x512xf32> to vector<2x128xf32>
    %228 = arith.negf %227 : vector<2x128xf32>
    %229 = math.exp %228 : vector<2x128xf32>
    %cst_73 = arith.constant 1.000000e+00 : f32
    %230 = vector.broadcast %cst_73 : f32 to vector<2x128xf32>
    %231 = arith.addf %230, %229 : vector<2x128xf32>
    %232 = arith.divf %230, %231 : vector<2x128xf32>
    %233 = vector.extract_strided_slice %195 {offsets = [0, 256], sizes = [2, 128], strides = [1, 1]} : vector<2x512xf32> to vector<2x128xf32>
    %234 = math.tanh %233 : vector<2x128xf32>
    %235 = vector.extract_strided_slice %195 {offsets = [0, 384], sizes = [2, 128], strides = [1, 1]} : vector<2x512xf32> to vector<2x128xf32>
    %236 = arith.negf %235 : vector<2x128xf32>
    %237 = math.exp %236 : vector<2x128xf32>
    %cst_74 = arith.constant 1.000000e+00 : f32
    %238 = vector.broadcast %cst_74 : f32 to vector<2x128xf32>
    %239 = arith.addf %238, %237 : vector<2x128xf32>
    %240 = arith.divf %238, %239 : vector<2x128xf32>
    %241 = arith.mulf %232, %183 : vector<2x128xf32>
    %242 = arith.mulf %226, %234 : vector<2x128xf32>
    %243 = arith.addf %241, %242 : vector<2x128xf32>
    %244 = math.tanh %243 : vector<2x128xf32>
    %245 = arith.mulf %240, %244 : vector<2x128xf32>
    %c6_75 = arith.constant 6 : index
    %c0_76 = arith.constant 0 : index
    %246 = vector.load %arg9[%c6_75, %c0_76] : memref<16x256xf32, #tpu.memory_space<vmem>>, vector<2x128xf32>
    tpu.vector_store %arg9[%c6_75, %c0_76], %220 {strides = array<i32>} : memref<16x256xf32, #tpu.memory_space<vmem>>, vector<2x128xf32>,
    %c8_77 = arith.constant 8 : index
    %c128_78 = arith.constant 128 : index
    %247 = vector.load %arg9[%c8_77, %c128_78] : memref<16x256xf32, #tpu.memory_space<vmem>>, vector<2x128xf32>
    tpu.vector_store %arg9[%c8_77, %c128_78], %245 {strides = array<i32>} : memref<16x256xf32, #tpu.memory_space<vmem>>, vector<2x128xf32>,
    %c8_79 = arith.constant 8 : index
    %c0_80 = arith.constant 0 : index
    %248 = vector.load %arg8[%c8_79, %c0_80] : memref<16x1024xf32, #tpu.memory_space<vmem>>, vector<2x512xf32>
    %c0_81 = arith.constant 0 : index
    %c0_82 = arith.constant 0 : index
    %249 = vector.load %arg2[%c0_81, %c0_82] : memref<128x512xf32, #tpu.memory_space<vmem>>, vector<128x512xf32>
    %cst_83 = arith.constant dense<0.000000e+00> : vector<2x512xf32>
    %250 = tpu.matmul %220, %249, %cst_83 {dimension_numbers = #tpu.dot_dimension_numbers<[1], [0], [0], [1], [0, 0, 1, 1], [], []>} : vector<2x128xf32>, vector<128x512xf32>, vector<2x512xf32> -> vector<2x512xf32>
    %251 = arith.addf %248, %250 : vector<2x512xf32>
    %c6_84 = arith.constant 6 : index
    %c512_85 = arith.constant 512 : index
    %252 = vector.load %arg8[%c6_84, %c512_85] : memref<16x1024xf32, #tpu.memory_space<vmem>>, vector<2x512xf32>
    %c0_86 = arith.constant 0 : index
    %c0_87 = arith.constant 0 : index
    %253 = vector.load %arg3[%c0_86, %c0_87] : memref<128x512xf32, #tpu.memory_space<vmem>>, vector<128x512xf32>
    %cst_88 = arith.constant dense<0.000000e+00> : vector<2x512xf32>
    %254 = tpu.matmul %245, %253, %cst_88 {dimension_numbers = #tpu.dot_dimension_numbers<[1], [0], [0], [1], [0, 0, 1, 1], [], []>} : vector<2x128xf32>, vector<128x512xf32>, vector<2x512xf32> -> vector<2x512xf32>
    %255 = arith.addf %252, %254 : vector<2x512xf32>
    %256 = vector.extract_strided_slice %251 {offsets = [0, 0], sizes = [2, 128], strides = [1, 1]} : vector<2x512xf32> to vector<2x128xf32>
    %257 = arith.negf %256 : vector<2x128xf32>
    %258 = math.exp %257 : vector<2x128xf32>
    %cst_89 = arith.constant 1.000000e+00 : f32
    %259 = vector.broadcast %cst_89 : f32 to vector<2x128xf32>
    %260 = arith.addf %259, %258 : vector<2x128xf32>
    %261 = arith.divf %259, %260 : vector<2x128xf32>
    %262 = vector.extract_strided_slice %251 {offsets = [0, 128], sizes = [2, 128], strides = [1, 1]} : vector<2x512xf32> to vector<2x128xf32>
    %263 = arith.negf %262 : vector<2x128xf32>
    %264 = math.exp %263 : vector<2x128xf32>
    %cst_90 = arith.constant 1.000000e+00 : f32
    %265 = vector.broadcast %cst_90 : f32 to vector<2x128xf32>
    %266 = arith.addf %265, %264 : vector<2x128xf32>
    %267 = arith.divf %265, %266 : vector<2x128xf32>
    %268 = vector.extract_strided_slice %251 {offsets = [0, 256], sizes = [2, 128], strides = [1, 1]} : vector<2x512xf32> to vector<2x128xf32>
    %269 = math.tanh %268 : vector<2x128xf32>
    %270 = vector.extract_strided_slice %251 {offsets = [0, 384], sizes = [2, 128], strides = [1, 1]} : vector<2x512xf32> to vector<2x128xf32>
    %271 = arith.negf %270 : vector<2x128xf32>
    %272 = math.exp %271 : vector<2x128xf32>
    %cst_91 = arith.constant 1.000000e+00 : f32
    %273 = vector.broadcast %cst_91 : f32 to vector<2x128xf32>
    %274 = arith.addf %273, %272 : vector<2x128xf32>
    %275 = arith.divf %273, %274 : vector<2x128xf32>
    %276 = arith.mulf %267, %218 : vector<2x128xf32>
    %277 = arith.mulf %261, %269 : vector<2x128xf32>
    %278 = arith.addf %276, %277 : vector<2x128xf32>
    %279 = math.tanh %278 : vector<2x128xf32>
    %280 = arith.mulf %275, %279 : vector<2x128xf32>
    %281 = vector.extract_strided_slice %255 {offsets = [0, 0], sizes = [2, 128], strides = [1, 1]} : vector<2x512xf32> to vector<2x128xf32>
    %282 = arith.negf %281 : vector<2x128xf32>
    %283 = math.exp %282 : vector<2x128xf32>
    %cst_92 = arith.constant 1.000000e+00 : f32
    %284 = vector.broadcast %cst_92 : f32 to vector<2x128xf32>
    %285 = arith.addf %284, %283 : vector<2x128xf32>
    %286 = arith.divf %284, %285 : vector<2x128xf32>
    %287 = vector.extract_strided_slice %255 {offsets = [0, 128], sizes = [2, 128], strides = [1, 1]} : vector<2x512xf32> to vector<2x128xf32>
    %288 = arith.negf %287 : vector<2x128xf32>
    %289 = math.exp %288 : vector<2x128xf32>
    %cst_93 = arith.constant 1.000000e+00 : f32
    %290 = vector.broadcast %cst_93 : f32 to vector<2x128xf32>
    %291 = arith.addf %290, %289 : vector<2x128xf32>
    %292 = arith.divf %290, %291 : vector<2x128xf32>
    %293 = vector.extract_strided_slice %255 {offsets = [0, 256], sizes = [2, 128], strides = [1, 1]} : vector<2x512xf32> to vector<2x128xf32>
    %294 = math.tanh %293 : vector<2x128xf32>
    %295 = vector.extract_strided_slice %255 {offsets = [0, 384], sizes = [2, 128], strides = [1, 1]} : vector<2x512xf32> to vector<2x128xf32>
    %296 = arith.negf %295 : vector<2x128xf32>
    %297 = math.exp %296 : vector<2x128xf32>
    %cst_94 = arith.constant 1.000000e+00 : f32
    %298 = vector.broadcast %cst_94 : f32 to vector<2x128xf32>
    %299 = arith.addf %298, %297 : vector<2x128xf32>
    %300 = arith.divf %298, %299 : vector<2x128xf32>
    %301 = arith.mulf %292, %243 : vector<2x128xf32>
    %302 = arith.mulf %286, %294 : vector<2x128xf32>
    %303 = arith.addf %301, %302 : vector<2x128xf32>
    %304 = math.tanh %303 : vector<2x128xf32>
    %305 = arith.mulf %300, %304 : vector<2x128xf32>
    %c8_95 = arith.constant 8 : index
    %c0_96 = arith.constant 0 : index
    %306 = vector.load %arg9[%c8_95, %c0_96] : memref<16x256xf32, #tpu.memory_space<vmem>>, vector<2x128xf32>
    tpu.vector_store %arg9[%c8_95, %c0_96], %280 {strides = array<i32>} : memref<16x256xf32, #tpu.memory_space<vmem>>, vector<2x128xf32>,
    %c6_97 = arith.constant 6 : index
    %c128_98 = arith.constant 128 : index
    %307 = vector.load %arg9[%c6_97, %c128_98] : memref<16x256xf32, #tpu.memory_space<vmem>>, vector<2x128xf32>
    tpu.vector_store %arg9[%c6_97, %c128_98], %305 {strides = array<i32>} : memref<16x256xf32, #tpu.memory_space<vmem>>, vector<2x128xf32>,
    %c10_99 = arith.constant 10 : index
    %c0_100 = arith.constant 0 : index
    %308 = vector.load %arg8[%c10_99, %c0_100] : memref<16x1024xf32, #tpu.memory_space<vmem>>, vector<2x512xf32>
    %c0_101 = arith.constant 0 : index
    %c0_102 = arith.constant 0 : index
    %309 = vector.load %arg2[%c0_101, %c0_102] : memref<128x512xf32, #tpu.memory_space<vmem>>, vector<128x512xf32>
    %cst_103 = arith.constant dense<0.000000e+00> : vector<2x512xf32>
    %310 = tpu.matmul %280, %309, %cst_103 {dimension_numbers = #tpu.dot_dimension_numbers<[1], [0], [0], [1], [0, 0, 1, 1], [], []>} : vector<2x128xf32>, vector<128x512xf32>, vector<2x512xf32> -> vector<2x512xf32>
    %311 = arith.addf %308, %310 : vector<2x512xf32>
    %c4_104 = arith.constant 4 : index
    %c512_105 = arith.constant 512 : index
    %312 = vector.load %arg8[%c4_104, %c512_105] : memref<16x1024xf32, #tpu.memory_space<vmem>>, vector<2x512xf32>
    %c0_106 = arith.constant 0 : index
    %c0_107 = arith.constant 0 : index
    %313 = vector.load %arg3[%c0_106, %c0_107] : memref<128x512xf32, #tpu.memory_space<vmem>>, vector<128x512xf32>
    %cst_108 = arith.constant dense<0.000000e+00> : vector<2x512xf32>
    %314 = tpu.matmul %305, %313, %cst_108 {dimension_numbers = #tpu.dot_dimension_numbers<[1], [0], [0], [1], [0, 0, 1, 1], [], []>} : vector<2x128xf32>, vector<128x512xf32>, vector<2x512xf32> -> vector<2x512xf32>
    %315 = arith.addf %312, %314 : vector<2x512xf32>
    %316 = vector.extract_strided_slice %311 {offsets = [0, 0], sizes = [2, 128], strides = [1, 1]} : vector<2x512xf32> to vector<2x128xf32>
    %317 = arith.negf %316 : vector<2x128xf32>
    %318 = math.exp %317 : vector<2x128xf32>
    %cst_109 = arith.constant 1.000000e+00 : f32
    %319 = vector.broadcast %cst_109 : f32 to vector<2x128xf32>
    %320 = arith.addf %319, %318 : vector<2x128xf32>
    %321 = arith.divf %319, %320 : vector<2x128xf32>
    %322 = vector.extract_strided_slice %311 {offsets = [0, 128], sizes = [2, 128], strides = [1, 1]} : vector<2x512xf32> to vector<2x128xf32>
    %323 = arith.negf %322 : vector<2x128xf32>
    %324 = math.exp %323 : vector<2x128xf32>
    %cst_110 = arith.constant 1.000000e+00 : f32
    %325 = vector.broadcast %cst_110 : f32 to vector<2x128xf32>
    %326 = arith.addf %325, %324 : vector<2x128xf32>
    %327 = arith.divf %325, %326 : vector<2x128xf32>
    %328 = vector.extract_strided_slice %311 {offsets = [0, 256], sizes = [2, 128], strides = [1, 1]} : vector<2x512xf32> to vector<2x128xf32>
    %329 = math.tanh %328 : vector<2x128xf32>
    %330 = vector.extract_strided_slice %311 {offsets = [0, 384], sizes = [2, 128], strides = [1, 1]} : vector<2x512xf32> to vector<2x128xf32>
    %331 = arith.negf %330 : vector<2x128xf32>
    %332 = math.exp %331 : vector<2x128xf32>
    %cst_111 = arith.constant 1.000000e+00 : f32
    %333 = vector.broadcast %cst_111 : f32 to vector<2x128xf32>
    %334 = arith.addf %333, %332 : vector<2x128xf32>
    %335 = arith.divf %333, %334 : vector<2x128xf32>
    %336 = arith.mulf %327, %278 : vector<2x128xf32>
    %337 = arith.mulf %321, %329 : vector<2x128xf32>
    %338 = arith.addf %336, %337 : vector<2x128xf32>
    %339 = math.tanh %338 : vector<2x128xf32>
    %340 = arith.mulf %335, %339 : vector<2x128xf32>
    %341 = vector.extract_strided_slice %315 {offsets = [0, 0], sizes = [2, 128], strides = [1, 1]} : vector<2x512xf32> to vector<2x128xf32>
    %342 = arith.negf %341 : vector<2x128xf32>
    %343 = math.exp %342 : vector<2x128xf32>
    %cst_112 = arith.constant 1.000000e+00 : f32
    %344 = vector.broadcast %cst_112 : f32 to vector<2x128xf32>
    %345 = arith.addf %344, %343 : vector<2x128xf32>
    %346 = arith.divf %344, %345 : vector<2x128xf32>
    %347 = vector.extract_strided_slice %315 {offsets = [0, 128], sizes = [2, 128], strides = [1, 1]} : vector<2x512xf32> to vector<2x128xf32>
    %348 = arith.negf %347 : vector<2x128xf32>
    %349 = math.exp %348 : vector<2x128xf32>
    %cst_113 = arith.constant 1.000000e+00 : f32
    %350 = vector.broadcast %cst_113 : f32 to vector<2x128xf32>
    %351 = arith.addf %350, %349 : vector<2x128xf32>
    %352 = arith.divf %350, %351 : vector<2x128xf32>
    %353 = vector.extract_strided_slice %315 {offsets = [0, 256], sizes = [2, 128], strides = [1, 1]} : vector<2x512xf32> to vector<2x128xf32>
    %354 = math.tanh %353 : vector<2x128xf32>
    %355 = vector.extract_strided_slice %315 {offsets = [0, 384], sizes = [2, 128], strides = [1, 1]} : vector<2x512xf32> to vector<2x128xf32>
    %356 = arith.negf %355 : vector<2x128xf32>
    %357 = math.exp %356 : vector<2x128xf32>
    %cst_114 = arith.constant 1.000000e+00 : f32
    %358 = vector.broadcast %cst_114 : f32 to vector<2x128xf32>
    %359 = arith.addf %358, %357 : vector<2x128xf32>
    %360 = arith.divf %358, %359 : vector<2x128xf32>
    %361 = arith.mulf %352, %303 : vector<2x128xf32>
    %362 = arith.mulf %346, %354 : vector<2x128xf32>
    %363 = arith.addf %361, %362 : vector<2x128xf32>
    %364 = math.tanh %363 : vector<2x128xf32>
    %365 = arith.mulf %360, %364 : vector<2x128xf32>
    %c10_115 = arith.constant 10 : index
    %c0_116 = arith.constant 0 : index
    %366 = vector.load %arg9[%c10_115, %c0_116] : memref<16x256xf32, #tpu.memory_space<vmem>>, vector<2x128xf32>
    tpu.vector_store %arg9[%c10_115, %c0_116], %340 {strides = array<i32>} : memref<16x256xf32, #tpu.memory_space<vmem>>, vector<2x128xf32>,
    %c4_117 = arith.constant 4 : index
    %c128_118 = arith.constant 128 : index
    %367 = vector.load %arg9[%c4_117, %c128_118] : memref<16x256xf32, #tpu.memory_space<vmem>>, vector<2x128xf32>
    tpu.vector_store %arg9[%c4_117, %c128_118], %365 {strides = array<i32>} : memref<16x256xf32, #tpu.memory_space<vmem>>, vector<2x128xf32>,
    %c12_119 = arith.constant 12 : index
    %c0_120 = arith.constant 0 : index
    %368 = vector.load %arg8[%c12_119, %c0_120] : memref<16x1024xf32, #tpu.memory_space<vmem>>, vector<2x512xf32>
    %c0_121 = arith.constant 0 : index
    %c0_122 = arith.constant 0 : index
    %369 = vector.load %arg2[%c0_121, %c0_122] : memref<128x512xf32, #tpu.memory_space<vmem>>, vector<128x512xf32>
    %cst_123 = arith.constant dense<0.000000e+00> : vector<2x512xf32>
    %370 = tpu.matmul %340, %369, %cst_123 {dimension_numbers = #tpu.dot_dimension_numbers<[1], [0], [0], [1], [0, 0, 1, 1], [], []>} : vector<2x128xf32>, vector<128x512xf32>, vector<2x512xf32> -> vector<2x512xf32>
    %371 = arith.addf %368, %370 : vector<2x512xf32>
    %c2_124 = arith.constant 2 : index
    %c512_125 = arith.constant 512 : index
    %372 = vector.load %arg8[%c2_124, %c512_125] : memref<16x1024xf32, #tpu.memory_space<vmem>>, vector<2x512xf32>
    %c0_126 = arith.constant 0 : index
    %c0_127 = arith.constant 0 : index
    %373 = vector.load %arg3[%c0_126, %c0_127] : memref<128x512xf32, #tpu.memory_space<vmem>>, vector<128x512xf32>
    %cst_128 = arith.constant dense<0.000000e+00> : vector<2x512xf32>
    %374 = tpu.matmul %365, %373, %cst_128 {dimension_numbers = #tpu.dot_dimension_numbers<[1], [0], [0], [1], [0, 0, 1, 1], [], []>} : vector<2x128xf32>, vector<128x512xf32>, vector<2x512xf32> -> vector<2x512xf32>
    %375 = arith.addf %372, %374 : vector<2x512xf32>
    %376 = vector.extract_strided_slice %371 {offsets = [0, 0], sizes = [2, 128], strides = [1, 1]} : vector<2x512xf32> to vector<2x128xf32>
    %377 = arith.negf %376 : vector<2x128xf32>
    %378 = math.exp %377 : vector<2x128xf32>
    %cst_129 = arith.constant 1.000000e+00 : f32
    %379 = vector.broadcast %cst_129 : f32 to vector<2x128xf32>
    %380 = arith.addf %379, %378 : vector<2x128xf32>
    %381 = arith.divf %379, %380 : vector<2x128xf32>
    %382 = vector.extract_strided_slice %371 {offsets = [0, 128], sizes = [2, 128], strides = [1, 1]} : vector<2x512xf32> to vector<2x128xf32>
    %383 = arith.negf %382 : vector<2x128xf32>
    %384 = math.exp %383 : vector<2x128xf32>
    %cst_130 = arith.constant 1.000000e+00 : f32
    %385 = vector.broadcast %cst_130 : f32 to vector<2x128xf32>
    %386 = arith.addf %385, %384 : vector<2x128xf32>
    %387 = arith.divf %385, %386 : vector<2x128xf32>
    %388 = vector.extract_strided_slice %371 {offsets = [0, 256], sizes = [2, 128], strides = [1, 1]} : vector<2x512xf32> to vector<2x128xf32>
    %389 = math.tanh %388 : vector<2x128xf32>
    %390 = vector.extract_strided_slice %371 {offsets = [0, 384], sizes = [2, 128], strides = [1, 1]} : vector<2x512xf32> to vector<2x128xf32>
    %391 = arith.negf %390 : vector<2x128xf32>
    %392 = math.exp %391 : vector<2x128xf32>
    %cst_131 = arith.constant 1.000000e+00 : f32
    %393 = vector.broadcast %cst_131 : f32 to vector<2x128xf32>
    %394 = arith.addf %393, %392 : vector<2x128xf32>
    %395 = arith.divf %393, %394 : vector<2x128xf32>
    %396 = arith.mulf %387, %338 : vector<2x128xf32>
    %397 = arith.mulf %381, %389 : vector<2x128xf32>
    %398 = arith.addf %396, %397 : vector<2x128xf32>
    %399 = math.tanh %398 : vector<2x128xf32>
    %400 = arith.mulf %395, %399 : vector<2x128xf32>
    %401 = vector.extract_strided_slice %375 {offsets = [0, 0], sizes = [2, 128], strides = [1, 1]} : vector<2x512xf32> to vector<2x128xf32>
    %402 = arith.negf %401 : vector<2x128xf32>
    %403 = math.exp %402 : vector<2x128xf32>
    %cst_132 = arith.constant 1.000000e+00 : f32
    %404 = vector.broadcast %cst_132 : f32 to vector<2x128xf32>
    %405 = arith.addf %404, %403 : vector<2x128xf32>
    %406 = arith.divf %404, %405 : vector<2x128xf32>
    %407 = vector.extract_strided_slice %375 {offsets = [0, 128], sizes = [2, 128], strides = [1, 1]} : vector<2x512xf32> to vector<2x128xf32>
    %408 = arith.negf %407 : vector<2x128xf32>
    %409 = math.exp %408 : vector<2x128xf32>
    %cst_133 = arith.constant 1.000000e+00 : f32
    %410 = vector.broadcast %cst_133 : f32 to vector<2x128xf32>
    %411 = arith.addf %410, %409 : vector<2x128xf32>
    %412 = arith.divf %410, %411 : vector<2x128xf32>
    %413 = vector.extract_strided_slice %375 {offsets = [0, 256], sizes = [2, 128], strides = [1, 1]} : vector<2x512xf32> to vector<2x128xf32>
    %414 = math.tanh %413 : vector<2x128xf32>
    %415 = vector.extract_strided_slice %375 {offsets = [0, 384], sizes = [2, 128], strides = [1, 1]} : vector<2x512xf32> to vector<2x128xf32>
    %416 = arith.negf %415 : vector<2x128xf32>
    %417 = math.exp %416 : vector<2x128xf32>
    %cst_134 = arith.constant 1.000000e+00 : f32
    %418 = vector.broadcast %cst_134 : f32 to vector<2x128xf32>
    %419 = arith.addf %418, %417 : vector<2x128xf32>
    %420 = arith.divf %418, %419 : vector<2x128xf32>
    %421 = arith.mulf %412, %363 : vector<2x128xf32>
    %422 = arith.mulf %406, %414 : vector<2x128xf32>
    %423 = arith.addf %421, %422 : vector<2x128xf32>
    %424 = math.tanh %423 : vector<2x128xf32>
    %425 = arith.mulf %420, %424 : vector<2x128xf32>
    %c12_135 = arith.constant 12 : index
    %c0_136 = arith.constant 0 : index
    %426 = vector.load %arg9[%c12_135, %c0_136] : memref<16x256xf32, #tpu.memory_space<vmem>>, vector<2x128xf32>
    tpu.vector_store %arg9[%c12_135, %c0_136], %400 {strides = array<i32>} : memref<16x256xf32, #tpu.memory_space<vmem>>, vector<2x128xf32>,
    %c2_137 = arith.constant 2 : index
    %c128_138 = arith.constant 128 : index
    %427 = vector.load %arg9[%c2_137, %c128_138] : memref<16x256xf32, #tpu.memory_space<vmem>>, vector<2x128xf32>
    tpu.vector_store %arg9[%c2_137, %c128_138], %425 {strides = array<i32>} : memref<16x256xf32, #tpu.memory_space<vmem>>, vector<2x128xf32>,
    %c14_139 = arith.constant 14 : index
    %c0_140 = arith.constant 0 : index
    %428 = vector.load %arg8[%c14_139, %c0_140] : memref<16x1024xf32, #tpu.memory_space<vmem>>, vector<2x512xf32>
    %c0_141 = arith.constant 0 : index
    %c0_142 = arith.constant 0 : index
    %429 = vector.load %arg2[%c0_141, %c0_142] : memref<128x512xf32, #tpu.memory_space<vmem>>, vector<128x512xf32>
    %cst_143 = arith.constant dense<0.000000e+00> : vector<2x512xf32>
    %430 = tpu.matmul %400, %429, %cst_143 {dimension_numbers = #tpu.dot_dimension_numbers<[1], [0], [0], [1], [0, 0, 1, 1], [], []>} : vector<2x128xf32>, vector<128x512xf32>, vector<2x512xf32> -> vector<2x512xf32>
    %431 = arith.addf %428, %430 : vector<2x512xf32>
    %c0_144 = arith.constant 0 : index
    %c512_145 = arith.constant 512 : index
    %432 = vector.load %arg8[%c0_144, %c512_145] : memref<16x1024xf32, #tpu.memory_space<vmem>>, vector<2x512xf32>
    %c0_146 = arith.constant 0 : index
    %c0_147 = arith.constant 0 : index
    %433 = vector.load %arg3[%c0_146, %c0_147] : memref<128x512xf32, #tpu.memory_space<vmem>>, vector<128x512xf32>
    %cst_148 = arith.constant dense<0.000000e+00> : vector<2x512xf32>
    %434 = tpu.matmul %425, %433, %cst_148 {dimension_numbers = #tpu.dot_dimension_numbers<[1], [0], [0], [1], [0, 0, 1, 1], [], []>} : vector<2x128xf32>, vector<128x512xf32>, vector<2x512xf32> -> vector<2x512xf32>
    %435 = arith.addf %432, %434 : vector<2x512xf32>
    %436 = vector.extract_strided_slice %431 {offsets = [0, 0], sizes = [2, 128], strides = [1, 1]} : vector<2x512xf32> to vector<2x128xf32>
    %437 = arith.negf %436 : vector<2x128xf32>
    %438 = math.exp %437 : vector<2x128xf32>
    %cst_149 = arith.constant 1.000000e+00 : f32
    %439 = vector.broadcast %cst_149 : f32 to vector<2x128xf32>
    %440 = arith.addf %439, %438 : vector<2x128xf32>
    %441 = arith.divf %439, %440 : vector<2x128xf32>
    %442 = vector.extract_strided_slice %431 {offsets = [0, 128], sizes = [2, 128], strides = [1, 1]} : vector<2x512xf32> to vector<2x128xf32>
    %443 = arith.negf %442 : vector<2x128xf32>
    %444 = math.exp %443 : vector<2x128xf32>
    %cst_150 = arith.constant 1.000000e+00 : f32
    %445 = vector.broadcast %cst_150 : f32 to vector<2x128xf32>
    %446 = arith.addf %445, %444 : vector<2x128xf32>
    %447 = arith.divf %445, %446 : vector<2x128xf32>
    %448 = vector.extract_strided_slice %431 {offsets = [0, 256], sizes = [2, 128], strides = [1, 1]} : vector<2x512xf32> to vector<2x128xf32>
    %449 = math.tanh %448 : vector<2x128xf32>
    %450 = vector.extract_strided_slice %431 {offsets = [0, 384], sizes = [2, 128], strides = [1, 1]} : vector<2x512xf32> to vector<2x128xf32>
    %451 = arith.negf %450 : vector<2x128xf32>
    %452 = math.exp %451 : vector<2x128xf32>
    %cst_151 = arith.constant 1.000000e+00 : f32
    %453 = vector.broadcast %cst_151 : f32 to vector<2x128xf32>
    %454 = arith.addf %453, %452 : vector<2x128xf32>
    %455 = arith.divf %453, %454 : vector<2x128xf32>
    %456 = arith.mulf %447, %398 : vector<2x128xf32>
    %457 = arith.mulf %441, %449 : vector<2x128xf32>
    %458 = arith.addf %456, %457 : vector<2x128xf32>
    %459 = math.tanh %458 : vector<2x128xf32>
    %460 = arith.mulf %455, %459 : vector<2x128xf32>
    %461 = vector.extract_strided_slice %435 {offsets = [0, 0], sizes = [2, 128], strides = [1, 1]} : vector<2x512xf32> to vector<2x128xf32>
    %462 = arith.negf %461 : vector<2x128xf32>
    %463 = math.exp %462 : vector<2x128xf32>
    %cst_152 = arith.constant 1.000000e+00 : f32
    %464 = vector.broadcast %cst_152 : f32 to vector<2x128xf32>
    %465 = arith.addf %464, %463 : vector<2x128xf32>
    %466 = arith.divf %464, %465 : vector<2x128xf32>
    %467 = vector.extract_strided_slice %435 {offsets = [0, 128], sizes = [2, 128], strides = [1, 1]} : vector<2x512xf32> to vector<2x128xf32>
    %468 = arith.negf %467 : vector<2x128xf32>
    %469 = math.exp %468 : vector<2x128xf32>
    %cst_153 = arith.constant 1.000000e+00 : f32
    %470 = vector.broadcast %cst_153 : f32 to vector<2x128xf32>
    %471 = arith.addf %470, %469 : vector<2x128xf32>
    %472 = arith.divf %470, %471 : vector<2x128xf32>
    %473 = vector.extract_strided_slice %435 {offsets = [0, 256], sizes = [2, 128], strides = [1, 1]} : vector<2x512xf32> to vector<2x128xf32>
    %474 = math.tanh %473 : vector<2x128xf32>
    %475 = vector.extract_strided_slice %435 {offsets = [0, 384], sizes = [2, 128], strides = [1, 1]} : vector<2x512xf32> to vector<2x128xf32>
    %476 = arith.negf %475 : vector<2x128xf32>
    %477 = math.exp %476 : vector<2x128xf32>
    %cst_154 = arith.constant 1.000000e+00 : f32
    %478 = vector.broadcast %cst_154 : f32 to vector<2x128xf32>
    %479 = arith.addf %478, %477 : vector<2x128xf32>
    %480 = arith.divf %478, %479 : vector<2x128xf32>
    %481 = arith.mulf %472, %423 : vector<2x128xf32>
    %482 = arith.mulf %466, %474 : vector<2x128xf32>
    %483 = arith.addf %481, %482 : vector<2x128xf32>
    %484 = math.tanh %483 : vector<2x128xf32>
    %485 = arith.mulf %480, %484 : vector<2x128xf32>
    %c14_155 = arith.constant 14 : index
    %c0_156 = arith.constant 0 : index
    %486 = vector.load %arg9[%c14_155, %c0_156] : memref<16x256xf32, #tpu.memory_space<vmem>>, vector<2x128xf32>
    tpu.vector_store %arg9[%c14_155, %c0_156], %460 {strides = array<i32>} : memref<16x256xf32, #tpu.memory_space<vmem>>, vector<2x128xf32>,
    %c0_157 = arith.constant 0 : index
    %c128_158 = arith.constant 128 : index
    %487 = vector.load %arg9[%c0_157, %c128_158] : memref<16x256xf32, #tpu.memory_space<vmem>>, vector<2x128xf32>
    tpu.vector_store %arg9[%c0_157, %c128_158], %485 {strides = array<i32>} : memref<16x256xf32, #tpu.memory_space<vmem>>, vector<2x128xf32>,
    %c0_159 = arith.constant 0 : index
    %c0_160 = arith.constant 0 : index
    %488 = vector.load %arg9[%c0_159, %c0_160] : memref<16x256xf32, #tpu.memory_space<vmem>>, vector<16x256xf32>
    %c0_161 = arith.constant 0 : index
    %c0_162 = arith.constant 0 : index
    %489 = vector.load %arg5[%c0_161, %c0_162] : memref<256x128xf32, #tpu.memory_space<vmem>>, vector<256x128xf32>
    %cst_163 = arith.constant dense<0.000000e+00> : vector<16x128xf32>
    %490 = tpu.matmul %488, %489, %cst_163 {dimension_numbers = #tpu.dot_dimension_numbers<[1], [0], [0], [1], [0, 0, 1, 1], [], []>} : vector<16x256xf32>, vector<256x128xf32>, vector<16x128xf32> -> vector<16x128xf32>
    %c0_164 = arith.constant 0 : index
    %c0_165 = arith.constant 0 : index
    %491 = vector.load %arg6[%c0_164, %c0_165] : memref<1x128xf32, #tpu.memory_space<vmem>>, vector<1x128xf32>
    %492 = vector.broadcast %491 : vector<1x128xf32> to vector<16x128xf32>
    %493 = arith.addf %490, %492 : vector<16x128xf32>
    %c0_166 = arith.constant 0 : index
    %c0_167 = arith.constant 0 : index
    %494 = vector.load %arg7[%c0_166, %c0_167] : memref<16x128xf32, #tpu.memory_space<vmem>>, vector<16x128xf32>
    tpu.vector_store %arg7[%c0_166, %c0_167], %493 {strides = array<i32>} : memref<16x128xf32, #tpu.memory_space<vmem>>, vector<16x128xf32>,
    return
  }
}

</mosaic_0001>

<bundles_post_ra>
// kernel: model_forward_eval.1
= control target key start
LH: loop header
LB: loop body
LE: loop exit
PB: predicated region body
PF: predicated region fallthrough
CT: control target
= control target key end

     0   :  { %12 = vsyncpa [#allocation5], 0  ;;  %s7229_s0 = inlined_call_operand.vmem [shape: f32[16,32], index: 0, kind: input, shape index: {}]   ;;  %s7230_s1 = inlined_call_operand.vmem [shape: f32[32,1024], index: 1, kind: input, shape index: {}]   ;;  %s7231_s2 = inlined_call_operand.hbm [shape: f32[128,512], index: 2, kind: input, shape index: {}]   ;;  %s7232_s3 = inlined_call_operand.hbm [shape: f32[128,512], index: 3, kind: input, shape index: {}]   ;;  %s7233_s4 = inlined_call_operand.vmem [shape: f32[1,1024], index: 4, kind: input, shape index: {}]   ;;  %s7234_s5 = inlined_call_operand.vmem [shape: f32[256,128], index: 5, kind: input, shape index: {}]   ;;  %s7235_s6 = inlined_call_operand.vmem [shape: f32[1,128], index: 6, kind: input, shape index: {}]   ;;  %s7236_s7 = inlined_call_operand.vmem [shape: f32[16,128], index: 7, kind: output, shape index: {}]  }
   0x1   :  { %s22_s26 = sshll.u32 %s7231_s2, 4  ;;  %s23_s26 = int_to_ptr.hbm [resolvable:$true] %s22_s26 }
   0x2   :  { %13 = vsyncpa [#allocation7], 0  ;;  %s4464_s27 = smov [#allocation4]   ;;  %s35_s8 = sshll.u32 %s7232_s3, 4  ;;  %s36_s8 = int_to_ptr.hbm [resolvable:$true] %s35_s8 }
   0x3   :  { %s24_s28 = sshll.u32 %s4464_s27, 4  ;;  %s4465_s9 = smov 512   ;;  %s25_s28 = int_to_ptr.vmem [resolvable:$true] %s24_s28 }
   0x4   :  { %s4466_s10 = smov 32   ;;  %s4467_s11 = smov [#allocation6]  }
   0x5   :  { %30 = dma.hbm_to_vmem [thread:$0]  %s23_s26, 8192, %s25_s28, [#allocation5], %s4465_s9, %s4465_s9, %s4466_s10  }
   0x6   :  { %s37_s12 = sshll.u32 %s4467_s11, 4  ;;  %s38_s12 = int_to_ptr.vmem [resolvable:$true] %s37_s12 }
   0x7   :  { %43 = dma.hbm_to_vmem [thread:$0]  %s36_s8, 8192, %s38_s12, [#allocation7], %s4465_s9, %s4465_s9, %s4466_s10  }
   0x8   :  { %4460 = dma.done.wait [#allocation5], 8192  }
   0x9   :  { %4461 = vsyncadd [#allocation5], 4294959104 }
   0xa   :  { %4462 = dma.done.wait [#allocation7], 8192  }
   0xb   :  { %4463 = vsyncadd [#allocation7], 4294959104  ;;  %v84_v0 = vld [vmem:[%s7230_s1 + $0xc0] sm:$0xff]  ;;  %v85_v1 = vld [vmem:[%s7230_s1 + $0xc8] sm:$0xff]  ;;  %vm110_vm0 = vcmask 261120  }
   0xc   :  { %v88_v2 = vld [vmem:[%s7230_s1 + $0xe0] sm:$0xff]  ;;  %129 = vmatpush.msra.mxu2 %v84_v0  ;;  %152 = vmatpush.msra.mxu3 %v85_v1  ;;  %v89_v3 = vld [vmem:[%s7230_s1 + $0xe8] sm:$0xff]  ;;  %v86_v19 = vld [vmem:[%s7230_s1 + $0xd0] sm:$0xff] }
   0xd   :  { %v76_v4 = vld [vmem:[%s7230_s1 + $0x80] sm:$0xff]  ;;  %v77_v5 = vld [vmem:[%s7230_s1 + $0x88] sm:$0xff]  ;;  %221 = vmatpush.msra.mxu0 %v88_v2  ;;  %244 = vmatpush.msra.mxu1 %v89_v3  ;;  %v87_v20 = vld [vmem:[%s7230_s1 + $0xd8] sm:$0xff] }
   0xe   :  { %v80_v6 = vld [vmem:[%s7230_s1 + $0xa0] sm:$0xff]  ;;  %v81_v7 = vld [vmem:[%s7230_s1 + $0xa8] sm:$0xff]  ;;  %130 = vmatpush.msra.mxu2 %v76_v4  ;;  %153 = vmatpush.msra.mxu3 %v77_v5  ;;  %v78_v23 = vld [vmem:[%s7230_s1 + $0x90] sm:$0xff] }
   0xf   :  { %v68_v8 = vld [vmem:[%s7230_s1 + $0x40] sm:$0xff]  ;;  %v69_v9 = vld [vmem:[%s7230_s1 + $0x48] sm:$0xff]  ;;  %222 = vmatpush.msra.mxu0 %v80_v6  ;;  %245 = vmatpush.msra.mxu1 %v81_v7  ;;  %v79_v24 = vld [vmem:[%s7230_s1 + $0x98] sm:$0xff] }
  0x10   :  { %v72_v10 = vld [vmem:[%s7230_s1 + $0x60] sm:$0xff]  ;;  %v73_v11 = vld [vmem:[%s7230_s1 + $0x68] sm:$0xff]  ;;  %131 = vmatpush.msra.mxu2 %v68_v8  ;;  %154 = vmatpush.msra.mxu3 %v69_v9  ;;  %v70_v27 = vld [vmem:[%s7230_s1 + $0x50] sm:$0xff] }
  0x11   :  { %v60_v12 = vld [vmem:[%s7230_s1] sm:$0xff]  ;;  %v61_v13 = vld [vmem:[%s7230_s1 + $0x8] sm:$0xff]  ;;  %223 = vmatpush.msra.mxu0 %v72_v10  ;;  %246 = vmatpush.msra.mxu1 %v73_v11  ;;  %v71_v28 = vld [vmem:[%s7230_s1 + $0x58] sm:$0xff] }
  0x12   :  { %v64_v14 = vld [vmem:[%s7230_s1 + $0x20] sm:$0xff]  ;;  %v65_v15 = vld [vmem:[%s7230_s1 + $0x28] sm:$0xff]  ;;  %132 = vmatpush.msra.mxu2 %v60_v12  ;;  %155 = vmatpush.msra.mxu3 %v61_v13  ;;  %v62_v32 = vld [vmem:[%s7230_s1 + $0x10] sm:$0xff] }
  0x13   :  { %v4566_v16 = vld [vmem:[%s7229_s0] sm:$0xff]  ;;  %v4570_v18 = vld [vmem:[#allocation4 + $0x1e8] sm:$0xff]  ;;  %224 = vmatpush.msra.mxu0 %v64_v14  ;;  %247 = vmatpush.msra.mxu1 %v65_v15  ;;  %v63_v33 = vld [vmem:[%s7230_s1 + $0x18] sm:$0xff] }
  0x14   :  { %v4568_v17 = vld [vmem:[#allocation4 + $0x1e0] sm:$0xff]  ;;  %4086 = vmatmul.msk.f32.vlgmr.msra.gmra.mxu2 %vm110_vm0, %v4566_v16  ;;  %4088 = vmatmul.msk.f32.vlgmr.msra.gmra.mxu3 %vm110_vm0, %v4566_v16  ;;  %v4584_v22 = vld [vmem:[#allocation4 + $0x1c8] sm:$0xff]  ;;  %v90_v36 = vld [vmem:[%s7230_s1 + $0xf0] sm:$0xff] }
  0x15   :  { %v4582_v21 = vld [vmem:[#allocation4 + $0x1c0] sm:$0xff]  ;;  %385 = vmatpush.msrb.mxu0 %v4568_v17  ;;  %405 = vmatpush.msrb.mxu1 %v4570_v18  ;;  %v4596_v26 = vld [vmem:[#allocation4 + $0x1a8] sm:$0xff]  ;;  %v91_v37 = vld [vmem:[%s7230_s1 + $0xf8] sm:$0xff] }
  0x16   :  { %175 = vmatpush.msrb.mxu2 %v86_v19  ;;  %198 = vmatpush.msrb.mxu3 %v87_v20  ;;  %v4594_v25 = vld [vmem:[#allocation4 + $0x1a0] sm:$0xff]  ;;  %v4608_v30 = vld [vmem:[#allocation4 + $0x188] sm:$0xff]  ;;  %v82_v40 = vld [vmem:[%s7230_s1 + $0xb0] sm:$0xff] }
  0x17   :  { %386 = vmatpush.msrb.mxu0 %v4582_v21  ;;  %406 = vmatpush.msrb.mxu1 %v4584_v22  ;;  %v4606_v29 = vld [vmem:[#allocation4 + $0x180] sm:$0xff]  ;;  %v4615_v31 = vld [vmem:[%s7229_s0 + $0x8] sm:$0xff]  ;;  %v83_v41 = vld [vmem:[%s7230_s1 + $0xb8] sm:$0xff] }
  0x18   :  { %176 = vmatpush.msrb.mxu2 %v78_v23  ;;  %199 = vmatpush.msrb.mxu3 %v79_v24  ;;  %v4625_v34 = vld [vmem:[#allocation4 + $0x160] sm:$0xff]  ;;  %v4627_v35 = vld [vmem:[#allocation4 + $0x168] sm:$0xff]  ;;  %v74_v44 = vld [vmem:[%s7230_s1 + $0x70] sm:$0xff] }
  0x19   :  { %387 = vmatpush.msrb.mxu0 %v4594_v25  ;;  %407 = vmatpush.msrb.mxu1 %v4596_v26  ;;  %v4639_v38 = vld [vmem:[#allocation4 + $0x140] sm:$0xff]  ;;  %v4641_v39 = vld [vmem:[#allocation4 + $0x148] sm:$0xff]  ;;  %v75_v45 = vld [vmem:[%s7230_s1 + $0x78] sm:$0xff] }
  0x1a   :  { %177 = vmatpush.msrb.mxu2 %v70_v27  ;;  %200 = vmatpush.msrb.mxu3 %v71_v28  ;;  %v4651_v42 = vld [vmem:[#allocation4 + $0x120] sm:$0xff]  ;;  %v4653_v43 = vld [vmem:[#allocation4 + $0x128] sm:$0xff]  ;;  %v66_v48 = vld [vmem:[%s7230_s1 + $0x30] sm:$0xff]  ;;  %v7237_v27 = vmov 0.0  }
  0x1b   :  { %388 = vmatpush.msrb.mxu0 %v4606_v29  ;;  %408 = vmatpush.msrb.mxu1 %v4608_v30  ;;  %v4663_v46 = vld [vmem:[#allocation4 + $0x100] sm:$0xff]  ;;  %v4665_v47 = vld [vmem:[#allocation4 + $0x108] sm:$0xff]  ;;  %v67_v49 = vld [vmem:[%s7230_s1 + $0x38] sm:$0xff] }
  0x1c   :  { %4087 = vmatmul.msk.f32.gmra.mxu2 %vm110_vm0, %v4615_v31  ;;  %4089 = vmatmul.msk.f32.gmra.mxu3 %vm110_vm0, %v4615_v31  ;;  %v4681_v50 = vld [vmem:[#allocation4 + $0xe0] sm:$0xff]  ;;  %v4683_v51 = vld [vmem:[#allocation4 + $0xe8] sm:$0xff]  ;;  %v4685_v52 = vld [vmem:[#allocation4 + $0x1f0] sm:$0xff] }
  0x1d   :  { %178 = vmatpush.msrb.mxu2 %v62_v32  ;;  %201 = vmatpush.msrb.mxu3 %v63_v33  ;;  %v4687_v53 = vld [vmem:[#allocation4 + $0x1f8] sm:$0xff]  ;;  %v4693_v54 = vld [vmem:[#allocation4 + $0xc0] sm:$0xff]  ;;  %v4695_v55 = vld [vmem:[#allocation4 + $0xc8] sm:$0xff] }
  0x1e   :  { %389 = vmatpush.msrb.mxu0 %v4625_v34  ;;  %409 = vmatpush.msrb.mxu1 %v4627_v35  ;;  %v4699_v56 = vld [vmem:[#allocation4 + $0x1d0] sm:$0xff]  ;;  %v4701_v57 = vld [vmem:[#allocation4 + $0x1d8] sm:$0xff]  ;;  %v4705_v58 = vld [vmem:[#allocation4 + $0xa0] sm:$0xff] }
  0x1f   :  { %267 = vmatpush.msra.mxu2 %v90_v36  ;;  %290 = vmatpush.msra.mxu3 %v91_v37  ;;  %v4707_v59 = vld [vmem:[#allocation4 + $0xa8] sm:$0xff]  ;;  %v4711_v60 = vld [vmem:[#allocation4 + $0x1b0] sm:$0xff]  ;;  %v4713_v61 = vld [vmem:[#allocation4 + $0x1b8] sm:$0xff] }
  0x20   :  { %390 = vmatpush.msrb.mxu0 %v4639_v38  ;;  %410 = vmatpush.msrb.mxu1 %v4641_v39  ;;  %v4717_v62 = vld [vmem:[#allocation4 + $0x80] sm:$0xff]  ;;  %v4719_v63 = vld [vmem:[#allocation4 + $0x88] sm:$0xff]  ;;  %v4723_v0 = vld [vmem:[#allocation4 + $0x190] sm:$0xff] }
  0x21   :  { %268 = vmatpush.msra.mxu2 %v82_v40  ;;  %291 = vmatpush.msra.mxu3 %v83_v41  ;;  %v4725_v1 = vld [vmem:[#allocation4 + $0x198] sm:$0xff]  ;;  %v4733_v2 = vld [vmem:[#allocation4 + $0x60] sm:$0xff]  ;;  %v4735_v3 = vld [vmem:[#allocation4 + $0x68] sm:$0xff] }
  0x22   :  { %391 = vmatpush.msrb.mxu0 %v4651_v42  ;;  %411 = vmatpush.msrb.mxu1 %v4653_v43  ;;  %v4741_v4 = vld [vmem:[#allocation4 + $0x170] sm:$0xff]  ;;  %v4743_v5 = vld [vmem:[#allocation4 + $0x178] sm:$0xff]  ;;  %v4749_v6 = vld [vmem:[#allocation4 + $0x40] sm:$0xff] }
  0x23   :  { %269 = vmatpush.msra.mxu2 %v74_v44  ;;  %292 = vmatpush.msra.mxu3 %v75_v45  ;;  %v4751_v7 = vld [vmem:[#allocation4 + $0x48] sm:$0xff]  ;;  %v4755_v8 = vld [vmem:[#allocation4 + $0x150] sm:$0xff]  ;;  %v4757_v9 = vld [vmem:[#allocation4 + $0x158] sm:$0xff] }
  0x24   :  { %392 = vmatpush.msrb.mxu0 %v4663_v46  ;;  %412 = vmatpush.msrb.mxu1 %v4665_v47  ;;  %v4761_v10 = vld [vmem:[#allocation4 + $0x20] sm:$0xff]  ;;  %v4763_v11 = vld [vmem:[#allocation4 + $0x28] sm:$0xff]  ;;  %v4767_v12 = vld [vmem:[#allocation4 + $0x130] sm:$0xff] }
  0x25   :  { %4094 = vmatmul.msk.f32.vlgmr.msra.gmra.mxu0 %vm110_vm0, %v4566_v16  ;;  %4096 = vmatmul.msk.f32.vlgmr.msra.gmra.mxu1 %vm110_vm0, %v4566_v16  ;;  %v4769_v13 = vld [vmem:[#allocation4 + $0x138] sm:$0xff]  ;;  %v4773_v14 = vld [vmem:[#allocation4] sm:$0xff]  ;;  %v4775_v15 = vld [vmem:[#allocation4 + $0x8] sm:$0xff] }
  0x26   :  { %270 = vmatpush.msra.mxu2 %v66_v48  ;;  %293 = vmatpush.msra.mxu3 %v67_v49  ;;  %v4779_v19 = vld [vmem:[#allocation4 + $0x110] sm:$0xff]  ;;  %v4781_v20 = vld [vmem:[#allocation4 + $0x118] sm:$0xff]  ;;  %v4787_v23 = vld [vmem:[#allocation6 + $0x1e0] sm:$0xff] }
  0x27   :  { %4090 = vmatmul.msk.f32.vlgmr.msrb.gmra.mxu2 %vm110_vm0, %v4566_v16  ;;  %4092 = vmatmul.msk.f32.vlgmr.msrb.gmra.mxu3 %vm110_vm0, %v4566_v16  ;;  %7525 = vst [vmem:[#allocation10_spill] sm:$0xff] %v4787_v23  ;;  %v4789_v24 = vld [vmem:[#allocation6 + $0x1e8] sm:$0xff]  ;;  %v4795_v28 = vld [vmem:[#allocation4 + $0xf0] sm:$0xff]  ;;  %v4797_v32 = vld [vmem:[#allocation4 + $0xf8] sm:$0xff] }
  0x28   :  { %393 = vmatpush.msrb.mxu0 %v4681_v50  ;;  %413 = vmatpush.msrb.mxu1 %v4683_v51  ;;  %7526 = vst [vmem:[#allocation11_spill] sm:$0xff] %v4789_v24  ;;  %v4801_v33 = vld [vmem:[#allocation6 + $0x1c0] sm:$0xff]  ;;  %v4803_v36 = vld [vmem:[#allocation6 + $0x1c8] sm:$0xff]  ;;  %v4809_v37 = vld [vmem:[#allocation4 + $0xd0] sm:$0xff] }
  0x29   :  { %425 = vmatpush.msrb.mxu2 %v4685_v52  ;;  %445 = vmatpush.msrb.mxu3 %v4687_v53  ;;  %7527 = vst [vmem:[#allocation12_spill] sm:$0xff] %v4801_v33  ;;  %v4811_v40 = vld [vmem:[#allocation4 + $0xd8] sm:$0xff]  ;;  %v4815_v41 = vld [vmem:[#allocation6 + $0x1a0] sm:$0xff]  ;;  %v4817_v44 = vld [vmem:[#allocation6 + $0x1a8] sm:$0xff] }
  0x2a   :  { %394 = vmatpush.msrb.mxu0 %v4693_v54  ;;  %414 = vmatpush.msrb.mxu1 %v4695_v55  ;;  %7528 = vst [vmem:[#allocation13_spill] sm:$0xff] %v4803_v36  ;;  %v4821_v45 = vld [vmem:[#allocation4 + $0xb0] sm:$0xff]  ;;  %v4823_v48 = vld [vmem:[#allocation4 + $0xb8] sm:$0xff]  ;;  %v4829_v49 = vld [vmem:[#allocation6 + $0x188] sm:$0xff] }
  0x2b   :  { %426 = vmatpush.msrb.mxu2 %v4699_v56  ;;  %446 = vmatpush.msrb.mxu3 %v4701_v57  ;;  %7529 = vst [vmem:[#allocation14_spill] sm:$0xff] %v4815_v41 }
  0x2c   :  { %395 = vmatpush.msrb.mxu0 %v4705_v58  ;;  %415 = vmatpush.msrb.mxu1 %v4707_v59  ;;  %7530 = vst [vmem:[#allocation15_spill] sm:$0xff] %v4817_v44 }
  0x2d   :  { %427 = vmatpush.msrb.mxu2 %v4711_v60  ;;  %447 = vmatpush.msrb.mxu3 %v4713_v61  ;;  %7531 = vst [vmem:[#allocation16_spill] sm:$0xff] %v4821_v45 }
  0x2e   :  { %396 = vmatpush.msrb.mxu0 %v4717_v62  ;;  %416 = vmatpush.msrb.mxu1 %v4719_v63  ;;  %7532 = vst [vmem:[#allocation17_spill] sm:$0xff] %v4823_v48 }
  0x2f   :  { %428 = vmatpush.msrb.mxu2 %v4723_v0  ;;  %448 = vmatpush.msrb.mxu3 %v4725_v1  ;;  %7534 = vst [vmem:[#allocation19_spill] sm:$0xff] %v4829_v49 }
  0x30   :  { %4095 = vmatmul.msk.f32.gmra.mxu0 %vm110_vm0, %v4615_v31  ;;  %4097 = vmatmul.msk.f32.gmra.mxu1 %vm110_vm0, %v4615_v31 }
  0x31   :  { %4091 = vmatmul.msk.f32.gmra.mxu2 %vm110_vm0, %v4615_v31  ;;  %4093 = vmatmul.msk.f32.gmra.mxu3 %vm110_vm0, %v4615_v31 }
  0x32   :  { %397 = vmatpush.msrb.mxu0 %v4733_v2  ;;  %417 = vmatpush.msrb.mxu1 %v4735_v3 }
  0x33   :  { %429 = vmatpush.msrb.mxu2 %v4741_v4  ;;  %449 = vmatpush.msrb.mxu3 %v4743_v5 }
  0x34   :  { %398 = vmatpush.msrb.mxu0 %v4749_v6  ;;  %418 = vmatpush.msrb.mxu1 %v4751_v7 }
  0x35   :  { %430 = vmatpush.msrb.mxu2 %v4755_v8  ;;  %450 = vmatpush.msrb.mxu3 %v4757_v9 }
  0x36   :  { %399 = vmatpush.msrb.mxu0 %v4761_v10  ;;  %419 = vmatpush.msrb.mxu1 %v4763_v11 }
  0x37   :  { %431 = vmatpush.msrb.mxu2 %v4767_v12  ;;  %451 = vmatpush.msrb.mxu3 %v4769_v13 }
  0x38   :  { %400 = vmatpush.msrb.mxu0 %v4773_v14  ;;  %420 = vmatpush.msrb.mxu1 %v4775_v15 }
  0x39   :  { %432 = vmatpush.msrb.mxu2 %v4779_v19  ;;  %452 = vmatpush.msrb.mxu3 %v4781_v20 }
  0x3a   :  { %401 = vmatmul.f32.vlgmr.msrb.gmra.mxu0 %v7237_v27  ;;  %421 = vmatmul.f32.vlgmr.msrb.gmra.mxu1 %v7237_v27  ;;  %v4833_v27 = vld [vmem:[#allocation4 + $0x90] sm:$0xff] }
  0x3b   :  { %537 = vmatpush.msra.mxu0 %v4787_v23  ;;  %557 = vmatpush.msra.mxu1 %v4789_v24  ;;  %7535 = vst [vmem:[#allocation20_spill] sm:$0xff] %v4833_v27  ;;  %v4841_v24 = vld [vmem:[#allocation6 + $0x168] sm:$0xff]  ;;  %v4935_v23 = vld [vmem:[#allocation6 + $0x190] sm:$0xff] }
  0x3c   :  { %4098 = vmatmul.msk.f32.vlgmr.msra.gmra.mxu2 %vm110_vm0, %v4566_v16  ;;  %4100 = vmatmul.msk.f32.vlgmr.msra.gmra.mxu3 %vm110_vm0, %v4566_v16  ;;  %v4827_v16 = vld [vmem:[#allocation6 + $0x180] sm:$0xff]  ;;  %7538 = vst [vmem:[#allocation23_spill] sm:$0xff] %v4841_v24 }
  0x3d   :  { %433 = vmatpush.msrb.mxu2 %v4795_v28  ;;  %453 = vmatpush.msrb.mxu3 %v4797_v32  ;;  %7533 = vst [vmem:[#allocation18_spill] sm:$0xff] %v4827_v16 }
  0x3e   :  { %538 = vmatpush.msra.mxu0 %v4801_v33  ;;  %558 = vmatpush.msra.mxu1 %v4803_v36  ;;  %v4835_v33 = vld [vmem:[#allocation4 + $0x98] sm:$0xff]  ;;  %v4839_v36 = vld [vmem:[#allocation6 + $0x160] sm:$0xff]  ;;  %7568 = vst [vmem:[#allocation52_spill] sm:$0xff] %v4935_v23 }
  0x3f   :  { %434 = vmatpush.msrb.mxu2 %v4809_v37  ;;  %454 = vmatpush.msrb.mxu3 %v4811_v40  ;;  %7536 = vst [vmem:[#allocation21_spill] sm:$0xff] %v4835_v33 }
  0x40   :  { %539 = vmatpush.msra.mxu0 %v4815_v41  ;;  %559 = vmatpush.msra.mxu1 %v4817_v44  ;;  %7537 = vst [vmem:[#allocation22_spill] sm:$0xff] %v4839_v36  ;;  %v4847_v44 = vld [vmem:[#allocation4 + $0x70] sm:$0xff]  ;;  %v4849_v41 = vld [vmem:[#allocation4 + $0x78] sm:$0xff] }
  0x41   :  { %435 = vmatpush.msrb.mxu2 %v4821_v45  ;;  %455 = vmatpush.msrb.mxu3 %v4823_v48  ;;  %7539 = vst [vmem:[#allocation24_spill] sm:$0xff] %v4847_v44  ;;  %v4853_v48 = vld [vmem:[#allocation6 + $0x140] sm:$0xff]  ;;  %v4855_v45 = vld [vmem:[#allocation6 + $0x148] sm:$0xff] }
  0x42   :  { %540 = vmatpush.msra.mxu0 %v4827_v16  ;;  %560 = vmatpush.msra.mxu1 %v4829_v49  ;;  %7540 = vst [vmem:[#allocation25_spill] sm:$0xff] %v4849_v41  ;;  %v4861_v49 = vld [vmem:[#allocation4 + $0x50] sm:$0xff]  ;;  %v4863_v16 = vld [vmem:[#allocation4 + $0x58] sm:$0xff] }
  0x43   :  { %436 = vmatpush.msrb.mxu2 %v4833_v27  ;;  %456 = vmatpush.msrb.mxu3 %v4835_v33  ;;  %7541 = vst [vmem:[#allocation26_spill] sm:$0xff] %v4853_v48  ;;  %v4873_v33 = vld [vmem:[#allocation4 + $0x30] sm:$0xff]  ;;  %v4875_v27 = vld [vmem:[#allocation4 + $0x38] sm:$0xff] }
  0x44   :  { %541 = vmatpush.msra.mxu0 %v4839_v36  ;;  %561 = vmatpush.msra.mxu1 %v4841_v24  ;;  %7542 = vst [vmem:[#allocation27_spill] sm:$0xff] %v4855_v45  ;;  %v4867_v36 = vld [vmem:[#allocation6 + $0x120] sm:$0xff]  ;;  %v4869_v24 = vld [vmem:[#allocation6 + $0x128] sm:$0xff] }
  0x45   :  { %4099 = vmatmul.msk.f32.gmra.mxu2 %vm110_vm0, %v4615_v31  ;;  %4101 = vmatmul.msk.f32.gmra.mxu3 %vm110_vm0, %v4615_v31  ;;  %7543 = vst [vmem:[#allocation28_spill] sm:$0xff] %v4861_v49  ;;  %v4879_v31 = vld [vmem:[#allocation6 + $0x100] sm:$0xff] }
  0x46   :  { %7544 = vst [vmem:[#allocation29_spill] sm:$0xff] %v4863_v16  ;;  %437 = vmatpush.msrb.mxu2 %v4847_v44  ;;  %457 = vmatpush.msrb.mxu3 %v4849_v41  ;;  %v4881_v44 = vld [vmem:[#allocation6 + $0x108] sm:$0xff]  ;;  %v4885_v41 = vld [vmem:[#allocation4 + $0x10] sm:$0xff] }
  0x47   :  { %7545 = vst [vmem:[#allocation30_spill] sm:$0xff] %v4867_v36  ;;  %542 = vmatpush.msra.mxu0 %v4853_v48  ;;  %562 = vmatpush.msra.mxu1 %v4855_v45  ;;  %v4887_v48 = vld [vmem:[#allocation4 + $0x18] sm:$0xff]  ;;  %v4891_v45 = vld [vmem:[#allocation6 + $0xe0] sm:$0xff] }
  0x48   :  { %7546 = vst [vmem:[#allocation31_spill] sm:$0xff] %v4869_v24  ;;  %438 = vmatpush.msrb.mxu2 %v4861_v49  ;;  %458 = vmatpush.msrb.mxu3 %v4863_v16  ;;  %v4893_v49 = vld [vmem:[#allocation6 + $0xe8] sm:$0xff]  ;;  %v4897_v16 = vld [vmem:[#allocation6 + $0x1f0] sm:$0xff] }
  0x49   :  { %7547 = vst [vmem:[#allocation32_spill] sm:$0xff] %v4873_v33  ;;  %543 = vmatpush.msra.mxu0 %v4867_v36  ;;  %563 = vmatpush.msra.mxu1 %v4869_v24  ;;  %v4899_v36 = vld [vmem:[#allocation6 + $0x1f8] sm:$0xff]  ;;  %v4905_v24 = vld [vmem:[#allocation6 + $0xc0] sm:$0xff] }
  0x4a   :  { %7548 = vst [vmem:[#allocation33_spill] sm:$0xff] %v4875_v27  ;;  %439 = vmatpush.msrb.mxu2 %v4873_v33  ;;  %459 = vmatpush.msrb.mxu3 %v4875_v27  ;;  %v4907_v27 = vld [vmem:[#allocation6 + $0xc8] sm:$0xff]  ;;  %v7561_v33 = vmov 0.0  }
  0x4b   :  { %7549 = vst [vmem:[#allocation34_spill] sm:$0xff] %v4879_v31  ;;  %544 = vmatpush.msra.mxu0 %v4879_v31  ;;  %564 = vmatpush.msra.mxu1 %v4881_v44  ;;  %v4913_v31 = vld [vmem:[#allocation6 + $0x1d8] sm:$0xff] }
  0x4c   :  { %7550 = vst [vmem:[#allocation35_spill] sm:$0xff] %v4881_v44  ;;  %440 = vmatpush.msrb.mxu2 %v4885_v41  ;;  %460 = vmatpush.msrb.mxu3 %v4887_v48  ;;  %v4911_v44 = vld [vmem:[#allocation6 + $0x1d0] sm:$0xff] }
  0x4d   :  { %7551 = vst [vmem:[#allocation36_spill] sm:$0xff] %v4885_v41  ;;  %545 = vmatpush.msra.mxu0 %v4891_v45  ;;  %565 = vmatpush.msra.mxu1 %v4893_v49  ;;  %v4931_v41 = vld [vmem:[#allocation6 + $0x88] sm:$0xff] }
  0x4e   :  { %7552 = vst [vmem:[#allocation37_spill] sm:$0xff] %v4887_v48  ;;  %577 = vmatpush.msra.mxu2 %v4897_v16  ;;  %597 = vmatpush.msra.mxu3 %v4899_v36  ;;  %v4917_v48 = vld [vmem:[#allocation6 + $0xa0] sm:$0xff] }
  0x4f   :  { %7553 = vst [vmem:[#allocation38_spill] sm:$0xff] %v4891_v45  ;;  %441 = vmatmul.f32.vlgmr.msrb.gmra.mxu2 %v7561_v33  ;;  %461 = vmatmul.f32.vlgmr.msrb.gmra.mxu3 %v7561_v33  ;;  %v4919_v45 = vld [vmem:[#allocation6 + $0xa8] sm:$0xff] }
  0x50   :  { %7554 = vst [vmem:[#allocation39_spill] sm:$0xff] %v4893_v49  ;;  %546 = vmatpush.msra.mxu0 %v4905_v24  ;;  %566 = vmatpush.msra.mxu1 %v4907_v27  ;;  %v4923_v49 = vld [vmem:[#allocation6 + $0x1b0] sm:$0xff] }
  0x51   :  { %7555 = vst [vmem:[#allocation40_spill] sm:$0xff] %v4897_v16  ;;  %v4925_v16 = vld [vmem:[#allocation6 + $0x1b8] sm:$0xff]  ;;  %578 = vmatpush.msra.mxu2 %v4911_v44  ;;  %598 = vmatpush.msra.mxu3 %v4913_v31 }
  0x52   :  { %7556 = vst [vmem:[#allocation41_spill] sm:$0xff] %v4899_v36  ;;  %v4929_v36 = vld [vmem:[#allocation6 + $0x80] sm:$0xff]  ;;  %547 = vmatpush.msra.mxu0 %v4917_v48  ;;  %567 = vmatpush.msra.mxu1 %v4919_v45 }
  0x53   :  { %7557 = vst [vmem:[#allocation42_spill] sm:$0xff] %v4905_v24  ;;  %v4937_v24 = vld [vmem:[#allocation6 + $0x198] sm:$0xff]  ;;  %579 = vmatpush.msra.mxu2 %v4923_v49  ;;  %599 = vmatpush.msra.mxu3 %v4925_v16 }
  0x54   :  { %7558 = vst [vmem:[#allocation43_spill] sm:$0xff] %v4907_v27  ;;  %v4941_v27 = vld [vmem:[#allocation6 + $0x60] sm:$0xff]  ;;  %548 = vmatpush.msra.mxu0 %v4929_v36  ;;  %568 = vmatpush.msra.mxu1 %v4931_v41 }
  0x55   :  { %7559 = vst [vmem:[#allocation44_spill] sm:$0xff] %v4911_v44  ;;  %v4943_v44 = vld [vmem:[#allocation6 + $0x68] sm:$0xff]  ;;  %580 = vmatpush.msra.mxu2 %v4935_v23  ;;  %600 = vmatpush.msra.mxu3 %v4937_v24 }
  0x56   :  { %7560 = vst [vmem:[#allocation45_spill] sm:$0xff] %v4913_v31  ;;  %v4947_v31 = vld [vmem:[#allocation6 + $0x170] sm:$0xff]  ;;  %549 = vmatpush.msra.mxu0 %v4941_v27  ;;  %569 = vmatpush.msra.mxu1 %v4943_v44  ;;  %v4967_v23 = vld [vmem:[#allocation6 + $0x28] sm:$0xff] }
  0x57   :  { %7562 = vst [vmem:[#allocation46_spill] sm:$0xff] %v4917_v48  ;;  %v4949_v48 = vld [vmem:[#allocation6 + $0x178] sm:$0xff]  ;;  %581 = vmatpush.msra.mxu2 %v4947_v31 }
  0x58   :  { %7563 = vst [vmem:[#allocation47_spill] sm:$0xff] %v4919_v45  ;;  %v4953_v45 = vld [vmem:[#allocation6 + $0x40] sm:$0xff]  ;;  %601 = vmatpush.msra.mxu3 %v4949_v48 }
  0x59   :  { %7564 = vst [vmem:[#allocation48_spill] sm:$0xff] %v4923_v49  ;;  %v4955_v49 = vld [vmem:[#allocation6 + $0x48] sm:$0xff]  ;;  %550 = vmatpush.msra.mxu0 %v4953_v45 }
  0x5a   :  { %7565 = vst [vmem:[#allocation49_spill] sm:$0xff] %v4925_v16  ;;  %v4959_v16 = vld [vmem:[#allocation6 + $0x150] sm:$0xff]  ;;  %570 = vmatpush.msra.mxu1 %v4955_v49 }
  0x5b   :  { %7566 = vst [vmem:[#allocation50_spill] sm:$0xff] %v4929_v36  ;;  %v4961_v36 = vld [vmem:[#allocation6 + $0x158] sm:$0xff]  ;;  %582 = vmatpush.msra.mxu2 %v4959_v16 }
  0x5c   :  { %7567 = vst [vmem:[#allocation51_spill] sm:$0xff] %v4931_v41  ;;  %v4965_v41 = vld [vmem:[#allocation6 + $0x20] sm:$0xff]  ;;  %602 = vmatpush.msra.mxu3 %v4961_v36  ;;  %571 = vmatpush.msra.mxu1 %v4967_v23 }
  0x5d   :  { %7569 = vst [vmem:[#allocation53_spill] sm:$0xff] %v4937_v24  ;;  %v4971_v24 = vld [vmem:[#allocation6 + $0x130] sm:$0xff]  ;;  %551 = vmatpush.msra.mxu0 %v4965_v41 }
  0x5e   :  { %7570 = vst [vmem:[#allocation54_spill] sm:$0xff] %v4941_v27  ;;  %v4973_v27 = vld [vmem:[#allocation6 + $0x138] sm:$0xff]  ;;  %583 = vmatpush.msra.mxu2 %v4971_v24 }
  0x5f   :  { %7571 = vst [vmem:[#allocation55_spill] sm:$0xff] %v4943_v44  ;;  %v4977_v44 = vld [vmem:[#allocation6] sm:$0xff]  ;;  %603 = vmatpush.msra.mxu3 %v4973_v27 }
  0x60   :  { %7572 = vst [vmem:[#allocation56_spill] sm:$0xff] %v4947_v31  ;;  %v4979_v31 = vld [vmem:[#allocation6 + $0x8] sm:$0xff]  ;;  %552 = vmatpush.msra.mxu0 %v4977_v44 }
  0x61   :  { %7573 = vst [vmem:[#allocation57_spill] sm:$0xff] %v4949_v48  ;;  %v4983_v48 = vld [vmem:[#allocation6 + $0x110] sm:$0xff]  ;;  %572 = vmatpush.msra.mxu1 %v4979_v31  ;;  %553 = vmatmul.f32.vlgmr.msra.gmra.mxu0 %v7561_v33 }
  0x62   :  { %7574 = vst [vmem:[#allocation58_spill] sm:$0xff] %v4953_v45  ;;  %v4985_v45 = vld [vmem:[#allocation6 + $0x118] sm:$0xff]  ;;  %584 = vmatpush.msra.mxu2 %v4983_v48  ;;  %573 = vmatmul.f32.vlgmr.msra.gmra.mxu1 %v7561_v33 }
  0x63   :  { %7575 = vst [vmem:[#allocation59_spill] sm:$0xff] %v4955_v49  ;;  %v4991_v49 = vld [vmem:[#allocation6 + $0xf0] sm:$0xff]  ;;  %604 = vmatpush.msra.mxu3 %v4985_v45  ;;  %829 = vmatpush.msrb.mxu0 %v4568_v17  ;;  %v5023_v17 = vld [vmem:[#allocation6 + $0x78] sm:$0xff] }
  0x64   :  { %7576 = vst [vmem:[#allocation60_spill] sm:$0xff] %v4961_v36  ;;  %v4993_v36 = vld [vmem:[#allocation6 + $0xf8] sm:$0xff]  ;;  %585 = vmatpush.msra.mxu2 %v4991_v49  ;;  %849 = vmatpush.msrb.mxu1 %v4570_v18  ;;  %v5029_v18 = vld [vmem:[#allocation6 + $0x50] sm:$0xff] }
  0x65   :  { %7577 = vst [vmem:[#allocation61_spill] sm:$0xff] %v4965_v41  ;;  %v5001_v41 = vld [vmem:[#allocation6 + $0xd8] sm:$0xff]  ;;  %605 = vmatpush.msra.mxu3 %v4993_v36  ;;  %830 = vmatpush.msrb.mxu0 %v4582_v21 }
  0x66   :  { %7578 = vst [vmem:[#allocation62_spill] sm:$0xff] %v4967_v23  ;;  %v4999_v23 = vld [vmem:[#allocation6 + $0xd0] sm:$0xff]  ;;  %850 = vmatpush.msrb.mxu1 %v4584_v22  ;;  %v5031_v21 = vld [vmem:[#allocation6 + $0x58] sm:$0xff] }
  0x67   :  { %7579 = vst [vmem:[#allocation63_spill] sm:$0xff] %v4977_v44  ;;  %v5007_v44 = vld [vmem:[#allocation6 + $0xb8] sm:$0xff]  ;;  %586 = vmatpush.msra.mxu2 %v4999_v23  ;;  %606 = vmatpush.msra.mxu3 %v5001_v41  ;;  %v5037_v22 = vld [vmem:[#allocation6 + $0x30] sm:$0xff] }
  0x68   :  { %7580 = vst [vmem:[#allocation64_spill] sm:$0xff] %v4979_v31  ;;  %v5005_v31 = vld [vmem:[#allocation6 + $0xb0] sm:$0xff]  ;;  %831 = vmatpush.msrb.mxu0 %v4594_v25  ;;  %851 = vmatpush.msrb.mxu1 %v4596_v26  ;;  %v5039_v25 = vld [vmem:[#allocation6 + $0x38] sm:$0xff] }
  0x69   :  { %7581 = vst [vmem:[#allocation65_spill] sm:$0xff] %v4983_v48  ;;  %v5015_v48 = vld [vmem:[#allocation6 + $0x98] sm:$0xff]  ;;  %587 = vmatpush.msra.mxu2 %v5005_v31  ;;  %607 = vmatpush.msra.mxu3 %v5007_v44  ;;  %v5045_v26 = vld [vmem:[#allocation6 + $0x10] sm:$0xff] }
  0x6a   :  { %7582 = vst [vmem:[#allocation66_spill] sm:$0xff] %v4985_v45  ;;  %v5013_v45 = vld [vmem:[#allocation6 + $0x90] sm:$0xff]  ;;  %832 = vmatpush.msrb.mxu0 %v4606_v29  ;;  %852 = vmatpush.msrb.mxu1 %v4608_v30  ;;  %v5047_v29 = vld [vmem:[#allocation6 + $0x18] sm:$0xff]  ;;  %v7584_v30 = vld [vmem:[#allocation10_spill] sm:$0xff] }
  0x6b   :  { %7583 = vst [vmem:[#allocation67_spill] sm:$0xff] %v4993_v36  ;;  %v5021_v36 = vld [vmem:[#allocation6 + $0x70] sm:$0xff]  ;;  %588 = vmatpush.msra.mxu2 %v5013_v45  ;;  %608 = vmatpush.msra.mxu3 %v5015_v48 }
  0x6c   :  { %833 = vmatpush.msrb.mxu0 %v4625_v34  ;;  %853 = vmatpush.msrb.mxu1 %v4627_v35  ;;  %v7585_v34 = vld [vmem:[#allocation11_spill] sm:$0xff]  ;;  %v7586_v35 = vld [vmem:[#allocation16_spill] sm:$0xff] }
  0x6d   :  { %589 = vmatpush.msra.mxu2 %v5021_v36  ;;  %609 = vmatpush.msra.mxu3 %v5023_v17 }
  0x6e   :  { %834 = vmatpush.msrb.mxu0 %v4639_v38  ;;  %854 = vmatpush.msrb.mxu1 %v4641_v39  ;;  %v7587_v38 = vld [vmem:[#allocation17_spill] sm:$0xff]  ;;  %v7588_v39 = vld [vmem:[#allocation12_spill] sm:$0xff] }
  0x6f   :  { %590 = vmatpush.msra.mxu2 %v5029_v18  ;;  %610 = vmatpush.msra.mxu3 %v5031_v21 }
  0x70   :  { %835 = vmatpush.msrb.mxu0 %v4651_v42  ;;  %855 = vmatpush.msrb.mxu1 %v4653_v43  ;;  %v7589_v42 = vld [vmem:[#allocation13_spill] sm:$0xff]  ;;  %v7590_v43 = vld [vmem:[#allocation20_spill] sm:$0xff] }
  0x71   :  { %591 = vmatpush.msra.mxu2 %v5037_v22  ;;  %611 = vmatpush.msra.mxu3 %v5039_v25 }
  0x72   :  { %836 = vmatpush.msrb.mxu0 %v4663_v46  ;;  %856 = vmatpush.msrb.mxu1 %v4665_v47  ;;  %v7591_v46 = vld [vmem:[#allocation21_spill] sm:$0xff]  ;;  %v7592_v47 = vld [vmem:[#allocation14_spill] sm:$0xff] }
  0x73   :  { %592 = vmatpush.msra.mxu2 %v5045_v26  ;;  %612 = vmatpush.msra.mxu3 %v5047_v29 }
  0x74   :  { %593 = vmatmul.f32.vlgmr.msra.gmra.mxu2 %v7561_v33  ;;  %613 = vmatmul.f32.vlgmr.msra.gmra.mxu3 %v7561_v33  ;;  %v7624_v33 = vld [vmem:[#allocation56_spill] sm:$0xff] }
  0x75   :  { %869 = vmatpush.msrb.mxu2 %v4685_v52  ;;  %889 = vmatpush.msrb.mxu3 %v4687_v53  ;;  %v7595_v52 = vld [vmem:[#allocation25_spill] sm:$0xff]  ;;  %v7596_v53 = vld [vmem:[#allocation18_spill] sm:$0xff] }
  0x76   :  { %837 = vmatpush.msrb.mxu0 %v4681_v50  ;;  %857 = vmatpush.msrb.mxu1 %v4683_v51  ;;  %v7593_v50 = vld [vmem:[#allocation15_spill] sm:$0xff]  ;;  %v7594_v51 = vld [vmem:[#allocation24_spill] sm:$0xff] }
  0x77   :  { %870 = vmatpush.msrb.mxu2 %v4699_v56  ;;  %890 = vmatpush.msrb.mxu3 %v4701_v57  ;;  %v7599_v56 = vld [vmem:[#allocation29_spill] sm:$0xff]  ;;  %v7600_v57 = vld [vmem:[#allocation22_spill] sm:$0xff] }
  0x78   :  { %838 = vmatpush.msrb.mxu0 %v4693_v54  ;;  %858 = vmatpush.msrb.mxu1 %v4695_v55  ;;  %v7597_v54 = vld [vmem:[#allocation19_spill] sm:$0xff]  ;;  %v7598_v55 = vld [vmem:[#allocation28_spill] sm:$0xff] }
  0x79   :  { %871 = vmatpush.msrb.mxu2 %v4711_v60  ;;  %891 = vmatpush.msrb.mxu3 %v4713_v61  ;;  %v7603_v60 = vld [vmem:[#allocation33_spill] sm:$0xff]  ;;  %v7604_v61 = vld [vmem:[#allocation26_spill] sm:$0xff] }
  0x7a   :  { %839 = vmatpush.msrb.mxu0 %v4705_v58  ;;  %859 = vmatpush.msrb.mxu1 %v4707_v59  ;;  %v7601_v58 = vld [vmem:[#allocation23_spill] sm:$0xff]  ;;  %v7602_v59 = vld [vmem:[#allocation32_spill] sm:$0xff] }
  0x7b   :  { %872 = vmatpush.msrb.mxu2 %v4723_v0  ;;  %892 = vmatpush.msrb.mxu3 %v4725_v1  ;;  %v7607_v0 = vld [vmem:[#allocation37_spill] sm:$0xff]  ;;  %v7608_v1 = vld [vmem:[#allocation40_spill] sm:$0xff] }
  0x7c   :  { %840 = vmatpush.msrb.mxu0 %v4717_v62  ;;  %860 = vmatpush.msrb.mxu1 %v4719_v63  ;;  %v7605_v62 = vld [vmem:[#allocation27_spill] sm:$0xff]  ;;  %v7606_v63 = vld [vmem:[#allocation36_spill] sm:$0xff] }
  0x7d   :  { %873 = vmatpush.msrb.mxu2 %v4741_v4  ;;  %893 = vmatpush.msrb.mxu3 %v4743_v5  ;;  %v7611_v4 = vld [vmem:[#allocation31_spill] sm:$0xff]  ;;  %v7612_v5 = vld [vmem:[#allocation44_spill] sm:$0xff] }
  0x7e   :  { %841 = vmatpush.msrb.mxu0 %v4733_v2  ;;  %861 = vmatpush.msrb.mxu1 %v4735_v3  ;;  %v7609_v2 = vld [vmem:[#allocation41_spill] sm:$0xff]  ;;  %v7610_v3 = vld [vmem:[#allocation30_spill] sm:$0xff] }
  0x7f   :  { %874 = vmatpush.msrb.mxu2 %v4755_v8  ;;  %894 = vmatpush.msrb.mxu3 %v4757_v9  ;;  %v7614_v8 = vld [vmem:[#allocation34_spill] sm:$0xff]  ;;  %v7615_v9 = vld [vmem:[#allocation35_spill] sm:$0xff] }
  0x80   :  { %842 = vmatpush.msrb.mxu0 %v4749_v6  ;;  %862 = vmatpush.msrb.mxu1 %v4751_v7  ;;  %v7613_v6 = vld [vmem:[#allocation45_spill] sm:$0xff]  ;;  %v5130_v7 = vld [vmem:[%s7233_s4] sm:$0xff] }
  0x81   :  { %875 = vmatpush.msrb.mxu2 %v4767_v12  ;;  %895 = vmatpush.msrb.mxu3 %v4769_v13  ;;  %v7618_v12 = vld [vmem:[#allocation38_spill] sm:$0xff]  ;;  %v7619_v13 = vld [vmem:[#allocation39_spill] sm:$0xff] }
  0x82   :  { %843 = vmatpush.msrb.mxu0 %v4761_v10  ;;  %863 = vmatpush.msrb.mxu1 %v4763_v11  ;;  %v7616_v10 = vld [vmem:[#allocation48_spill] sm:$0xff]  ;;  %v7617_v11 = vld [vmem:[#allocation49_spill] sm:$0xff] }
  0x83   :  { %876 = vmatpush.msrb.mxu2 %v4779_v19  ;;  %896 = vmatpush.msrb.mxu3 %v4781_v20  ;;  %v7620_v19 = vld [vmem:[#allocation52_spill] sm:$0xff]  ;;  %v7621_v20 = vld [vmem:[#allocation53_spill] sm:$0xff] }
  0x84   :  { %844 = vmatpush.msrb.mxu0 %v4773_v14  ;;  %864 = vmatpush.msrb.mxu1 %v4775_v15  ;;  %v94_v14 = vperm.slane %v5130_v7, 0  ;;  %v95_v15 = vperm.slane %v5130_v7, 1 }
  0x85   :  { %877 = vmatpush.msrb.mxu2 %v4795_v28  ;;  %897 = vmatpush.msrb.mxu3 %v4797_v32  ;;  %v7622_v28 = vld [vmem:[#allocation42_spill] sm:$0xff]  ;;  %v7623_v32 = vld [vmem:[#allocation43_spill] sm:$0xff] }
  0x86   :  { %996 = vmatpush.msra.mxu0 %v7584_v30  ;;  %1016 = vmatpush.msra.mxu1 %v7585_v34  ;;  %v7626_v34 = vld [vmem:[#allocation46_spill] sm:$0xff] }
  0x87   :  { %878 = vmatpush.msrb.mxu2 %v4809_v37  ;;  %898 = vmatpush.msrb.mxu3 %v4811_v40  ;;  %v7625_v37 = vld [vmem:[#allocation57_spill] sm:$0xff] }
  0x88   :  { %997 = vmatpush.msra.mxu0 %v7588_v39  ;;  %1017 = vmatpush.msra.mxu1 %v7589_v42  ;;  %v7628_v42 = vld [vmem:[#allocation60_spill] sm:$0xff] }
  0x89   :  { %879 = vmatpush.msrb.mxu2 %v7586_v35  ;;  %899 = vmatpush.msrb.mxu3 %v7587_v38  ;;  %v7627_v35 = vld [vmem:[#allocation47_spill] sm:$0xff] }
  0x8a   :  { %998 = vmatpush.msra.mxu0 %v7592_v47  ;;  %1018 = vmatpush.msra.mxu1 %v7593_v50  ;;  %v7631_v47 = vld [vmem:[#allocation54_spill] sm:$0xff]  ;;  %v7632_v50 = vld [vmem:[#allocation55_spill] sm:$0xff] }
  0x8b   :  { %880 = vmatpush.msrb.mxu2 %v7590_v43  ;;  %900 = vmatpush.msrb.mxu3 %v7591_v46  ;;  %v7629_v43 = vld [vmem:[#allocation50_spill] sm:$0xff]  ;;  %v7630_v46 = vld [vmem:[#allocation51_spill] sm:$0xff] }
  0x8c   :  { %999 = vmatpush.msra.mxu0 %v7596_v53  ;;  %1019 = vmatpush.msra.mxu1 %v7597_v54  ;;  %v7636_v53 = vld [vmem:[#allocation59_spill] sm:$0xff] }
  0x8d   :  { %881 = vmatpush.msrb.mxu2 %v7594_v51  ;;  %901 = vmatpush.msrb.mxu3 %v7595_v52  ;;  %v7633_v51 = vld [vmem:[#allocation65_spill] sm:$0xff]  ;;  %v7634_v52 = vld [vmem:[#allocation66_spill] sm:$0xff]  ;;  %v7637_v54 = vld [vmem:[#allocation67_spill] sm:$0xff] }
  0x8e   :  { %1000 = vmatpush.msra.mxu0 %v7600_v57  ;;  %1020 = vmatpush.msra.mxu1 %v7601_v58  ;;  %v7638_v57 = vld [vmem:[#allocation61_spill] sm:$0xff]  ;;  %v7639_v58 = vld [vmem:[#allocation62_spill] sm:$0xff] }
  0x8f   :  { %882 = vmatpush.msrb.mxu2 %v7598_v55  ;;  %902 = vmatpush.msrb.mxu3 %v7599_v56  ;;  %v99_v56 = vperm.slane %v5130_v7, 5 }
  0x90   :  { %1001 = vmatpush.msra.mxu0 %v7604_v61  ;;  %1021 = vmatpush.msra.mxu1 %v7605_v62  ;;  %v7640_v61 = vld [vmem:[#allocation63_spill] sm:$0xff] }
  0x91   :  { %883 = vmatpush.msrb.mxu2 %v7602_v59  ;;  %903 = vmatpush.msrb.mxu3 %v7603_v60 }
  0x92   :  { %1002 = vmatpush.msra.mxu0 %v7610_v3  ;;  %1022 = vmatpush.msra.mxu1 %v7611_v4 }
  0x93   :  { %884 = vmatpush.msrb.mxu2 %v7606_v63  ;;  %904 = vmatpush.msrb.mxu3 %v7607_v0 }
  0x94   :  { %1003 = vmatpush.msra.mxu0 %v7614_v8  ;;  %1023 = vmatpush.msra.mxu1 %v7615_v9 }
  0x95   :  { %1036 = vmatpush.msra.mxu2 %v7608_v1  ;;  %1056 = vmatpush.msra.mxu3 %v7609_v2 }
  0x96   :  { %1004 = vmatpush.msra.mxu0 %v7618_v12  ;;  %1024 = vmatpush.msra.mxu1 %v7619_v13  ;;  %v101_v12 = vperm.slane %v5130_v7, 7 }
  0x97   :  { %1037 = vmatpush.msra.mxu2 %v7612_v5  ;;  %1057 = vmatpush.msra.mxu3 %v7613_v6  ;;  %v134_v40 = vpop.f32.mrf.mxu2  ;;  %v157_v30 = vpop.f32.mrf.mxu3 }
  0x98   :  { %1005 = vmatpush.msra.mxu0 %v7622_v28  ;;  %1025 = vmatpush.msra.mxu1 %v7623_v32  ;;  %v135_v38 = vadd.f32 %v134_v40, %v94_v14  ;;  %v158_v39 = vadd.f32 %v157_v30, %v95_v15 }
  0x99   :  { %1038 = vmatpush.msra.mxu2 %v7616_v10  ;;  %1058 = vmatpush.msra.mxu3 %v7617_v11  ;;  %v100_v11 = vperm.slane %v5130_v7, 6 }
  0x9a   :  { %1006 = vmatpush.msra.mxu0 %v7626_v34  ;;  %1026 = vmatpush.msra.mxu1 %v7627_v35  ;;  %301 = vst [vmem:[#allocation2 + $0x30] sm:$0xff] %v135_v38 }
  0x9b   :  { %1039 = vmatpush.msra.mxu2 %v7620_v19  ;;  %1059 = vmatpush.msra.mxu3 %v7621_v20  ;;  %302 = vst [vmem:[#allocation2] sm:$0xff] %v158_v39 }
  0x9c   :  { %1007 = vmatpush.msra.mxu0 %v7629_v43  ;;  %1027 = vmatpush.msra.mxu1 %v7630_v46 }
  0x9d   :  { %1040 = vmatpush.msra.mxu2 %v7624_v33  ;;  %1060 = vmatpush.msra.mxu3 %v7625_v37 }
  0x9e   :  { %1008 = vmatpush.msra.mxu0 %v7631_v47  ;;  %1028 = vmatpush.msra.mxu1 %v7632_v50 }
  0x9f   :  { %1041 = vmatpush.msra.mxu2 %v4959_v16  ;;  %1061 = vmatpush.msra.mxu3 %v7628_v42  ;;  %v7635_v16 = vld [vmem:[#allocation58_spill] sm:$0xff]  ;;  %v160_v55 = vpop.f32.mrf.mxu3 }
  0xa0   :  { %1009 = vmatpush.msra.mxu0 %v7635_v16  ;;  %1029 = vmatpush.msra.mxu1 %v7636_v53  ;;  %v161_v60 = vadd.f32 %v160_v55, %v95_v15 }
  0xa1   :  { %1042 = vmatpush.msra.mxu2 %v4971_v24  ;;  %1062 = vmatpush.msra.mxu3 %v4973_v27  ;;  %v137_v24 = vpop.f32.mrf.mxu2  ;;  %v98_v27 = vperm.slane %v5130_v7, 4 }
  0xa2   :  { %1010 = vmatpush.msra.mxu0 %v7638_v57  ;;  %1030 = vmatpush.msra.mxu1 %v7639_v58  ;;  %v138_v59 = vadd.f32 %v137_v24, %v94_v14  ;;  %v226_v62 = vpop.f32.mrf.mxu0  ;;  %v249_v63 = vpop.f32.mrf.mxu1  ;;  %310 = vst [vmem:[#allocation2 + $0x20] sm:$0xff] %v161_v60  ;;  %v318_v6 = vld [vmem:[#allocation2] sm:$0x3] }
  0xa3   :  { %1043 = vmatpush.msra.mxu2 %v7633_v51  ;;  %1063 = vmatpush.msra.mxu3 %v7634_v52  ;;  %v227_v0 = vadd.f32 %v226_v62, %v98_v27  ;;  %v250_v1 = vadd.f32 %v249_v63, %v99_v56 }
  0xa4   :  { %1011 = vmatpush.msra.mxu0 %v7640_v61  ;;  %309 = vst [vmem:[#allocation2 + $0x40] sm:$0xff] %v138_v59 }
  0xa5   :  { %1044 = vmatpush.msra.mxu2 %v4991_v49  ;;  %1064 = vmatpush.msra.mxu3 %v7637_v54  ;;  %v7641_v49 = vld [vmem:[#allocation64_spill] sm:$0xff]  ;;  %305 = vst [vmem:[#allocation2 + $0x50] sm:$0xff] %v227_v0 }
  0xa6   :  { %1031 = vmatpush.msra.mxu1 %v7641_v49  ;;  %306 = vst [vmem:[#allocation2 + $0x68] sm:$0xff] %v250_v1 }
  0xa7   :  { %1045 = vmatpush.msra.mxu2 %v4999_v23  ;;  %1065 = vmatpush.msra.mxu3 %v5001_v41  ;;  %v96_v23 = vperm.slane %v5130_v7, 2  ;;  %v97_v41 = vperm.slane %v5130_v7, 3 }
  0xa9   :  { %1046 = vmatpush.msra.mxu2 %v5005_v31  ;;  %1066 = vmatpush.msra.mxu3 %v5007_v44 }
  0xaa   :  { %v180_v44 = vpop.f32.mrf.mxu2  ;;  %v203_v31 = vpop.f32.mrf.mxu3 }
  0xab   :  { %1047 = vmatpush.msra.mxu2 %v5013_v45  ;;  %1067 = vmatpush.msra.mxu3 %v5015_v48  ;;  %v181_v45 = vadd.f32 %v180_v44, %v96_v23  ;;  %v204_v48 = vadd.f32 %v203_v31, %v97_v41 }
  0xad   :  { %1048 = vmatpush.msra.mxu2 %v5021_v36  ;;  %1068 = vmatpush.msra.mxu3 %v5023_v17  ;;  %303 = vst [vmem:[#allocation2 + $0x58] sm:$0xff] %v181_v45  ;;  %v229_v36 = vpop.f32.mrf.mxu0  ;;  %v252_v17 = vpop.f32.mrf.mxu1 }
  0xae   :  { %304 = vst [vmem:[#allocation2 + $0x18] sm:$0xff] %v204_v48  ;;  %v230_v2 = vadd.f32 %v229_v36, %v98_v27 }
  0xaf   :  { %1049 = vmatpush.msra.mxu2 %v5029_v18  ;;  %1069 = vmatpush.msra.mxu3 %v5031_v21  ;;  %v253_v18 = vadd.f32 %v252_v17, %v99_v56 }
  0xb0   :  { %313 = vst [vmem:[#allocation2 + $0x60] sm:$0xff] %v230_v2 }
  0xb1   :  { %1050 = vmatpush.msra.mxu2 %v5037_v22  ;;  %1070 = vmatpush.msra.mxu3 %v5039_v25  ;;  %314 = vst [vmem:[#allocation2 + $0x70] sm:$0xff] %v253_v18  ;;  %v317_v25 = vld [vmem:[#allocation2 + $0x30] sm:$0x3] }
  0xb3   :  { %1051 = vmatpush.msra.mxu2 %v5045_v26  ;;  %1071 = vmatpush.msra.mxu3 %v5047_v29 }
  0xb4   :  { %v183_v21 = vpop.f32.mrf.mxu2  ;;  %v206_v3 = vpop.f32.mrf.mxu3  ;;  %v319_v52 = vld [vmem:[#allocation2 + $0x58] sm:$0x3] }
  0xb5   :  { %v184_v4 = vadd.f32 %v183_v21, %v96_v23  ;;  %v207_v22 = vadd.f32 %v206_v3, %v97_v41  ;;  %v320_v42 = vld [vmem:[#allocation2 + $0x18] sm:$0x3] }
  0xb7   :  { %311 = vst [vmem:[#allocation2 + $0x10] sm:$0xff] %v184_v4  ;;  %v402_v5 = vpop.f32.mrf.mxu0  ;;  %v422_v8 = vpop.f32.mrf.mxu1  ;;  %v469_v57 = vld [vmem:[#allocation2 + $0x60] sm:$0xc0] }
  0xb8   :  { %312 = vst [vmem:[#allocation2 + $0x38] sm:$0xff] %v207_v22  ;;  %v465_v26 = vadd.f32 %v402_v5, %v317_v25  ;;  %v466_v29 = vadd.f32 %v422_v8, %v318_v6  ;;  %v470_v59 = vld [vmem:[#allocation2 + $0x70] sm:$0xc0] }
  0xba   :  { %v4102_v9 = vmul.f32 -1.442695, %v465_v26  ;;  %v4103_v10 = vmul.f32 -1.442695, %v466_v29 }
  0xbc   :  { %4156 = vpow2.f32 %v4102_v9 }
  0xbd   :  { %4158 = vpow2.f32 %v4103_v10 }
  0xbf   :  { %v272_v13 = vpop.f32.mrf.mxu2  ;;  %v295_v14 = vpop.f32.mrf.mxu3 }
  0xc0   :  { %v273_v15 = vadd.f32 %v272_v13, %v100_v11  ;;  %v296_v19 = vadd.f32 %v295_v14, %v101_v12 }
  0xc2   :  { %v4157_v20 = vpop.eup %4156  ;;  %307 = vst [vmem:[#allocation2 + $0x8] sm:$0xff] %v273_v15 }
  0xc3   :  { %v4159_v28 = vpop.eup %4158  ;;  %v636_v32 = vadd.f32 1.0, %v4157_v20  ;;  %308 = vst [vmem:[#allocation2 + $0x48] sm:$0xff] %v296_v19 }
  0xc4   :  { %v655_v33 = vadd.f32 1.0, %v4159_v28 }
  0xc5   :  { %4160 = vrcp.f32 %v636_v32  ;;  %vm642_vm1 = vweird.f32 %v636_v32  ;;  %v646_v27 = vand.u32 2147483647, %v636_v32  ;;  %v648_v49 = vand.u32 2147483648, %v636_v32 }
  0xc6   :  { %4162 = vrcp.f32 %v655_v33  ;;  %v667_v61 = vand.u32 2147483648, %v655_v33  ;;  %vm661_vm4 = vweird.f32 %v655_v33  ;;  %v665_v23 = vand.u32 2147483647, %v655_v33 }
  0xc7   :  { %vm647_vm7 = vcmp.eq.f32.partialorder %v646_v27, 8.507059e+37  ;;  %v649_v18 = vor.u32 1.1754944e-38, %v648_v49 }
  0xc8   :  { %v275_v37 = vpop.f32.mrf.mxu2  ;;  %v298_v40 = vpop.f32.mrf.mxu3  ;;  %v668_v2 = vor.u32 1.1754944e-38, %v667_v61  ;;  %vm666_vm8 = vcmp.eq.f32.partialorder %v665_v23, 8.507059e+37 }
  0xc9   :  { %v276_v30 = vadd.f32 %v275_v37, %v100_v11  ;;  %v299_v34 = vadd.f32 %v298_v40, %v101_v12 }
  0xcb   :  { %v4161_v35 = vpop.eup %4160  ;;  %315 = vst [vmem:[#allocation2 + $0x78] sm:$0xff] %v276_v30 }
  0xcc   :  { %v4163_v7 = vpop.eup %4162  ;;  %316 = vst [vmem:[#allocation2 + $0x28] sm:$0xff] %v299_v34  ;;  %v638_v38 = vmul.f32 %v4161_v35, %v636_v32  ;;  %vm643_vm2 = vweird.f32 %v4161_v35 }
  0xcd   :  { %v657_v39 = vmul.f32 %v4163_v7, %v655_v33  ;;  %vm662_vm3 = vweird.f32 %v4163_v7  ;;  %vm5188_vm5 = vmor %vm642_vm1, %vm643_vm2 }
  0xce   :  { %v639_v46 = vsub.f32 1.0, %v638_v38  ;;  %vm5192_vm6 = vmor %vm661_vm4, %vm662_vm3 }
  0xcf   :  { %v658_v47 = vsub.f32 1.0, %v657_v39 }
  0xd0   :  { %v640_v24 = vmul.f32 %v4161_v35, %v639_v46 }
  0xd1   :  { %v659_v54 = vmul.f32 %v4163_v7, %v658_v47 }
  0xd2   :  { %v462_v43 = vpop.f32.mrf.mxu3  ;;  %v442_v50 = vpop.f32.mrf.mxu2  ;;  %v641_v55 = vadd.f32 %v4161_v35, %v640_v24 }
  0xd3   :  { %v468_v51 = vadd.f32 %v462_v43, %v320_v42  ;;  %v467_v53 = vadd.f32 %v442_v50, %v319_v52  ;;  %v660_v56 = vadd.f32 %v4163_v7, %v659_v54  ;;  %v471_v42 = vld [vmem:[#allocation2 + $0x78] sm:$0xc0]  ;;  %v472_v43 = vld [vmem:[#allocation2 + $0x28] sm:$0xc0] }
  0xd4   :  { %v645_v48 = vsel %vm5188_vm5, %v4161_v35, %v641_v55 }
  0xd5   :  { %v4104_v16 = vmul.f32 -1.442695, %v468_v51  ;;  %v664_v36 = vsel %vm5192_vm6, %v4163_v7, %v660_v56  ;;  %v650_v4 = vsel %vm647_vm7, %v649_v18, %v645_v48 }
  0xd6   :  { %v669_v22 = vsel %vm666_vm8, %v668_v2, %v664_v36 }
  0xd7   :  { %4164 = vpow2.f32 %v4104_v16  ;;  %v691_v5 = vmul.f32 0.0, %v669_v22 }
  0xd8   :  { %4166 = vtanh.f32 %v467_v53 }
  0xdd   :  { %v4165_v0 = vpop.eup %4164 }
  0xde   :  { %v554_v58 = vpop.f32.mrf.mxu0  ;;  %v675_v44 = vadd.f32 1.0, %v4165_v0  ;;  %v4167_v17 = vpop.eup %4166 }
  0xdf   :  { %v574_v60 = vpop.f32.mrf.mxu1  ;;  %v621_v62 = vrot.slane %v554_v58, 2  ;;  %v692_v25 = vmul.f32 %v4167_v17, %v650_v4 }
  0xe0   :  { %v622_v63 = vrot.slane %v574_v60, 2  ;;  %4168 = vrcp.f32 %v675_v44  ;;  %v687_v12 = vand.u32 2147483648, %v675_v44  ;;  %v685_v15 = vand.u32 2147483647, %v675_v44 }
  0xe1   :  { %v629_v31 = vadd.f32 %v621_v62, %v469_v57  ;;  %v5200_v8 = vadd.f32 %v692_v25, %v691_v5  ;;  %vm681_vm10 = vweird.f32 %v675_v44 }
  0xe2   :  { %v630_v45 = vadd.f32 %v622_v63, %v470_v59  ;;  %v688_v20 = vor.u32 1.1754944e-38, %v687_v12  ;;  %vm686_vm12 = vcmp.eq.f32.partialorder %v685_v15, 8.507059e+37  ;;  %v5220_v12 = vld [vmem:[#allocation4 + $0x1c8] sm:$0xff]  ;;  %v5230_v15 = vld [vmem:[#allocation4 + $0x1a0] sm:$0xff] }
  0xe3   :  { %v4105_v21 = vmul.f32 -1.442695, %v629_v31 }
  0xe4   :  { %v4106_v3 = vmul.f32 -1.442695, %v630_v45 }
  0xe5   :  { %4170 = vpow2.f32 %v4105_v21 }
  0xe6   :  { %4172 = vpow2.f32 %v4106_v3  ;;  %v4169_v6 = vpop.eup %4168 }
  0xe7   :  { %v677_v26 = vmul.f32 %v4169_v6, %v675_v44  ;;  %4174 = vtanh.f32 %v5200_v8  ;;  %vm682_vm9 = vweird.f32 %v4169_v6 }
  0xe8   :  { %vm683_vm11 = vmor %vm681_vm10, %vm682_vm9 }
  0xe9   :  { %v678_v10 = vsub.f32 1.0, %v677_v26  ;;  %v5206_v26 = vld [vmem:[#allocation4 + $0x1e0] sm:$0xff] }
  0xeb   :  { %v4171_v29 = vpop.eup %4170  ;;  %v679_v14 = vmul.f32 %v4169_v6, %v678_v10  ;;  %v5214_v10 = vld [vmem:[#allocation4 + $0x1f8] sm:$0xff] }
  0xec   :  { %v4173_v9 = vpop.eup %4172  ;;  %v699_v11 = vadd.f32 1.0, %v4171_v29  ;;  %v5208_v29 = vld [vmem:[#allocation4 + $0x1e8] sm:$0xff] }
  0xed   :  { %v718_v13 = vadd.f32 1.0, %v4173_v9  ;;  %v680_v19 = vadd.f32 %v4169_v6, %v679_v14  ;;  %v4175_v32 = vpop.eup %4174  ;;  %v5210_v9 = vld [vmem:[#allocation4 + $0x1f0] sm:$0xff]  ;;  %v5226_v14 = vld [vmem:[#allocation4 + $0x1d8] sm:$0xff] }
  0xee   :  { %4176 = vrcp.f32 %v699_v11  ;;  %vm705_vm14 = vweird.f32 %v699_v11  ;;  %v711_v27 = vand.u32 2147483648, %v699_v11  ;;  %v709_v57 = vand.u32 2147483647, %v699_v11 }
  0xef   :  { %4178 = vrcp.f32 %v718_v13  ;;  %v684_v28 = vsel %vm683_vm11, %v4169_v6, %v680_v19  ;;  %v730_v55 = vand.u32 2147483648, %v718_v13  ;;  %vm724_vm0 = vweird.f32 %v718_v13  ;;  %v5232_v19 = vld [vmem:[#allocation4 + $0x1a8] sm:$0xff] }
  0xf0   :  { %v689_v40 = vsel %vm686_vm12, %v688_v20, %v684_v28  ;;  %v728_v58 = vand.u32 2147483647, %v718_v13  ;;  %v712_v62 = vor.u32 1.1754944e-38, %v711_v27  ;;  %vm710_vm3 = vcmp.eq.f32.partialorder %v709_v57, 8.507059e+37  ;;  %v5234_v20 = vld [vmem:[#allocation4 + $0x1b0] sm:$0xff]  ;;  %v5238_v28 = vld [vmem:[#allocation4 + $0x1b8] sm:$0xff] }
  0xf1   :  { %v695_v7 = vmul.f32 %v4175_v32, %v689_v40  ;;  %v731_v49 = vor.u32 1.1754944e-38, %v730_v55  ;;  %v5242_v32 = vld [vmem:[#allocation4 + $0x180] sm:$0xff]  ;;  %v5250_v40 = vld [vmem:[#allocation4 + $0x198] sm:$0xff] }
  0xf2   :  { %vm729_vm4 = vcmp.eq.f32.partialorder %v728_v58, 8.507059e+37  ;;  %v5302_v58 = vld [vmem:[#allocation4 + $0xe0] sm:$0xff] }
  0xf3   :  { %759 = vst [vmem:[#allocation3 + $0x18] sm:$0x3] %v695_v7  ;;  %845 = vmatmul.f32.vlgmr.msrb.gmra.mxu0 %v695_v7  ;;  %865 = vmatmul.f32.vlgmr.msrb.gmra.mxu1 %v695_v7 }
  0xf4   :  { %v4177_v30 = vpop.eup %4176  ;;  %885 = vmatmul.f32.vlgmr.msrb.gmra.mxu2 %v695_v7  ;;  %905 = vmatmul.f32.vlgmr.msrb.gmra.mxu3 %v695_v7  ;;  %v5262_v7 = vld [vmem:[#allocation4 + $0x178] sm:$0xff] }
  0xf5   :  { %v4179_v38 = vpop.eup %4178  ;;  %v701_v39 = vmul.f32 %v4177_v30, %v699_v11  ;;  %vm706_vm13 = vweird.f32 %v4177_v30  ;;  %1297 = vmatpush.msrb.mxu0 %v5206_v26  ;;  %1317 = vmatpush.msrb.mxu1 %v5208_v29  ;;  %v5218_v11 = vld [vmem:[#allocation4 + $0x1c0] sm:$0xff] }
  0xf6   :  { %v720_v46 = vmul.f32 %v4179_v38, %v718_v13  ;;  %vm725_vm15 = vweird.f32 %v4179_v38  ;;  %vm707_vm1 = vmor %vm705_vm14, %vm706_vm13  ;;  %1337 = vmatpush.msrb.mxu2 %v5210_v9  ;;  %1357 = vmatpush.msrb.mxu3 %v5214_v10  ;;  %v5222_v13 = vld [vmem:[#allocation4 + $0x1d0] sm:$0xff] }
  0xf7   :  { %v594_v33 = vpop.f32.mrf.mxu2  ;;  %v614_v37 = vpop.f32.mrf.mxu3  ;;  %v702_v50 = vsub.f32 1.0, %v701_v39  ;;  %vm726_vm2 = vmor %vm724_vm0, %vm725_vm15  ;;  %1298 = vmatpush.msrb.mxu0 %v5218_v11  ;;  %1318 = vmatpush.msrb.mxu1 %v5220_v12  ;;  %v5268_v39 = vld [vmem:[#allocation4 + $0x148] sm:$0xff] }
  0xf8   :  { %v623_v34 = vrot.slane %v594_v33, 2  ;;  %v624_v35 = vrot.slane %v614_v37, 2  ;;  %v721_v51 = vsub.f32 1.0, %v720_v46  ;;  %1338 = vmatpush.msrb.mxu2 %v5222_v13  ;;  %1358 = vmatpush.msrb.mxu3 %v5226_v14  ;;  %v5244_v33 = vld [vmem:[#allocation4 + $0x188] sm:$0xff]  ;;  %v5246_v37 = vld [vmem:[#allocation4 + $0x190] sm:$0xff]  ;;  %v5278_v46 = vld [vmem:[#allocation4 + $0x120] sm:$0xff] }
  0xf9   :  { %v703_v53 = vmul.f32 %v4177_v30, %v702_v50  ;;  %1299 = vmatpush.msrb.mxu0 %v5230_v15  ;;  %1319 = vmatpush.msrb.mxu1 %v5232_v19  ;;  %v5282_v50 = vld [vmem:[#allocation4 + $0x130] sm:$0xff] }
  0xfa   :  { %v632_v47 = vadd.f32 %v624_v35, %v472_v43  ;;  %v631_v52 = vadd.f32 %v623_v34, %v471_v42  ;;  %v722_v54 = vmul.f32 %v4179_v38, %v721_v51  ;;  %1339 = vmatpush.msrb.mxu2 %v5234_v20  ;;  %1359 = vmatpush.msrb.mxu3 %v5238_v28  ;;  %v5256_v34 = vld [vmem:[#allocation4 + $0x168] sm:$0xff]  ;;  %v5258_v35 = vld [vmem:[#allocation4 + $0x170] sm:$0xff]  ;;  %v5274_v43 = vld [vmem:[#allocation4 + $0x158] sm:$0xff] }
  0xfb   :  { %v704_v24 = vadd.f32 %v4177_v30, %v703_v53  ;;  %1300 = vmatpush.msrb.mxu0 %v5242_v32  ;;  %1320 = vmatpush.msrb.mxu1 %v5244_v33  ;;  %v5270_v42 = vld [vmem:[#allocation4 + $0x150] sm:$0xff]  ;;  %v5286_v51 = vld [vmem:[#allocation4 + $0x138] sm:$0xff]  ;;  %v5292_v53 = vld [vmem:[#allocation4 + $0x108] sm:$0xff] }
  0xfc   :  { %v4107_v16 = vmul.f32 -1.442695, %v632_v47  ;;  %v723_v56 = vadd.f32 %v4179_v38, %v722_v54  ;;  %1340 = vmatpush.msrb.mxu2 %v5246_v37  ;;  %1360 = vmatpush.msrb.mxu3 %v5250_v40  ;;  %v5280_v47 = vld [vmem:[#allocation4 + $0x128] sm:$0xff]  ;;  %v5294_v54 = vld [vmem:[#allocation4 + $0x110] sm:$0xff] }
  0xfd   :  { %v708_v59 = vsel %vm707_vm1, %v4177_v30, %v704_v24  ;;  %v5254_v30 = vld [vmem:[#allocation4 + $0x160] sm:$0xff]  ;;  %1321 = vmatpush.msrb.mxu1 %v5256_v34  ;;  %v761_v24 = vld [vmem:[#allocation2 + $0x30] sm:$0xc] }
  0xfe   :  { %4180 = vpow2.f32 %v4107_v16  ;;  %v727_v60 = vsel %vm726_vm2, %v4179_v38, %v723_v56  ;;  %v713_v1 = vsel %vm710_vm3, %v712_v62, %v708_v59  ;;  %1301 = vmatpush.msrb.mxu0 %v5254_v30  ;;  %1341 = vmatpush.msrb.mxu2 %v5258_v35  ;;  %v5266_v38 = vld [vmem:[#allocation4 + $0x140] sm:$0xff]  ;;  %v5298_v56 = vld [vmem:[#allocation4 + $0x118] sm:$0xff]  ;;  %v5304_v59 = vld [vmem:[#allocation4 + $0xe8] sm:$0xff] }
  0xff   :  { %4182 = vtanh.f32 %v631_v52  ;;  %v732_v23 = vsel %vm729_vm4, %v731_v49, %v727_v60  ;;  %1361 = vmatpush.msrb.mxu3 %v5262_v7  ;;  %1322 = vmatpush.msrb.mxu1 %v5268_v39  ;;  %v5290_v16 = vld [vmem:[#allocation4 + $0x100] sm:$0xff]  ;;  %v5306_v60 = vld [vmem:[#allocation4 + $0xf0] sm:$0xff]  ;;  %v5310_v62 = vld [vmem:[#allocation4 + $0xf8] sm:$0xff] }
 0x100   :  { %v754_v41 = vmul.f32 0.0, %v732_v23  ;;  %1302 = vmatpush.msrb.mxu0 %v5266_v38  ;;  %1342 = vmatpush.msrb.mxu2 %v5270_v42  ;;  %v762_v49 = vld [vmem:[#allocation2] sm:$0xc]  ;;  %v5318_v23 = vld [vmem:[#allocation4 + $0xd0] sm:$0xff] }
 0x101   :  { %1362 = vmatpush.msrb.mxu3 %v5274_v43  ;;  %1323 = vmatpush.msrb.mxu1 %v5280_v47 }
 0x102   :  { %1303 = vmatpush.msrb.mxu0 %v5278_v46  ;;  %1343 = vmatpush.msrb.mxu2 %v5282_v50 }
 0x103   :  { %1363 = vmatpush.msrb.mxu3 %v5286_v51  ;;  %1324 = vmatpush.msrb.mxu1 %v5292_v53 }
 0x104   :  { %v4181_v61 = vpop.eup %4180  ;;  %1304 = vmatpush.msrb.mxu0 %v5290_v16  ;;  %1344 = vmatpush.msrb.mxu2 %v5294_v54 }
 0x105   :  { %v738_v63 = vadd.f32 1.0, %v4181_v61  ;;  %v4183_v0 = vpop.eup %4182  ;;  %1364 = vmatpush.msrb.mxu3 %v5298_v56  ;;  %1325 = vmatpush.msrb.mxu1 %v5304_v59 }
 0x106   :  { %v755_v44 = vmul.f32 %v4183_v0, %v713_v1  ;;  %1305 = vmatpush.msrb.mxu0 %v5302_v58  ;;  %1345 = vmatpush.msrb.mxu2 %v5306_v60  ;;  %v5314_v0 = vld [vmem:[#allocation4 + $0xc0] sm:$0xff]  ;;  %v5316_v1 = vld [vmem:[#allocation4 + $0xc8] sm:$0xff] }
 0x107   :  { %4184 = vrcp.f32 %v738_v63  ;;  %v750_v17 = vand.u32 2147483648, %v738_v63  ;;  %v748_v18 = vand.u32 2147483647, %v738_v63  ;;  %vm744_vm6 = vweird.f32 %v738_v63  ;;  %1365 = vmatpush.msrb.mxu3 %v5310_v62  ;;  %1326 = vmatpush.msrb.mxu1 %v5316_v1 }
 0x108   :  { %v5203_v45 = vadd.f32 %v755_v44, %v754_v41  ;;  %1306 = vmatpush.msrb.mxu0 %v5314_v0  ;;  %v5322_v44 = vld [vmem:[#allocation4 + $0xd8] sm:$0xff]  ;;  %1346 = vmatpush.msrb.mxu2 %v5318_v23 }
 0x109   :  { %v751_v3 = vor.u32 1.1754944e-38, %v750_v17  ;;  %vm749_vm8 = vcmp.eq.f32.partialorder %v748_v18, 8.507059e+37  ;;  %1366 = vmatpush.msrb.mxu3 %v5322_v44  ;;  %v5330_v17 = vld [vmem:[#allocation4 + $0xb0] sm:$0xff] }
 0x10a   :  { %4186 = vtanh.f32 %v5203_v45  ;;  %7648 = vst [vmem:[#allocation16_spill] sm:$0xff] %v5330_v17  ;;  %1347 = vmatpush.msrb.mxu2 %v5330_v17 }
 0x10d   :  { %v4185_v31 = vpop.eup %4184 }
 0x10e   :  { %v740_v48 = vmul.f32 %v4185_v31, %v738_v63  ;;  %vm745_vm5 = vweird.f32 %v4185_v31 }
 0x10f   :  { %vm746_vm7 = vmor %vm744_vm6, %vm745_vm5 }
 0x110   :  { %v741_v36 = vsub.f32 1.0, %v740_v48  ;;  %v4187_v22 = vpop.eup %4186  ;;  %v5326_v48 = vld [vmem:[#allocation4 + $0xa0] sm:$0xff] }
 0x111   :  { %7646 = vst [vmem:[#allocation10_spill] sm:$0xff] %v5326_v48  ;;  %1307 = vmatpush.msrb.mxu0 %v5326_v48 }
 0x112   :  { %v742_v2 = vmul.f32 %v4185_v31, %v741_v36  ;;  %v5328_v36 = vld [vmem:[#allocation4 + $0xa8] sm:$0xff] }
 0x113   :  { %7647 = vst [vmem:[#allocation11_spill] sm:$0xff] %v5328_v36  ;;  %1327 = vmatpush.msrb.mxu1 %v5328_v36 }
 0x114   :  { %v743_v21 = vadd.f32 %v4185_v31, %v742_v2  ;;  %v5334_v2 = vld [vmem:[#allocation4 + $0xb8] sm:$0xff] }
 0x115   :  { %7649 = vst [vmem:[#allocation17_spill] sm:$0xff] %v5334_v2  ;;  %1367 = vmatpush.msrb.mxu3 %v5334_v2  ;;  %v5486_v2 = vld [vmem:[#allocation6 + $0x170] sm:$0xff] }
 0x116   :  { %v747_v4 = vsel %vm746_vm7, %v4185_v31, %v743_v21  ;;  %v5338_v21 = vld [vmem:[#allocation4 + $0x80] sm:$0xff] }
 0x117   :  { %v752_v25 = vsel %vm749_vm8, %v751_v3, %v747_v4  ;;  %7650 = vst [vmem:[#allocation12_spill] sm:$0xff] %v5338_v21  ;;  %v5340_v3 = vld [vmem:[#allocation4 + $0x88] sm:$0xff]  ;;  %v5342_v4 = vld [vmem:[#allocation4 + $0x90] sm:$0xff]  ;;  %1308 = vmatpush.msrb.mxu0 %v5338_v21 }
 0x118   :  { %v758_v5 = vmul.f32 %v4187_v22, %v752_v25  ;;  %7651 = vst [vmem:[#allocation13_spill] sm:$0xff] %v5340_v3  ;;  %v764_v22 = vld [vmem:[#allocation2 + $0x18] sm:$0xc]  ;;  %1328 = vmatpush.msrb.mxu1 %v5340_v3  ;;  %1348 = vmatpush.msrb.mxu2 %v5342_v4  ;;  %v5484_v21 = vld [vmem:[#allocation6 + $0x168] sm:$0xff] }
 0x119   :  { %7652 = vst [vmem:[#allocation20_spill] sm:$0xff] %v5342_v4 }
 0x11a   :  { %760 = vst [vmem:[#allocation3] sm:$0xc0] %v758_v5  ;;  %v994_v6 = vrot.slane %v758_v5, 6  ;;  %v5346_v5 = vld [vmem:[#allocation4 + $0x98] sm:$0xff] }
 0x11b   :  { %7653 = vst [vmem:[#allocation21_spill] sm:$0xff] %v5346_v5  ;;  %1368 = vmatpush.msrb.mxu3 %v5346_v5 }
 0x11c   :  { %1012 = vmatmul.f32.vlgmr.msra.gmra.mxu0 %v994_v6  ;;  %1032 = vmatmul.f32.vlgmr.msra.gmra.mxu1 %v994_v6  ;;  %7689 = vst [vmem:[#allocation57_spill] sm:$0xff] %v5484_v21 }
 0x11d   :  { %1052 = vmatmul.f32.vlgmr.msra.gmra.mxu2 %v994_v6  ;;  %1072 = vmatmul.f32.vlgmr.msra.gmra.mxu3 %v994_v6  ;;  %v5350_v6 = vld [vmem:[#allocation4 + $0x60] sm:$0xff] }
 0x11e   :  { %7654 = vst [vmem:[#allocation14_spill] sm:$0xff] %v5350_v6  ;;  %1309 = vmatpush.msrb.mxu0 %v5350_v6 }
 0x170   :  { %v846_v52 = vpop.f32.mrf.mxu0  ;;  %v866_v27 = vpop.f32.mrf.mxu1 }
 0x171   :  { %v913_v55 = vrot.slane %v846_v52, 6  ;;  %v914_v57 = vrot.slane %v866_v27, 6  ;;  %v5352_v52 = vld [vmem:[#allocation4 + $0x68] sm:$0xff]  ;;  %v5358_v27 = vld [vmem:[#allocation4 + $0x78] sm:$0xff] }
 0x172   :  { %7655 = vst [vmem:[#allocation15_spill] sm:$0xff] %v5352_v52  ;;  %1329 = vmatpush.msrb.mxu1 %v5352_v52  ;;  %1369 = vmatpush.msrb.mxu3 %v5358_v27  ;;  %v5408_v52 = vld [vmem:[#allocation6 + $0x1f0] sm:$0xff] }
 0x173   :  { %v921_v61 = vadd.f32 %v913_v55, %v761_v24  ;;  %v922_v63 = vadd.f32 %v914_v57, %v762_v49  ;;  %v5354_v24 = vld [vmem:[#allocation4 + $0x70] sm:$0xff]  ;;  %7657 = vst [vmem:[#allocation25_spill] sm:$0xff] %v5358_v27  ;;  %v5362_v57 = vld [vmem:[#allocation4 + $0x40] sm:$0xff]  ;;  %v5378_v27 = vld [vmem:[#allocation4 + $0x28] sm:$0xff] }
 0x174   :  { %7656 = vst [vmem:[#allocation24_spill] sm:$0xff] %v5354_v24  ;;  %1349 = vmatpush.msrb.mxu2 %v5354_v24  ;;  %v5366_v49 = vld [vmem:[#allocation4 + $0x50] sm:$0xff]  ;;  %1310 = vmatpush.msrb.mxu0 %v5362_v57 }
 0x175   :  { %v4108_v41 = vmul.f32 -1.442695, %v921_v61  ;;  %v4109_v31 = vmul.f32 -1.442695, %v922_v63  ;;  %7658 = vst [vmem:[#allocation18_spill] sm:$0xff] %v5362_v57  ;;  %v5364_v61 = vld [vmem:[#allocation4 + $0x48] sm:$0xff] }
 0x176   :  { %7659 = vst [vmem:[#allocation19_spill] sm:$0xff] %v5364_v61  ;;  %1330 = vmatpush.msrb.mxu1 %v5364_v61  ;;  %1350 = vmatpush.msrb.mxu2 %v5366_v49  ;;  %v5380_v24 = vld [vmem:[#allocation4 + $0x30] sm:$0xff]  ;;  %v5406_v61 = vld [vmem:[#allocation6 + $0x1e8] sm:$0xff] }
 0x177   :  { %4188 = vpow2.f32 %v4108_v41  ;;  %v906_v18 = vpop.f32.mrf.mxu3  ;;  %7660 = vst [vmem:[#allocation28_spill] sm:$0xff] %v5366_v49  ;;  %v886_v57 = vpop.f32.mrf.mxu2  ;;  %v5393_v49 = vld [vmem:[#allocation4 + $0x8] sm:$0xff] }
 0x178   :  { %4190 = vpow2.f32 %v4109_v31  ;;  %v916_v25 = vrot.slane %v906_v18, 6  ;;  %v5370_v31 = vld [vmem:[#allocation4 + $0x58] sm:$0xff]  ;;  %7663 = vst [vmem:[#allocation23_spill] sm:$0xff] %v5378_v27  ;;  %1331 = vmatpush.msrb.mxu1 %v5378_v27  ;;  %1351 = vmatpush.msrb.mxu2 %v5380_v24  ;;  %v915_v27 = vrot.slane %v886_v57, 6 }
 0x179   :  { %7661 = vst [vmem:[#allocation29_spill] sm:$0xff] %v5370_v31  ;;  %1370 = vmatpush.msrb.mxu3 %v5370_v31  ;;  %v5391_v31 = vld [vmem:[#allocation4] sm:$0xff]  ;;  %v5416_v57 = vld [vmem:[#allocation6 + $0x1f8] sm:$0xff] }
 0x17a   :  { %v924_v55 = vadd.f32 %v916_v25, %v764_v22  ;;  %v5376_v25 = vld [vmem:[#allocation4 + $0x20] sm:$0xff]  ;;  %7664 = vst [vmem:[#allocation32_spill] sm:$0xff] %v5380_v24  ;;  %1332 = vmatpush.msrb.mxu1 %v5393_v49 }
 0x17b   :  { %7662 = vst [vmem:[#allocation22_spill] sm:$0xff] %v5376_v25  ;;  %1311 = vmatpush.msrb.mxu0 %v5376_v25  ;;  %v5404_v25 = vld [vmem:[#allocation6 + $0x1e0] sm:$0xff] }
 0x17c   :  { %v4110_v41 = vmul.f32 -1.442695, %v924_v55  ;;  %7666 = vst [vmem:[#allocation26_spill] sm:$0xff] %v5391_v31  ;;  %1484 = vmatpush.msra.mxu1 %v5406_v61 }
 0x17d   :  { %v4189_v63 = vpop.eup %4188  ;;  %7667 = vst [vmem:[#allocation27_spill] sm:$0xff] %v5393_v49  ;;  %1312 = vmatpush.msrb.mxu0 %v5391_v31  ;;  %v5424_v49 = vld [vmem:[#allocation6 + $0x1c0] sm:$0xff] }
 0x17e   :  { %v4191_v18 = vpop.eup %4190  ;;  %v5372_v22 = vadd.f32 1.0, %v4189_v63  ;;  %4192 = vpow2.f32 %v4110_v41  ;;  %v5386_v63 = vld [vmem:[#allocation4 + $0x38] sm:$0xff]  ;;  %7670 = vst [vmem:[#allocation40_spill] sm:$0xff] %v5404_v25 }
 0x17f   :  { %v5382_v55 = vadd.f32 1.0, %v4191_v18  ;;  %7665 = vst [vmem:[#allocation33_spill] sm:$0xff] %v5386_v63  ;;  %1371 = vmatpush.msrb.mxu3 %v5386_v63  ;;  %v5395_v18 = vld [vmem:[#allocation4 + $0x10] sm:$0xff]  ;;  %v5400_v41 = vld [vmem:[#allocation4 + $0x18] sm:$0xff]  ;;  %1464 = vmatpush.msra.mxu0 %v5404_v25  ;;  %v5442_v25 = vld [vmem:[#allocation6 + $0x1a8] sm:$0xff] }
 0x180   :  { %4194 = vrcp.f32 %v5372_v22  ;;  %7668 = vst [vmem:[#allocation36_spill] sm:$0xff] %v5395_v18  ;;  %1352 = vmatpush.msrb.mxu2 %v5395_v18  ;;  %v763_v63 = vld [vmem:[#allocation2 + $0x58] sm:$0xc]  ;;  %vm1101_vm10 = vweird.f32 %v5372_v22 }
 0x181   :  { %4196 = vrcp.f32 %v5382_v55  ;;  %7669 = vst [vmem:[#allocation37_spill] sm:$0xff] %v5400_v41  ;;  %1372 = vmatpush.msrb.mxu3 %v5400_v41  ;;  %v923_v31 = vadd.f32 %v915_v27, %v763_v63  ;;  %v5426_v27 = vld [vmem:[#allocation6 + $0x1c8] sm:$0xff]  ;;  %1465 = vmatpush.msra.mxu0 %v5424_v49  ;;  %vm1120_vm13 = vweird.f32 %v5382_v55 }
 0x182   :  { %7671 = vst [vmem:[#allocation41_spill] sm:$0xff] %v5406_v61  ;;  %1504 = vmatpush.msra.mxu2 %v5408_v52  ;;  %1485 = vmatpush.msra.mxu1 %v5426_v27  ;;  %v5435_v61 = vld [vmem:[#allocation6 + $0x1d8] sm:$0xff] }
 0x183   :  { %7672 = vst [vmem:[#allocation30_spill] sm:$0xff] %v5408_v52  ;;  %1524 = vmatpush.msra.mxu3 %v5416_v57 }
 0x184   :  { %v4193_v24 = vpop.eup %4192  ;;  %7673 = vst [vmem:[#allocation31_spill] sm:$0xff] %v5416_v57  ;;  %v5440_v57 = vld [vmem:[#allocation6 + $0x1a0] sm:$0xff]  ;;  %1486 = vmatpush.msra.mxu1 %v5442_v25 }
 0x185   :  { %v5412_v5 = vadd.f32 1.0, %v4193_v24  ;;  %7674 = vst [vmem:[#allocation44_spill] sm:$0xff] %v5424_v49  ;;  %v5428_v24 = vld [vmem:[#allocation6 + $0x1d0] sm:$0xff]  ;;  %1525 = vmatpush.msra.mxu3 %v5435_v61  ;;  %v1107_v49 = vand.u32 2147483648, %v5372_v22  ;;  %1466 = vmatpush.msra.mxu0 %v5440_v57 }
 0x186   :  { %v5410_v6 = vpop.eup %4194  ;;  %7675 = vst [vmem:[#allocation45_spill] sm:$0xff] %v5426_v27  ;;  %1505 = vmatpush.msra.mxu2 %v5428_v24  ;;  %v5450_v27 = vld [vmem:[#allocation6 + $0x1b8] sm:$0xff] }
 0x187   :  { %v5418_v41 = vpop.eup %4196  ;;  %v1097_v18 = vmul.f32 %v5410_v6, %v5372_v22  ;;  %7676 = vst [vmem:[#allocation34_spill] sm:$0xff] %v5428_v24  ;;  %4198 = vrcp.f32 %v5412_v5  ;;  %vm1102_vm9 = vweird.f32 %v5410_v6  ;;  %1526 = vmatpush.msra.mxu3 %v5450_v27  ;;  %vm1140_vm2 = vweird.f32 %v5412_v5 }
 0x188   :  { %v1116_v63 = vmul.f32 %v5418_v41, %v5382_v55  ;;  %7677 = vst [vmem:[#allocation35_spill] sm:$0xff] %v5435_v61  ;;  %4200 = vtanh.f32 %v923_v31  ;;  %vm1121_vm11 = vweird.f32 %v5418_v41  ;;  %v1126_v61 = vand.u32 2147483648, %v5382_v55  ;;  %v5458_v31 = vld [vmem:[#allocation6 + $0x180] sm:$0xff]  ;;  %vm5469_vm12 = vmor %vm1101_vm10, %vm1102_vm9 }
 0x189   :  { %v1098_v52 = vsub.f32 1.0, %v1097_v18  ;;  %7678 = vst [vmem:[#allocation48_spill] sm:$0xff] %v5440_v57  ;;  %v5448_v18 = vld [vmem:[#allocation6 + $0x1b0] sm:$0xff]  ;;  %v5460_v57 = vld [vmem:[#allocation6 + $0x188] sm:$0xff]  ;;  %1467 = vmatpush.msra.mxu0 %v5458_v31  ;;  %vm5492_vm14 = vmor %vm1120_vm13, %vm1121_vm11 }
 0x18a   :  { %7679 = vst [vmem:[#allocation49_spill] sm:$0xff] %v5442_v25  ;;  %v1117_v4 = vsub.f32 1.0, %v1116_v63  ;;  %v1105_v63 = vand.u32 2147483647, %v5372_v22  ;;  %1506 = vmatpush.msra.mxu2 %v5448_v18  ;;  %v5462_v25 = vld [vmem:[#allocation6 + $0x190] sm:$0xff]  ;;  %1487 = vmatpush.msra.mxu1 %v5460_v57  ;;  %v5482_v22 = vld [vmem:[#allocation6 + $0x160] sm:$0xff] }
 0x18b   :  { %7680 = vst [vmem:[#allocation38_spill] sm:$0xff] %v5448_v18  ;;  %v1099_v24 = vmul.f32 %v5410_v6, %v1098_v52  ;;  %v1124_v18 = vand.u32 2147483647, %v5382_v55  ;;  %v1108_v55 = vor.u32 1.1754944e-38, %v1107_v49  ;;  %1468 = vmatpush.msra.mxu0 %v5482_v22  ;;  %v5510_v49 = vld [vmem:[#allocation6 + $0x148] sm:$0xff] }
 0x18c   :  { %7681 = vst [vmem:[#allocation39_spill] sm:$0xff] %v5450_v27  ;;  %v1118_v3 = vmul.f32 %v5418_v41, %v1117_v4  ;;  %v5476_v27 = vld [vmem:[#allocation6 + $0x198] sm:$0xff]  ;;  %1507 = vmatpush.msra.mxu2 %v5462_v25  ;;  %1488 = vmatpush.msra.mxu1 %v5484_v21  ;;  %vm1106_vm15 = vcmp.eq.f32.partialorder %v1105_v63, 8.507059e+37  ;;  %v5512_v21 = vld [vmem:[#allocation6 + $0x150] sm:$0xff] }
 0x18d   :  { %7682 = vst [vmem:[#allocation52_spill] sm:$0xff] %v5458_v31  ;;  %v1100_v4 = vadd.f32 %v5410_v6, %v1099_v24  ;;  %1527 = vmatpush.msra.mxu3 %v5476_v27  ;;  %v5488_v17 = vpop.eup %4198  ;;  %vm1125_vm0 = vcmp.eq.f32.partialorder %v1124_v18, 8.507059e+37  ;;  %v5520_v63 = vld [vmem:[#allocation6 + $0x158] sm:$0xff] }
 0x18e   :  { %7683 = vst [vmem:[#allocation53_spill] sm:$0xff] %v5460_v57  ;;  %v1119_v24 = vadd.f32 %v5418_v41, %v1118_v3  ;;  %v1136_v36 = vmul.f32 %v5488_v17, %v5412_v5  ;;  %1508 = vmatpush.msra.mxu2 %v5486_v2  ;;  %v5508_v3 = vld [vmem:[#allocation6 + $0x140] sm:$0xff]  ;;  %1489 = vmatpush.msra.mxu1 %v5510_v49  ;;  %v5528_v57 = vld [vmem:[#allocation6 + $0x130] sm:$0xff]  ;;  %vm1141_vm1 = vweird.f32 %v5488_v17 }
 0x18f   :  { %7684 = vst [vmem:[#allocation42_spill] sm:$0xff] %v5462_v25  ;;  %v1127_v25 = vor.u32 1.1754944e-38, %v1126_v61  ;;  %v1104_v31 = vsel %vm5469_vm12, %v5410_v6, %v1100_v4  ;;  %v1151_v61 = vrot.slane %v5200_v8, 6  ;;  %1469 = vmatpush.msra.mxu0 %v5508_v3  ;;  %v5524_v8 = vld [vmem:[#allocation6 + $0x120] sm:$0xff]  ;;  %vm5569_vm3 = vmor %vm1140_vm2, %vm1141_vm1 }
 0x190   :  { %7687 = vst [vmem:[#allocation43_spill] sm:$0xff] %v5476_v27  ;;  %v5499_v27 = vld [vmem:[#allocation6 + $0x178] sm:$0xff]  ;;  %v1109_v48 = vsel %vm1106_vm15, %v1108_v55, %v1104_v31  ;;  %v1123_v6 = vsel %vm5492_vm14, %v5418_v41, %v1119_v24  ;;  %1509 = vmatpush.msra.mxu2 %v5512_v21  ;;  %v5526_v31 = vld [vmem:[#allocation6 + $0x128] sm:$0xff]  ;;  %v5537_v24 = vld [vmem:[#allocation6 + $0x100] sm:$0xff] }
 0x191   :  { %7688 = vst [vmem:[#allocation56_spill] sm:$0xff] %v5482_v22  ;;  %1528 = vmatpush.msra.mxu3 %v5499_v27  ;;  %v4201_v22 = vpop.eup %4200  ;;  %v1128_v52 = vsel %vm1125_vm0, %v1127_v25, %v1123_v6  ;;  %1470 = vmatpush.msra.mxu0 %v5524_v8  ;;  %v5532_v25 = vld [vmem:[#allocation6 + $0x138] sm:$0xff]  ;;  %v5539_v6 = vld [vmem:[#allocation6 + $0x108] sm:$0xff] }
 0x192   :  { %7692 = vst [vmem:[#allocation46_spill] sm:$0xff] %v5499_v27  ;;  %v1154_v4 = vmul.f32 %v4201_v22, %v1109_v48  ;;  %v1137_v27 = vsub.f32 1.0, %v1136_v36  ;;  %v1153_v41 = vmul.f32 %v1151_v61, %v1128_v52  ;;  %1490 = vmatpush.msra.mxu1 %v5526_v31  ;;  %1510 = vmatpush.msra.mxu2 %v5528_v57  ;;  %v5541_v61 = vld [vmem:[#allocation6 + $0x110] sm:$0xff] }
 0x193   :  { %7693 = vst [vmem:[#allocation47_spill] sm:$0xff] %v5520_v63  ;;  %1529 = vmatpush.msra.mxu3 %v5520_v63  ;;  %1471 = vmatpush.msra.mxu0 %v5537_v24 }
 0x194   :  { %7694 = vst [vmem:[#allocation60_spill] sm:$0xff] %v5524_v8  ;;  %v1138_v22 = vmul.f32 %v5488_v17, %v1137_v27  ;;  %v5543_v52 = vadd.f32 %v1154_v4, %v1153_v41  ;;  %v925_v8 = vld [vmem:[#allocation2 + $0x60] sm:$0x30]  ;;  %1491 = vmatpush.msra.mxu1 %v5539_v6  ;;  %v5548_v27 = vld [vmem:[#allocation6 + $0x118] sm:$0xff]  ;;  %1511 = vmatpush.msra.mxu2 %v5541_v61  ;;  %v5555_v41 = vld [vmem:[#allocation6 + $0xe8] sm:$0xff] }
 0x195   :  { %7695 = vst [vmem:[#allocation50_spill] sm:$0xff] %v5526_v31  ;;  %1530 = vmatpush.msra.mxu3 %v5532_v25  ;;  %v926_v31 = vld [vmem:[#allocation2 + $0x70] sm:$0x30]  ;;  %v5553_v4 = vld [vmem:[#allocation6 + $0xe0] sm:$0xff] }
 0x196   :  { %7696 = vst [vmem:[#allocation51_spill] sm:$0xff] %v5528_v57  ;;  %v5557_v57 = vld [vmem:[#allocation6 + $0xf0] sm:$0xff]  ;;  %4202 = vtanh.f32 %v5543_v52  ;;  %1472 = vmatpush.msra.mxu0 %v5553_v4  ;;  %1492 = vmatpush.msra.mxu1 %v5555_v41 }
 0x197   :  { %7697 = vst [vmem:[#allocation54_spill] sm:$0xff] %v5532_v25  ;;  %v1139_v25 = vadd.f32 %v5488_v17, %v1138_v22  ;;  %1531 = vmatpush.msra.mxu3 %v5548_v27  ;;  %1512 = vmatpush.msra.mxu2 %v5557_v57  ;;  %v5608_v22 = vld [vmem:[#allocation6 + $0x98] sm:$0xff] }
 0x198   :  { %7698 = vst [vmem:[#allocation55_spill] sm:$0xff] %v5537_v24 }
 0x199   :  { %v1013_v18 = vpop.f32.mrf.mxu0  ;;  %v1033_v55 = vpop.f32.mrf.mxu1  ;;  %7699 = vst [vmem:[#allocation65_spill] sm:$0xff] %v5539_v6  ;;  %v1144_v6 = vand.u32 2147483647, %v5412_v5 }
 0x19a   :  { %v1080_v48 = vrot.slane %v1013_v18, 4  ;;  %v1081_v36 = vrot.slane %v1033_v55, 4  ;;  %7700 = vst [vmem:[#allocation66_spill] sm:$0xff] %v5541_v61 }
 0x19b   :  { %7701 = vst [vmem:[#allocation58_spill] sm:$0xff] %v5543_v52  ;;  %v5575_v52 = vld [vmem:[#allocation6 + $0xc0] sm:$0xff]  ;;  %vm1145_vm4 = vcmp.eq.f32.partialorder %v1144_v6, 8.507059e+37  ;;  %v5618_v6 = vld [vmem:[#allocation6 + $0x78] sm:$0xff] }
 0x19c   :  { %7702 = vst [vmem:[#allocation59_spill] sm:$0xff] %v5548_v27  ;;  %v1088_v18 = vadd.f32 %v1080_v48, %v925_v8  ;;  %v1089_v55 = vadd.f32 %v1081_v36, %v926_v31  ;;  %v1146_v8 = vand.u32 2147483648, %v5412_v5  ;;  %v5565_v31 = vld [vmem:[#allocation6 + $0xf8] sm:$0xff]  ;;  %v5577_v5 = vld [vmem:[#allocation6 + $0xc8] sm:$0xff]  ;;  %1473 = vmatpush.msra.mxu0 %v5575_v52 }
 0x19d   :  { %7703 = vst [vmem:[#allocation67_spill] sm:$0xff] %v5553_v4  ;;  %1532 = vmatpush.msra.mxu3 %v5565_v31  ;;  %1493 = vmatpush.msra.mxu1 %v5577_v5  ;;  %v928_v4 = vld [vmem:[#allocation2 + $0x28] sm:$0x30] }
 0x19e   :  { %7704 = vst [vmem:[#allocation61_spill] sm:$0xff] %v5555_v41  ;;  %v4111_v48 = vmul.f32 -1.442695, %v1088_v18  ;;  %v4112_v36 = vmul.f32 -1.442695, %v1089_v55  ;;  %v5581_v18 = vld [vmem:[#allocation6 + $0xd0] sm:$0xff] }
 0x19f   :  { %7705 = vst [vmem:[#allocation62_spill] sm:$0xff] %v5557_v57  ;;  %v5583_v55 = vld [vmem:[#allocation6 + $0xd8] sm:$0xff]  ;;  %v5585_v41 = vld [vmem:[#allocation6 + $0xa0] sm:$0xff]  ;;  %1513 = vmatpush.msra.mxu2 %v5581_v18  ;;  %v1147_v24 = vor.u32 1.1754944e-38, %v1146_v8  ;;  %v4203_v8 = vpop.eup %4202 }
 0x1a0   :  { %7706 = vst [vmem:[#allocation63_spill] sm:$0xff] %v5565_v31  ;;  %4204 = vpow2.f32 %v4111_v48  ;;  %v1073_v27 = vpop.f32.mrf.mxu3  ;;  %v1143_v31 = vsel %vm5569_vm3, %v5488_v17, %v1139_v25  ;;  %1533 = vmatpush.msra.mxu3 %v5583_v55  ;;  %v5596_v57 = vld [vmem:[#allocation6 + $0xb8] sm:$0xff]  ;;  %1474 = vmatpush.msra.mxu0 %v5585_v41  ;;  %v5600_v48 = vld [vmem:[#allocation6 + $0x80] sm:$0xff]  ;;  %v5602_v17 = vld [vmem:[#allocation6 + $0x88] sm:$0xff] }
 0x1a1   :  { %7709 = vst [vmem:[#allocation64_spill] sm:$0xff] %v5575_v52  ;;  %v5592_v52 = vld [vmem:[#allocation6 + $0xa8] sm:$0xff]  ;;  %4206 = vpow2.f32 %v4112_v36  ;;  %v1083_v61 = vrot.slane %v1073_v27, 4  ;;  %v5604_v25 = vld [vmem:[#allocation6 + $0x90] sm:$0xff]  ;;  %v5610_v36 = vld [vmem:[#allocation6 + $0x60] sm:$0xff] }
 0x1a2   :  { %7710 = vst [vmem:[#allocation68_spill] sm:$0xff] %v5577_v5  ;;  %v5594_v5 = vld [vmem:[#allocation6 + $0xb0] sm:$0xff]  ;;  %1494 = vmatpush.msra.mxu1 %v5592_v52  ;;  %1534 = vmatpush.msra.mxu3 %v5596_v57  ;;  %v5612_v27 = vld [vmem:[#allocation6 + $0x68] sm:$0xff] }
 0x1a3   :  { %7711 = vst [vmem:[#allocation69_spill] sm:$0xff] %v5581_v18  ;;  %1514 = vmatpush.msra.mxu2 %v5594_v5  ;;  %1475 = vmatpush.msra.mxu0 %v5600_v48  ;;  %v5624_v18 = vld [vmem:[#allocation6 + $0x48] sm:$0xff] }
 0x1a4   :  { %7712 = vst [vmem:[#allocation70_spill] sm:$0xff] %v5583_v55  ;;  %1495 = vmatpush.msra.mxu1 %v5602_v17  ;;  %v5616_v55 = vld [vmem:[#allocation6 + $0x70] sm:$0xff]  ;;  %1535 = vmatpush.msra.mxu3 %v5608_v22 }
 0x1a5   :  { %7713 = vst [vmem:[#allocation71_spill] sm:$0xff] %v5585_v41  ;;  %v1091_v41 = vadd.f32 %v1083_v61, %v928_v4  ;;  %1515 = vmatpush.msra.mxu2 %v5604_v25  ;;  %1476 = vmatpush.msra.mxu0 %v5610_v36 }
 0x1a6   :  { %7714 = vst [vmem:[#allocation72_spill] sm:$0xff] %v5592_v52  ;;  %v1148_v52 = vsel %vm1145_vm4, %v1147_v24, %v1143_v31  ;;  %1496 = vmatpush.msra.mxu1 %v5612_v27  ;;  %v4205_v24 = vpop.eup %4204  ;;  %1536 = vmatpush.msra.mxu3 %v5618_v6  ;;  %v5636_v31 = vld [vmem:[#allocation6 + $0x58] sm:$0xff] }
 0x1a7   :  { %7715 = vst [vmem:[#allocation73_spill] sm:$0xff] %v5594_v5  ;;  %v1157_v5 = vmul.f32 %v4203_v8, %v1148_v52  ;;  %v4113_v63 = vmul.f32 -1.442695, %v1091_v41  ;;  %1516 = vmatpush.msra.mxu2 %v5616_v55  ;;  %v4207_v52 = vpop.eup %4206  ;;  %v5630_v4 = vadd.f32 1.0, %v4205_v24  ;;  %v5634_v41 = vld [vmem:[#allocation6 + $0x50] sm:$0xff]  ;;  %v5647_v24 = vld [vmem:[#allocation6 + $0x38] sm:$0xff] }
 0x1a8   :  { %7716 = vst [vmem:[#allocation74_spill] sm:$0xff] %v5596_v57  ;;  %v5622_v57 = vld [vmem:[#allocation6 + $0x40] sm:$0xff]  ;;  %1497 = vmatpush.msra.mxu1 %v5624_v18  ;;  %v5638_v8 = vadd.f32 1.0, %v4207_v52  ;;  %1537 = vmatpush.msra.mxu3 %v5636_v31 }
 0x1a9   :  { %7717 = vst [vmem:[#allocation75_spill] sm:$0xff] %v5610_v36  ;;  %v1295_v61 = vrot.slane %v1157_v5, 2  ;;  %4208 = vpow2.f32 %v4113_v63  ;;  %1477 = vmatpush.msra.mxu0 %v5622_v57  ;;  %v5645_v63 = vld [vmem:[#allocation6 + $0x30] sm:$0xff]  ;;  %1517 = vmatpush.msra.mxu2 %v5634_v41  ;;  %v5652_v52 = vld [vmem:[#allocation6] sm:$0xff]  ;;  %vm1167_vm7 = vweird.f32 %v5630_v4 }
 0x1aa   :  { %7718 = vst [vmem:[#allocation76_spill] sm:$0xff] %v5612_v27  ;;  %v1053_v27 = vpop.f32.mrf.mxu2  ;;  %4210 = vrcp.f32 %v5630_v4  ;;  %1538 = vmatpush.msra.mxu3 %v5647_v24  ;;  %vm1186_vm8 = vweird.f32 %v5638_v8 }
 0x1ab   :  { %7719 = vst [vmem:[#allocation77_spill] sm:$0xff] %v5616_v55  ;;  %1313 = vmatmul.f32.vlgmr.msrb.gmra.mxu0 %v1295_v61  ;;  %1333 = vmatmul.f32.vlgmr.msrb.gmra.mxu1 %v1295_v61  ;;  %4212 = vrcp.f32 %v5638_v8  ;;  %v5660_v55 = vld [vmem:[#allocation6 + $0x18] sm:$0xff] }
 0x1ac   :  { %7720 = vst [vmem:[#allocation78_spill] sm:$0xff] %v5618_v6  ;;  %v5642_v6 = vld [vmem:[#allocation6 + $0x28] sm:$0xff]  ;;  %1353 = vmatmul.f32.vlgmr.msrb.gmra.mxu2 %v1295_v61  ;;  %1373 = vmatmul.f32.vlgmr.msrb.gmra.mxu3 %v1295_v61  ;;  %v5658_v61 = vld [vmem:[#allocation6 + $0x10] sm:$0xff] }
 0x1ad   :  { %7721 = vst [vmem:[#allocation79_spill] sm:$0xff] %v5622_v57  ;;  %v1082_v57 = vrot.slane %v1053_v27, 4  ;;  %1498 = vmatpush.msra.mxu1 %v5642_v6  ;;  %1518 = vmatpush.msra.mxu2 %v5645_v63 }
 0x1ae   :  { %7722 = vst [vmem:[#allocation80_spill] sm:$0xff] %v5624_v18  ;;  %v5654_v18 = vld [vmem:[#allocation6 + $0x8] sm:$0xff]  ;;  %1539 = vmatpush.msra.mxu3 %v5660_v55 }
 0x1af   :  { %1224 = vst [vmem:[#allocation3 + $0x18] sm:$0xc] %v1157_v5  ;;  %v5640_v5 = vld [vmem:[#allocation6 + $0x20] sm:$0xff]  ;;  %1499 = vmatpush.msra.mxu1 %v5654_v18  ;;  %1519 = vmatpush.msra.mxu2 %v5658_v61 }
 0x1b0   :  { %7723 = vst [vmem:[#allocation81_spill] sm:$0xff] %v5634_v41  ;;  %1478 = vmatpush.msra.mxu0 %v5640_v5  ;;  %v4209_v41 = vpop.eup %4208  ;;  %1825 = vmatpush.msrb.mxu3 %v5214_v10 }
 0x1b1   :  { %7724 = vst [vmem:[#allocation82_spill] sm:$0xff] %v5636_v31  ;;  %v927_v31 = vld [vmem:[#allocation2 + $0x78] sm:$0x30]  ;;  %v5666_v36 = vadd.f32 1.0, %v4209_v41  ;;  %v4211_v27 = vpop.eup %4210  ;;  %1785 = vmatpush.msrb.mxu1 %v5208_v29  ;;  %1805 = vmatpush.msrb.mxu2 %v5210_v9  ;;  %v1173_v29 = vand.u32 2147483648, %v5630_v4  ;;  %v1192_v9 = vand.u32 2147483648, %v5638_v8 }
 0x1b2   :  { %7725 = vst [vmem:[#allocation83_spill] sm:$0xff] %v5642_v6  ;;  %1479 = vmatpush.msra.mxu0 %v5652_v52  ;;  %v1090_v6 = vadd.f32 %v1082_v57, %v927_v31  ;;  %1826 = vmatpush.msrb.mxu3 %v5226_v14  ;;  %vm1168_vm5 = vweird.f32 %v4211_v27 }
 0x1b3   :  { %7726 = vst [vmem:[#allocation84_spill] sm:$0xff] %v5645_v63  ;;  %v4213_v63 = vpop.eup %4212  ;;  %4214 = vrcp.f32 %v5666_v36  ;;  %1786 = vmatpush.msrb.mxu1 %v5220_v12  ;;  %1806 = vmatpush.msrb.mxu2 %v5222_v13  ;;  %v1190_v13 = vand.u32 2147483647, %v5638_v8  ;;  %vm1169_vm9 = vmor %vm1167_vm7, %vm1168_vm5  ;;  %vm1206_vm14 = vweird.f32 %v5666_v36 }
 0x1b4   :  { %7727 = vst [vmem:[#allocation85_spill] sm:$0xff] %v5647_v24  ;;  %1765 = vmatpush.msrb.mxu0 %v5206_v26  ;;  %v1163_v24 = vmul.f32 %v4211_v27, %v5630_v4  ;;  %v1182_v41 = vmul.f32 %v4213_v63, %v5638_v8  ;;  %4216 = vtanh.f32 %v1090_v6  ;;  %1827 = vmatpush.msrb.mxu3 %v5238_v28  ;;  %vm1187_vm6 = vweird.f32 %v4213_v63  ;;  %v7740_v8 = vld [vmem:[#allocation18_spill] sm:$0xff] }
 0x1b5   :  { %1787 = vmatpush.msrb.mxu1 %v5232_v19  ;;  %1807 = vmatpush.msrb.mxu2 %v5234_v20  ;;  %v1174_v19 = vor.u32 1.1754944e-38, %v1173_v29  ;;  %vm1188_vm10 = vmor %vm1186_vm8, %vm1187_vm6  ;;  %vm1191_vm12 = vcmp.eq.f32.partialorder %v1190_v13, 8.507059e+37  ;;  %v7747_v29 = vld [vmem:[#allocation33_spill] sm:$0xff]  ;;  %v7752_v13 = vld [vmem:[#allocation40_spill] sm:$0xff] }
 0x1b6   :  { %1766 = vmatpush.msrb.mxu0 %v5218_v11  ;;  %v1164_v57 = vsub.f32 1.0, %v1163_v24  ;;  %v1183_v26 = vsub.f32 1.0, %v1182_v41  ;;  %v1171_v11 = vand.u32 2147483647, %v5630_v4  ;;  %1828 = vmatpush.msrb.mxu3 %v5250_v40  ;;  %v7742_v24 = vld [vmem:[#allocation28_spill] sm:$0xff]  ;;  %v7744_v41 = vld [vmem:[#allocation22_spill] sm:$0xff] }
 0x1b7   :  { %1788 = vmatpush.msrb.mxu1 %v5244_v33  ;;  %1808 = vmatpush.msrb.mxu2 %v5246_v37  ;;  %v1193_v33 = vor.u32 1.1754944e-38, %v1192_v9  ;;  %v7748_v9 = vld [vmem:[#allocation26_spill] sm:$0xff] }
 0x1b8   :  { %1767 = vmatpush.msrb.mxu0 %v5230_v15  ;;  %v1165_v10 = vmul.f32 %v4211_v27, %v1164_v57  ;;  %v1184_v12 = vmul.f32 %v4213_v63, %v1183_v26  ;;  %vm1172_vm11 = vcmp.eq.f32.partialorder %v1171_v11, 8.507059e+37  ;;  %1829 = vmatpush.msrb.mxu3 %v5262_v7  ;;  %v7745_v57 = vld [vmem:[#allocation23_spill] sm:$0xff]  ;;  %v7746_v26 = vld [vmem:[#allocation32_spill] sm:$0xff] }
 0x1b9   :  { %v5691_v14 = vpop.eup %4214  ;;  %1789 = vmatpush.msrb.mxu1 %v5256_v34  ;;  %1809 = vmatpush.msrb.mxu2 %v5258_v35  ;;  %v7750_v11 = vld [vmem:[#allocation36_spill] sm:$0xff] }
 0x1ba   :  { %1768 = vmatpush.msrb.mxu0 %v5242_v32  ;;  %v1166_v15 = vadd.f32 %v4211_v27, %v1165_v10  ;;  %v1185_v20 = vadd.f32 %v4213_v63, %v1184_v12  ;;  %v1202_v28 = vmul.f32 %v5691_v14, %v5666_v36  ;;  %v1217_v32 = vrot.slane %v5203_v45, 2  ;;  %v4217_v40 = vpop.eup %4216  ;;  %1830 = vmatpush.msrb.mxu3 %v5274_v43  ;;  %v7749_v10 = vld [vmem:[#allocation27_spill] sm:$0xff]  ;;  %v7751_v12 = vld [vmem:[#allocation37_spill] sm:$0xff] }
 0x1bb   :  { %1790 = vmatpush.msrb.mxu1 %v5268_v39  ;;  %1810 = vmatpush.msrb.mxu2 %v5270_v42  ;;  %vm1207_vm13 = vweird.f32 %v5691_v14  ;;  %v1212_v39 = vand.u32 2147483648, %v5666_v36  ;;  %v1210_v42 = vand.u32 2147483647, %v5666_v36  ;;  %v7739_v36 = vld [vmem:[#allocation25_spill] sm:$0xff] }
 0x1bc   :  { %1769 = vmatpush.msrb.mxu0 %v5254_v30  ;;  %v1170_v37 = vsel %vm1169_vm9, %v4211_v27, %v1166_v15  ;;  %v1189_v4 = vsel %vm1188_vm10, %v4213_v63, %v1185_v20  ;;  %v1203_v31 = vsub.f32 1.0, %v1202_v28  ;;  %1831 = vmatpush.msrb.mxu3 %v5286_v51  ;;  %vm1208_vm15 = vmor %vm1206_vm14, %vm1207_vm13  ;;  %v7730_v51 = vld [vmem:[#allocation16_spill] sm:$0xff]  ;;  %v7741_v63 = vld [vmem:[#allocation19_spill] sm:$0xff] }
 0x1bd   :  { %v1175_v6 = vsel %vm1172_vm11, %v1174_v19, %v1170_v37  ;;  %v1194_v30 = vsel %vm1191_vm12, %v1193_v33, %v1189_v4  ;;  %1791 = vmatpush.msrb.mxu1 %v5280_v47  ;;  %1811 = vmatpush.msrb.mxu2 %v5282_v50  ;;  %v7728_v47 = vld [vmem:[#allocation10_spill] sm:$0xff]  ;;  %v7729_v50 = vld [vmem:[#allocation11_spill] sm:$0xff]  ;;  %vm1211_vm0 = vcmp.eq.f32.partialorder %v1210_v42, 8.507059e+37  ;;  %v7743_v27 = vld [vmem:[#allocation29_spill] sm:$0xff] }
 0x1be   :  { %1770 = vmatpush.msrb.mxu0 %v5266_v38  ;;  %v1220_v45 = vmul.f32 %v4217_v40, %v1175_v6  ;;  %v1219_v34 = vmul.f32 %v1217_v32, %v1194_v30  ;;  %v1204_v35 = vmul.f32 %v5691_v14, %v1203_v31  ;;  %1832 = vmatpush.msrb.mxu3 %v5298_v56  ;;  %v7732_v56 = vld [vmem:[#allocation12_spill] sm:$0xff]  ;;  %v7754_v15 = vld [vmem:[#allocation30_spill] sm:$0xff]  ;;  %v7755_v19 = vld [vmem:[#allocation31_spill] sm:$0xff] }
 0x1bf   :  { %1792 = vmatpush.msrb.mxu1 %v5292_v53  ;;  %1812 = vmatpush.msrb.mxu2 %v5294_v54  ;;  %v7756_v20 = vld [vmem:[#allocation44_spill] sm:$0xff]  ;;  %v7757_v28 = vld [vmem:[#allocation45_spill] sm:$0xff]  ;;  %v7758_v32 = vld [vmem:[#allocation34_spill] sm:$0xff] }
 0x1c0   :  { %1771 = vmatpush.msrb.mxu0 %v5278_v46  ;;  %v5715_v7 = vadd.f32 %v1220_v45, %v1219_v34  ;;  %v1205_v38 = vadd.f32 %v5691_v14, %v1204_v35  ;;  %1833 = vmatpush.msrb.mxu3 %v5310_v62  ;;  %v1213_v46 = vor.u32 1.1754944e-38, %v1212_v39  ;;  %v7735_v62 = vld [vmem:[#allocation21_spill] sm:$0xff]  ;;  %v7759_v33 = vld [vmem:[#allocation35_spill] sm:$0xff]  ;;  %v7760_v37 = vld [vmem:[#allocation48_spill] sm:$0xff] }
 0x1c1   :  { %1793 = vmatpush.msrb.mxu1 %v5304_v59  ;;  %1813 = vmatpush.msrb.mxu2 %v5306_v60  ;;  %v7734_v60 = vld [vmem:[#allocation20_spill] sm:$0xff]  ;;  %v7761_v40 = vld [vmem:[#allocation49_spill] sm:$0xff]  ;;  %v7762_v6 = vld [vmem:[#allocation38_spill] sm:$0xff] }
 0x1c2   :  { %1772 = vmatpush.msrb.mxu0 %v5290_v16  ;;  %4218 = vtanh.f32 %v5715_v7  ;;  %v1209_v43 = vsel %vm1208_vm15, %v5691_v14, %v1205_v38  ;;  %1834 = vmatpush.msrb.mxu3 %v5322_v44  ;;  %v7731_v16 = vld [vmem:[#allocation17_spill] sm:$0xff]  ;;  %v7738_v44 = vld [vmem:[#allocation24_spill] sm:$0xff]  ;;  %v7763_v4 = vld [vmem:[#allocation39_spill] sm:$0xff] }
 0x1c3   :  { %1794 = vmatpush.msrb.mxu1 %v5316_v1  ;;  %1814 = vmatpush.msrb.mxu2 %v5318_v23  ;;  %v1214_v54 = vsel %vm1211_vm0, %v1213_v46, %v1209_v43  ;;  %v7737_v1 = vld [vmem:[#allocation15_spill] sm:$0xff]  ;;  %v7753_v14 = vld [vmem:[#allocation41_spill] sm:$0xff]  ;;  %v7764_v31 = vld [vmem:[#allocation52_spill] sm:$0xff] }
 0x1c4   :  { %1773 = vmatpush.msrb.mxu0 %v5302_v58  ;;  %1835 = vmatpush.msrb.mxu3 %v7731_v16  ;;  %v7733_v58 = vld [vmem:[#allocation13_spill] sm:$0xff]  ;;  %v7766_v45 = vld [vmem:[#allocation42_spill] sm:$0xff]  ;;  %v7767_v34 = vld [vmem:[#allocation43_spill] sm:$0xff] }
 0x1c5   :  { %1795 = vmatpush.msrb.mxu1 %v7729_v50  ;;  %1815 = vmatpush.msrb.mxu2 %v7730_v51  ;;  %v7765_v30 = vld [vmem:[#allocation53_spill] sm:$0xff]  ;;  %v7768_v35 = vld [vmem:[#allocation56_spill] sm:$0xff]  ;;  %v7770_v39 = vld [vmem:[#allocation46_spill] sm:$0xff] }
 0x1c6   :  { %1774 = vmatpush.msrb.mxu0 %v5314_v0  ;;  %1836 = vmatpush.msrb.mxu3 %v7735_v62  ;;  %v7736_v0 = vld [vmem:[#allocation14_spill] sm:$0xff]  ;;  %v7769_v38 = vld [vmem:[#allocation57_spill] sm:$0xff]  ;;  %v7771_v42 = vld [vmem:[#allocation47_spill] sm:$0xff] }
 0x1c7   :  { %1796 = vmatpush.msrb.mxu1 %v7733_v58  ;;  %1816 = vmatpush.msrb.mxu2 %v7734_v60  ;;  %v7772_v43 = vld [vmem:[#allocation60_spill] sm:$0xff]  ;;  %v7773_v46 = vld [vmem:[#allocation50_spill] sm:$0xff]  ;;  %v7776_v51 = vld [vmem:[#allocation55_spill] sm:$0xff] }
 0x1c8   :  { %1775 = vmatpush.msrb.mxu0 %v7728_v47  ;;  %v4219_v53 = vpop.eup %4218  ;;  %1837 = vmatpush.msrb.mxu3 %v7739_v36  ;;  %v7774_v47 = vld [vmem:[#allocation51_spill] sm:$0xff]  ;;  %v7775_v50 = vld [vmem:[#allocation54_spill] sm:$0xff]  ;;  %v7785_v58 = vld [vmem:[#allocation68_spill] sm:$0xff] }
 0x1c9   :  { %v1223_v59 = vmul.f32 %v4219_v53, %v1214_v54  ;;  %1797 = vmatpush.msrb.mxu1 %v7737_v1  ;;  %1817 = vmatpush.msrb.mxu2 %v7738_v44  ;;  %v7778_v16 = vld [vmem:[#allocation66_spill] sm:$0xff]  ;;  %v7783_v54 = vld [vmem:[#allocation63_spill] sm:$0xff]  ;;  %v7790_v1 = vld [vmem:[#allocation73_spill] sm:$0xff] }
 0x1ca   :  { %1776 = vmatpush.msrb.mxu0 %v7732_v56  ;;  %1838 = vmatpush.msrb.mxu3 %v7743_v27  ;;  %v7782_v53 = vld [vmem:[#allocation62_spill] sm:$0xff]  ;;  %v7784_v56 = vld [vmem:[#allocation64_spill] sm:$0xff]  ;;  %v7788_v62 = vld [vmem:[#allocation71_spill] sm:$0xff] }
 0x1cb   :  { %1225 = vst [vmem:[#allocation3] sm:$0x30] %v1223_v59  ;;  %v1462_v23 = vrot.slane %v1223_v59, 4  ;;  %1798 = vmatpush.msrb.mxu1 %v7741_v63  ;;  %1818 = vmatpush.msrb.mxu2 %v7742_v24  ;;  %v7786_v59 = vld [vmem:[#allocation69_spill] sm:$0xff]  ;;  %v7787_v60 = vld [vmem:[#allocation70_spill] sm:$0xff]  ;;  %v7792_v44 = vld [vmem:[#allocation75_spill] sm:$0xff] }
 0x1cc   :  { %1777 = vmatpush.msrb.mxu0 %v7736_v0  ;;  %1839 = vmatpush.msrb.mxu3 %v7747_v29  ;;  %v7789_v0 = vld [vmem:[#allocation72_spill] sm:$0xff]  ;;  %v7795_v63 = vld [vmem:[#allocation78_spill] sm:$0xff]  ;;  %v7796_v24 = vld [vmem:[#allocation79_spill] sm:$0xff] }
 0x1cd   :  { %1480 = vmatmul.f32.vlgmr.msra.gmra.mxu0 %v1462_v23  ;;  %1500 = vmatmul.f32.vlgmr.msra.gmra.mxu1 %v1462_v23  ;;  %v7793_v36 = vld [vmem:[#allocation76_spill] sm:$0xff] }
 0x1ce   :  { %1778 = vmatpush.msrb.mxu0 %v7740_v8  ;;  %1520 = vmatmul.f32.vlgmr.msra.gmra.mxu2 %v1462_v23  ;;  %v7794_v8 = vld [vmem:[#allocation77_spill] sm:$0xff]  ;;  %v7797_v27 = vld [vmem:[#allocation80_spill] sm:$0xff] }
 0x1cf   :  { %1540 = vmatmul.f32.vlgmr.msra.gmra.mxu3 %v1462_v23  ;;  %1799 = vmatpush.msrb.mxu1 %v7745_v57  ;;  %v7791_v23 = vld [vmem:[#allocation74_spill] sm:$0xff] }
 0x1d0   :  { %1779 = vmatpush.msrb.mxu0 %v7744_v41  ;;  %1819 = vmatpush.msrb.mxu2 %v7746_v26  ;;  %v7798_v41 = vld [vmem:[#allocation81_spill] sm:$0xff] }
 0x1d1   :  { %1800 = vmatpush.msrb.mxu1 %v7749_v10  ;;  %1840 = vmatpush.msrb.mxu3 %v7751_v12  ;;  %v1226_v10 = vld [vmem:[#allocation2 + $0x30] sm:$0x30] }
 0x1d2   :  { %1780 = vmatpush.msrb.mxu0 %v7748_v9  ;;  %1820 = vmatpush.msrb.mxu2 %v7750_v11 }
 0x1d3   :  { %1952 = vmatpush.msra.mxu1 %v7753_v14  ;;  %1992 = vmatpush.msra.mxu3 %v7755_v19  ;;  %v1229_v19 = vld [vmem:[#allocation2 + $0x18] sm:$0x30] }
 0x1d4   :  { %1932 = vmatpush.msra.mxu0 %v7752_v13  ;;  %1972 = vmatpush.msra.mxu2 %v7754_v15 }
 0x1d5   :  { %1953 = vmatpush.msra.mxu1 %v7757_v28  ;;  %1993 = vmatpush.msra.mxu3 %v7759_v33 }
 0x1d6   :  { %1933 = vmatpush.msra.mxu0 %v7756_v20  ;;  %1973 = vmatpush.msra.mxu2 %v7758_v32 }
 0x1d7   :  { %1954 = vmatpush.msra.mxu1 %v7761_v40  ;;  %1994 = vmatpush.msra.mxu3 %v7763_v4 }
 0x1d8   :  { %1934 = vmatpush.msra.mxu0 %v7760_v37  ;;  %1974 = vmatpush.msra.mxu2 %v7762_v6  ;;  %v1228_v6 = vld [vmem:[#allocation2 + $0x58] sm:$0x30] }
 0x1d9   :  { %1955 = vmatpush.msra.mxu1 %v7765_v30  ;;  %1995 = vmatpush.msra.mxu3 %v7767_v34 }
 0x1da   :  { %1935 = vmatpush.msra.mxu0 %v7764_v31  ;;  %1975 = vmatpush.msra.mxu2 %v7766_v45 }
 0x1db   :  { %1956 = vmatpush.msra.mxu1 %v7769_v38  ;;  %1996 = vmatpush.msra.mxu3 %v7770_v39 }
 0x1dc   :  { %1936 = vmatpush.msra.mxu0 %v7768_v35  ;;  %1976 = vmatpush.msra.mxu2 %v5486_v2  ;;  %v7777_v2 = vld [vmem:[#allocation65_spill] sm:$0xff] }
 0x1dd   :  { %1957 = vmatpush.msra.mxu1 %v5510_v49  ;;  %1997 = vmatpush.msra.mxu3 %v7771_v42  ;;  %v7780_v49 = vld [vmem:[#allocation67_spill] sm:$0xff] }
 0x1de   :  { %1937 = vmatpush.msra.mxu0 %v5508_v3  ;;  %1977 = vmatpush.msra.mxu2 %v5512_v21  ;;  %v7779_v3 = vld [vmem:[#allocation59_spill] sm:$0xff]  ;;  %v7781_v21 = vld [vmem:[#allocation61_spill] sm:$0xff] }
 0x1df   :  { %1958 = vmatpush.msra.mxu1 %v7773_v46  ;;  %1998 = vmatpush.msra.mxu3 %v7775_v50 }
 0x1e0   :  { %1938 = vmatpush.msra.mxu0 %v7772_v43  ;;  %1978 = vmatpush.msra.mxu2 %v7774_v47 }
 0x1e1   :  { %1959 = vmatpush.msra.mxu1 %v7777_v2  ;;  %1999 = vmatpush.msra.mxu3 %v7779_v3 }
 0x1e2   :  { %1939 = vmatpush.msra.mxu0 %v7776_v51  ;;  %1979 = vmatpush.msra.mxu2 %v7778_v16 }
 0x1e3   :  { %1960 = vmatpush.msra.mxu1 %v7781_v21  ;;  %2000 = vmatpush.msra.mxu3 %v7783_v54 }
 0x1e4   :  { %1940 = vmatpush.msra.mxu0 %v7780_v49  ;;  %1980 = vmatpush.msra.mxu2 %v7782_v53  ;;  %v7803_v53 = vld [vmem:[#allocation58_spill] sm:$0xff] }
 0x1e5   :  { %1961 = vmatpush.msra.mxu1 %v7785_v58  ;;  %2001 = vmatpush.msra.mxu3 %v7787_v60  ;;  %v1619_v54 = vrot.slane %v7803_v53, 6 }
 0x1e6   :  { %1941 = vmatpush.msra.mxu0 %v7784_v56  ;;  %1981 = vmatpush.msra.mxu2 %v7786_v59 }
 0x1e7   :  { %1962 = vmatpush.msra.mxu1 %v7789_v0  ;;  %2002 = vmatpush.msra.mxu3 %v7791_v23 }
 0x1e8   :  { %1942 = vmatpush.msra.mxu0 %v7788_v62  ;;  %1982 = vmatpush.msra.mxu2 %v7790_v1 }
 0x1e9   :  { %1963 = vmatpush.msra.mxu1 %v5602_v17  ;;  %2003 = vmatpush.msra.mxu3 %v5608_v22  ;;  %v7800_v17 = vld [vmem:[#allocation83_spill] sm:$0xff]  ;;  %v7802_v22 = vld [vmem:[#allocation85_spill] sm:$0xff] }
 0x1ea   :  { %1943 = vmatpush.msra.mxu0 %v5600_v48  ;;  %1983 = vmatpush.msra.mxu2 %v5604_v25  ;;  %v7799_v48 = vld [vmem:[#allocation82_spill] sm:$0xff]  ;;  %v7801_v25 = vld [vmem:[#allocation84_spill] sm:$0xff] }
 0x1eb   :  { %1964 = vmatpush.msra.mxu1 %v7793_v36  ;;  %2004 = vmatpush.msra.mxu3 %v7795_v63 }
 0x1ec   :  { %1944 = vmatpush.msra.mxu0 %v7792_v44  ;;  %1984 = vmatpush.msra.mxu2 %v7794_v8 }
 0x1ed   :  { %1965 = vmatpush.msra.mxu1 %v7797_v27  ;;  %2005 = vmatpush.msra.mxu3 %v7799_v48  ;;  %v1393_v48 = vld [vmem:[#allocation2 + $0x60] sm:$0xc] }
 0x1ee   :  { %1945 = vmatpush.msra.mxu0 %v7796_v24  ;;  %1985 = vmatpush.msra.mxu2 %v7798_v41 }
 0x1ef   :  { %1966 = vmatpush.msra.mxu1 %v7800_v17  ;;  %2006 = vmatpush.msra.mxu3 %v7802_v22  ;;  %v1394_v17 = vld [vmem:[#allocation2 + $0x70] sm:$0xc] }
 0x1f0   :  { %1946 = vmatpush.msra.mxu0 %v5640_v5  ;;  %1986 = vmatpush.msra.mxu2 %v7801_v25  ;;  %v1227_v5 = vld [vmem:[#allocation2] sm:$0x30] }
 0x1f1   :  { %1967 = vmatpush.msra.mxu1 %v5654_v18  ;;  %2007 = vmatpush.msra.mxu3 %v5660_v55 }
 0x1f2   :  { %1947 = vmatpush.msra.mxu0 %v5652_v52  ;;  %1987 = vmatpush.msra.mxu2 %v5658_v61 }
 0x228   :  { %v1314_v57 = vpop.f32.mrf.mxu0  ;;  %v1334_v26 = vpop.f32.mrf.mxu1 }
 0x229   :  { %v1381_v29 = vrot.slane %v1314_v57, 4  ;;  %v1382_v9 = vrot.slane %v1334_v26, 4 }
 0x22b   :  { %v1389_v11 = vadd.f32 %v1381_v29, %v1226_v10  ;;  %v1390_v12 = vadd.f32 %v1382_v9, %v1227_v5 }
 0x22d   :  { %v4114_v13 = vmul.f32 -1.442695, %v1389_v11  ;;  %v4115_v14 = vmul.f32 -1.442695, %v1390_v12 }
 0x22f   :  { %4220 = vpow2.f32 %v4114_v13  ;;  %v1374_v15 = vpop.f32.mrf.mxu3  ;;  %v1354_v33 = vpop.f32.mrf.mxu2 }
 0x230   :  { %4222 = vpow2.f32 %v4115_v14  ;;  %v1384_v52 = vrot.slane %v1374_v15, 4  ;;  %v1383_v37 = vrot.slane %v1354_v33, 4  ;;  %v1396_v14 = vld [vmem:[#allocation2 + $0x28] sm:$0xc] }
 0x232   :  { %v1392_v18 = vadd.f32 %v1384_v52, %v1229_v19  ;;  %v1391_v30 = vadd.f32 %v1383_v37, %v1228_v6 }
 0x234   :  { %v4116_v20 = vmul.f32 -1.442695, %v1392_v18 }
 0x235   :  { %v4221_v61 = vpop.eup %4220 }
 0x236   :  { %v4223_v28 = vpop.eup %4222  ;;  %v1563_v55 = vadd.f32 1.0, %v4221_v61  ;;  %4224 = vpow2.f32 %v4116_v20 }
 0x237   :  { %v1582_v32 = vadd.f32 1.0, %v4223_v28 }
 0x238   :  { %4226 = vrcp.f32 %v1563_v55  ;;  %v1575_v42 = vand.u32 2147483648, %v1563_v55  ;;  %v1573_v47 = vand.u32 2147483647, %v1563_v55  ;;  %vm1569_vm3 = vweird.f32 %v1563_v55 }
 0x239   :  { %4228 = vrcp.f32 %v1582_v32  ;;  %v1594_v43 = vand.u32 2147483648, %v1582_v32  ;;  %v1592_v51 = vand.u32 2147483647, %v1582_v32  ;;  %vm1588_vm4 = vweird.f32 %v1582_v32 }
 0x23a   :  { %v1576_v3 = vor.u32 1.1754944e-38, %v1575_v42  ;;  %vm1574_vm7 = vcmp.eq.f32.partialorder %v1573_v47, 8.507059e+37 }
 0x23b   :  { %v1595_v56 = vor.u32 1.1754944e-38, %v1594_v43  ;;  %vm1593_vm8 = vcmp.eq.f32.partialorder %v1592_v51, 8.507059e+37 }
 0x23c   :  { %v4225_v40 = vpop.eup %4224 }
 0x23d   :  { %v5824_v4 = vadd.f32 1.0, %v4225_v40 }
 0x23e   :  { %v4227_v31 = vpop.eup %4226 }
 0x23f   :  { %v4229_v45 = vpop.eup %4228  ;;  %v1565_v34 = vmul.f32 %v4227_v31, %v1563_v55  ;;  %4230 = vrcp.f32 %v5824_v4  ;;  %vm1570_vm1 = vweird.f32 %v4227_v31  ;;  %v1614_v26 = vand.u32 2147483648, %v5824_v4 }
 0x240   :  { %v1584_v35 = vmul.f32 %v4229_v45, %v1582_v32  ;;  %4232 = vtanh.f32 %v1391_v30  ;;  %vm1589_vm2 = vweird.f32 %v4229_v45  ;;  %vm1571_vm5 = vmor %vm1569_vm3, %vm1570_vm1  ;;  %vm1608_vm10 = vweird.f32 %v5824_v4 }
 0x241   :  { %v1566_v38 = vsub.f32 1.0, %v1565_v34  ;;  %vm1590_vm6 = vmor %vm1588_vm4, %vm1589_vm2  ;;  %v1612_v10 = vand.u32 2147483647, %v5824_v4  ;;  %v1615_v13 = vor.u32 1.1754944e-38, %v1614_v26  ;;  %v5839_v26 = vld [vmem:[#allocation4 + $0x1e0] sm:$0xff] }
 0x242   :  { %v1585_v39 = vsub.f32 1.0, %v1584_v35 }
 0x243   :  { %v1567_v46 = vmul.f32 %v4227_v31, %v1566_v38  ;;  %vm1613_vm12 = vcmp.eq.f32.partialorder %v1612_v10, 8.507059e+37  ;;  %v5847_v10 = vld [vmem:[#allocation4 + $0x1f8] sm:$0xff] }
 0x244   :  { %v1586_v50 = vmul.f32 %v4229_v45, %v1585_v39 }
 0x245   :  { %v4231_v2 = vpop.eup %4230  ;;  %v1568_v16 = vadd.f32 %v4227_v31, %v1567_v46 }
 0x246   :  { %v1587_v49 = vadd.f32 %v4229_v45, %v1586_v50  ;;  %v1604_v21 = vmul.f32 %v4231_v2, %v5824_v4  ;;  %v4233_v59 = vpop.eup %4232  ;;  %vm1609_vm9 = vweird.f32 %v4231_v2  ;;  %v1395_v4 = vld [vmem:[#allocation2 + $0x78] sm:$0xc] }
 0x247   :  { %v1572_v58 = vsel %vm1571_vm5, %v4227_v31, %v1568_v16  ;;  %vm1610_vm11 = vmor %vm1608_vm10, %vm1609_vm9 }
 0x248   :  { %v1577_v60 = vsel %vm1574_vm7, %v1576_v3, %v1572_v58  ;;  %v1591_v62 = vsel %vm1590_vm6, %v4229_v45, %v1587_v49  ;;  %v1605_v0 = vsub.f32 1.0, %v1604_v21 }
 0x249   :  { %v1596_v1 = vsel %vm1593_vm8, %v1595_v56, %v1591_v62  ;;  %v1622_v23 = vmul.f32 %v4233_v59, %v1577_v60 }
 0x24a   :  { %v1621_v44 = vmul.f32 %v1619_v54, %v1596_v1  ;;  %v1481_v36 = vpop.f32.mrf.mxu0  ;;  %v1501_v8 = vpop.f32.mrf.mxu1  ;;  %v1606_v63 = vmul.f32 %v4231_v2, %v1605_v0  ;;  %v1685_v54 = vrot.slane %v5715_v7, 2 }
 0x24b   :  { %v1548_v24 = vrot.slane %v1481_v36, 6  ;;  %v1549_v27 = vrot.slane %v1501_v8, 6 }
 0x24c   :  { %v5829_v41 = vadd.f32 %v1622_v23, %v1621_v44  ;;  %v1607_v57 = vadd.f32 %v4231_v2, %v1606_v63 }
 0x24d   :  { %v1556_v25 = vadd.f32 %v1548_v24, %v1393_v48  ;;  %v1557_v22 = vadd.f32 %v1549_v27, %v1394_v17 }
 0x24e   :  { %4234 = vtanh.f32 %v5829_v41  ;;  %v1611_v11 = vsel %vm1610_vm11, %v4231_v2, %v1607_v57 }
 0x24f   :  { %v4117_v29 = vmul.f32 -1.442695, %v1556_v25  ;;  %v4118_v9 = vmul.f32 -1.442695, %v1557_v22  ;;  %v1616_v19 = vsel %vm1613_vm12, %v1615_v13, %v1611_v11  ;;  %v5853_v11 = vld [vmem:[#allocation4 + $0x1c8] sm:$0xff]  ;;  %v5859_v13 = vld [vmem:[#allocation4 + $0x1d8] sm:$0xff] }
 0x251   :  { %4236 = vpow2.f32 %v4117_v29  ;;  %v1521_v37 = vpop.f32.mrf.mxu2  ;;  %v5841_v29 = vld [vmem:[#allocation4 + $0x1e8] sm:$0xff] }
 0x252   :  { %v1541_v5 = vpop.f32.mrf.mxu3  ;;  %4238 = vpow2.f32 %v4118_v9  ;;  %v1550_v40 = vrot.slane %v1521_v37, 6  ;;  %v5843_v9 = vld [vmem:[#allocation4 + $0x1f0] sm:$0xff]  ;;  %v5895_v37 = vld [vmem:[#allocation4 + $0x178] sm:$0xff] }
 0x253   :  { %v1551_v12 = vrot.slane %v1541_v5, 6  ;;  %v5851_v5 = vld [vmem:[#allocation4 + $0x1c0] sm:$0xff] }
 0x254   :  { %v4235_v15 = vpop.eup %4234  ;;  %v1558_v45 = vadd.f32 %v1550_v40, %v1395_v4  ;;  %v5899_v40 = vld [vmem:[#allocation4 + $0x140] sm:$0xff]  ;;  %v5903_v4 = vld [vmem:[#allocation4 + $0x150] sm:$0xff] }
 0x255   :  { %v1559_v52 = vadd.f32 %v1551_v12, %v1396_v14  ;;  %v1625_v18 = vmul.f32 %v4235_v15, %v1616_v19  ;;  %v5855_v12 = vld [vmem:[#allocation4 + $0x1d0] sm:$0xff]  ;;  %v5863_v14 = vld [vmem:[#allocation4 + $0x1a0] sm:$0xff]  ;;  %v5865_v15 = vld [vmem:[#allocation4 + $0x1a8] sm:$0xff] }
 0x256   :  { %v5871_v19 = vld [vmem:[#allocation4 + $0x1b8] sm:$0xff] }
 0x257   :  { %v4119_v20 = vmul.f32 -1.442695, %v1559_v52  ;;  %v4237_v61 = vpop.eup %4236  ;;  %1692 = vst [vmem:[#allocation3 + $0x18] sm:$0x30] %v1625_v18  ;;  %v1763_v28 = vrot.slane %v1625_v18, 4  ;;  %v5867_v52 = vld [vmem:[#allocation4 + $0x1b0] sm:$0xff] }
 0x258   :  { %v4239_v55 = vpop.eup %4238  ;;  %v1629_v32 = vadd.f32 1.0, %v4237_v61  ;;  %v5875_v18 = vld [vmem:[#allocation4 + $0x180] sm:$0xff]  ;;  %v5879_v61 = vld [vmem:[#allocation4 + $0x190] sm:$0xff] }
 0x259   :  { %4240 = vpow2.f32 %v4119_v20  ;;  %v1648_v33 = vadd.f32 1.0, %v4239_v55  ;;  %1781 = vmatmul.f32.vlgmr.msrb.gmra.mxu0 %v1763_v28  ;;  %1801 = vmatmul.f32.vlgmr.msrb.gmra.mxu1 %v1763_v28  ;;  %v5877_v20 = vld [vmem:[#allocation4 + $0x188] sm:$0xff]  ;;  %v5887_v55 = vld [vmem:[#allocation4 + $0x160] sm:$0xff] }
 0x25a   :  { %4242 = vrcp.f32 %v1629_v32  ;;  %1821 = vmatmul.f32.vlgmr.msrb.gmra.mxu2 %v1763_v28  ;;  %1841 = vmatmul.f32.vlgmr.msrb.gmra.mxu3 %v1763_v28  ;;  %v1641_v43 = vand.u32 2147483648, %v1629_v32  ;;  %v1639_v50 = vand.u32 2147483647, %v1629_v32  ;;  %vm1635_vm15 = vweird.f32 %v1629_v32  ;;  %v5883_v28 = vld [vmem:[#allocation4 + $0x198] sm:$0xff] }
 0x25b   :  { %4244 = vrcp.f32 %v1648_v33  ;;  %v1660_v46 = vand.u32 2147483648, %v1648_v33  ;;  %v1658_v2 = vand.u32 2147483647, %v1648_v33  ;;  %vm1654_vm0 = vweird.f32 %v1648_v33  ;;  %2221 = vmatpush.msrb.mxu0 %v5839_v26  ;;  %2241 = vmatpush.msrb.mxu1 %v5841_v29 }
 0x25c   :  { %v1642_v49 = vor.u32 1.1754944e-38, %v1641_v43  ;;  %vm1640_vm3 = vcmp.eq.f32.partialorder %v1639_v50, 8.507059e+37  ;;  %2261 = vmatpush.msrb.mxu2 %v5843_v9  ;;  %2281 = vmatpush.msrb.mxu3 %v5847_v10  ;;  %v5931_v43 = vld [vmem:[#allocation4 + $0x118] sm:$0xff] }
 0x25d   :  { %v1661_v56 = vor.u32 1.1754944e-38, %v1660_v46  ;;  %vm1659_vm4 = vcmp.eq.f32.partialorder %v1658_v2, 8.507059e+37  ;;  %2222 = vmatpush.msrb.mxu0 %v5851_v5  ;;  %2242 = vmatpush.msrb.mxu1 %v5853_v11  ;;  %v1694_v46 = vld [vmem:[#allocation2 + $0x30] sm:$0xc0]  ;;  %v5937_v2 = vld [vmem:[#allocation4 + $0xe8] sm:$0xff] }
 0x25e   :  { %2262 = vmatpush.msrb.mxu2 %v5855_v12  ;;  %2282 = vmatpush.msrb.mxu3 %v5859_v13 }
 0x25f   :  { %v4241_v6 = vpop.eup %4240  ;;  %2223 = vmatpush.msrb.mxu0 %v5863_v14  ;;  %2243 = vmatpush.msrb.mxu1 %v5865_v15 }
 0x260   :  { %v1668_v31 = vadd.f32 1.0, %v4241_v6  ;;  %v4243_v30 = vpop.eup %4242  ;;  %2263 = vmatpush.msrb.mxu2 %v5867_v52  ;;  %2283 = vmatpush.msrb.mxu3 %v5871_v19  ;;  %v5901_v6 = vld [vmem:[#allocation4 + $0x148] sm:$0xff] }
 0x261   :  { %v4245_v34 = vpop.eup %4244  ;;  %v1631_v35 = vmul.f32 %v4243_v30, %v1629_v32  ;;  %vm1636_vm13 = vweird.f32 %v4243_v30  ;;  %2224 = vmatpush.msrb.mxu0 %v5875_v18  ;;  %2244 = vmatpush.msrb.mxu1 %v5877_v20  ;;  %v5889_v32 = vld [vmem:[#allocation4 + $0x168] sm:$0xff] }
 0x262   :  { %4246 = vrcp.f32 %v1668_v31  ;;  %v1650_v38 = vmul.f32 %v4245_v34, %v1648_v33  ;;  %vm1655_vm14 = vweird.f32 %v4245_v34  ;;  %vm1637_vm1 = vmor %vm1635_vm15, %vm1636_vm13  ;;  %v1680_v7 = vand.u32 2147483648, %v1668_v31  ;;  %2264 = vmatpush.msrb.mxu2 %v5879_v61  ;;  %2284 = vmatpush.msrb.mxu3 %v5883_v28  ;;  %v5891_v33 = vld [vmem:[#allocation4 + $0x170] sm:$0xff] }
 0x263   :  { %v1632_v39 = vsub.f32 1.0, %v1631_v35  ;;  %4248 = vtanh.f32 %v1558_v45  ;;  %vm1656_vm2 = vmor %vm1654_vm0, %vm1655_vm14  ;;  %vm1674_vm6 = vweird.f32 %v1668_v31  ;;  %v1678_v24 = vand.u32 2147483647, %v1668_v31  ;;  %2225 = vmatpush.msrb.mxu0 %v5887_v55  ;;  %2245 = vmatpush.msrb.mxu1 %v5889_v32  ;;  %v5913_v45 = vld [vmem:[#allocation4 + $0x128] sm:$0xff]  ;;  %v5919_v35 = vld [vmem:[#allocation4 + $0x138] sm:$0xff] }
 0x264   :  { %v1651_v42 = vsub.f32 1.0, %v1650_v38  ;;  %v1681_v48 = vor.u32 1.1754944e-38, %v1680_v7  ;;  %2265 = vmatpush.msrb.mxu2 %v5891_v33  ;;  %2285 = vmatpush.msrb.mxu3 %v5895_v37  ;;  %v5923_v38 = vld [vmem:[#allocation4 + $0x100] sm:$0xff] }
 0x265   :  { %v1633_v47 = vmul.f32 %v4243_v30, %v1632_v39  ;;  %vm1679_vm8 = vcmp.eq.f32.partialorder %v1678_v24, 8.507059e+37  ;;  %2226 = vmatpush.msrb.mxu0 %v5899_v40  ;;  %2246 = vmatpush.msrb.mxu1 %v5901_v6  ;;  %v5925_v39 = vld [vmem:[#allocation4 + $0x108] sm:$0xff]  ;;  %v5971_v7 = vld [vmem:[#allocation4 + $0x80] sm:$0xff] }
 0x266   :  { %v1652_v51 = vmul.f32 %v4245_v34, %v1651_v42  ;;  %2266 = vmatpush.msrb.mxu2 %v5903_v4  ;;  %v5927_v42 = vld [vmem:[#allocation4 + $0x110] sm:$0xff]  ;;  %7811 = vst [vmem:[#allocation21_spill] sm:$0xff] %v5971_v7  ;;  %v5973_v24 = vld [vmem:[#allocation4 + $0x88] sm:$0xff] }
 0x267   :  { %v1634_v3 = vadd.f32 %v4243_v30, %v1633_v47  ;;  %2247 = vmatpush.msrb.mxu1 %v5913_v45  ;;  %7812 = vst [vmem:[#allocation14_spill] sm:$0xff] %v5973_v24 }
 0x268   :  { %v4247_v16 = vpop.eup %4246  ;;  %v1653_v21 = vadd.f32 %v4245_v34, %v1652_v51  ;;  %v5935_v51 = vld [vmem:[#allocation4 + $0xe0] sm:$0xff] }
 0x269   :  { %v1670_v53 = vmul.f32 %v4247_v16, %v1668_v31  ;;  %v1638_v58 = vsel %vm1637_vm1, %v4243_v30, %v1634_v3  ;;  %v4249_v59 = vpop.eup %4248  ;;  %vm1675_vm5 = vweird.f32 %v4247_v16  ;;  %v5907_v31 = vld [vmem:[#allocation4 + $0x158] sm:$0xff]  ;;  %v5911_v30 = vld [vmem:[#allocation4 + $0x120] sm:$0xff]  ;;  %2248 = vmatpush.msrb.mxu1 %v5925_v39 }
 0x26a   :  { %v1643_v60 = vsel %vm1640_vm3, %v1642_v49, %v1638_v58  ;;  %v1657_v62 = vsel %vm1656_vm2, %v4245_v34, %v1653_v21  ;;  %vm1676_vm7 = vmor %vm1674_vm6, %vm1675_vm5  ;;  %2286 = vmatpush.msrb.mxu3 %v5907_v31  ;;  %v5915_v34 = vld [vmem:[#allocation4 + $0x130] sm:$0xff]  ;;  %2227 = vmatpush.msrb.mxu0 %v5911_v30  ;;  %v1695_v49 = vld [vmem:[#allocation2] sm:$0xc0] }
 0x26b   :  { %v1671_v0 = vsub.f32 1.0, %v1670_v53  ;;  %v1662_v1 = vsel %vm1659_vm4, %v1661_v56, %v1657_v62  ;;  %v1688_v23 = vmul.f32 %v4249_v59, %v1643_v60  ;;  %2267 = vmatpush.msrb.mxu2 %v5915_v34  ;;  %2249 = vmatpush.msrb.mxu1 %v5937_v2  ;;  %v5943_v53 = vld [vmem:[#allocation4 + $0xf8] sm:$0xff]  ;;  %v5949_v56 = vld [vmem:[#allocation4 + $0xc8] sm:$0xff]  ;;  %v5951_v58 = vld [vmem:[#allocation4 + $0xd0] sm:$0xff] }
 0x26c   :  { %v1687_v44 = vmul.f32 %v1685_v54, %v1662_v1  ;;  %2287 = vmatpush.msrb.mxu3 %v5919_v35  ;;  %2228 = vmatpush.msrb.mxu0 %v5923_v38  ;;  %v5947_v54 = vld [vmem:[#allocation4 + $0xc0] sm:$0xff]  ;;  %7804 = vst [vmem:[#allocation10_spill] sm:$0xff] %v5949_v56  ;;  %v5955_v62 = vld [vmem:[#allocation4 + $0xd8] sm:$0xff]  ;;  %v5961_v1 = vld [vmem:[#allocation4 + $0xa8] sm:$0xff] }
 0x26d   :  { %v1672_v36 = vmul.f32 %v4247_v16, %v1671_v0  ;;  %2268 = vmatpush.msrb.mxu2 %v5927_v42  ;;  %7805 = vst [vmem:[#allocation11_spill] sm:$0xff] %v5951_v58  ;;  %2250 = vmatpush.msrb.mxu1 %v5949_v56  ;;  %v5959_v0 = vld [vmem:[#allocation4 + $0xa0] sm:$0xff] }
 0x26e   :  { %v5836_v8 = vadd.f32 %v1688_v23, %v1687_v44  ;;  %2288 = vmatpush.msrb.mxu3 %v5931_v43  ;;  %2229 = vmatpush.msrb.mxu0 %v5935_v51  ;;  %7806 = vst [vmem:[#allocation16_spill] sm:$0xff] %v5955_v62  ;;  %v5963_v23 = vld [vmem:[#allocation4 + $0xb0] sm:$0xff] }
 0x26f   :  { %v1673_v63 = vadd.f32 %v4247_v16, %v1672_v36  ;;  %7807 = vst [vmem:[#allocation17_spill] sm:$0xff] %v5959_v0  ;;  %2251 = vmatpush.msrb.mxu1 %v5961_v1 }
 0x270   :  { %4250 = vtanh.f32 %v5836_v8  ;;  %2289 = vmatpush.msrb.mxu3 %v5943_v53  ;;  %2230 = vmatpush.msrb.mxu0 %v5947_v54  ;;  %7808 = vst [vmem:[#allocation12_spill] sm:$0xff] %v5961_v1 }
 0x271   :  { %v1677_v27 = vsel %vm1676_vm7, %v4247_v16, %v1673_v63  ;;  %v5939_v16 = vld [vmem:[#allocation4 + $0xf0] sm:$0xff]  ;;  %7809 = vst [vmem:[#allocation13_spill] sm:$0xff] %v5963_v23  ;;  %v5967_v63 = vld [vmem:[#allocation4 + $0xb8] sm:$0xff]  ;;  %2252 = vmatpush.msrb.mxu1 %v5973_v24 }
 0x272   :  { %v1682_v25 = vsel %vm1679_vm8, %v1681_v48, %v1677_v27  ;;  %2269 = vmatpush.msrb.mxu2 %v5939_v16  ;;  %2290 = vmatpush.msrb.mxu3 %v5955_v62  ;;  %7810 = vst [vmem:[#allocation20_spill] sm:$0xff] %v5967_v63  ;;  %v5975_v27 = vld [vmem:[#allocation4 + $0x90] sm:$0xff]  ;;  %v6154_v62 = vld [vmem:[#allocation6 + $0x108] sm:$0xff] }
 0x273   :  { %2231 = vmatpush.msrb.mxu0 %v5959_v0  ;;  %7813 = vst [vmem:[#allocation15_spill] sm:$0xff] %v5975_v27  ;;  %v6079_v24 = vld [vmem:[#allocation6 + $0x190] sm:$0xff]  ;;  %v6152_v0 = vld [vmem:[#allocation6 + $0x100] sm:$0xff] }
 0x274   :  { %2270 = vmatpush.msrb.mxu2 %v5951_v58  ;;  %2291 = vmatpush.msrb.mxu3 %v5967_v63  ;;  %7845 = vst [vmem:[#allocation57_spill] sm:$0xff] %v6079_v24 }
 0x275   :  { %2232 = vmatpush.msrb.mxu0 %v5971_v7 }
 0x276   :  { %v4251_v17 = vpop.eup %4250  ;;  %2271 = vmatpush.msrb.mxu2 %v5963_v23  ;;  %v6129_v23 = vld [vmem:[#allocation6 + $0x128] sm:$0xff] }
 0x277   :  { %v1691_v22 = vmul.f32 %v4251_v17, %v1682_v25  ;;  %v5979_v17 = vld [vmem:[#allocation4 + $0x98] sm:$0xff]  ;;  %7856 = vst [vmem:[#allocation67_spill] sm:$0xff] %v6129_v23 }
 0x278   :  { %7814 = vst [vmem:[#allocation24_spill] sm:$0xff] %v5979_v17  ;;  %v1697_v25 = vld [vmem:[#allocation2 + $0x18] sm:$0xc0]  ;;  %2272 = vmatpush.msrb.mxu2 %v5975_v27  ;;  %2292 = vmatpush.msrb.mxu3 %v5979_v17  ;;  %v6077_v27 = vld [vmem:[#allocation6 + $0x188] sm:$0xff] }
 0x279   :  { %1693 = vst [vmem:[#allocation3] sm:$0xc] %v1691_v22  ;;  %v1930_v57 = vrot.slane %v1691_v22, 2 }
 0x27a   :  { %7844 = vst [vmem:[#allocation56_spill] sm:$0xff] %v6077_v27 }
 0x27b   :  { %1948 = vmatmul.f32.vlgmr.msra.gmra.mxu0 %v1930_v57  ;;  %1968 = vmatmul.f32.vlgmr.msra.gmra.mxu1 %v1930_v57 }
 0x27c   :  { %1988 = vmatmul.f32.vlgmr.msra.gmra.mxu2 %v1930_v57  ;;  %2008 = vmatmul.f32.vlgmr.msra.gmra.mxu3 %v1930_v57  ;;  %v5983_v57 = vld [vmem:[#allocation4 + $0x60] sm:$0xff] }
 0x27d   :  { %7815 = vst [vmem:[#allocation25_spill] sm:$0xff] %v5983_v57  ;;  %2233 = vmatpush.msrb.mxu0 %v5983_v57  ;;  %v1696_v57 = vld [vmem:[#allocation2 + $0x58] sm:$0xc0] }
 0x2d6   :  { %v1782_v47 = vpop.f32.mrf.mxu0  ;;  %v1802_v50 = vpop.f32.mrf.mxu1 }
 0x2d7   :  { %v1849_v3 = vrot.slane %v1782_v47, 2  ;;  %v1850_v21 = vrot.slane %v1802_v50, 2  ;;  %v5987_v47 = vld [vmem:[#allocation4 + $0x70] sm:$0xff] }
 0x2d8   :  { %7817 = vst [vmem:[#allocation19_spill] sm:$0xff] %v5987_v47  ;;  %2273 = vmatpush.msrb.mxu2 %v5987_v47 }
 0x2d9   :  { %v1857_v59 = vadd.f32 %v1849_v3, %v1694_v46  ;;  %v1858_v60 = vadd.f32 %v1850_v21, %v1695_v49  ;;  %v5985_v46 = vld [vmem:[#allocation4 + $0x68] sm:$0xff]  ;;  %v5991_v3 = vld [vmem:[#allocation4 + $0x78] sm:$0xff]  ;;  %v5995_v49 = vld [vmem:[#allocation4 + $0x40] sm:$0xff] }
 0x2da   :  { %7816 = vst [vmem:[#allocation18_spill] sm:$0xff] %v5985_v46  ;;  %2253 = vmatpush.msrb.mxu1 %v5985_v46  ;;  %2293 = vmatpush.msrb.mxu3 %v5991_v3  ;;  %v5997_v21 = vld [vmem:[#allocation4 + $0x48] sm:$0xff]  ;;  %v6051_v46 = vld [vmem:[#allocation6 + $0x1d0] sm:$0xff] }
 0x2db   :  { %v4120_v44 = vmul.f32 -1.442695, %v1857_v59  ;;  %v4121_v36 = vmul.f32 -1.442695, %v1858_v60  ;;  %7818 = vst [vmem:[#allocation28_spill] sm:$0xff] %v5991_v3  ;;  %v5999_v59 = vld [vmem:[#allocation4 + $0x50] sm:$0xff]  ;;  %2234 = vmatpush.msrb.mxu0 %v5995_v49 }
 0x2dc   :  { %7819 = vst [vmem:[#allocation29_spill] sm:$0xff] %v5995_v49  ;;  %2254 = vmatpush.msrb.mxu1 %v5997_v21  ;;  %2274 = vmatpush.msrb.mxu2 %v5999_v59  ;;  %v6025_v49 = vld [vmem:[#allocation4 + $0x8] sm:$0xff] }
 0x2dd   :  { %4252 = vpow2.f32 %v4120_v44  ;;  %v1842_v48 = vpop.f32.mrf.mxu3  ;;  %7820 = vst [vmem:[#allocation22_spill] sm:$0xff] %v5997_v21  ;;  %v6003_v44 = vld [vmem:[#allocation4 + $0x58] sm:$0xff] }
 0x2de   :  { %4254 = vpow2.f32 %v4121_v36  ;;  %v1852_v22 = vrot.slane %v1842_v48, 2  ;;  %7821 = vst [vmem:[#allocation23_spill] sm:$0xff] %v5999_v59  ;;  %2294 = vmatpush.msrb.mxu3 %v6003_v44  ;;  %v6007_v48 = vld [vmem:[#allocation4 + $0x20] sm:$0xff]  ;;  %v1822_v59 = vpop.f32.mrf.mxu2 }
 0x2df   :  { %7822 = vst [vmem:[#allocation32_spill] sm:$0xff] %v6003_v44  ;;  %2235 = vmatpush.msrb.mxu0 %v6007_v48  ;;  %v6023_v44 = vld [vmem:[#allocation4] sm:$0xff] }
 0x2e0   :  { %v1860_v50 = vadd.f32 %v1852_v22, %v1697_v25  ;;  %7823 = vst [vmem:[#allocation33_spill] sm:$0xff] %v6007_v48  ;;  %v6009_v25 = vld [vmem:[#allocation4 + $0x28] sm:$0xff]  ;;  %v6011_v22 = vld [vmem:[#allocation4 + $0x30] sm:$0xff]  ;;  %v1851_v48 = vrot.slane %v1822_v59, 2  ;;  %v6059_v59 = vld [vmem:[#allocation6 + $0x1a0] sm:$0xff] }
 0x2e1   :  { %7824 = vst [vmem:[#allocation26_spill] sm:$0xff] %v6009_v25  ;;  %2255 = vmatpush.msrb.mxu1 %v6009_v25  ;;  %2275 = vmatpush.msrb.mxu2 %v6011_v22  ;;  %v6036_v25 = vld [vmem:[#allocation6 + $0x1e8] sm:$0xff] }
 0x2e2   :  { %v4122_v60 = vmul.f32 -1.442695, %v1860_v50  ;;  %7825 = vst [vmem:[#allocation27_spill] sm:$0xff] %v6011_v22  ;;  %v6017_v50 = vld [vmem:[#allocation4 + $0x38] sm:$0xff]  ;;  %2236 = vmatpush.msrb.mxu0 %v6023_v44 }
 0x2e3   :  { %v4253_v36 = vpop.eup %4252  ;;  %7826 = vst [vmem:[#allocation36_spill] sm:$0xff] %v6017_v50  ;;  %2295 = vmatpush.msrb.mxu3 %v6017_v50  ;;  %2256 = vmatpush.msrb.mxu1 %v6025_v49  ;;  %v6041_v50 = vld [vmem:[#allocation6 + $0x1f0] sm:$0xff]  ;;  %v6043_v22 = vld [vmem:[#allocation6 + $0x1f8] sm:$0xff] }
 0x2e4   :  { %v4255_v3 = vpop.eup %4254  ;;  %v6013_v47 = vadd.f32 1.0, %v4253_v36  ;;  %4256 = vpow2.f32 %v4122_v60  ;;  %7827 = vst [vmem:[#allocation37_spill] sm:$0xff] %v6023_v44  ;;  %v6027_v36 = vld [vmem:[#allocation4 + $0x10] sm:$0xff]  ;;  %v6032_v60 = vld [vmem:[#allocation4 + $0x18] sm:$0xff]  ;;  %v6049_v44 = vld [vmem:[#allocation6 + $0x1c8] sm:$0xff] }
 0x2e5   :  { %v6019_v21 = vadd.f32 1.0, %v4255_v3  ;;  %7828 = vst [vmem:[#allocation40_spill] sm:$0xff] %v6025_v49  ;;  %v6034_v3 = vld [vmem:[#allocation6 + $0x1e0] sm:$0xff]  ;;  %2276 = vmatpush.msrb.mxu2 %v6027_v36  ;;  %2296 = vmatpush.msrb.mxu3 %v6032_v60 }
 0x2e6   :  { %7829 = vst [vmem:[#allocation41_spill] sm:$0xff] %v6027_v36  ;;  %4258 = vrcp.f32 %v6013_v47  ;;  %2373 = vmatpush.msra.mxu0 %v6034_v3  ;;  %2393 = vmatpush.msra.mxu1 %v6036_v25  ;;  %v6047_v49 = vld [vmem:[#allocation6 + $0x1c0] sm:$0xff]  ;;  %vm2025_vm11 = vweird.f32 %v6013_v47 }
 0x2e7   :  { %7830 = vst [vmem:[#allocation30_spill] sm:$0xff] %v6032_v60  ;;  %4260 = vrcp.f32 %v6019_v21  ;;  %2413 = vmatpush.msra.mxu2 %v6041_v50  ;;  %2433 = vmatpush.msra.mxu3 %v6043_v22  ;;  %v6055_v60 = vld [vmem:[#allocation6 + $0x1d8] sm:$0xff]  ;;  %vm2044_vm13 = vweird.f32 %v6019_v21 }
 0x2e8   :  { %7831 = vst [vmem:[#allocation31_spill] sm:$0xff] %v6034_v3  ;;  %2374 = vmatpush.msra.mxu0 %v6047_v49  ;;  %2394 = vmatpush.msra.mxu1 %v6049_v44  ;;  %v6063_v3 = vld [vmem:[#allocation6 + $0x1b0] sm:$0xff] }
 0x2e9   :  { %7832 = vst [vmem:[#allocation44_spill] sm:$0xff] %v6036_v25  ;;  %v6061_v25 = vld [vmem:[#allocation6 + $0x1a8] sm:$0xff]  ;;  %2414 = vmatpush.msra.mxu2 %v6051_v46  ;;  %2434 = vmatpush.msra.mxu3 %v6055_v60 }
 0x2ea   :  { %7833 = vst [vmem:[#allocation45_spill] sm:$0xff] %v6041_v50  ;;  %v4257_v36 = vpop.eup %4256  ;;  %2375 = vmatpush.msra.mxu0 %v6059_v59  ;;  %2395 = vmatpush.msra.mxu1 %v6061_v25 }
 0x2eb   :  { %7834 = vst [vmem:[#allocation34_spill] sm:$0xff] %v6043_v22  ;;  %v6065_v17 = vadd.f32 1.0, %v4257_v36  ;;  %v6069_v22 = vld [vmem:[#allocation6 + $0x1b8] sm:$0xff]  ;;  %2415 = vmatpush.msra.mxu2 %v6063_v3 }
 0x2ec   :  { %7835 = vst [vmem:[#allocation35_spill] sm:$0xff] %v6047_v49  ;;  %v6071_v50 = vpop.eup %4258  ;;  %v1859_v49 = vadd.f32 %v1851_v48, %v1696_v57  ;;  %2435 = vmatpush.msra.mxu3 %v6069_v22  ;;  %v6088_v57 = vld [vmem:[#allocation6 + $0x198] sm:$0xff]  ;;  %2396 = vmatpush.msra.mxu1 %v6077_v27  ;;  %v6108_v27 = vld [vmem:[#allocation6 + $0x140] sm:$0xff] }
 0x2ed   :  { %7836 = vst [vmem:[#allocation48_spill] sm:$0xff] %v6049_v44  ;;  %v6075_v44 = vld [vmem:[#allocation6 + $0x180] sm:$0xff]  ;;  %v6081_v36 = vpop.eup %4260  ;;  %4262 = vrcp.f32 %v6065_v17  ;;  %2416 = vmatpush.msra.mxu2 %v6079_v24  ;;  %vm2026_vm9 = vweird.f32 %v6071_v50  ;;  %v6112_v24 = vld [vmem:[#allocation6 + $0x150] sm:$0xff]  ;;  %vm2064_vm2 = vweird.f32 %v6065_v17 }
 0x2ee   :  { %7837 = vst [vmem:[#allocation49_spill] sm:$0xff] %v6051_v46  ;;  %v2040_v48 = vmul.f32 %v6081_v36, %v6019_v21  ;;  %2376 = vmatpush.msra.mxu0 %v6075_v44  ;;  %2436 = vmatpush.msra.mxu3 %v6088_v57  ;;  %4264 = vtanh.f32 %v1859_v49  ;;  %v6119_v49 = vld [vmem:[#allocation6 + $0x158] sm:$0xff]  ;;  %vm2045_vm10 = vweird.f32 %v6081_v36  ;;  %vm6138_vm12 = vmor %vm2025_vm11, %vm2026_vm9 }
 0x2ef   :  { %7838 = vst [vmem:[#allocation38_spill] sm:$0xff] %v6055_v60  ;;  %v2021_v60 = vmul.f32 %v6071_v50, %v6013_v47  ;;  %vm6161_vm14 = vmor %vm2044_vm13, %vm2045_vm10 }
 0x2f0   :  { %7839 = vst [vmem:[#allocation39_spill] sm:$0xff] %v6059_v59  ;;  %v6096_v59 = vld [vmem:[#allocation6 + $0x168] sm:$0xff]  ;;  %v2041_v7 = vsub.f32 1.0, %v2040_v48  ;;  %v2029_v48 = vand.u32 2147483647, %v6013_v47 }
 0x2f1   :  { %7840 = vst [vmem:[#allocation52_spill] sm:$0xff] %v6061_v25  ;;  %v6094_v25 = vld [vmem:[#allocation6 + $0x160] sm:$0xff]  ;;  %v2022_v46 = vsub.f32 1.0, %v2021_v60  ;;  %2397 = vmatpush.msra.mxu1 %v6096_v59  ;;  %v6110_v60 = vld [vmem:[#allocation6 + $0x148] sm:$0xff] }
 0x2f2   :  { %7841 = vst [vmem:[#allocation53_spill] sm:$0xff] %v6063_v3  ;;  %v6100_v3 = vld [vmem:[#allocation6 + $0x170] sm:$0xff]  ;;  %2377 = vmatpush.msra.mxu0 %v6094_v25  ;;  %vm2030_vm15 = vcmp.eq.f32.partialorder %v2029_v48, 8.507059e+37 }
 0x2f3   :  { %7842 = vst [vmem:[#allocation42_spill] sm:$0xff] %v6069_v22  ;;  %v6102_v22 = vld [vmem:[#allocation6 + $0x178] sm:$0xff]  ;;  %v2023_v63 = vmul.f32 %v6071_v50, %v2022_v46  ;;  %2417 = vmatpush.msra.mxu2 %v6100_v3  ;;  %2398 = vmatpush.msra.mxu1 %v6110_v60  ;;  %v6127_v46 = vld [vmem:[#allocation6 + $0x120] sm:$0xff]  ;;  %v6181_v48 = vld [vmem:[#allocation6 + $0xf0] sm:$0xff] }
 0x2f4   :  { %7843 = vst [vmem:[#allocation43_spill] sm:$0xff] %v6075_v44  ;;  %v2031_v44 = vand.u32 2147483648, %v6013_v47  ;;  %2437 = vmatpush.msra.mxu3 %v6102_v22  ;;  %2378 = vmatpush.msra.mxu0 %v6108_v27 }
 0x2f5   :  { %7846 = vst [vmem:[#allocation46_spill] sm:$0xff] %v6088_v57  ;;  %v2050_v57 = vand.u32 2147483648, %v6019_v21  ;;  %2418 = vmatpush.msra.mxu2 %v6112_v24  ;;  %2399 = vmatpush.msra.mxu1 %v6129_v23  ;;  %v6170_v23 = vld [vmem:[#allocation6 + $0x118] sm:$0xff] }
 0x2f6   :  { %7847 = vst [vmem:[#allocation47_spill] sm:$0xff] %v6094_v25  ;;  %v2048_v25 = vand.u32 2147483647, %v6019_v21  ;;  %2438 = vmatpush.msra.mxu3 %v6119_v49  ;;  %2379 = vmatpush.msra.mxu0 %v6127_v46 }
 0x2f7   :  { %7848 = vst [vmem:[#allocation60_spill] sm:$0xff] %v6096_v59  ;;  %v2042_v59 = vmul.f32 %v6081_v36, %v2041_v7  ;;  %v2024_v7 = vadd.f32 %v6071_v50, %v2023_v63  ;;  %2400 = vmatpush.msra.mxu1 %v6154_v62 }
 0x2f8   :  { %7849 = vst [vmem:[#allocation50_spill] sm:$0xff] %v6100_v3  ;;  %v6131_v3 = vld [vmem:[#allocation6 + $0x130] sm:$0xff]  ;;  %vm2049_vm0 = vcmp.eq.f32.partialorder %v2048_v25, 8.507059e+37  ;;  %2380 = vmatpush.msra.mxu0 %v6152_v0 }
 0x2f9   :  { %7850 = vst [vmem:[#allocation51_spill] sm:$0xff] %v6102_v22  ;;  %v6133_v22 = vpop.eup %4262  ;;  %v2043_v1 = vadd.f32 %v6081_v36, %v2042_v59  ;;  %v2028_v59 = vsel %vm6138_vm12, %v6071_v50, %v2024_v7  ;;  %2419 = vmatpush.msra.mxu2 %v6131_v3  ;;  %v6177_v50 = vld [vmem:[#allocation6 + $0xe0] sm:$0xff] }
 0x2fa   :  { %7851 = vst [vmem:[#allocation54_spill] sm:$0xff] %v6108_v27  ;;  %v2032_v27 = vor.u32 1.1754944e-38, %v2031_v44  ;;  %v2060_v63 = vmul.f32 %v6133_v22, %v6065_v17  ;;  %v2051_v44 = vor.u32 1.1754944e-38, %v2050_v57  ;;  %v6179_v57 = vld [vmem:[#allocation6 + $0xe8] sm:$0xff]  ;;  %2381 = vmatpush.msra.mxu0 %v6177_v50  ;;  %vm2065_vm1 = vweird.f32 %v6133_v22 }
 0x2fb   :  { %7852 = vst [vmem:[#allocation55_spill] sm:$0xff] %v6110_v60  ;;  %v6144_v60 = vld [vmem:[#allocation6 + $0x138] sm:$0xff]  ;;  %v2047_v58 = vsel %vm6161_vm14, %v6081_v36, %v2043_v1  ;;  %v1949_v36 = vpop.f32.mrf.mxu0  ;;  %2401 = vmatpush.msra.mxu1 %v6179_v57  ;;  %vm6238_vm3 = vmor %vm2064_vm2, %vm2065_vm1 }
 0x2fc   :  { %7853 = vst [vmem:[#allocation65_spill] sm:$0xff] %v6112_v24  ;;  %v6156_v24 = vld [vmem:[#allocation6 + $0x110] sm:$0xff]  ;;  %2439 = vmatpush.msra.mxu3 %v6144_v60  ;;  %v2061_v56 = vsub.f32 1.0, %v2060_v63  ;;  %v2052_v7 = vsel %vm2049_vm0, %v2051_v44, %v2047_v58  ;;  %v6185_v1 = vld [vmem:[#allocation6 + $0xf8] sm:$0xff]  ;;  %v1969_v63 = vpop.f32.mrf.mxu1  ;;  %v6192_v58 = vld [vmem:[#allocation6 + $0xc8] sm:$0xff] }
 0x2fd   :  { %7854 = vst [vmem:[#allocation66_spill] sm:$0xff] %v6119_v49  ;;  %v2075_v49 = vrot.slane %v5829_v41, 6  ;;  %v2033_v41 = vsel %vm2030_vm15, %v2032_v27, %v2028_v59  ;;  %v1862_v27 = vld [vmem:[#allocation2 + $0x70] sm:$0x3]  ;;  %2420 = vmatpush.msra.mxu2 %v6156_v24  ;;  %v6190_v59 = vld [vmem:[#allocation6 + $0xc0] sm:$0xff]  ;;  %2402 = vmatpush.msra.mxu1 %v6192_v58 }
 0x2fe   :  { %7855 = vst [vmem:[#allocation59_spill] sm:$0xff] %v6127_v46  ;;  %v4265_v46 = vpop.eup %4264  ;;  %2440 = vmatpush.msra.mxu3 %v6170_v23  ;;  %v2062_v21 = vmul.f32 %v6133_v22, %v2061_v56  ;;  %2382 = vmatpush.msra.mxu0 %v6190_v59  ;;  %v6204_v56 = vld [vmem:[#allocation6 + $0xa0] sm:$0xff] }
 0x2ff   :  { %7859 = vst [vmem:[#allocation61_spill] sm:$0xff] %v6144_v60  ;;  %v2078_v47 = vmul.f32 %v4265_v46, %v2033_v41  ;;  %v1861_v60 = vld [vmem:[#allocation2 + $0x60] sm:$0x3]  ;;  %v2077_v25 = vmul.f32 %v2075_v49, %v2052_v7  ;;  %v6194_v46 = vld [vmem:[#allocation6 + $0xd0] sm:$0xff]  ;;  %v2013_v41 = vadd.f32 %v1969_v63, %v1862_v27  ;;  %2421 = vmatpush.msra.mxu2 %v6181_v48  ;;  %v6198_v49 = vld [vmem:[#allocation6 + $0xd8] sm:$0xff] }
 0x300   :  { %7862 = vst [vmem:[#allocation62_spill] sm:$0xff] %v6177_v50  ;;  %v2012_v44 = vadd.f32 %v1949_v36, %v1861_v60  ;;  %2441 = vmatpush.msra.mxu3 %v6185_v1  ;;  %v6208_v50 = vld [vmem:[#allocation6 + $0xb0] sm:$0xff]  ;;  %v2063_v36 = vadd.f32 %v6133_v22, %v2062_v21  ;;  %2383 = vmatpush.msra.mxu0 %v6204_v56  ;;  %v6220_v63 = vld [vmem:[#allocation6 + $0x80] sm:$0xff] }
 0x301   :  { %7863 = vst [vmem:[#allocation63_spill] sm:$0xff] %v6179_v57  ;;  %v6200_v7 = vadd.f32 %v2078_v47, %v2077_v25  ;;  %v6206_v57 = vld [vmem:[#allocation6 + $0xa8] sm:$0xff]  ;;  %v4124_v27 = vmul.f32 -1.442695, %v2013_v41  ;;  %2422 = vmatpush.msra.mxu2 %v6194_v46  ;;  %v6214_v47 = vld [vmem:[#allocation6 + $0xb8] sm:$0xff]  ;;  %v2070_v25 = vand.u32 2147483648, %v6065_v17 }
 0x302   :  { %7864 = vst [vmem:[#allocation64_spill] sm:$0xff] %v6185_v1  ;;  %v4123_v60 = vmul.f32 -1.442695, %v2012_v44  ;;  %2442 = vmatpush.msra.mxu3 %v6198_v49  ;;  %2403 = vmatpush.msra.mxu1 %v6206_v57  ;;  %v6222_v44 = vld [vmem:[#allocation6 + $0x88] sm:$0xff]  ;;  %v6224_v21 = vld [vmem:[#allocation6 + $0x90] sm:$0xff]  ;;  %v6261_v1 = vld [vmem:[#allocation6 + $0x58] sm:$0xff] }
 0x303   :  { %7865 = vst [vmem:[#allocation68_spill] sm:$0xff] %v6190_v59  ;;  %4266 = vtanh.f32 %v6200_v7  ;;  %v2068_v41 = vand.u32 2147483647, %v6065_v17  ;;  %2423 = vmatpush.msra.mxu2 %v6208_v50  ;;  %2384 = vmatpush.msra.mxu0 %v6220_v63  ;;  %v6244_v17 = vld [vmem:[#allocation6 + $0x70] sm:$0xff] }
 0x304   :  { %7866 = vst [vmem:[#allocation69_spill] sm:$0xff] %v6192_v58  ;;  %4268 = vpow2.f32 %v4123_v60  ;;  %2443 = vmatpush.msra.mxu3 %v6214_v47  ;;  %2404 = vmatpush.msra.mxu1 %v6222_v44  ;;  %v6246_v60 = vld [vmem:[#allocation6 + $0x78] sm:$0xff]  ;;  %v6255_v58 = vld [vmem:[#allocation6 + $0x48] sm:$0xff]  ;;  %v6259_v59 = vld [vmem:[#allocation6 + $0x50] sm:$0xff] }
 0x305   :  { %7867 = vst [vmem:[#allocation70_spill] sm:$0xff] %v6194_v46  ;;  %4270 = vpow2.f32 %v4124_v27  ;;  %v2067_v27 = vsel %vm6238_vm3, %v6133_v22, %v2063_v36  ;;  %2424 = vmatpush.msra.mxu2 %v6224_v21  ;;  %v6253_v46 = vld [vmem:[#allocation6 + $0x40] sm:$0xff]  ;;  %vm2069_vm4 = vcmp.eq.f32.partialorder %v2068_v41, 8.507059e+37 }
 0x306   :  { %7868 = vst [vmem:[#allocation71_spill] sm:$0xff] %v6198_v49  ;;  %v6265_v22 = vld [vmem:[#allocation6 + $0x20] sm:$0xff]  ;;  %v6267_v49 = vld [vmem:[#allocation6 + $0x28] sm:$0xff] }
 0x307   :  { %7869 = vst [vmem:[#allocation72_spill] sm:$0xff] %v6200_v7  ;;  %v6230_v7 = vld [vmem:[#allocation6 + $0x98] sm:$0xff]  ;;  %2425 = vmatpush.msra.mxu2 %v6244_v17 }
 0x308   :  { %7870 = vst [vmem:[#allocation73_spill] sm:$0xff] %v6204_v56  ;;  %v6232_v56 = vld [vmem:[#allocation6 + $0x60] sm:$0xff]  ;;  %2444 = vmatpush.msra.mxu3 %v6230_v7 }
 0x309   :  { %7871 = vst [vmem:[#allocation74_spill] sm:$0xff] %v6206_v57  ;;  %v6234_v57 = vld [vmem:[#allocation6 + $0x68] sm:$0xff]  ;;  %2385 = vmatpush.msra.mxu0 %v6232_v56  ;;  %v4267_v36 = vpop.eup %4266  ;;  %2426 = vmatpush.msra.mxu2 %v6259_v59 }
 0x30a   :  { %7872 = vst [vmem:[#allocation75_spill] sm:$0xff] %v6208_v50  ;;  %v2009_v50 = vpop.f32.mrf.mxu3  ;;  %2405 = vmatpush.msra.mxu1 %v6234_v57  ;;  %2445 = vmatpush.msra.mxu3 %v6246_v60  ;;  %v4269_v41 = vpop.eup %4268 }
 0x30b   :  { %7873 = vst [vmem:[#allocation76_spill] sm:$0xff] %v6214_v47  ;;  %v1864_v47 = vld [vmem:[#allocation2 + $0x28] sm:$0x3]  ;;  %2386 = vmatpush.msra.mxu0 %v6253_v46 }
 0x30c   :  { %7874 = vst [vmem:[#allocation77_spill] sm:$0xff] %v6220_v63  ;;  %v2015_v63 = vadd.f32 %v2009_v50, %v1864_v47  ;;  %2406 = vmatpush.msra.mxu1 %v6255_v58  ;;  %2446 = vmatpush.msra.mxu3 %v6261_v1 }
 0x30d   :  { %7875 = vst [vmem:[#allocation78_spill] sm:$0xff] %v6222_v44  ;;  %v2071_v44 = vor.u32 1.1754944e-38, %v2070_v25  ;;  %v6271_v25 = vld [vmem:[#allocation6 + $0x30] sm:$0xff]  ;;  %2387 = vmatpush.msra.mxu0 %v6265_v22 }
 0x30e   :  { %7876 = vst [vmem:[#allocation79_spill] sm:$0xff] %v6232_v56  ;;  %v4125_v50 = vmul.f32 -1.442695, %v2015_v63  ;;  %v4271_v63 = vpop.eup %4270  ;;  %2407 = vmatpush.msra.mxu1 %v6267_v49  ;;  %2427 = vmatpush.msra.mxu2 %v6271_v25 }
 0x30f   :  { %7877 = vst [vmem:[#allocation80_spill] sm:$0xff] %v6234_v57  ;;  %v2072_v47 = vsel %vm2069_vm4, %v2071_v44, %v2067_v27  ;;  %v6273_v57 = vld [vmem:[#allocation6 + $0x38] sm:$0xff]  ;;  %v6281_v44 = vadd.f32 1.0, %v4269_v41  ;;  %v6285_v27 = vadd.f32 1.0, %v4271_v63 }
 0x310   :  { %7880 = vst [vmem:[#allocation81_spill] sm:$0xff] %v6244_v17  ;;  %v2081_v56 = vmul.f32 %v4267_v36, %v2072_v47  ;;  %v6279_v17 = vld [vmem:[#allocation6 + $0x8] sm:$0xff]  ;;  %4272 = vpow2.f32 %v4125_v50  ;;  %2447 = vmatpush.msra.mxu3 %v6273_v57  ;;  %v6292_v47 = vld [vmem:[#allocation6 + $0x10] sm:$0xff]  ;;  %v6294_v50 = vld [vmem:[#allocation6 + $0x18] sm:$0xff] }
 0x311   :  { %7881 = vst [vmem:[#allocation82_spill] sm:$0xff] %v6246_v60  ;;  %v6277_v60 = vld [vmem:[#allocation6] sm:$0xff]  ;;  %4274 = vrcp.f32 %v6281_v44  ;;  %2408 = vmatpush.msra.mxu1 %v6279_v17  ;;  %2428 = vmatpush.msra.mxu2 %v6292_v47  ;;  %v1863_v63 = vld [vmem:[#allocation2 + $0x78] sm:$0x3]  ;;  %vm2091_vm7 = vweird.f32 %v6281_v44  ;;  %vm2110_vm8 = vweird.f32 %v6285_v27 }
 0x312   :  { %7882 = vst [vmem:[#allocation83_spill] sm:$0xff] %v6273_v57  ;;  %v2219_v36 = vrot.slane %v2081_v56, 6  ;;  %2388 = vmatpush.msra.mxu0 %v6277_v60  ;;  %4276 = vrcp.f32 %v6285_v27  ;;  %2448 = vmatpush.msra.mxu3 %v6294_v50 }
 0x313   :  { %7883 = vst [vmem:[#allocation84_spill] sm:$0xff] %v6277_v60 }
 0x314   :  { %7884 = vst [vmem:[#allocation85_spill] sm:$0xff] %v6279_v17  ;;  %2237 = vmatmul.f32.vlgmr.msrb.gmra.mxu0 %v2219_v36  ;;  %2257 = vmatmul.f32.vlgmr.msrb.gmra.mxu1 %v2219_v36 }
 0x315   :  { %2148 = vst [vmem:[#allocation3 + $0x18] sm:$0xc0] %v2081_v56  ;;  %2277 = vmatmul.f32.vlgmr.msrb.gmra.mxu2 %v2219_v36  ;;  %2297 = vmatmul.f32.vlgmr.msrb.gmra.mxu3 %v2219_v36  ;;  %v1989_v56 = vpop.f32.mrf.mxu2 }
 0x316   :  { %7885 = vst [vmem:[#allocation58_spill] sm:$0xff] %v6294_v50  ;;  %v4273_v41 = vpop.eup %4272  ;;  %2671 = vmatpush.msrb.mxu0 %v5839_v26  ;;  %2691 = vmatpush.msrb.mxu1 %v5841_v29  ;;  %v2014_v57 = vadd.f32 %v1989_v56, %v1863_v63  ;;  %v7897_v56 = vld [vmem:[#allocation25_spill] sm:$0xff] }
 0x317   :  { %v6301_v17 = vadd.f32 1.0, %v4273_v41  ;;  %2711 = vmatpush.msrb.mxu2 %v5843_v9  ;;  %2731 = vmatpush.msrb.mxu3 %v5847_v10  ;;  %v4275_v60 = vpop.eup %4274  ;;  %v2097_v10 = vand.u32 2147483648, %v6281_v44  ;;  %v7898_v41 = vld [vmem:[#allocation18_spill] sm:$0xff] }
 0x318   :  { %2672 = vmatpush.msrb.mxu0 %v5851_v5  ;;  %2692 = vmatpush.msrb.mxu1 %v5853_v11  ;;  %v4277_v36 = vpop.eup %4276  ;;  %v2087_v50 = vmul.f32 %v4275_v60, %v6281_v44  ;;  %v2116_v5 = vand.u32 2147483648, %v6285_v27  ;;  %vm2092_vm5 = vweird.f32 %v4275_v60 }
 0x319   :  { %4278 = vrcp.f32 %v6301_v17  ;;  %2712 = vmatpush.msrb.mxu2 %v5855_v12  ;;  %2732 = vmatpush.msrb.mxu3 %v5859_v13  ;;  %v2106_v26 = vmul.f32 %v4277_v36, %v6285_v27  ;;  %v2095_v12 = vand.u32 2147483647, %v6281_v44  ;;  %vm2111_vm6 = vweird.f32 %v4277_v36  ;;  %vm2093_vm9 = vmor %vm2091_vm7, %vm2092_vm5  ;;  %v7896_v44 = vld [vmem:[#allocation24_spill] sm:$0xff] }
 0x31a   :  { %2673 = vmatpush.msrb.mxu0 %v5863_v14  ;;  %2693 = vmatpush.msrb.mxu1 %v5865_v15  ;;  %v2088_v29 = vsub.f32 1.0, %v2087_v50  ;;  %4280 = vtanh.f32 %v2014_v57  ;;  %v2114_v14 = vand.u32 2147483647, %v6285_v27  ;;  %vm2112_vm10 = vmor %vm2110_vm8, %vm2111_vm6  ;;  %vm2130_vm14 = vweird.f32 %v6301_v17 }
 0x31b   :  { %2713 = vmatpush.msrb.mxu2 %v5867_v52  ;;  %2733 = vmatpush.msrb.mxu3 %v5871_v19  ;;  %v2107_v9 = vsub.f32 1.0, %v2106_v26  ;;  %v2098_v19 = vor.u32 1.1754944e-38, %v2097_v10  ;;  %vm2096_vm11 = vcmp.eq.f32.partialorder %v2095_v12, 8.507059e+37  ;;  %v7900_v26 = vld [vmem:[#allocation28_spill] sm:$0xff]  ;;  %v7903_v10 = vld [vmem:[#allocation23_spill] sm:$0xff]  ;;  %v7906_v12 = vld [vmem:[#allocation26_spill] sm:$0xff] }
 0x31c   :  { %2674 = vmatpush.msrb.mxu0 %v5875_v18  ;;  %2694 = vmatpush.msrb.mxu1 %v5877_v20  ;;  %v2089_v11 = vmul.f32 %v4275_v60, %v2088_v29  ;;  %vm2115_vm12 = vcmp.eq.f32.partialorder %v2114_v14, 8.507059e+37  ;;  %v7901_v29 = vld [vmem:[#allocation29_spill] sm:$0xff]  ;;  %v7908_v14 = vld [vmem:[#allocation36_spill] sm:$0xff] }
 0x31d   :  { %2714 = vmatpush.msrb.mxu2 %v5879_v61  ;;  %2734 = vmatpush.msrb.mxu3 %v5883_v28  ;;  %v2108_v13 = vmul.f32 %v4277_v36, %v2107_v9  ;;  %v2117_v61 = vor.u32 1.1754944e-38, %v2116_v5  ;;  %v7902_v9 = vld [vmem:[#allocation22_spill] sm:$0xff]  ;;  %v7904_v5 = vld [vmem:[#allocation32_spill] sm:$0xff] }
 0x31e   :  { %2675 = vmatpush.msrb.mxu0 %v5887_v55  ;;  %2695 = vmatpush.msrb.mxu1 %v5889_v32  ;;  %v2090_v52 = vadd.f32 %v4275_v60, %v2089_v11  ;;  %v2141_v55 = vrot.slane %v5836_v8, 2  ;;  %v7905_v11 = vld [vmem:[#allocation33_spill] sm:$0xff] }
 0x31f   :  { %v6326_v15 = vpop.eup %4278  ;;  %2715 = vmatpush.msrb.mxu2 %v5891_v33  ;;  %2735 = vmatpush.msrb.mxu3 %v5895_v37  ;;  %v2109_v18 = vadd.f32 %v4277_v36, %v2108_v13  ;;  %v7907_v13 = vld [vmem:[#allocation27_spill] sm:$0xff] }
 0x320   :  { %v2126_v20 = vmul.f32 %v6326_v15, %v6301_v17  ;;  %2676 = vmatpush.msrb.mxu0 %v5899_v40  ;;  %2696 = vmatpush.msrb.mxu1 %v5901_v6  ;;  %v2094_v28 = vsel %vm2093_vm9, %v4275_v60, %v2090_v52  ;;  %v4281_v32 = vpop.eup %4280  ;;  %vm2131_vm13 = vweird.f32 %v6326_v15  ;;  %v7894_v60 = vld [vmem:[#allocation14_spill] sm:$0xff]  ;;  %v7910_v52 = vld [vmem:[#allocation40_spill] sm:$0xff] }
 0x321   :  { %2716 = vmatpush.msrb.mxu2 %v5903_v4  ;;  %2736 = vmatpush.msrb.mxu3 %v5907_v31  ;;  %v2099_v33 = vsel %vm2096_vm11, %v2098_v19, %v2094_v28  ;;  %v2113_v37 = vsel %vm2112_vm10, %v4277_v36, %v2109_v18  ;;  %vm2132_vm15 = vmor %vm2130_vm14, %vm2131_vm13  ;;  %v7899_v36 = vld [vmem:[#allocation19_spill] sm:$0xff]  ;;  %v7911_v19 = vld [vmem:[#allocation41_spill] sm:$0xff] }
 0x322   :  { %v2127_v57 = vsub.f32 1.0, %v2126_v20  ;;  %2677 = vmatpush.msrb.mxu0 %v5911_v30  ;;  %2697 = vmatpush.msrb.mxu1 %v5913_v45  ;;  %v2118_v40 = vsel %vm2115_vm12, %v2117_v61, %v2113_v37  ;;  %v2144_v6 = vmul.f32 %v4281_v32, %v2099_v33  ;;  %v2136_v45 = vand.u32 2147483648, %v6301_v17  ;;  %v7912_v18 = vld [vmem:[#allocation30_spill] sm:$0xff]  ;;  %v7913_v20 = vld [vmem:[#allocation31_spill] sm:$0xff]  ;;  %v7914_v61 = vld [vmem:[#allocation44_spill] sm:$0xff] }
 0x323   :  { %2717 = vmatpush.msrb.mxu2 %v5915_v34  ;;  %2737 = vmatpush.msrb.mxu3 %v5919_v35  ;;  %v2143_v8 = vmul.f32 %v2141_v55, %v2118_v40  ;;  %v7886_v34 = vld [vmem:[#allocation10_spill] sm:$0xff]  ;;  %v2134_v35 = vand.u32 2147483647, %v6301_v17  ;;  %v7895_v17 = vld [vmem:[#allocation15_spill] sm:$0xff]  ;;  %v7915_v28 = vld [vmem:[#allocation45_spill] sm:$0xff] }
 0x324   :  { %v2128_v4 = vmul.f32 %v6326_v15, %v2127_v57  ;;  %2678 = vmatpush.msrb.mxu0 %v5923_v38  ;;  %2698 = vmatpush.msrb.mxu1 %v5925_v39  ;;  %v7887_v38 = vld [vmem:[#allocation11_spill] sm:$0xff]  ;;  %v7888_v39 = vld [vmem:[#allocation16_spill] sm:$0xff]  ;;  %v7916_v55 = vld [vmem:[#allocation34_spill] sm:$0xff] }
 0x325   :  { %2718 = vmatpush.msrb.mxu2 %v5927_v42  ;;  %2738 = vmatpush.msrb.mxu3 %v5931_v43  ;;  %v6350_v31 = vadd.f32 %v2144_v6, %v2143_v8  ;;  %v7889_v42 = vld [vmem:[#allocation17_spill] sm:$0xff]  ;;  %v7890_v43 = vld [vmem:[#allocation12_spill] sm:$0xff]  ;;  %vm2135_vm0 = vcmp.eq.f32.partialorder %v2134_v35, 8.507059e+37  ;;  %v7917_v32 = vld [vmem:[#allocation35_spill] sm:$0xff] }
 0x326   :  { %2679 = vmatpush.msrb.mxu0 %v5935_v51  ;;  %2699 = vmatpush.msrb.mxu1 %v5937_v2  ;;  %v2129_v30 = vadd.f32 %v6326_v15, %v2128_v4  ;;  %v7891_v2 = vld [vmem:[#allocation13_spill] sm:$0xff]  ;;  %v7918_v33 = vld [vmem:[#allocation48_spill] sm:$0xff]  ;;  %v7920_v57 = vld [vmem:[#allocation38_spill] sm:$0xff] }
 0x327   :  { %2719 = vmatpush.msrb.mxu2 %v5939_v16  ;;  %2739 = vmatpush.msrb.mxu3 %v5943_v53  ;;  %4282 = vtanh.f32 %v6350_v31  ;;  %v7892_v16 = vld [vmem:[#allocation20_spill] sm:$0xff]  ;;  %v2137_v53 = vor.u32 1.1754944e-38, %v2136_v45  ;;  %v7919_v37 = vld [vmem:[#allocation49_spill] sm:$0xff]  ;;  %v7921_v40 = vld [vmem:[#allocation39_spill] sm:$0xff] }
 0x328   :  { %2680 = vmatpush.msrb.mxu0 %v5947_v54  ;;  %2700 = vmatpush.msrb.mxu1 %v7886_v34  ;;  %v2133_v51 = vsel %vm2132_vm15, %v6326_v15, %v2129_v30  ;;  %v7893_v54 = vld [vmem:[#allocation21_spill] sm:$0xff]  ;;  %v7922_v6 = vld [vmem:[#allocation52_spill] sm:$0xff]  ;;  %v7924_v4 = vld [vmem:[#allocation42_spill] sm:$0xff] }
 0x329   :  { %2720 = vmatpush.msrb.mxu2 %v7887_v38  ;;  %2740 = vmatpush.msrb.mxu3 %v7888_v39  ;;  %v2138_v50 = vsel %vm2135_vm0, %v2137_v53, %v2133_v51  ;;  %v7909_v15 = vld [vmem:[#allocation37_spill] sm:$0xff]  ;;  %v7925_v30 = vld [vmem:[#allocation43_spill] sm:$0xff]  ;;  %v7926_v45 = vld [vmem:[#allocation56_spill] sm:$0xff] }
 0x32a   :  { %2681 = vmatpush.msrb.mxu0 %v7889_v42  ;;  %2701 = vmatpush.msrb.mxu1 %v7890_v43  ;;  %v7923_v8 = vld [vmem:[#allocation53_spill] sm:$0xff]  ;;  %v7928_v35 = vld [vmem:[#allocation46_spill] sm:$0xff]  ;;  %v7929_v38 = vld [vmem:[#allocation47_spill] sm:$0xff] }
 0x32b   :  { %2721 = vmatpush.msrb.mxu2 %v7891_v2  ;;  %2741 = vmatpush.msrb.mxu3 %v7892_v16  ;;  %v7927_v34 = vld [vmem:[#allocation57_spill] sm:$0xff]  ;;  %v7930_v39 = vld [vmem:[#allocation60_spill] sm:$0xff]  ;;  %v7931_v42 = vld [vmem:[#allocation50_spill] sm:$0xff] }
 0x32c   :  { %2682 = vmatpush.msrb.mxu0 %v7893_v54  ;;  %2702 = vmatpush.msrb.mxu1 %v7894_v60  ;;  %v7932_v43 = vld [vmem:[#allocation51_spill] sm:$0xff]  ;;  %v7933_v51 = vld [vmem:[#allocation54_spill] sm:$0xff]  ;;  %v7935_v16 = vld [vmem:[#allocation65_spill] sm:$0xff] }
 0x32d   :  { %2722 = vmatpush.msrb.mxu2 %v7895_v17  ;;  %2742 = vmatpush.msrb.mxu3 %v7896_v44  ;;  %v4283_v27 = vpop.eup %4282  ;;  %v7934_v2 = vld [vmem:[#allocation55_spill] sm:$0xff]  ;;  %v7936_v53 = vld [vmem:[#allocation66_spill] sm:$0xff]  ;;  %v7939_v17 = vld [vmem:[#allocation61_spill] sm:$0xff] }
 0x32e   :  { %2683 = vmatpush.msrb.mxu0 %v7897_v56  ;;  %2703 = vmatpush.msrb.mxu1 %v7898_v41  ;;  %v2147_v63 = vmul.f32 %v4283_v27, %v2138_v50  ;;  %v7937_v54 = vld [vmem:[#allocation59_spill] sm:$0xff]  ;;  %v7940_v44 = vld [vmem:[#allocation62_spill] sm:$0xff]  ;;  %v7942_v50 = vld [vmem:[#allocation64_spill] sm:$0xff] }
 0x32f   :  { %2723 = vmatpush.msrb.mxu2 %v7899_v36  ;;  %2743 = vmatpush.msrb.mxu3 %v7900_v26  ;;  %v7938_v60 = vld [vmem:[#allocation67_spill] sm:$0xff]  ;;  %v7943_v56 = vld [vmem:[#allocation68_spill] sm:$0xff]  ;;  %v7945_v41 = vld [vmem:[#allocation70_spill] sm:$0xff] }
 0x330   :  { %2684 = vmatpush.msrb.mxu0 %v7901_v29  ;;  %2704 = vmatpush.msrb.mxu1 %v7902_v9  ;;  %2149 = vst [vmem:[#allocation3] sm:$0x3] %v2147_v63  ;;  %v7941_v27 = vld [vmem:[#allocation63_spill] sm:$0xff]  ;;  %v7951_v36 = vld [vmem:[#allocation77_spill] sm:$0xff]  ;;  %v7954_v29 = vld [vmem:[#allocation80_spill] sm:$0xff] }
 0x331   :  { %2389 = vmatmul.f32.vlgmr.msra.gmra.mxu0 %v2147_v63  ;;  %2409 = vmatmul.f32.vlgmr.msra.gmra.mxu1 %v2147_v63  ;;  %v7953_v26 = vld [vmem:[#allocation79_spill] sm:$0xff]  ;;  %v7955_v9 = vld [vmem:[#allocation81_spill] sm:$0xff] }
 0x332   :  { %2429 = vmatmul.f32.vlgmr.msra.gmra.mxu2 %v2147_v63  ;;  %2449 = vmatmul.f32.vlgmr.msra.gmra.mxu3 %v2147_v63  ;;  %v7950_v63 = vld [vmem:[#allocation76_spill] sm:$0xff] }
 0x333   :  { %2724 = vmatpush.msrb.mxu2 %v7903_v10  ;;  %2744 = vmatpush.msrb.mxu3 %v7904_v5  ;;  %v7956_v10 = vld [vmem:[#allocation82_spill] sm:$0xff]  ;;  %v7959_v5 = vld [vmem:[#allocation85_spill] sm:$0xff] }
 0x334   :  { %2685 = vmatpush.msrb.mxu0 %v7905_v11  ;;  %2705 = vmatpush.msrb.mxu1 %v7906_v12  ;;  %v2151_v11 = vld [vmem:[#allocation2 + $0x20] sm:$0x3] }
 0x335   :  { %2725 = vmatpush.msrb.mxu2 %v7907_v13  ;;  %2745 = vmatpush.msrb.mxu3 %v7908_v14 }
 0x336   :  { %2686 = vmatpush.msrb.mxu0 %v7909_v15  ;;  %2706 = vmatpush.msrb.mxu1 %v7910_v52 }
 0x337   :  { %2726 = vmatpush.msrb.mxu2 %v7911_v19  ;;  %2746 = vmatpush.msrb.mxu3 %v7912_v18 }
 0x338   :  { %2838 = vmatpush.msra.mxu0 %v7913_v20  ;;  %2858 = vmatpush.msra.mxu1 %v7914_v61 }
 0x339   :  { %2878 = vmatpush.msra.mxu2 %v7915_v28  ;;  %2898 = vmatpush.msra.mxu3 %v7916_v55  ;;  %v2152_v55 = vld [vmem:[#allocation2 + $0x10] sm:$0x3] }
 0x33a   :  { %2839 = vmatpush.msra.mxu0 %v7917_v32  ;;  %2859 = vmatpush.msra.mxu1 %v7918_v33 }
 0x33b   :  { %2879 = vmatpush.msra.mxu2 %v7919_v37  ;;  %2899 = vmatpush.msra.mxu3 %v7920_v57 }
 0x33c   :  { %2840 = vmatpush.msra.mxu0 %v7921_v40  ;;  %2860 = vmatpush.msra.mxu1 %v7922_v6 }
 0x33d   :  { %2880 = vmatpush.msra.mxu2 %v7923_v8  ;;  %2900 = vmatpush.msra.mxu3 %v7924_v4 }
 0x33e   :  { %2841 = vmatpush.msra.mxu0 %v7925_v30  ;;  %2861 = vmatpush.msra.mxu1 %v7926_v45 }
 0x33f   :  { %2881 = vmatpush.msra.mxu2 %v7927_v34  ;;  %2901 = vmatpush.msra.mxu3 %v7928_v35 }
 0x340   :  { %2842 = vmatpush.msra.mxu0 %v7929_v38  ;;  %2862 = vmatpush.msra.mxu1 %v7930_v39 }
 0x341   :  { %2882 = vmatpush.msra.mxu2 %v7931_v42  ;;  %2902 = vmatpush.msra.mxu3 %v7932_v43 }
 0x342   :  { %2843 = vmatpush.msra.mxu0 %v7933_v51  ;;  %2863 = vmatpush.msra.mxu1 %v7934_v2 }
 0x343   :  { %2883 = vmatpush.msra.mxu2 %v7935_v16  ;;  %2903 = vmatpush.msra.mxu3 %v7936_v53 }
 0x344   :  { %2844 = vmatpush.msra.mxu0 %v7937_v54  ;;  %2864 = vmatpush.msra.mxu1 %v7938_v60  ;;  %v7961_v60 = vld [vmem:[#allocation72_spill] sm:$0xff] }
 0x345   :  { %2884 = vmatpush.msra.mxu2 %v6131_v3  ;;  %2904 = vmatpush.msra.mxu3 %v7939_v17  ;;  %v7944_v3 = vld [vmem:[#allocation69_spill] sm:$0xff]  ;;  %v2528_v17 = vrot.slane %v7961_v60, 6 }
 0x346   :  { %2845 = vmatpush.msra.mxu0 %v6152_v0  ;;  %2865 = vmatpush.msra.mxu1 %v6154_v62  ;;  %v7946_v0 = vld [vmem:[#allocation71_spill] sm:$0xff]  ;;  %v7947_v62 = vld [vmem:[#allocation73_spill] sm:$0xff] }
 0x347   :  { %2885 = vmatpush.msra.mxu2 %v6156_v24  ;;  %2905 = vmatpush.msra.mxu3 %v6170_v23  ;;  %v7948_v24 = vld [vmem:[#allocation74_spill] sm:$0xff]  ;;  %v7949_v23 = vld [vmem:[#allocation75_spill] sm:$0xff] }
 0x348   :  { %2846 = vmatpush.msra.mxu0 %v7940_v44  ;;  %2866 = vmatpush.msra.mxu1 %v7941_v27 }
 0x349   :  { %2886 = vmatpush.msra.mxu2 %v6181_v48  ;;  %2906 = vmatpush.msra.mxu3 %v7942_v50  ;;  %v7952_v48 = vld [vmem:[#allocation78_spill] sm:$0xff] }
 0x34a   :  { %2847 = vmatpush.msra.mxu0 %v7943_v56  ;;  %2867 = vmatpush.msra.mxu1 %v7944_v3 }
 0x34b   :  { %2887 = vmatpush.msra.mxu2 %v7945_v41  ;;  %2907 = vmatpush.msra.mxu3 %v7946_v0 }
 0x34c   :  { %2848 = vmatpush.msra.mxu0 %v7947_v62  ;;  %2868 = vmatpush.msra.mxu1 %v7948_v24 }
 0x34d   :  { %2888 = vmatpush.msra.mxu2 %v7949_v23  ;;  %2908 = vmatpush.msra.mxu3 %v7950_v63 }
 0x34e   :  { %2849 = vmatpush.msra.mxu0 %v7951_v36  ;;  %2869 = vmatpush.msra.mxu1 %v7952_v48  ;;  %v2305_v48 = vld [vmem:[#allocation2 + $0x50] sm:$0xc0] }
 0x34f   :  { %2889 = vmatpush.msra.mxu2 %v6224_v21  ;;  %2909 = vmatpush.msra.mxu3 %v6230_v7  ;;  %v7957_v7 = vld [vmem:[#allocation83_spill] sm:$0xff]  ;;  %v7958_v21 = vld [vmem:[#allocation84_spill] sm:$0xff] }
 0x350   :  { %2850 = vmatpush.msra.mxu0 %v7953_v26  ;;  %2870 = vmatpush.msra.mxu1 %v7954_v29  ;;  %v2306_v26 = vld [vmem:[#allocation2 + $0x68] sm:$0xc0] }
 0x351   :  { %2890 = vmatpush.msra.mxu2 %v7955_v9  ;;  %2910 = vmatpush.msra.mxu3 %v7956_v10 }
 0x352   :  { %2851 = vmatpush.msra.mxu0 %v6253_v46  ;;  %2871 = vmatpush.msra.mxu1 %v6255_v58  ;;  %v7960_v46 = vld [vmem:[#allocation58_spill] sm:$0xff] }
 0x353   :  { %2891 = vmatpush.msra.mxu2 %v6259_v59  ;;  %2911 = vmatpush.msra.mxu3 %v6261_v1  ;;  %v2150_v58 = vld [vmem:[#allocation2 + $0x40] sm:$0x3] }
 0x354   :  { %2852 = vmatpush.msra.mxu0 %v6265_v22  ;;  %2872 = vmatpush.msra.mxu1 %v6267_v49 }
 0x355   :  { %2892 = vmatpush.msra.mxu2 %v6271_v25  ;;  %2912 = vmatpush.msra.mxu3 %v7957_v7  ;;  %v2153_v25 = vld [vmem:[#allocation2 + $0x38] sm:$0x3] }
 0x356   :  { %2853 = vmatpush.msra.mxu0 %v7958_v21  ;;  %2873 = vmatpush.msra.mxu1 %v7959_v5 }
 0x357   :  { %2893 = vmatpush.msra.mxu2 %v6292_v47  ;;  %2913 = vmatpush.msra.mxu3 %v7960_v46 }
 0x391   :  { %v2238_v59 = vpop.f32.mrf.mxu0  ;;  %v2258_v1 = vpop.f32.mrf.mxu1 }
 0x392   :  { %v2301_v12 = vadd.f32 %v2238_v59, %v2150_v58  ;;  %v2302_v22 = vadd.f32 %v2258_v1, %v2151_v11  ;;  %v2308_v1 = vld [vmem:[#allocation2 + $0x48] sm:$0xc0] }
 0x394   :  { %v4126_v13 = vmul.f32 -1.442695, %v2301_v12  ;;  %v4127_v49 = vmul.f32 -1.442695, %v2302_v22 }
 0x396   :  { %4284 = vpow2.f32 %v4126_v13 }
 0x397   :  { %4286 = vpow2.f32 %v4127_v49 }
 0x398   :  { %v2298_v14 = vpop.f32.mrf.mxu3  ;;  %v2278_v61 = vpop.f32.mrf.mxu2 }
 0x399   :  { %v2304_v15 = vadd.f32 %v2298_v14, %v2153_v25  ;;  %v2303_v37 = vadd.f32 %v2278_v61, %v2152_v55  ;;  %v2307_v55 = vld [vmem:[#allocation2 + $0x8] sm:$0xc0] }
 0x39b   :  { %v4128_v52 = vmul.f32 -1.442695, %v2304_v15 }
 0x39c   :  { %v4285_v19 = vpop.eup %4284 }
 0x39d   :  { %v4287_v18 = vpop.eup %4286  ;;  %v2472_v20 = vadd.f32 1.0, %v4285_v19  ;;  %4288 = vpow2.f32 %v4128_v52 }
 0x39e   :  { %v2491_v47 = vadd.f32 1.0, %v4287_v18 }
 0x39f   :  { %4290 = vrcp.f32 %v2472_v20  ;;  %v2484_v30 = vand.u32 2147483648, %v2472_v20  ;;  %v2482_v35 = vand.u32 2147483647, %v2472_v20  ;;  %vm2478_vm3 = vweird.f32 %v2472_v20 }
 0x3a0   :  { %4292 = vrcp.f32 %v2491_v47  ;;  %v2503_v45 = vand.u32 2147483648, %v2491_v47  ;;  %v2501_v39 = vand.u32 2147483647, %v2491_v47  ;;  %vm2497_vm4 = vweird.f32 %v2491_v47 }
 0x3a1   :  { %v2485_v51 = vor.u32 1.1754944e-38, %v2484_v30  ;;  %vm2483_vm7 = vcmp.eq.f32.partialorder %v2482_v35, 8.507059e+37 }
 0x3a2   :  { %v2504_v53 = vor.u32 1.1754944e-38, %v2503_v45  ;;  %vm2502_vm8 = vcmp.eq.f32.partialorder %v2501_v39, 8.507059e+37 }
 0x3a3   :  { %v4289_v28 = vpop.eup %4288 }
 0x3a4   :  { %v6455_v32 = vadd.f32 1.0, %v4289_v28 }
 0x3a5   :  { %v4291_v33 = vpop.eup %4290 }
 0x3a6   :  { %v4293_v57 = vpop.eup %4292  ;;  %v2474_v40 = vmul.f32 %v4291_v33, %v2472_v20  ;;  %4294 = vrcp.f32 %v6455_v32  ;;  %vm2479_vm1 = vweird.f32 %v4291_v33  ;;  %v2523_v46 = vand.u32 2147483648, %v6455_v32 }
 0x3a7   :  { %v2493_v6 = vmul.f32 %v4293_v57, %v2491_v47  ;;  %4296 = vtanh.f32 %v2303_v37  ;;  %vm2498_vm2 = vweird.f32 %v4293_v57  ;;  %vm2480_vm5 = vmor %vm2478_vm3, %vm2479_vm1  ;;  %vm2517_vm10 = vweird.f32 %v6455_v32 }
 0x3a8   :  { %v2475_v8 = vsub.f32 1.0, %v2474_v40  ;;  %vm2499_vm6 = vmor %vm2497_vm4, %vm2498_vm2  ;;  %v2521_v59 = vand.u32 2147483647, %v6455_v32  ;;  %v2524_v22 = vor.u32 1.1754944e-38, %v2523_v46  ;;  %v6478_v46 = vld [vmem:[#allocation4 + $0x1f8] sm:$0xff] }
 0x3a9   :  { %v2494_v4 = vsub.f32 1.0, %v2493_v6 }
 0x3aa   :  { %v2476_v34 = vmul.f32 %v4291_v33, %v2475_v8  ;;  %vm2522_vm12 = vcmp.eq.f32.partialorder %v2521_v59, 8.507059e+37  ;;  %v6484_v59 = vld [vmem:[#allocation4 + $0x1c8] sm:$0xff] }
 0x3ab   :  { %v2495_v38 = vmul.f32 %v4293_v57, %v2494_v4 }
 0x3ac   :  { %v4295_v42 = vpop.eup %4294  ;;  %v2477_v43 = vadd.f32 %v4291_v33, %v2476_v34 }
 0x3ad   :  { %v2496_v2 = vadd.f32 %v4293_v57, %v2495_v38  ;;  %v2513_v16 = vmul.f32 %v4295_v42, %v6455_v32  ;;  %v4297_v44 = vpop.eup %4296  ;;  %vm2518_vm9 = vweird.f32 %v4295_v42 }
 0x3ae   :  { %v2481_v54 = vsel %vm2480_vm5, %v4291_v33, %v2477_v43  ;;  %v2390_v3 = vpop.f32.mrf.mxu0  ;;  %v2410_v41 = vpop.f32.mrf.mxu1  ;;  %vm2519_vm11 = vmor %vm2517_vm10, %vm2518_vm9 }
 0x3af   :  { %v2486_v27 = vsel %vm2483_vm7, %v2485_v51, %v2481_v54  ;;  %v2500_v50 = vsel %vm2499_vm6, %v4293_v57, %v2496_v2  ;;  %v2514_v56 = vsub.f32 1.0, %v2513_v16  ;;  %v2457_v24 = vrot.slane %v2390_v3, 2 }
 0x3b0   :  { %v2505_v0 = vsel %vm2502_vm8, %v2504_v53, %v2500_v50  ;;  %v2531_v62 = vmul.f32 %v4297_v44, %v2486_v27  ;;  %v2458_v23 = vrot.slane %v2410_v41, 2  ;;  %v2594_v53 = vrot.slane %v6350_v31, 2 }
 0x3b1   :  { %v2530_v63 = vmul.f32 %v2528_v17, %v2505_v0  ;;  %v2515_v36 = vmul.f32 %v4295_v42, %v2514_v56  ;;  %v2465_v29 = vadd.f32 %v2457_v24, %v2305_v48 }
 0x3b2   :  { %v2466_v9 = vadd.f32 %v2458_v23, %v2306_v26 }
 0x3b3   :  { %v6460_v10 = vadd.f32 %v2531_v62, %v2530_v63  ;;  %v4129_v7 = vmul.f32 -1.442695, %v2465_v29  ;;  %v2516_v5 = vadd.f32 %v4295_v42, %v2515_v36 }
 0x3b4   :  { %v4130_v21 = vmul.f32 -1.442695, %v2466_v9 }
 0x3b5   :  { %4298 = vtanh.f32 %v6460_v10  ;;  %v2450_v58 = vpop.f32.mrf.mxu3  ;;  %v2520_v12 = vsel %vm2519_vm11, %v4295_v42, %v2516_v5  ;;  %v2430_v47 = vpop.f32.mrf.mxu2  ;;  %v6474_v5 = vld [vmem:[#allocation4 + $0x1f0] sm:$0xff] }
 0x3b6   :  { %4300 = vpow2.f32 %v4129_v7  ;;  %v2460_v11 = vrot.slane %v2450_v58, 2  ;;  %v2525_v14 = vsel %vm2522_vm12, %v2524_v22, %v2520_v12  ;;  %v2459_v61 = vrot.slane %v2430_v47, 2  ;;  %v6470_v7 = vld [vmem:[#allocation4 + $0x1e0] sm:$0xff]  ;;  %v6496_v22 = vld [vmem:[#allocation4 + $0x1a8] sm:$0xff]  ;;  %v6526_v47 = vld [vmem:[#allocation4 + $0x178] sm:$0xff] }
 0x3b7   :  { %4302 = vpow2.f32 %v4130_v21  ;;  %v6472_v21 = vld [vmem:[#allocation4 + $0x1e8] sm:$0xff]  ;;  %v6482_v58 = vld [vmem:[#allocation4 + $0x1c0] sm:$0xff] }
 0x3b8   :  { %v2468_v13 = vadd.f32 %v2460_v11, %v2308_v1  ;;  %v2467_v37 = vadd.f32 %v2459_v61, %v2307_v55  ;;  %v6486_v11 = vld [vmem:[#allocation4 + $0x1d0] sm:$0xff]  ;;  %v6490_v1 = vld [vmem:[#allocation4 + $0x1d8] sm:$0xff]  ;;  %v6494_v12 = vld [vmem:[#allocation4 + $0x1a0] sm:$0xff] }
 0x3b9   :  { %v6530_v61 = vld [vmem:[#allocation4 + $0x140] sm:$0xff]  ;;  %v6534_v55 = vld [vmem:[#allocation4 + $0x150] sm:$0xff] }
 0x3ba   :  { %v4131_v25 = vmul.f32 -1.442695, %v2468_v13  ;;  %v6498_v13 = vld [vmem:[#allocation4 + $0x1b0] sm:$0xff] }
 0x3bb   :  { %v4299_v49 = vpop.eup %4298 }
 0x3bc   :  { %v4301_v15 = vpop.eup %4300  ;;  %v2534_v52 = vmul.f32 %v4299_v49, %v2525_v14  ;;  %4304 = vpow2.f32 %v4131_v25  ;;  %v6502_v49 = vld [vmem:[#allocation4 + $0x1b8] sm:$0xff]  ;;  %v6506_v25 = vld [vmem:[#allocation4 + $0x180] sm:$0xff]  ;;  %v6508_v14 = vld [vmem:[#allocation4 + $0x188] sm:$0xff] }
 0x3bd   :  { %v4303_v19 = vpop.eup %4302  ;;  %v2538_v18 = vadd.f32 1.0, %v4301_v15  ;;  %v6510_v15 = vld [vmem:[#allocation4 + $0x190] sm:$0xff] }
 0x3be   :  { %v2557_v20 = vadd.f32 1.0, %v4303_v19  ;;  %2601 = vst [vmem:[#allocation3 + $0x10] sm:$0x3] %v2534_v52  ;;  %2687 = vmatmul.f32.vlgmr.msrb.gmra.mxu0 %v2534_v52  ;;  %2707 = vmatmul.f32.vlgmr.msrb.gmra.mxu1 %v2534_v52  ;;  %v6518_v19 = vld [vmem:[#allocation4 + $0x160] sm:$0xff] }
 0x3bf   :  { %4306 = vrcp.f32 %v2538_v18  ;;  %2727 = vmatmul.f32.vlgmr.msrb.gmra.mxu2 %v2534_v52  ;;  %2747 = vmatmul.f32.vlgmr.msrb.gmra.mxu3 %v2534_v52  ;;  %v2550_v30 = vand.u32 2147483648, %v2538_v18  ;;  %v2548_v35 = vand.u32 2147483647, %v2538_v18  ;;  %vm2544_vm15 = vweird.f32 %v2538_v18  ;;  %v6514_v52 = vld [vmem:[#allocation4 + $0x198] sm:$0xff] }
 0x3c0   :  { %4308 = vrcp.f32 %v2557_v20  ;;  %v2569_v45 = vand.u32 2147483648, %v2557_v20  ;;  %v2567_v39 = vand.u32 2147483647, %v2557_v20  ;;  %vm2563_vm0 = vweird.f32 %v2557_v20  ;;  %3139 = vmatpush.msrb.mxu0 %v6470_v7  ;;  %3159 = vmatpush.msrb.mxu1 %v6472_v21 }
 0x3c1   :  { %v2551_v51 = vor.u32 1.1754944e-38, %v2550_v30  ;;  %vm2549_vm3 = vcmp.eq.f32.partialorder %v2548_v35, 8.507059e+37  ;;  %3179 = vmatpush.msrb.mxu2 %v6474_v5  ;;  %3199 = vmatpush.msrb.mxu3 %v6478_v46 }
 0x3c2   :  { %v4305_v28 = vpop.eup %4304  ;;  %v2570_v54 = vor.u32 1.1754944e-38, %v2569_v45  ;;  %vm2568_vm4 = vcmp.eq.f32.partialorder %v2567_v39, 8.507059e+37  ;;  %3140 = vmatpush.msrb.mxu0 %v6482_v58  ;;  %3160 = vmatpush.msrb.mxu1 %v6484_v59  ;;  %v6566_v39 = vld [vmem:[#allocation4 + $0xe0] sm:$0xff] }
 0x3c3   :  { %v2577_v32 = vadd.f32 1.0, %v4305_v28  ;;  %3180 = vmatpush.msrb.mxu2 %v6486_v11  ;;  %3200 = vmatpush.msrb.mxu3 %v6490_v1  ;;  %v6532_v28 = vld [vmem:[#allocation4 + $0x148] sm:$0xff] }
 0x3c4   :  { %3141 = vmatpush.msrb.mxu0 %v6494_v12  ;;  %3161 = vmatpush.msrb.mxu1 %v6496_v22 }
 0x3c5   :  { %v4307_v33 = vpop.eup %4306  ;;  %4310 = vrcp.f32 %v2577_v32  ;;  %v2589_v31 = vand.u32 2147483648, %v2577_v32  ;;  %vm2583_vm6 = vweird.f32 %v2577_v32  ;;  %v2587_v23 = vand.u32 2147483647, %v2577_v32  ;;  %3181 = vmatpush.msrb.mxu2 %v6498_v13  ;;  %3201 = vmatpush.msrb.mxu3 %v6502_v49 }
 0x3c6   :  { %v4309_v57 = vpop.eup %4308  ;;  %v2540_v40 = vmul.f32 %v4307_v33, %v2538_v18  ;;  %4312 = vtanh.f32 %v2467_v37  ;;  %vm2545_vm13 = vweird.f32 %v4307_v33  ;;  %3142 = vmatpush.msrb.mxu0 %v6506_v25  ;;  %3162 = vmatpush.msrb.mxu1 %v6508_v14  ;;  %v6520_v18 = vld [vmem:[#allocation4 + $0x168] sm:$0xff] }
 0x3c7   :  { %v2559_v6 = vmul.f32 %v4309_v57, %v2557_v20  ;;  %vm2564_vm14 = vweird.f32 %v4309_v57  ;;  %vm2546_vm1 = vmor %vm2544_vm15, %vm2545_vm13  ;;  %v2590_v36 = vor.u32 1.1754944e-38, %v2589_v31  ;;  %vm2588_vm8 = vcmp.eq.f32.partialorder %v2587_v23, 8.507059e+37  ;;  %3182 = vmatpush.msrb.mxu2 %v6510_v15  ;;  %3202 = vmatpush.msrb.mxu3 %v6514_v52  ;;  %v6522_v20 = vld [vmem:[#allocation4 + $0x170] sm:$0xff]  ;;  %v6544_v37 = vld [vmem:[#allocation4 + $0x128] sm:$0xff] }
 0x3c8   :  { %v2541_v8 = vsub.f32 1.0, %v2540_v40  ;;  %vm2565_vm2 = vmor %vm2563_vm0, %vm2564_vm14  ;;  %3143 = vmatpush.msrb.mxu0 %v6518_v19  ;;  %3163 = vmatpush.msrb.mxu1 %v6520_v18  ;;  %v6550_v40 = vld [vmem:[#allocation4 + $0x138] sm:$0xff]  ;;  %v6602_v23 = vld [vmem:[#allocation4 + $0x80] sm:$0xff] }
 0x3c9   :  { %v2560_v4 = vsub.f32 1.0, %v2559_v6  ;;  %3183 = vmatpush.msrb.mxu2 %v6522_v20  ;;  %3203 = vmatpush.msrb.mxu3 %v6526_v47  ;;  %v6554_v6 = vld [vmem:[#allocation4 + $0x100] sm:$0xff]  ;;  %7967 = vst [vmem:[#allocation13_spill] sm:$0xff] %v6602_v23 }
 0x3ca   :  { %v2542_v34 = vmul.f32 %v4307_v33, %v2541_v8  ;;  %3144 = vmatpush.msrb.mxu0 %v6530_v61  ;;  %3164 = vmatpush.msrb.mxu1 %v6532_v28  ;;  %v6556_v8 = vld [vmem:[#allocation4 + $0x108] sm:$0xff] }
 0x3cb   :  { %v2561_v38 = vmul.f32 %v4309_v57, %v2560_v4  ;;  %v4311_v42 = vpop.eup %4310  ;;  %3184 = vmatpush.msrb.mxu2 %v6534_v55  ;;  %v6558_v4 = vld [vmem:[#allocation4 + $0x110] sm:$0xff] }
 0x3cc   :  { %v2543_v43 = vadd.f32 %v4307_v33, %v2542_v34  ;;  %v2579_v16 = vmul.f32 %v4311_v42, %v2577_v32  ;;  %v4313_v17 = vpop.eup %4312  ;;  %vm2584_vm5 = vweird.f32 %v4311_v42  ;;  %v6538_v32 = vld [vmem:[#allocation4 + $0x158] sm:$0xff]  ;;  %3165 = vmatpush.msrb.mxu1 %v6544_v37 }
 0x3cd   :  { %v2562_v2 = vadd.f32 %v4309_v57, %v2561_v38  ;;  %vm2585_vm7 = vmor %vm2583_vm6, %vm2584_vm5  ;;  %3204 = vmatpush.msrb.mxu3 %v6538_v32  ;;  %v6562_v34 = vld [vmem:[#allocation4 + $0x118] sm:$0xff] }
 0x3ce   :  { %v2547_v60 = vsel %vm2546_vm1, %v4307_v33, %v2543_v43  ;;  %v2580_v50 = vsub.f32 1.0, %v2579_v16  ;;  %v6542_v33 = vld [vmem:[#allocation4 + $0x120] sm:$0xff]  ;;  %3166 = vmatpush.msrb.mxu1 %v6556_v8  ;;  %v6570_v43 = vld [vmem:[#allocation4 + $0xf0] sm:$0xff]  ;;  %v6574_v16 = vld [vmem:[#allocation4 + $0xf8] sm:$0xff] }
 0x3cf   :  { %v2552_v44 = vsel %vm2549_vm3, %v2551_v51, %v2547_v60  ;;  %v2566_v27 = vsel %vm2565_vm2, %v4309_v57, %v2562_v2  ;;  %v6546_v57 = vld [vmem:[#allocation4 + $0x130] sm:$0xff]  ;;  %3145 = vmatpush.msrb.mxu0 %v6542_v33  ;;  %3205 = vmatpush.msrb.mxu3 %v6550_v40  ;;  %v2603_v51 = vld [vmem:[#allocation2 + $0x40] sm:$0xc] }
 0x3d0   :  { %v2571_v56 = vsel %vm2568_vm4, %v2570_v54, %v2566_v27  ;;  %v2597_v3 = vmul.f32 %v4313_v17, %v2552_v44  ;;  %v2581_v0 = vmul.f32 %v4311_v42, %v2580_v50  ;;  %3185 = vmatpush.msrb.mxu2 %v6546_v57  ;;  %v2604_v2 = vld [vmem:[#allocation2 + $0x20] sm:$0xc]  ;;  %v6580_v17 = vld [vmem:[#allocation4 + $0xc8] sm:$0xff]  ;;  %v6582_v44 = vld [vmem:[#allocation4 + $0xd0] sm:$0xff] }
 0x3d1   :  { %v2596_v41 = vmul.f32 %v2594_v53, %v2571_v56  ;;  %3146 = vmatpush.msrb.mxu0 %v6554_v6  ;;  %3206 = vmatpush.msrb.mxu3 %v6562_v34  ;;  %v6578_v60 = vld [vmem:[#allocation4 + $0xc0] sm:$0xff]  ;;  %v6586_v27 = vld [vmem:[#allocation4 + $0xd8] sm:$0xff] }
 0x3d2   :  { %v2582_v24 = vadd.f32 %v4311_v42, %v2581_v0  ;;  %3186 = vmatpush.msrb.mxu2 %v6558_v4  ;;  %7962 = vst [vmem:[#allocation10_spill] sm:$0xff] %v6586_v27  ;;  %v6596_v0 = vld [vmem:[#allocation4 + $0xb0] sm:$0xff] }
 0x3d3   :  { %v6467_v62 = vadd.f32 %v2597_v3, %v2596_v41  ;;  %3147 = vmatpush.msrb.mxu0 %v6566_v39  ;;  %3207 = vmatpush.msrb.mxu3 %v6574_v16  ;;  %v6590_v3 = vld [vmem:[#allocation4 + $0xa0] sm:$0xff]  ;;  %v6592_v41 = vld [vmem:[#allocation4 + $0xa8] sm:$0xff]  ;;  %7965 = vst [vmem:[#allocation17_spill] sm:$0xff] %v6596_v0 }
 0x3d4   :  { %v2586_v63 = vsel %vm2585_vm7, %v4311_v42, %v2582_v24  ;;  %v6568_v42 = vld [vmem:[#allocation4 + $0xe8] sm:$0xff]  ;;  %3187 = vmatpush.msrb.mxu2 %v6570_v43  ;;  %7963 = vst [vmem:[#allocation11_spill] sm:$0xff] %v6590_v3  ;;  %v6598_v24 = vld [vmem:[#allocation4 + $0xb8] sm:$0xff] }
 0x3d5   :  { %4314 = vtanh.f32 %v6467_v62  ;;  %v2591_v26 = vsel %vm2588_vm8, %v2590_v36, %v2586_v63  ;;  %3167 = vmatpush.msrb.mxu1 %v6568_v42  ;;  %3148 = vmatpush.msrb.mxu0 %v6578_v60  ;;  %7964 = vst [vmem:[#allocation16_spill] sm:$0xff] %v6592_v41  ;;  %v6604_v63 = vld [vmem:[#allocation4 + $0x88] sm:$0xff]  ;;  %v6606_v36 = vld [vmem:[#allocation4 + $0x90] sm:$0xff] }
 0x3d6   :  { %3188 = vmatpush.msrb.mxu2 %v6582_v44  ;;  %3208 = vmatpush.msrb.mxu3 %v6586_v27  ;;  %7966 = vst [vmem:[#allocation12_spill] sm:$0xff] %v6598_v24 }
 0x3d7   :  { %3168 = vmatpush.msrb.mxu1 %v6580_v17  ;;  %3149 = vmatpush.msrb.mxu0 %v6590_v3  ;;  %7968 = vst [vmem:[#allocation20_spill] sm:$0xff] %v6604_v63 }
 0x3d8   :  { %3189 = vmatpush.msrb.mxu2 %v6596_v0  ;;  %3209 = vmatpush.msrb.mxu3 %v6598_v24  ;;  %7969 = vst [vmem:[#allocation21_spill] sm:$0xff] %v6606_v36  ;;  %v6761_v0 = vld [vmem:[#allocation6 + $0x140] sm:$0xff] }
 0x3d9   :  { %3169 = vmatpush.msrb.mxu1 %v6592_v41  ;;  %3150 = vmatpush.msrb.mxu0 %v6602_v23  ;;  %v6738_v23 = vld [vmem:[#allocation6 + $0x168] sm:$0xff] }
 0x3da   :  { %3190 = vmatpush.msrb.mxu2 %v6606_v36  ;;  %8004 = vst [vmem:[#allocation46_spill] sm:$0xff] %v6738_v23  ;;  %v6763_v41 = vld [vmem:[#allocation6 + $0x148] sm:$0xff] }
 0x3db   :  { %v4315_v48 = vpop.eup %4314  ;;  %3170 = vmatpush.msrb.mxu1 %v6604_v63 }
 0x3dc   :  { %v2600_v29 = vmul.f32 %v4315_v48, %v2591_v26  ;;  %v2606_v48 = vld [vmem:[#allocation2 + $0x38] sm:$0xc] }
 0x3de   :  { %2602 = vst [vmem:[#allocation3 + $0x8] sm:$0xc0] %v2600_v29  ;;  %v2836_v9 = vrot.slane %v2600_v29, 6  ;;  %v6610_v29 = vld [vmem:[#allocation4 + $0x98] sm:$0xff] }
 0x3df   :  { %7970 = vst [vmem:[#allocation14_spill] sm:$0xff] %v6610_v29  ;;  %3210 = vmatpush.msrb.mxu3 %v6610_v29  ;;  %v6688_v29 = vld [vmem:[#allocation6 + $0x1d0] sm:$0xff] }
 0x3e0   :  { %2854 = vmatmul.f32.vlgmr.msra.gmra.mxu0 %v2836_v9  ;;  %2874 = vmatmul.f32.vlgmr.msra.gmra.mxu1 %v2836_v9  ;;  %7993 = vst [vmem:[#allocation35_spill] sm:$0xff] %v6688_v29 }
 0x3e1   :  { %2894 = vmatmul.f32.vlgmr.msra.gmra.mxu2 %v2836_v9  ;;  %2914 = vmatmul.f32.vlgmr.msra.gmra.mxu3 %v2836_v9  ;;  %v6614_v9 = vld [vmem:[#allocation4 + $0x60] sm:$0xff] }
 0x3e2   :  { %7971 = vst [vmem:[#allocation15_spill] sm:$0xff] %v6614_v9  ;;  %3151 = vmatpush.msrb.mxu0 %v6614_v9  ;;  %v6686_v9 = vld [vmem:[#allocation6 + $0x1c8] sm:$0xff] }
 0x3e3   :  { %7992 = vst [vmem:[#allocation34_spill] sm:$0xff] %v6686_v9 }
 0x43b   :  { %v2688_v30 = vpop.f32.mrf.mxu0  ;;  %v2708_v45 = vpop.f32.mrf.mxu1 }
 0x43c   :  { %v2755_v35 = vrot.slane %v2688_v30, 6  ;;  %v2756_v38 = vrot.slane %v2708_v45, 6  ;;  %v6616_v30 = vld [vmem:[#allocation4 + $0x68] sm:$0xff]  ;;  %v6618_v45 = vld [vmem:[#allocation4 + $0x70] sm:$0xff] }
 0x43d   :  { %7972 = vst [vmem:[#allocation24_spill] sm:$0xff] %v6616_v30  ;;  %3171 = vmatpush.msrb.mxu1 %v6616_v30  ;;  %3191 = vmatpush.msrb.mxu2 %v6618_v45  ;;  %v2605_v30 = vld [vmem:[#allocation2 + $0x10] sm:$0xc] }
 0x43e   :  { %v2763_v53 = vadd.f32 %v2755_v35, %v2603_v51  ;;  %v2764_v54 = vadd.f32 %v2756_v38, %v2604_v2  ;;  %7973 = vst [vmem:[#allocation25_spill] sm:$0xff] %v6618_v45  ;;  %v6622_v38 = vld [vmem:[#allocation4 + $0x78] sm:$0xff]  ;;  %v6626_v51 = vld [vmem:[#allocation4 + $0x40] sm:$0xff]  ;;  %v6628_v2 = vld [vmem:[#allocation4 + $0x48] sm:$0xff] }
 0x43f   :  { %7974 = vst [vmem:[#allocation18_spill] sm:$0xff] %v6622_v38  ;;  %3211 = vmatpush.msrb.mxu3 %v6622_v38  ;;  %3152 = vmatpush.msrb.mxu0 %v6626_v51 }
 0x440   :  { %v4132_v50 = vmul.f32 -1.442695, %v2763_v53  ;;  %v4133_v56 = vmul.f32 -1.442695, %v2764_v54  ;;  %7975 = vst [vmem:[#allocation19_spill] sm:$0xff] %v6626_v51  ;;  %v6630_v53 = vld [vmem:[#allocation4 + $0x50] sm:$0xff]  ;;  %3172 = vmatpush.msrb.mxu1 %v6628_v2 }
 0x441   :  { %7976 = vst [vmem:[#allocation28_spill] sm:$0xff] %v6628_v2  ;;  %3192 = vmatpush.msrb.mxu2 %v6630_v53  ;;  %v6656_v51 = vld [vmem:[#allocation4 + $0x8] sm:$0xff] }
 0x442   :  { %4316 = vpow2.f32 %v4132_v50  ;;  %v2748_v31 = vpop.f32.mrf.mxu3  ;;  %7977 = vst [vmem:[#allocation29_spill] sm:$0xff] %v6630_v53  ;;  %v6634_v50 = vld [vmem:[#allocation4 + $0x58] sm:$0xff]  ;;  %v2728_v53 = vpop.f32.mrf.mxu2 }
 0x443   :  { %4318 = vpow2.f32 %v4133_v56  ;;  %v2758_v26 = vrot.slane %v2748_v31, 6  ;;  %7978 = vst [vmem:[#allocation22_spill] sm:$0xff] %v6634_v50  ;;  %3212 = vmatpush.msrb.mxu3 %v6634_v50  ;;  %v6638_v31 = vld [vmem:[#allocation4 + $0x20] sm:$0xff] }
 0x444   :  { %7979 = vst [vmem:[#allocation23_spill] sm:$0xff] %v6638_v31  ;;  %3153 = vmatpush.msrb.mxu0 %v6638_v31  ;;  %v6654_v50 = vld [vmem:[#allocation4] sm:$0xff]  ;;  %v6672_v31 = vld [vmem:[#allocation6 + $0x1f0] sm:$0xff] }
 0x445   :  { %v2766_v35 = vadd.f32 %v2758_v26, %v2606_v48  ;;  %v6640_v48 = vld [vmem:[#allocation4 + $0x28] sm:$0xff]  ;;  %v6642_v26 = vld [vmem:[#allocation4 + $0x30] sm:$0xff]  ;;  %7983 = vst [vmem:[#allocation27_spill] sm:$0xff] %v6654_v50 }
 0x446   :  { %7980 = vst [vmem:[#allocation32_spill] sm:$0xff] %v6640_v48  ;;  %3173 = vmatpush.msrb.mxu1 %v6640_v48  ;;  %3193 = vmatpush.msrb.mxu2 %v6642_v26  ;;  %v6670_v48 = vld [vmem:[#allocation6 + $0x1e8] sm:$0xff] }
 0x447   :  { %v4134_v54 = vmul.f32 -1.442695, %v2766_v35  ;;  %7981 = vst [vmem:[#allocation33_spill] sm:$0xff] %v6642_v26  ;;  %v6648_v35 = vld [vmem:[#allocation4 + $0x38] sm:$0xff]  ;;  %3154 = vmatpush.msrb.mxu0 %v6654_v50  ;;  %v6668_v26 = vld [vmem:[#allocation6 + $0x1e0] sm:$0xff] }
 0x448   :  { %v4317_v56 = vpop.eup %4316  ;;  %7982 = vst [vmem:[#allocation26_spill] sm:$0xff] %v6648_v35  ;;  %3213 = vmatpush.msrb.mxu3 %v6648_v35  ;;  %3174 = vmatpush.msrb.mxu1 %v6656_v51 }
 0x449   :  { %v4319_v38 = vpop.eup %4318  ;;  %v6644_v45 = vadd.f32 1.0, %v4317_v56  ;;  %4320 = vpow2.f32 %v4134_v54  ;;  %7984 = vst [vmem:[#allocation36_spill] sm:$0xff] %v6656_v51  ;;  %v6658_v56 = vld [vmem:[#allocation4 + $0x10] sm:$0xff]  ;;  %v6663_v54 = vld [vmem:[#allocation4 + $0x18] sm:$0xff]  ;;  %3306 = vmatpush.msra.mxu0 %v6668_v26 }
 0x44a   :  { %v6650_v2 = vadd.f32 1.0, %v4319_v38  ;;  %7985 = vst [vmem:[#allocation37_spill] sm:$0xff] %v6658_v56  ;;  %3194 = vmatpush.msrb.mxu2 %v6658_v56  ;;  %3214 = vmatpush.msrb.mxu3 %v6663_v54  ;;  %v2757_v38 = vrot.slane %v2728_v53, 6  ;;  %v6678_v51 = vld [vmem:[#allocation6 + $0x1f8] sm:$0xff]  ;;  %v6684_v53 = vld [vmem:[#allocation6 + $0x1c0] sm:$0xff] }
 0x44b   :  { %4322 = vrcp.f32 %v6644_v45  ;;  %7986 = vst [vmem:[#allocation40_spill] sm:$0xff] %v6663_v54  ;;  %3326 = vmatpush.msra.mxu1 %v6670_v48  ;;  %3307 = vmatpush.msra.mxu0 %v6684_v53  ;;  %vm2943_vm11 = vweird.f32 %v6644_v45 }
 0x44c   :  { %4324 = vrcp.f32 %v6650_v2  ;;  %7987 = vst [vmem:[#allocation41_spill] sm:$0xff] %v6668_v26  ;;  %v2765_v54 = vadd.f32 %v2757_v38, %v2605_v30  ;;  %3346 = vmatpush.msra.mxu2 %v6672_v31  ;;  %3366 = vmatpush.msra.mxu3 %v6678_v51  ;;  %v6697_v30 = vld [vmem:[#allocation6 + $0x1d8] sm:$0xff]  ;;  %vm2962_vm13 = vweird.f32 %v6650_v2 }
 0x44d   :  { %7988 = vst [vmem:[#allocation30_spill] sm:$0xff] %v6670_v48  ;;  %3327 = vmatpush.msra.mxu1 %v6686_v9  ;;  %v6711_v9 = vld [vmem:[#allocation6 + $0x1b8] sm:$0xff] }
 0x44e   :  { %7989 = vst [vmem:[#allocation31_spill] sm:$0xff] %v6672_v31  ;;  %3347 = vmatpush.msra.mxu2 %v6688_v29  ;;  %3367 = vmatpush.msra.mxu3 %v6697_v30  ;;  %v6705_v31 = vld [vmem:[#allocation6 + $0x1a8] sm:$0xff]  ;;  %v2949_v29 = vand.u32 2147483648, %v6644_v45 }
 0x44f   :  { %v4321_v35 = vpop.eup %4320  ;;  %7990 = vst [vmem:[#allocation44_spill] sm:$0xff] %v6678_v51  ;;  %v6703_v51 = vld [vmem:[#allocation6 + $0x1a0] sm:$0xff]  ;;  %3328 = vmatpush.msra.mxu1 %v6705_v31 }
 0x450   :  { %v6674_v50 = vadd.f32 1.0, %v4321_v35  ;;  %7991 = vst [vmem:[#allocation45_spill] sm:$0xff] %v6684_v53  ;;  %3308 = vmatpush.msra.mxu0 %v6703_v51  ;;  %v6709_v53 = vld [vmem:[#allocation6 + $0x1b0] sm:$0xff]  ;;  %3368 = vmatpush.msra.mxu3 %v6711_v9 }
 0x451   :  { %v6680_v56 = vpop.eup %4322  ;;  %7994 = vst [vmem:[#allocation48_spill] sm:$0xff] %v6697_v30  ;;  %3348 = vmatpush.msra.mxu2 %v6709_v53  ;;  %v6717_v30 = vld [vmem:[#allocation6 + $0x180] sm:$0xff] }
 0x452   :  { %v6690_v35 = vpop.eup %4324  ;;  %v2939_v48 = vmul.f32 %v6680_v56, %v6644_v45  ;;  %4326 = vrcp.f32 %v6674_v50  ;;  %7995 = vst [vmem:[#allocation49_spill] sm:$0xff] %v6703_v51  ;;  %vm2944_vm9 = vweird.f32 %v6680_v56  ;;  %v6721_v51 = vld [vmem:[#allocation6 + $0x190] sm:$0xff]  ;;  %3309 = vmatpush.msra.mxu0 %v6717_v30  ;;  %vm2982_vm2 = vweird.f32 %v6674_v50 }
 0x453   :  { %v2958_v38 = vmul.f32 %v6690_v35, %v6650_v2  ;;  %7996 = vst [vmem:[#allocation38_spill] sm:$0xff] %v6705_v31  ;;  %4328 = vtanh.f32 %v2765_v54  ;;  %v2968_v31 = vand.u32 2147483648, %v6650_v2  ;;  %v6728_v54 = vld [vmem:[#allocation6 + $0x198] sm:$0xff]  ;;  %vm2963_vm10 = vweird.f32 %v6690_v35  ;;  %3349 = vmatpush.msra.mxu2 %v6721_v51  ;;  %vm6747_vm12 = vmor %vm2943_vm11, %vm2944_vm9 }
 0x454   :  { %v2940_v26 = vsub.f32 1.0, %v2939_v48  ;;  %7997 = vst [vmem:[#allocation39_spill] sm:$0xff] %v6709_v53  ;;  %v6719_v48 = vld [vmem:[#allocation6 + $0x188] sm:$0xff]  ;;  %v2966_v53 = vand.u32 2147483647, %v6650_v2  ;;  %3369 = vmatpush.msra.mxu3 %v6728_v54  ;;  %vm6770_vm14 = vmor %vm2962_vm13, %vm2963_vm10 }
 0x455   :  { %7998 = vst [vmem:[#allocation52_spill] sm:$0xff] %v6711_v9  ;;  %v2959_v36 = vsub.f32 1.0, %v2958_v38  ;;  %v2947_v38 = vand.u32 2147483647, %v6644_v45  ;;  %3329 = vmatpush.msra.mxu1 %v6719_v48 }
 0x456   :  { %7999 = vst [vmem:[#allocation53_spill] sm:$0xff] %v6717_v30  ;;  %v2941_v63 = vmul.f32 %v6680_v56, %v2940_v26  ;;  %v6736_v26 = vld [vmem:[#allocation6 + $0x160] sm:$0xff]  ;;  %v6740_v30 = vld [vmem:[#allocation6 + $0x170] sm:$0xff]  ;;  %vm2967_vm0 = vcmp.eq.f32.partialorder %v2966_v53, 8.507059e+37 }
 0x457   :  { %8000 = vst [vmem:[#allocation42_spill] sm:$0xff] %v6719_v48  ;;  %v2960_v9 = vmul.f32 %v6690_v35, %v2959_v36  ;;  %3310 = vmatpush.msra.mxu0 %v6736_v26  ;;  %3330 = vmatpush.msra.mxu1 %v6738_v23  ;;  %v2993_v23 = vrot.slane %v6460_v10, 6  ;;  %vm2948_vm15 = vcmp.eq.f32.partialorder %v2947_v38, 8.507059e+37  ;;  %v6790_v38 = vld [vmem:[#allocation6 + $0x130] sm:$0xff] }
 0x458   :  { %8001 = vst [vmem:[#allocation43_spill] sm:$0xff] %v6721_v51  ;;  %v6742_v48 = vpop.eup %4326  ;;  %v2942_v36 = vadd.f32 %v6680_v56, %v2941_v63  ;;  %v2950_v51 = vor.u32 1.1754944e-38, %v2949_v29  ;;  %3350 = vmatpush.msra.mxu2 %v6740_v30  ;;  %v2767_v53 = vld [vmem:[#allocation2 + $0x50] sm:$0x30] }
 0x459   :  { %8002 = vst [vmem:[#allocation56_spill] sm:$0xff] %v6728_v54  ;;  %v6753_v54 = vld [vmem:[#allocation6 + $0x178] sm:$0xff]  ;;  %v2961_v24 = vadd.f32 %v6690_v35, %v2960_v9  ;;  %v2978_v63 = vmul.f32 %v6742_v48, %v6674_v50  ;;  %v2969_v9 = vor.u32 1.1754944e-38, %v2968_v31  ;;  %3311 = vmatpush.msra.mxu0 %v6761_v0  ;;  %3331 = vmatpush.msra.mxu1 %v6763_v41  ;;  %v6786_v31 = vld [vmem:[#allocation6 + $0x120] sm:$0xff]  ;;  %vm2983_vm1 = vweird.f32 %v6742_v48 }
 0x45a   :  { %8003 = vst [vmem:[#allocation57_spill] sm:$0xff] %v6736_v26  ;;  %3370 = vmatpush.msra.mxu3 %v6753_v54  ;;  %v6765_v26 = vld [vmem:[#allocation6 + $0x150] sm:$0xff]  ;;  %v2946_v2 = vsel %vm6747_vm12, %v6680_v56, %v2942_v36  ;;  %v6788_v56 = vld [vmem:[#allocation6 + $0x128] sm:$0xff]  ;;  %vm6839_vm3 = vmor %vm2982_vm2, %vm2983_vm1 }
 0x45b   :  { %8005 = vst [vmem:[#allocation47_spill] sm:$0xff] %v6740_v30  ;;  %v4329_v30 = vpop.eup %4328  ;;  %v2951_v10 = vsel %vm2948_vm15, %v2950_v51, %v2946_v2  ;;  %v2965_v3 = vsel %vm6770_vm14, %v6690_v35, %v2961_v24  ;;  %v2979_v27 = vsub.f32 1.0, %v2978_v63  ;;  %3351 = vmatpush.msra.mxu2 %v6765_v26  ;;  %3312 = vmatpush.msra.mxu0 %v6786_v31  ;;  %v6794_v51 = vld [vmem:[#allocation6 + $0x138] sm:$0xff]  ;;  %v6799_v2 = vld [vmem:[#allocation6 + $0x100] sm:$0xff] }
 0x45c   :  { %8008 = vst [vmem:[#allocation60_spill] sm:$0xff] %v6753_v54  ;;  %v6779_v54 = vld [vmem:[#allocation6 + $0x158] sm:$0xff]  ;;  %v2970_v36 = vsel %vm2967_vm0, %v2969_v9, %v2965_v3  ;;  %v2996_v45 = vmul.f32 %v4329_v30, %v2951_v10  ;;  %3332 = vmatpush.msra.mxu1 %v6788_v56  ;;  %v6801_v3 = vld [vmem:[#allocation6 + $0x108] sm:$0xff]  ;;  %v6803_v30 = vld [vmem:[#allocation6 + $0x110] sm:$0xff] }
 0x45d   :  { %3371 = vmatpush.msra.mxu3 %v6779_v54  ;;  %8011 = vst [vmem:[#allocation50_spill] sm:$0xff] %v6788_v56  ;;  %v2995_v24 = vmul.f32 %v2993_v23, %v2970_v36  ;;  %v2855_v35 = vpop.f32.mrf.mxu0  ;;  %v2875_v63 = vpop.f32.mrf.mxu1  ;;  %v2980_v29 = vmul.f32 %v6742_v48, %v2979_v27  ;;  %3352 = vmatpush.msra.mxu2 %v6790_v38  ;;  %v2768_v10 = vld [vmem:[#allocation2 + $0x68] sm:$0x30]  ;;  %v6807_v23 = vld [vmem:[#allocation6 + $0x118] sm:$0xff]  ;;  %v6814_v36 = vld [vmem:[#allocation6 + $0xe0] sm:$0xff] }
 0x45e   :  { %8012 = vst [vmem:[#allocation51_spill] sm:$0xff] %v6790_v38  ;;  %v2922_v9 = vrot.slane %v2855_v35, 4  ;;  %v2923_v56 = vrot.slane %v2875_v63, 4  ;;  %3313 = vmatpush.msra.mxu0 %v6799_v2  ;;  %3333 = vmatpush.msra.mxu1 %v6801_v3  ;;  %v6818_v35 = vld [vmem:[#allocation6 + $0xf0] sm:$0xff] }
 0x45f   :  { %8013 = vst [vmem:[#allocation54_spill] sm:$0xff] %v6794_v51  ;;  %3372 = vmatpush.msra.mxu3 %v6794_v51  ;;  %v6809_v27 = vadd.f32 %v2996_v45, %v2995_v24  ;;  %3353 = vmatpush.msra.mxu2 %v6803_v30  ;;  %v6816_v51 = vld [vmem:[#allocation6 + $0xe8] sm:$0xff]  ;;  %v6823_v45 = vld [vmem:[#allocation6 + $0xf8] sm:$0xff]  ;;  %v2986_v24 = vand.u32 2147483647, %v6674_v50 }
 0x460   :  { %8014 = vst [vmem:[#allocation55_spill] sm:$0xff] %v6799_v2  ;;  %v2930_v63 = vadd.f32 %v2922_v9, %v2767_v53  ;;  %v2931_v38 = vadd.f32 %v2923_v56, %v2768_v10  ;;  %3314 = vmatpush.msra.mxu0 %v6814_v36  ;;  %3334 = vmatpush.msra.mxu1 %v6816_v51  ;;  %v6831_v56 = vld [vmem:[#allocation6 + $0xc0] sm:$0xff]  ;;  %v6833_v53 = vld [vmem:[#allocation6 + $0xc8] sm:$0xff] }
 0x461   :  { %8015 = vst [vmem:[#allocation65_spill] sm:$0xff] %v6801_v3  ;;  %3373 = vmatpush.msra.mxu3 %v6807_v23  ;;  %v2981_v3 = vadd.f32 %v6742_v48, %v2980_v29  ;;  %4330 = vtanh.f32 %v6809_v27  ;;  %3354 = vmatpush.msra.mxu2 %v6818_v35  ;;  %v6835_v29 = vld [vmem:[#allocation6 + $0xd0] sm:$0xff]  ;;  %vm2987_vm4 = vcmp.eq.f32.partialorder %v2986_v24, 8.507059e+37  ;;  %v6886_v24 = vld [vmem:[#allocation6 + $0x48] sm:$0xff] }
 0x462   :  { %8016 = vst [vmem:[#allocation66_spill] sm:$0xff] %v6803_v30  ;;  %v4135_v9 = vmul.f32 -1.442695, %v2930_v63  ;;  %v4136_v10 = vmul.f32 -1.442695, %v2931_v38  ;;  %3315 = vmatpush.msra.mxu0 %v6831_v56  ;;  %3335 = vmatpush.msra.mxu1 %v6833_v53  ;;  %v6851_v63 = vld [vmem:[#allocation6 + $0xa8] sm:$0xff] }
 0x463   :  { %8017 = vst [vmem:[#allocation59_spill] sm:$0xff] %v6807_v23  ;;  %v2988_v23 = vand.u32 2147483648, %v6674_v50  ;;  %3374 = vmatpush.msra.mxu3 %v6823_v45  ;;  %v6845_v50 = vld [vmem:[#allocation6 + $0xd8] sm:$0xff]  ;;  %3355 = vmatpush.msra.mxu2 %v6835_v29  ;;  %v6853_v38 = vld [vmem:[#allocation6 + $0xb0] sm:$0xff] }
 0x464   :  { %8018 = vst [vmem:[#allocation67_spill] sm:$0xff] %v6809_v27  ;;  %4332 = vpow2.f32 %v4135_v9  ;;  %3336 = vmatpush.msra.mxu1 %v6851_v63  ;;  %v6868_v9 = vld [vmem:[#allocation6 + $0x90] sm:$0xff]  ;;  %v6876_v27 = vld [vmem:[#allocation6 + $0x68] sm:$0xff] }
 0x465   :  { %8019 = vst [vmem:[#allocation61_spill] sm:$0xff] %v6814_v36  ;;  %3375 = vmatpush.msra.mxu3 %v6845_v50  ;;  %4334 = vpow2.f32 %v4136_v10  ;;  %v2989_v36 = vor.u32 1.1754944e-38, %v2988_v23  ;;  %3356 = vmatpush.msra.mxu2 %v6853_v38  ;;  %v6878_v10 = vld [vmem:[#allocation6 + $0x70] sm:$0xff] }
 0x466   :  { %8020 = vst [vmem:[#allocation62_spill] sm:$0xff] %v6816_v51  ;;  %v2915_v51 = vpop.f32.mrf.mxu3 }
 0x467   :  { %8021 = vst [vmem:[#allocation63_spill] sm:$0xff] %v6818_v35  ;;  %v2770_v35 = vld [vmem:[#allocation2 + $0x48] sm:$0x30]  ;;  %v2925_v30 = vrot.slane %v2915_v51, 4  ;;  %v6880_v51 = vld [vmem:[#allocation6 + $0x78] sm:$0xff]  ;;  %v4331_v23 = vpop.eup %4330  ;;  %3357 = vmatpush.msra.mxu2 %v6868_v9 }
 0x468   :  { %8022 = vst [vmem:[#allocation64_spill] sm:$0xff] %v6823_v45  ;;  %v6849_v45 = vld [vmem:[#allocation6 + $0xa0] sm:$0xff] }
 0x469   :  { %8023 = vst [vmem:[#allocation68_spill] sm:$0xff] %v6831_v56  ;;  %v2985_v56 = vsel %vm6839_vm3, %v6742_v48, %v2981_v3  ;;  %3316 = vmatpush.msra.mxu0 %v6849_v45  ;;  %v6870_v48 = vld [vmem:[#allocation6 + $0x98] sm:$0xff]  ;;  %v6872_v3 = vld [vmem:[#allocation6 + $0x60] sm:$0xff]  ;;  %3358 = vmatpush.msra.mxu2 %v6878_v10 }
 0x46a   :  { %8024 = vst [vmem:[#allocation69_spill] sm:$0xff] %v6833_v53  ;;  %v6864_v53 = vld [vmem:[#allocation6 + $0x88] sm:$0xff] }
 0x46b   :  { %8025 = vst [vmem:[#allocation70_spill] sm:$0xff] %v6835_v29  ;;  %v6860_v29 = vld [vmem:[#allocation6 + $0xb8] sm:$0xff]  ;;  %3337 = vmatpush.msra.mxu1 %v6864_v53 }
 0x46c   :  { %8028 = vst [vmem:[#allocation71_spill] sm:$0xff] %v6845_v50  ;;  %v6862_v50 = vld [vmem:[#allocation6 + $0x80] sm:$0xff]  ;;  %3376 = vmatpush.msra.mxu3 %v6860_v29 }
 0x46d   :  { %8029 = vst [vmem:[#allocation73_spill] sm:$0xff] %v6849_v45  ;;  %3317 = vmatpush.msra.mxu0 %v6862_v50  ;;  %3338 = vmatpush.msra.mxu1 %v6876_v27  ;;  %v6892_v45 = vld [vmem:[#allocation6 + $0x58] sm:$0xff] }
 0x46e   :  { %8030 = vst [vmem:[#allocation74_spill] sm:$0xff] %v6851_v63  ;;  %3377 = vmatpush.msra.mxu3 %v6870_v48  ;;  %v6884_v63 = vld [vmem:[#allocation6 + $0x40] sm:$0xff] }
 0x46f   :  { %8031 = vst [vmem:[#allocation75_spill] sm:$0xff] %v6853_v38  ;;  %v2933_v38 = vadd.f32 %v2925_v30, %v2770_v35  ;;  %3318 = vmatpush.msra.mxu0 %v6872_v3  ;;  %v4333_v30 = vpop.eup %4332  ;;  %3339 = vmatpush.msra.mxu1 %v6886_v24 }
 0x470   :  { %8032 = vst [vmem:[#allocation76_spill] sm:$0xff] %v6860_v29  ;;  %v2990_v29 = vsel %vm2987_vm4, %v2989_v36, %v2985_v56  ;;  %3378 = vmatpush.msra.mxu3 %v6880_v51  ;;  %v4335_v35 = vpop.eup %4334  ;;  %v6898_v56 = vadd.f32 1.0, %v4333_v30  ;;  %v6915_v30 = vld [vmem:[#allocation6 + $0x8] sm:$0xff] }
 0x471   :  { %8033 = vst [vmem:[#allocation77_spill] sm:$0xff] %v6862_v50  ;;  %v2999_v50 = vmul.f32 %v4331_v23, %v2990_v29  ;;  %v4137_v2 = vmul.f32 -1.442695, %v2933_v38  ;;  %3319 = vmatpush.msra.mxu0 %v6884_v63  ;;  %v6902_v29 = vld [vmem:[#allocation6 + $0x20] sm:$0xff]  ;;  %v6904_v38 = vld [vmem:[#allocation6 + $0x28] sm:$0xff]  ;;  %v6906_v23 = vadd.f32 1.0, %v4335_v35 }
 0x472   :  { %8034 = vst [vmem:[#allocation78_spill] sm:$0xff] %v6864_v53  ;;  %v6890_v53 = vld [vmem:[#allocation6 + $0x50] sm:$0xff]  ;;  %3379 = vmatpush.msra.mxu3 %v6892_v45  ;;  %3340 = vmatpush.msra.mxu1 %v6904_v38  ;;  %vm3009_vm7 = vweird.f32 %v6898_v56 }
 0x473   :  { %8035 = vst [vmem:[#allocation79_spill] sm:$0xff] %v6880_v51  ;;  %v3137_v36 = vrot.slane %v2999_v50, 2  ;;  %4336 = vpow2.f32 %v4137_v2  ;;  %3359 = vmatpush.msra.mxu2 %v6890_v53  ;;  %v2895_v51 = vpop.f32.mrf.mxu2  ;;  %v6913_v2 = vld [vmem:[#allocation6] sm:$0xff]  ;;  %3320 = vmatpush.msra.mxu0 %v6902_v29  ;;  %v6920_v35 = vld [vmem:[#allocation6 + $0x10] sm:$0xff]  ;;  %vm3028_vm8 = vweird.f32 %v6906_v23 }
 0x474   :  { %8036 = vst [vmem:[#allocation80_spill] sm:$0xff] %v6886_v24  ;;  %v6910_v24 = vld [vmem:[#allocation6 + $0x38] sm:$0xff]  ;;  %4338 = vrcp.f32 %v6898_v56  ;;  %3341 = vmatpush.msra.mxu1 %v6915_v30 }
 0x475   :  { %8037 = vst [vmem:[#allocation81_spill] sm:$0xff] %v6890_v53  ;;  %3155 = vmatmul.f32.vlgmr.msrb.gmra.mxu0 %v3137_v36  ;;  %3175 = vmatmul.f32.vlgmr.msrb.gmra.mxu1 %v3137_v36  ;;  %4340 = vrcp.f32 %v6906_v23  ;;  %v2924_v53 = vrot.slane %v2895_v51, 4 }
 0x476   :  { %8038 = vst [vmem:[#allocation82_spill] sm:$0xff] %v6892_v45  ;;  %3195 = vmatmul.f32.vlgmr.msrb.gmra.mxu2 %v3137_v36  ;;  %3215 = vmatmul.f32.vlgmr.msrb.gmra.mxu3 %v3137_v36  ;;  %v6922_v45 = vld [vmem:[#allocation6 + $0x18] sm:$0xff] }
 0x477   :  { %3066 = vst [vmem:[#allocation3 + $0x10] sm:$0xc] %v2999_v50  ;;  %v6908_v50 = vld [vmem:[#allocation6 + $0x30] sm:$0xff]  ;;  %3380 = vmatpush.msra.mxu3 %v6910_v24  ;;  %3321 = vmatpush.msra.mxu0 %v6913_v2 }
 0x478   :  { %8039 = vst [vmem:[#allocation83_spill] sm:$0xff] %v6902_v29  ;;  %3360 = vmatpush.msra.mxu2 %v6908_v50  ;;  %v2769_v29 = vld [vmem:[#allocation2 + $0x8] sm:$0x30]  ;;  %3627 = vmatpush.msrb.mxu1 %v6472_v21 }
 0x479   :  { %8040 = vst [vmem:[#allocation84_spill] sm:$0xff] %v6904_v38  ;;  %v4337_v36 = vpop.eup %4336  ;;  %3381 = vmatpush.msra.mxu3 %v6922_v45  ;;  %3607 = vmatpush.msrb.mxu0 %v6470_v7 }
 0x47a   :  { %8041 = vst [vmem:[#allocation85_spill] sm:$0xff] %v6908_v50  ;;  %3361 = vmatpush.msra.mxu2 %v6920_v35  ;;  %v6930_v38 = vadd.f32 1.0, %v4337_v36  ;;  %v4339_v51 = vpop.eup %4338  ;;  %v2932_v50 = vadd.f32 %v2924_v53, %v2769_v29  ;;  %3628 = vmatpush.msrb.mxu1 %v6484_v59  ;;  %v3013_v59 = vand.u32 2147483647, %v6898_v56  ;;  %v8054_v29 = vld [vmem:[#allocation24_spill] sm:$0xff] }
 0x47b   :  { %8042 = vst [vmem:[#allocation58_spill] sm:$0xff] %v6910_v24  ;;  %3667 = vmatpush.msrb.mxu3 %v6478_v46  ;;  %v4341_v24 = vpop.eup %4340  ;;  %3608 = vmatpush.msrb.mxu0 %v6482_v58  ;;  %v3034_v46 = vand.u32 2147483648, %v6906_v23  ;;  %vm3010_vm5 = vweird.f32 %v4339_v51 }
 0x47c   :  { %8043 = vst [vmem:[#allocation72_spill] sm:$0xff] %v6915_v30  ;;  %3647 = vmatpush.msrb.mxu2 %v6474_v5  ;;  %v3005_v30 = vmul.f32 %v4339_v51, %v6898_v56  ;;  %4342 = vrcp.f32 %v6930_v38  ;;  %v3024_v36 = vmul.f32 %v4341_v24, %v6906_v23  ;;  %3629 = vmatpush.msrb.mxu1 %v6496_v22  ;;  %v3015_v5 = vand.u32 2147483648, %v6898_v56  ;;  %vm3011_vm9 = vmor %vm3009_vm7, %vm3010_vm5 }
 0x47d   :  { %3668 = vmatpush.msrb.mxu3 %v6490_v1  ;;  %3609 = vmatpush.msrb.mxu0 %v6494_v12  ;;  %4344 = vtanh.f32 %v2932_v50  ;;  %vm3029_vm6 = vweird.f32 %v4341_v24  ;;  %v3032_v1 = vand.u32 2147483647, %v6906_v23  ;;  %vm3014_vm11 = vcmp.eq.f32.partialorder %v3013_v59, 8.507059e+37  ;;  %v8056_v23 = vld [vmem:[#allocation18_spill] sm:$0xff]  ;;  %v8065_v59 = vld [vmem:[#allocation27_spill] sm:$0xff] }
 0x47e   :  { %3648 = vmatpush.msrb.mxu2 %v6486_v11  ;;  %v3006_v7 = vsub.f32 1.0, %v3005_v30  ;;  %v3025_v21 = vsub.f32 1.0, %v3024_v36  ;;  %3630 = vmatpush.msrb.mxu1 %v6508_v14  ;;  %v3059_v14 = vrot.slane %v6467_v62, 2  ;;  %vm3030_vm10 = vmor %vm3028_vm8, %vm3029_vm6  ;;  %vm3048_vm14 = vweird.f32 %v6930_v38  ;;  %v8057_v30 = vld [vmem:[#allocation19_spill] sm:$0xff]  ;;  %v8059_v36 = vld [vmem:[#allocation29_spill] sm:$0xff] }
 0x47f   :  { %3669 = vmatpush.msrb.mxu3 %v6502_v49  ;;  %3610 = vmatpush.msrb.mxu0 %v6506_v25  ;;  %vm3033_vm12 = vcmp.eq.f32.partialorder %v3032_v1, 8.507059e+37  ;;  %v8067_v1 = vld [vmem:[#allocation41_spill] sm:$0xff] }
 0x480   :  { %3649 = vmatpush.msrb.mxu2 %v6498_v13  ;;  %v3007_v58 = vmul.f32 %v4339_v51, %v3006_v7  ;;  %v3026_v11 = vmul.f32 %v4341_v24, %v3025_v21  ;;  %3631 = vmatpush.msrb.mxu1 %v6520_v18  ;;  %v3016_v13 = vor.u32 1.1754944e-38, %v3015_v5  ;;  %v8060_v7 = vld [vmem:[#allocation22_spill] sm:$0xff]  ;;  %v8061_v21 = vld [vmem:[#allocation23_spill] sm:$0xff]  ;;  %v8062_v5 = vld [vmem:[#allocation32_spill] sm:$0xff] }
 0x481   :  { %3670 = vmatpush.msrb.mxu3 %v6514_v52  ;;  %3611 = vmatpush.msrb.mxu0 %v6518_v19 }
 0x482   :  { %3650 = vmatpush.msrb.mxu2 %v6510_v15  ;;  %v6955_v12 = vpop.eup %4342  ;;  %v3008_v22 = vadd.f32 %v4339_v51, %v3007_v58  ;;  %v3027_v49 = vadd.f32 %v4341_v24, %v3026_v11  ;;  %v3035_v15 = vor.u32 1.1754944e-38, %v3034_v46  ;;  %3632 = vmatpush.msrb.mxu1 %v6532_v28  ;;  %v8063_v46 = vld [vmem:[#allocation33_spill] sm:$0xff]  ;;  %v8064_v58 = vld [vmem:[#allocation26_spill] sm:$0xff]  ;;  %v8066_v11 = vld [vmem:[#allocation36_spill] sm:$0xff] }
 0x483   :  { %v3044_v25 = vmul.f32 %v6955_v12, %v6930_v38  ;;  %3671 = vmatpush.msrb.mxu3 %v6526_v47  ;;  %3612 = vmatpush.msrb.mxu0 %v6530_v61  ;;  %v4345_v19 = vpop.eup %4344  ;;  %vm3049_vm13 = vweird.f32 %v6955_v12 }
 0x484   :  { %3651 = vmatpush.msrb.mxu2 %v6522_v20  ;;  %v3012_v52 = vsel %vm3011_vm9, %v4339_v51, %v3008_v22  ;;  %v3031_v53 = vsel %vm3030_vm10, %v4341_v24, %v3027_v49  ;;  %3633 = vmatpush.msrb.mxu1 %v6544_v37  ;;  %vm3050_vm15 = vmor %vm3048_vm14, %vm3049_vm13  ;;  %v8044_v37 = vld [vmem:[#allocation10_spill] sm:$0xff]  ;;  %v8053_v24 = vld [vmem:[#allocation15_spill] sm:$0xff] }
 0x485   :  { %v3017_v18 = vsel %vm3014_vm11, %v3016_v13, %v3012_v52  ;;  %v3045_v56 = vsub.f32 1.0, %v3044_v25  ;;  %3672 = vmatpush.msrb.mxu3 %v6538_v32  ;;  %v3036_v20 = vsel %vm3033_vm12, %v3035_v15, %v3031_v53  ;;  %3613 = vmatpush.msrb.mxu0 %v6542_v33  ;;  %v3054_v32 = vand.u32 2147483648, %v6930_v38  ;;  %v8058_v51 = vld [vmem:[#allocation28_spill] sm:$0xff]  ;;  %v8070_v13 = vld [vmem:[#allocation30_spill] sm:$0xff]  ;;  %v8071_v49 = vld [vmem:[#allocation45_spill] sm:$0xff] }
 0x486   :  { %3652 = vmatpush.msrb.mxu2 %v6534_v55  ;;  %v3062_v62 = vmul.f32 %v4345_v19, %v3017_v18  ;;  %v3061_v47 = vmul.f32 %v3059_v14, %v3036_v20  ;;  %3634 = vmatpush.msrb.mxu1 %v6556_v8  ;;  %v3052_v33 = vand.u32 2147483647, %v6930_v38  ;;  %v8055_v38 = vld [vmem:[#allocation25_spill] sm:$0xff]  ;;  %v8069_v22 = vld [vmem:[#allocation40_spill] sm:$0xff]  ;;  %v8072_v25 = vld [vmem:[#allocation31_spill] sm:$0xff] }
 0x487   :  { %v3046_v61 = vmul.f32 %v6955_v12, %v3045_v56  ;;  %3673 = vmatpush.msrb.mxu3 %v6550_v40  ;;  %3614 = vmatpush.msrb.mxu0 %v6554_v6  ;;  %v8045_v40 = vld [vmem:[#allocation11_spill] sm:$0xff]  ;;  %v8046_v6 = vld [vmem:[#allocation16_spill] sm:$0xff]  ;;  %v3055_v8 = vor.u32 1.1754944e-38, %v3054_v32  ;;  %v8074_v15 = vld [vmem:[#allocation34_spill] sm:$0xff] }
 0x488   :  { %3653 = vmatpush.msrb.mxu2 %v6546_v57  ;;  %v6979_v28 = vadd.f32 %v3062_v62, %v3061_v47  ;;  %3635 = vmatpush.msrb.mxu1 %v6568_v42  ;;  %vm3053_vm0 = vcmp.eq.f32.partialorder %v3052_v33, 8.507059e+37  ;;  %v8050_v42 = vld [vmem:[#allocation20_spill] sm:$0xff]  ;;  %v8075_v52 = vld [vmem:[#allocation49_spill] sm:$0xff]  ;;  %v8076_v19 = vld [vmem:[#allocation35_spill] sm:$0xff] }
 0x489   :  { %3674 = vmatpush.msrb.mxu3 %v6562_v34  ;;  %v3047_v55 = vadd.f32 %v6955_v12, %v3046_v61  ;;  %3615 = vmatpush.msrb.mxu0 %v6566_v39  ;;  %v8048_v34 = vld [vmem:[#allocation12_spill] sm:$0xff]  ;;  %v8049_v39 = vld [vmem:[#allocation13_spill] sm:$0xff]  ;;  %v8078_v53 = vld [vmem:[#allocation38_spill] sm:$0xff] }
 0x48a   :  { %3654 = vmatpush.msrb.mxu2 %v6558_v4  ;;  %4346 = vtanh.f32 %v6979_v28  ;;  %3636 = vmatpush.msrb.mxu1 %v6580_v17  ;;  %v8047_v4 = vld [vmem:[#allocation17_spill] sm:$0xff]  ;;  %v8052_v17 = vld [vmem:[#allocation14_spill] sm:$0xff]  ;;  %v8073_v14 = vld [vmem:[#allocation44_spill] sm:$0xff] }
 0x48b   :  { %3675 = vmatpush.msrb.mxu3 %v6574_v16  ;;  %3616 = vmatpush.msrb.mxu0 %v6578_v60  ;;  %v3051_v57 = vsel %vm3050_vm15, %v6955_v12, %v3047_v55  ;;  %v8051_v60 = vld [vmem:[#allocation21_spill] sm:$0xff]  ;;  %v8077_v18 = vld [vmem:[#allocation48_spill] sm:$0xff]  ;;  %v8080_v20 = vld [vmem:[#allocation39_spill] sm:$0xff] }
 0x48c   :  { %3655 = vmatpush.msrb.mxu2 %v6570_v43  ;;  %3637 = vmatpush.msrb.mxu1 %v8046_v6  ;;  %v3056_v16 = vsel %vm3053_vm0, %v3055_v8, %v3051_v57  ;;  %v8068_v12 = vld [vmem:[#allocation37_spill] sm:$0xff]  ;;  %v8081_v62 = vld [vmem:[#allocation52_spill] sm:$0xff]  ;;  %v8082_v47 = vld [vmem:[#allocation42_spill] sm:$0xff] }
 0x48d   :  { %3676 = vmatpush.msrb.mxu3 %v8044_v37  ;;  %3617 = vmatpush.msrb.mxu0 %v8045_v40  ;;  %v8079_v56 = vld [vmem:[#allocation53_spill] sm:$0xff]  ;;  %v8084_v55 = vld [vmem:[#allocation43_spill] sm:$0xff]  ;;  %v8085_v32 = vld [vmem:[#allocation56_spill] sm:$0xff] }
 0x48e   :  { %3656 = vmatpush.msrb.mxu2 %v6582_v44  ;;  %3638 = vmatpush.msrb.mxu1 %v8050_v42  ;;  %v8083_v61 = vld [vmem:[#allocation57_spill] sm:$0xff]  ;;  %v8086_v33 = vld [vmem:[#allocation46_spill] sm:$0xff]  ;;  %v8087_v37 = vld [vmem:[#allocation47_spill] sm:$0xff] }
 0x48f   :  { %3677 = vmatpush.msrb.mxu3 %v8048_v34  ;;  %3618 = vmatpush.msrb.mxu0 %v8049_v39  ;;  %v8088_v57 = vld [vmem:[#allocation60_spill] sm:$0xff]  ;;  %v8089_v40 = vld [vmem:[#allocation50_spill] sm:$0xff]  ;;  %v8090_v6 = vld [vmem:[#allocation55_spill] sm:$0xff] }
 0x490   :  { %3657 = vmatpush.msrb.mxu2 %v8047_v4  ;;  %v4347_v43 = vpop.eup %4346  ;;  %3639 = vmatpush.msrb.mxu1 %v8054_v29  ;;  %v8091_v8 = vld [vmem:[#allocation51_spill] sm:$0xff]  ;;  %v8092_v4 = vld [vmem:[#allocation54_spill] sm:$0xff]  ;;  %v8094_v34 = vld [vmem:[#allocation61_spill] sm:$0xff] }
 0x491   :  { %3678 = vmatpush.msrb.mxu3 %v8052_v17  ;;  %v3065_v44 = vmul.f32 %v4347_v43, %v3056_v16  ;;  %3619 = vmatpush.msrb.mxu0 %v8053_v24  ;;  %v8095_v39 = vld [vmem:[#allocation66_spill] sm:$0xff]  ;;  %v8100_v42 = vld [vmem:[#allocation64_spill] sm:$0xff]  ;;  %v8101_v43 = vld [vmem:[#allocation69_spill] sm:$0xff] }
 0x492   :  { %3658 = vmatpush.msrb.mxu2 %v8051_v60  ;;  %3640 = vmatpush.msrb.mxu1 %v8058_v51  ;;  %v8102_v16 = vld [vmem:[#allocation73_spill] sm:$0xff]  ;;  %v8103_v60 = vld [vmem:[#allocation70_spill] sm:$0xff]  ;;  %v8104_v17 = vld [vmem:[#allocation71_spill] sm:$0xff] }
 0x493   :  { %3679 = vmatpush.msrb.mxu3 %v8056_v23  ;;  %3067 = vst [vmem:[#allocation3 + $0x8] sm:$0x30] %v3065_v44  ;;  %v3304_v50 = vrot.slane %v3065_v44, 4  ;;  %3620 = vmatpush.msrb.mxu0 %v8057_v30  ;;  %v8105_v44 = vld [vmem:[#allocation74_spill] sm:$0xff]  ;;  %v8106_v24 = vld [vmem:[#allocation77_spill] sm:$0xff]  ;;  %v8107_v29 = vld [vmem:[#allocation75_spill] sm:$0xff] }
 0x494   :  { %3659 = vmatpush.msrb.mxu2 %v8055_v38  ;;  %3641 = vmatpush.msrb.mxu1 %v8062_v5  ;;  %v8108_v38 = vld [vmem:[#allocation76_spill] sm:$0xff]  ;;  %v8109_v23 = vld [vmem:[#allocation78_spill] sm:$0xff]  ;;  %v8112_v51 = vld [vmem:[#allocation83_spill] sm:$0xff] }
 0x495   :  { %3680 = vmatpush.msrb.mxu3 %v8060_v7  ;;  %3322 = vmatmul.f32.vlgmr.msra.gmra.mxu0 %v3304_v50  ;;  %v8111_v30 = vld [vmem:[#allocation80_spill] sm:$0xff]  ;;  %v8114_v7 = vld [vmem:[#allocation82_spill] sm:$0xff] }
 0x496   :  { %3660 = vmatpush.msrb.mxu2 %v8059_v36  ;;  %3342 = vmatmul.f32.vlgmr.msra.gmra.mxu1 %v3304_v50  ;;  %v8113_v36 = vld [vmem:[#allocation81_spill] sm:$0xff] }
 0x497   :  { %3362 = vmatmul.f32.vlgmr.msra.gmra.mxu2 %v3304_v50  ;;  %3382 = vmatmul.f32.vlgmr.msra.gmra.mxu3 %v3304_v50  ;;  %v8110_v50 = vld [vmem:[#allocation79_spill] sm:$0xff] }
 0x498   :  { %3621 = vmatpush.msrb.mxu0 %v8061_v21  ;;  %3661 = vmatpush.msrb.mxu2 %v8063_v46  ;;  %v3068_v46 = vld [vmem:[#allocation2 + $0x40] sm:$0x30] }
 0x499   :  { %3681 = vmatpush.msrb.mxu3 %v8064_v58  ;;  %3642 = vmatpush.msrb.mxu1 %v8066_v11  ;;  %v3069_v58 = vld [vmem:[#allocation2 + $0x20] sm:$0x30] }
 0x49a   :  { %3622 = vmatpush.msrb.mxu0 %v8065_v59  ;;  %3662 = vmatpush.msrb.mxu2 %v8068_v12 }
 0x49b   :  { %3682 = vmatpush.msrb.mxu3 %v8069_v22  ;;  %3794 = vmatpush.msra.mxu1 %v8070_v13  ;;  %v3071_v13 = vld [vmem:[#allocation2 + $0x38] sm:$0x30] }
 0x49c   :  { %3774 = vmatpush.msra.mxu0 %v8067_v1  ;;  %3814 = vmatpush.msra.mxu2 %v8072_v25 }
 0x49d   :  { %3834 = vmatpush.msra.mxu3 %v8073_v14  ;;  %3795 = vmatpush.msra.mxu1 %v8074_v15 }
 0x49e   :  { %3775 = vmatpush.msra.mxu0 %v8071_v49  ;;  %3815 = vmatpush.msra.mxu2 %v8076_v19 }
 0x49f   :  { %3835 = vmatpush.msra.mxu3 %v8077_v18  ;;  %3796 = vmatpush.msra.mxu1 %v8078_v53  ;;  %v3070_v53 = vld [vmem:[#allocation2 + $0x10] sm:$0x30] }
 0x4a0   :  { %3776 = vmatpush.msra.mxu0 %v8075_v52  ;;  %3816 = vmatpush.msra.mxu2 %v8080_v20 }
 0x4a1   :  { %3836 = vmatpush.msra.mxu3 %v8081_v62  ;;  %3797 = vmatpush.msra.mxu1 %v8082_v47 }
 0x4a2   :  { %3777 = vmatpush.msra.mxu0 %v8079_v56  ;;  %3817 = vmatpush.msra.mxu2 %v8084_v55 }
 0x4a3   :  { %3837 = vmatpush.msra.mxu3 %v8085_v32  ;;  %3798 = vmatpush.msra.mxu1 %v8086_v33 }
 0x4a4   :  { %3778 = vmatpush.msra.mxu0 %v8083_v61  ;;  %3818 = vmatpush.msra.mxu2 %v8087_v37 }
 0x4a5   :  { %3838 = vmatpush.msra.mxu3 %v8088_v57  ;;  %3799 = vmatpush.msra.mxu1 %v6763_v41  ;;  %v8096_v41 = vld [vmem:[#allocation59_spill] sm:$0xff] }
 0x4a6   :  { %3779 = vmatpush.msra.mxu0 %v6761_v0  ;;  %3819 = vmatpush.msra.mxu2 %v6765_v26  ;;  %v8093_v0 = vld [vmem:[#allocation65_spill] sm:$0xff]  ;;  %v8098_v26 = vld [vmem:[#allocation68_spill] sm:$0xff] }
 0x4a7   :  { %3839 = vmatpush.msra.mxu3 %v6779_v54  ;;  %3800 = vmatpush.msra.mxu1 %v8089_v40  ;;  %v8099_v54 = vld [vmem:[#allocation63_spill] sm:$0xff] }
 0x4a8   :  { %3780 = vmatpush.msra.mxu0 %v6786_v31  ;;  %3820 = vmatpush.msra.mxu2 %v8091_v8  ;;  %v8097_v31 = vld [vmem:[#allocation62_spill] sm:$0xff] }
 0x4a9   :  { %3840 = vmatpush.msra.mxu3 %v8092_v4  ;;  %3801 = vmatpush.msra.mxu1 %v8093_v0 }
 0x4aa   :  { %3781 = vmatpush.msra.mxu0 %v8090_v6  ;;  %3821 = vmatpush.msra.mxu2 %v8095_v39 }
 0x4ab   :  { %3841 = vmatpush.msra.mxu3 %v8096_v41  ;;  %3802 = vmatpush.msra.mxu1 %v8097_v31 }
 0x4ac   :  { %3782 = vmatpush.msra.mxu0 %v8094_v34  ;;  %3822 = vmatpush.msra.mxu2 %v8099_v54 }
 0x4ad   :  { %3842 = vmatpush.msra.mxu3 %v8100_v42  ;;  %3803 = vmatpush.msra.mxu1 %v8101_v43 }
 0x4ae   :  { %3783 = vmatpush.msra.mxu0 %v8098_v26  ;;  %3823 = vmatpush.msra.mxu2 %v8103_v60  ;;  %v8119_v26 = vld [vmem:[#allocation67_spill] sm:$0xff] }
 0x4af   :  { %3843 = vmatpush.msra.mxu3 %v8104_v17  ;;  %3804 = vmatpush.msra.mxu1 %v8105_v44  ;;  %v3461_v54 = vrot.slane %v8119_v26, 6 }
 0x4b0   :  { %3784 = vmatpush.msra.mxu0 %v8102_v16  ;;  %3824 = vmatpush.msra.mxu2 %v8107_v29 }
 0x4b1   :  { %3844 = vmatpush.msra.mxu3 %v8108_v38  ;;  %3805 = vmatpush.msra.mxu1 %v8109_v23 }
 0x4b2   :  { %3785 = vmatpush.msra.mxu0 %v8106_v24  ;;  %3825 = vmatpush.msra.mxu2 %v6868_v9  ;;  %v8116_v9 = vld [vmem:[#allocation85_spill] sm:$0xff] }
 0x4b3   :  { %3845 = vmatpush.msra.mxu3 %v6870_v48  ;;  %3806 = vmatpush.msra.mxu1 %v6876_v27  ;;  %v8117_v48 = vld [vmem:[#allocation58_spill] sm:$0xff] }
 0x4b4   :  { %3786 = vmatpush.msra.mxu0 %v6872_v3  ;;  %3826 = vmatpush.msra.mxu2 %v6878_v10  ;;  %v8115_v3 = vld [vmem:[#allocation84_spill] sm:$0xff] }
 0x4b5   :  { %3846 = vmatpush.msra.mxu3 %v8110_v50  ;;  %3807 = vmatpush.msra.mxu1 %v8111_v30 }
 0x4b6   :  { %3787 = vmatpush.msra.mxu0 %v6884_v63  ;;  %3827 = vmatpush.msra.mxu2 %v8113_v36  ;;  %v8118_v63 = vld [vmem:[#allocation72_spill] sm:$0xff] }
 0x4b7   :  { %3847 = vmatpush.msra.mxu3 %v8114_v7  ;;  %3808 = vmatpush.msra.mxu1 %v8115_v3  ;;  %v3235_v3 = vld [vmem:[#allocation2 + $0x50] sm:$0xc] }
 0x4b8   :  { %3788 = vmatpush.msra.mxu0 %v8112_v51  ;;  %3828 = vmatpush.msra.mxu2 %v8116_v9  ;;  %v3236_v9 = vld [vmem:[#allocation2 + $0x68] sm:$0xc] }
 0x4b9   :  { %3848 = vmatpush.msra.mxu3 %v8117_v48  ;;  %3809 = vmatpush.msra.mxu1 %v8118_v63 }
 0x4ba   :  { %3789 = vmatpush.msra.mxu0 %v6913_v2  ;;  %3829 = vmatpush.msra.mxu2 %v6920_v35 }
 0x4bb   :  { %3849 = vmatpush.msra.mxu3 %v6922_v45 }
 0x4f2   :  { %v3156_v27 = vpop.f32.mrf.mxu0  ;;  %v3176_v10 = vpop.f32.mrf.mxu1 }
 0x4f3   :  { %v3223_v21 = vrot.slane %v3156_v27, 4  ;;  %v3224_v5 = vrot.slane %v3176_v10, 4 }
 0x4f5   :  { %v3231_v59 = vadd.f32 %v3223_v21, %v3068_v46  ;;  %v3232_v11 = vadd.f32 %v3224_v5, %v3069_v58 }
 0x4f7   :  { %v4138_v1 = vmul.f32 -1.442695, %v3231_v59  ;;  %v4139_v2 = vmul.f32 -1.442695, %v3232_v11 }
 0x4f9   :  { %4348 = vpow2.f32 %v4138_v1  ;;  %v3216_v12 = vpop.f32.mrf.mxu3  ;;  %v3196_v52 = vpop.f32.mrf.mxu2 }
 0x4fa   :  { %4350 = vpow2.f32 %v4139_v2  ;;  %v3226_v22 = vrot.slane %v3216_v12, 4  ;;  %v3225_v19 = vrot.slane %v3196_v52, 4  ;;  %v3238_v2 = vld [vmem:[#allocation2 + $0x48] sm:$0xc]  ;;  %v4011_v52 = vld [vmem:[%s7234_s5 + $0x78] sm:$0xff] }
 0x4fc   :  { %v3234_v49 = vadd.f32 %v3226_v22, %v3071_v13  ;;  %v3233_v62 = vadd.f32 %v3225_v19, %v3070_v53  ;;  %v4010_v53 = vld [vmem:[%s7234_s5 + $0x70] sm:$0xff] }
 0x4fe   :  { %v4140_v25 = vmul.f32 -1.442695, %v3234_v49 }
 0x4ff   :  { %v4349_v35 = vpop.eup %4348 }
 0x500   :  { %v4351_v14 = vpop.eup %4350  ;;  %v3405_v45 = vadd.f32 1.0, %v4349_v35  ;;  %4352 = vpow2.f32 %v4140_v25 }
 0x501   :  { %v3424_v15 = vadd.f32 1.0, %v4351_v14 }
 0x502   :  { %4354 = vrcp.f32 %v3405_v45  ;;  %v3417_v37 = vand.u32 2147483648, %v3405_v45  ;;  %v3415_v6 = vand.u32 2147483647, %v3405_v45  ;;  %vm3411_vm3 = vweird.f32 %v3405_v45 }
 0x503   :  { %4356 = vrcp.f32 %v3424_v15  ;;  %v3436_v57 = vand.u32 2147483648, %v3424_v15  ;;  %v3434_v4 = vand.u32 2147483647, %v3424_v15  ;;  %vm3430_vm4 = vweird.f32 %v3424_v15 }
 0x504   :  { %v3418_v39 = vor.u32 1.1754944e-38, %v3417_v37  ;;  %vm3416_vm7 = vcmp.eq.f32.partialorder %v3415_v6, 8.507059e+37  ;;  %v4007_v37 = vld [vmem:[%s7234_s5 + $0x58] sm:$0xff] }
 0x505   :  { %v3437_v42 = vor.u32 1.1754944e-38, %v3436_v57  ;;  %vm3435_vm8 = vcmp.eq.f32.partialorder %v3434_v4, 8.507059e+37 }
 0x506   :  { %v4353_v18 = vpop.eup %4352 }
 0x507   :  { %v7086_v56 = vadd.f32 1.0, %v4353_v18 }
 0x508   :  { %v4355_v20 = vpop.eup %4354 }
 0x509   :  { %v4357_v47 = vpop.eup %4356  ;;  %v3407_v61 = vmul.f32 %v4355_v20, %v3405_v45  ;;  %4358 = vrcp.f32 %v7086_v56  ;;  %vm3412_vm1 = vweird.f32 %v4355_v20  ;;  %v3456_v10 = vand.u32 2147483648, %v7086_v56 }
 0x50a   :  { %v3426_v55 = vmul.f32 %v4357_v47, %v3424_v15  ;;  %4360 = vtanh.f32 %v3233_v62  ;;  %vm3431_vm2 = vweird.f32 %v4357_v47  ;;  %vm3413_vm5 = vmor %vm3411_vm3, %vm3412_vm1  ;;  %vm3450_vm10 = vweird.f32 %v7086_v56 }
 0x50b   :  { %v3408_v32 = vsub.f32 1.0, %v3407_v61  ;;  %vm3432_vm6 = vmor %vm3430_vm4, %vm3431_vm2  ;;  %v3454_v46 = vand.u32 2147483647, %v7086_v56  ;;  %v3457_v1 = vor.u32 1.1754944e-38, %v3456_v10  ;;  %v3237_v61 = vld [vmem:[#allocation2 + $0x8] sm:$0xc] }
 0x50c   :  { %v3427_v33 = vsub.f32 1.0, %v3426_v55 }
 0x50d   :  { %v3409_v40 = vmul.f32 %v4355_v20, %v3408_v32  ;;  %vm3455_vm12 = vcmp.eq.f32.partialorder %v3454_v46, 8.507059e+37 }
 0x50e   :  { %v3428_v8 = vmul.f32 %v4357_v47, %v3427_v33 }
 0x50f   :  { %v4359_v0 = vpop.eup %4358  ;;  %v3410_v34 = vadd.f32 %v4355_v20, %v3409_v40 }
 0x510   :  { %v3429_v41 = vadd.f32 %v4357_v47, %v3428_v8  ;;  %v3446_v31 = vmul.f32 %v4359_v0, %v7086_v56  ;;  %v4361_v16 = vpop.eup %4360  ;;  %vm3451_vm9 = vweird.f32 %v4359_v0  ;;  %v4006_v8 = vld [vmem:[%s7234_s5 + $0x50] sm:$0xff] }
 0x511   :  { %v3414_v43 = vsel %vm3413_vm5, %v4355_v20, %v3410_v34  ;;  %vm3452_vm11 = vmor %vm3450_vm10, %vm3451_vm9  ;;  %v4009_v20 = vld [vmem:[%s7234_s5 + $0x68] sm:$0xff] }
 0x512   :  { %v3419_v60 = vsel %vm3416_vm7, %v3418_v39, %v3414_v43  ;;  %v3433_v17 = vsel %vm3432_vm6, %v4357_v47, %v3429_v41  ;;  %v3447_v44 = vsub.f32 1.0, %v3446_v31  ;;  %v3323_v23 = vpop.f32.mrf.mxu0  ;;  %v4008_v47 = vld [vmem:[%s7234_s5 + $0x60] sm:$0xff]  ;;  %v4005_v39 = vld [vmem:[%s7234_s5 + $0x48] sm:$0xff] }
 0x513   :  { %v3438_v24 = vsel %vm3435_vm8, %v3437_v42, %v3433_v17  ;;  %v3464_v29 = vmul.f32 %v4361_v16, %v3419_v60  ;;  %v3343_v50 = vpop.f32.mrf.mxu1  ;;  %v3390_v51 = vrot.slane %v3323_v23, 6  ;;  %v4004_v43 = vld [vmem:[%s7234_s5 + $0x40] sm:$0xff] }
 0x514   :  { %v3463_v38 = vmul.f32 %v3461_v54, %v3438_v24  ;;  %v3448_v30 = vmul.f32 %v4359_v0, %v3447_v44  ;;  %v3391_v36 = vrot.slane %v3343_v50, 6 }
 0x515   :  { %v3398_v48 = vadd.f32 %v3390_v51, %v3235_v3 }
 0x516   :  { %v7091_v7 = vadd.f32 %v3464_v29, %v3463_v38  ;;  %v3399_v63 = vadd.f32 %v3391_v36, %v3236_v9  ;;  %v3449_v27 = vadd.f32 %v4359_v0, %v3448_v30  ;;  %v4003_v29 = vld [vmem:[%s7234_s5 + $0x38] sm:$0xff]  ;;  %v3527_v38 = vrot.slane %v6979_v28, 2  ;;  %v4002_v9 = vld [vmem:[%s7234_s5 + $0x30] sm:$0xff]  ;;  %v4001_v28 = vld [vmem:[%s7234_s5 + $0x28] sm:$0xff] }
 0x517   :  { %v4141_v21 = vmul.f32 -1.442695, %v3398_v48 }
 0x518   :  { %4362 = vtanh.f32 %v7091_v7  ;;  %v4142_v5 = vmul.f32 -1.442695, %v3399_v63  ;;  %v3453_v59 = vsel %vm3452_vm11, %v4359_v0, %v3449_v27 }
 0x519   :  { %4364 = vpow2.f32 %v4141_v21  ;;  %v3458_v13 = vsel %vm3455_vm12, %v3457_v1, %v3453_v59  ;;  %v3999_v59 = vld [vmem:[%s7234_s5 + $0x18] sm:$0xff]  ;;  %v3998_v1 = vld [vmem:[%s7234_s5 + $0x10] sm:$0xff] }
 0x51a   :  { %v3383_v58 = vpop.f32.mrf.mxu3  ;;  %4366 = vpow2.f32 %v4142_v5  ;;  %v3363_v18 = vpop.f32.mrf.mxu2  ;;  %v4000_v5 = vld [vmem:[%s7234_s5 + $0x20] sm:$0xff] }
 0x51b   :  { %v3393_v11 = vrot.slane %v3383_v58, 6  ;;  %v3392_v56 = vrot.slane %v3363_v18, 6 }
 0x51d   :  { %v3401_v22 = vadd.f32 %v3393_v11, %v3238_v2  ;;  %v3400_v33 = vadd.f32 %v3392_v56, %v3237_v61  ;;  %v3537_v56 = vld [vmem:[#allocation2 + $0x20] sm:$0xc0] }
 0x51e   :  { %v4363_v12 = vpop.eup %4362 }
 0x51f   :  { %v3467_v49 = vmul.f32 %v4363_v12, %v3458_v13  ;;  %v4143_v25 = vmul.f32 -1.442695, %v3401_v22  ;;  %v4365_v35 = vpop.eup %4364  ;;  %v3997_v22 = vld [vmem:[%s7234_s5 + $0x8] sm:$0xff] }
 0x520   :  { %v4367_v45 = vpop.eup %4366  ;;  %v3471_v15 = vadd.f32 1.0, %v4365_v35 }
 0x521   :  { %3534 = vst [vmem:[#allocation3 + $0x10] sm:$0x30] %v3467_v49  ;;  %v3605_v14 = vrot.slane %v3467_v49, 4  ;;  %4368 = vpow2.f32 %v4143_v25  ;;  %v3490_v19 = vadd.f32 1.0, %v4367_v45  ;;  %v3996_v25 = vld [vmem:[%s7234_s5] sm:$0xff]  ;;  %v3992_v45 = vld [vmem:[#allocation3 + $0x18] sm:$0xff] }
 0x522   :  { %4370 = vrcp.f32 %v3471_v15  ;;  %v3483_v34 = vand.u32 2147483648, %v3471_v15  ;;  %v3481_v26 = vand.u32 2147483647, %v3471_v15  ;;  %vm3477_vm15 = vweird.f32 %v3471_v15 }
 0x523   :  { %3623 = vmatmul.f32.vlgmr.msrb.gmra.mxu0 %v3605_v14  ;;  %3643 = vmatmul.f32.vlgmr.msrb.gmra.mxu1 %v3605_v14  ;;  %4372 = vrcp.f32 %v3490_v19  ;;  %v3502_v41 = vand.u32 2147483648, %v3490_v19  ;;  %v3500_v42 = vand.u32 2147483647, %v3490_v19  ;;  %vm3496_vm0 = vweird.f32 %v3490_v19 }
 0x524   :  { %3663 = vmatmul.f32.vlgmr.msrb.gmra.mxu2 %v3605_v14  ;;  %3683 = vmatmul.f32.vlgmr.msrb.gmra.mxu3 %v3605_v14  ;;  %v3484_v17 = vor.u32 1.1754944e-38, %v3483_v34  ;;  %vm3482_vm3 = vcmp.eq.f32.partialorder %v3481_v26, 8.507059e+37 }
 0x525   :  { %4032 = vmatpush.msrb.mxu0 %v4011_v52  ;;  %v3503_v23 = vor.u32 1.1754944e-38, %v3502_v41  ;;  %vm3501_vm4 = vcmp.eq.f32.partialorder %v3500_v42, 8.507059e+37  ;;  %v3538_v41 = vld [vmem:[#allocation2 + $0x10] sm:$0xc0] }
 0x527   :  { %4033 = vmatpush.msrb.mxu0 %v4010_v53  ;;  %v4369_v62 = vpop.eup %4368  ;;  %v3536_v53 = vld [vmem:[#allocation2 + $0x40] sm:$0xc0] }
 0x528   :  { %v7109_v55 = vadd.f32 1.0, %v4369_v62  ;;  %v4371_v32 = vpop.eup %4370 }
 0x529   :  { %4034 = vmatpush.msrb.mxu0 %v4009_v20  ;;  %v4373_v57 = vpop.eup %4372  ;;  %v3473_v40 = vmul.f32 %v4371_v32, %v3471_v15  ;;  %vm3478_vm13 = vweird.f32 %v4371_v32 }
 0x52a   :  { %4374 = vrcp.f32 %v7109_v55  ;;  %v3492_v6 = vmul.f32 %v4373_v57, %v3490_v19  ;;  %vm3497_vm14 = vweird.f32 %v4373_v57  ;;  %vm3479_vm1 = vmor %vm3477_vm15, %vm3478_vm13  ;;  %v3522_v58 = vand.u32 2147483648, %v7109_v55 }
 0x52b   :  { %4035 = vmatpush.msrb.mxu0 %v4008_v47  ;;  %v3474_v4 = vsub.f32 1.0, %v3473_v40  ;;  %4376 = vtanh.f32 %v3400_v33  ;;  %vm3498_vm2 = vmor %vm3496_vm0, %vm3497_vm14  ;;  %vm3516_vm6 = vweird.f32 %v7109_v55  ;;  %v3520_v11 = vand.u32 2147483647, %v7109_v55  ;;  %v3539_v33 = vld [vmem:[#allocation2 + $0x38] sm:$0xc0] }
 0x52c   :  { %v3493_v0 = vsub.f32 1.0, %v3492_v6  ;;  %v3523_v12 = vor.u32 1.1754944e-38, %v3522_v58 }
 0x52d   :  { %4036 = vmatpush.msrb.mxu0 %v4007_v37  ;;  %v3475_v31 = vmul.f32 %v4371_v32, %v3474_v4  ;;  %vm3521_vm8 = vcmp.eq.f32.partialorder %v3520_v11, 8.507059e+37 }
 0x52e   :  { %v3494_v54 = vmul.f32 %v4373_v57, %v3493_v0 }
 0x52f   :  { %4037 = vmatpush.msrb.mxu0 %v4006_v8  ;;  %v3476_v60 = vadd.f32 %v4371_v32, %v3475_v31 }
 0x530   :  { %v4375_v16 = vpop.eup %4374  ;;  %v3495_v44 = vadd.f32 %v4373_v57, %v3494_v54 }
 0x531   :  { %4038 = vmatpush.msrb.mxu0 %v4005_v39  ;;  %v3512_v24 = vmul.f32 %v4375_v16, %v7109_v55  ;;  %v3480_v50 = vsel %vm3479_vm1, %v4371_v32, %v3476_v60  ;;  %v4377_v30 = vpop.eup %4376  ;;  %vm3517_vm5 = vweird.f32 %v4375_v16  ;;  %v4027_v60 = vld [vmem:[%s7234_s5 + $0xf8] sm:$0xff] }
 0x532   :  { %v3485_v51 = vsel %vm3482_vm3, %v3484_v17, %v3480_v50  ;;  %v3499_v36 = vsel %vm3498_vm2, %v4373_v57, %v3495_v44  ;;  %vm3518_vm7 = vmor %vm3516_vm6, %vm3517_vm5  ;;  %4055 = vmatpush.msrb.mxu1 %v4027_v60  ;;  %v4013_v60 = vld [vmem:[%s7234_s5 + $0x88] sm:$0xff] }
 0x533   :  { %4039 = vmatpush.msrb.mxu0 %v4004_v43  ;;  %v3513_v3 = vsub.f32 1.0, %v3512_v24  ;;  %v3504_v48 = vsel %vm3501_vm4, %v3503_v23, %v3499_v36  ;;  %v3530_v63 = vmul.f32 %v4377_v30, %v3485_v51  ;;  %v4025_v36 = vld [vmem:[%s7234_s5 + $0xe8] sm:$0xff] }
 0x534   :  { %v3529_v27 = vmul.f32 %v3527_v38, %v3504_v48 }
 0x535   :  { %4040 = vmatpush.msrb.mxu0 %v4003_v29  ;;  %v3514_v10 = vmul.f32 %v4375_v16, %v3513_v3  ;;  %v4026_v29 = vld [vmem:[%s7234_s5 + $0xf0] sm:$0xff] }
 0x536   :  { %v7135_v21 = vadd.f32 %v3530_v63, %v3529_v27  ;;  %4056 = vmatpush.msrb.mxu1 %v4026_v29  ;;  %v3705_v29 = vld [vmem:[#allocation2 + $0x8] sm:$0x3] }
 0x537   :  { %4041 = vmatpush.msrb.mxu0 %v4002_v9  ;;  %v3515_v46 = vadd.f32 %v4375_v16, %v3514_v10  ;;  %v3917_v10 = vrot.slane %v7091_v7, 6 }
 0x538   :  { %4378 = vtanh.f32 %v7135_v21  ;;  %4057 = vmatpush.msrb.mxu1 %v4025_v36 }
 0x539   :  { %4042 = vmatpush.msrb.mxu0 %v4001_v28  ;;  %v3519_v2 = vsel %vm3518_vm7, %v4375_v16, %v3515_v46  ;;  %v4024_v28 = vld [vmem:[%s7234_s5 + $0xe0] sm:$0xff] }
 0x53a   :  { %v3524_v49 = vsel %vm3521_vm8, %v3523_v12, %v3519_v2  ;;  %4058 = vmatpush.msrb.mxu1 %v4024_v28  ;;  %v4023_v2 = vld [vmem:[%s7234_s5 + $0xd8] sm:$0xff] }
 0x53b   :  { %4043 = vmatpush.msrb.mxu0 %v4000_v5 }
 0x53c   :  { %4059 = vmatpush.msrb.mxu1 %v4023_v2 }
 0x53d   :  { %4044 = vmatpush.msrb.mxu0 %v3999_v59 }
 0x53e   :  { %v4379_v13 = vpop.eup %4378 }
 0x53f   :  { %4045 = vmatpush.msrb.mxu0 %v3998_v1  ;;  %v3533_v35 = vmul.f32 %v4379_v13, %v3524_v49  ;;  %v3703_v49 = vld [vmem:[#allocation2 + $0x50] sm:$0x3] }
 0x541   :  { %4046 = vmatpush.msrb.mxu0 %v3997_v22  ;;  %3535 = vst [vmem:[#allocation3 + $0x8] sm:$0xc] %v3533_v35  ;;  %v3772_v14 = vrot.slane %v3533_v35, 2  ;;  %v3704_v35 = vld [vmem:[#allocation2 + $0x68] sm:$0x3] }
 0x543   :  { %4047 = vmatpush.msrb.mxu0 %v3996_v25  ;;  %3810 = vmatmul.f32.vlgmr.msra.gmra.mxu1 %v3772_v14 }
 0x544   :  { %3790 = vmatmul.f32.vlgmr.msra.gmra.mxu0 %v3772_v14  ;;  %3830 = vmatmul.f32.vlgmr.msra.gmra.mxu2 %v3772_v14 }
 0x545   :  { %3850 = vmatmul.f32.vlgmr.msra.gmra.mxu3 %v3772_v14 }
 0x54c   :  { %4048 = vmatmul.f32.vlgmr.msrb.gmra.mxu0 %v3992_v45  ;;  %v4022_v45 = vld [vmem:[%s7234_s5 + $0xd0] sm:$0xff] }
 0x54d   :  { %4060 = vmatpush.msrb.mxu1 %v4022_v45 }
 0x5a0   :  { %v3624_v15 = vpop.f32.mrf.mxu0  ;;  %v3644_v52 = vpop.f32.mrf.mxu1 }
 0x5a1   :  { %v3691_v19 = vrot.slane %v3624_v15, 2  ;;  %v3692_v18 = vrot.slane %v3644_v52, 2 }
 0x5a3   :  { %v3699_v20 = vadd.f32 %v3691_v19, %v3536_v53  ;;  %v3700_v62 = vadd.f32 %v3692_v18, %v3537_v56  ;;  %v4021_v18 = vld [vmem:[%s7234_s5 + $0xc8] sm:$0xff] }
 0x5a4   :  { %4061 = vmatpush.msrb.mxu1 %v4021_v18 }
 0x5a5   :  { %v4144_v47 = vmul.f32 -1.442695, %v3699_v20  ;;  %v4145_v61 = vmul.f32 -1.442695, %v3700_v62 }
 0x5a7   :  { %4380 = vpow2.f32 %v4144_v47  ;;  %v3684_v55 = vpop.f32.mrf.mxu3  ;;  %v3664_v0 = vpop.f32.mrf.mxu2  ;;  %v4020_v47 = vld [vmem:[%s7234_s5 + $0xc0] sm:$0xff] }
 0x5a8   :  { %4382 = vpow2.f32 %v4145_v61  ;;  %v3694_v32 = vrot.slane %v3684_v55, 2  ;;  %v3693_v34 = vrot.slane %v3664_v0, 2  ;;  %4062 = vmatpush.msrb.mxu1 %v4020_v47  ;;  %v4019_v55 = vld [vmem:[%s7234_s5 + $0xb8] sm:$0xff] }
 0x5aa   :  { %v3702_v37 = vadd.f32 %v3694_v32, %v3539_v33  ;;  %v3701_v54 = vadd.f32 %v3693_v34, %v3538_v41  ;;  %v3706_v33 = vld [vmem:[#allocation2 + $0x48] sm:$0x3]  ;;  %4063 = vmatpush.msrb.mxu1 %v4019_v55 }
 0x5ab   :  { %v4017_v34 = vld [vmem:[%s7234_s5 + $0xa8] sm:$0xff] }
 0x5ac   :  { %v4146_v57 = vmul.f32 -1.442695, %v3702_v37 }
 0x5ad   :  { %v4381_v40 = vpop.eup %4380 }
 0x5ae   :  { %v4383_v6 = vpop.eup %4382  ;;  %v3861_v8 = vadd.f32 1.0, %v4381_v40  ;;  %4384 = vpow2.f32 %v4146_v57 }
 0x5af   :  { %v3880_v4 = vadd.f32 1.0, %v4383_v6  ;;  %v4018_v6 = vld [vmem:[%s7234_s5 + $0xb0] sm:$0xff] }
 0x5b0   :  { %4386 = vrcp.f32 %v3861_v8  ;;  %v3873_v24 = vand.u32 2147483648, %v3861_v8  ;;  %v3871_v50 = vand.u32 2147483647, %v3861_v8  ;;  %vm3867_vm11 = vweird.f32 %v3861_v8  ;;  %4064 = vmatpush.msrb.mxu1 %v4018_v6 }
 0x5b1   :  { %4388 = vrcp.f32 %v3880_v4  ;;  %v3892_v38 = vand.u32 2147483648, %v3880_v4  ;;  %v3890_v51 = vand.u32 2147483647, %v3880_v4  ;;  %vm3886_vm12 = vweird.f32 %v3880_v4 }
 0x5b2   :  { %v3874_v48 = vor.u32 1.1754944e-38, %v3873_v24  ;;  %vm3872_vm15 = vcmp.eq.f32.partialorder %v3871_v50, 8.507059e+37  ;;  %4065 = vmatpush.msrb.mxu1 %v4017_v34  ;;  %v4012_v24 = vld [vmem:[%s7234_s5 + $0x80] sm:$0xff] }
 0x5b3   :  { %v3893_v5 = vor.u32 1.1754944e-38, %v3892_v38  ;;  %vm3891_vm0 = vcmp.eq.f32.partialorder %v3890_v51, 8.507059e+37 }
 0x5b4   :  { %v4385_v39 = vpop.eup %4384 }
 0x5b5   :  { %v7156_v31 = vadd.f32 1.0, %v4385_v39 }
 0x5b6   :  { %v4387_v26 = vpop.eup %4386 }
 0x5b7   :  { %v4389_v42 = vpop.eup %4388  ;;  %v3863_v43 = vmul.f32 %v4387_v26, %v3861_v8  ;;  %4390 = vrcp.f32 %v7156_v31  ;;  %vm3868_vm9 = vweird.f32 %v4387_v26  ;;  %v3912_v62 = vand.u32 2147483648, %v7156_v31 }
 0x5b8   :  { %v3882_v16 = vmul.f32 %v4389_v42, %v3880_v4  ;;  %4392 = vtanh.f32 %v3701_v54  ;;  %vm3887_vm10 = vweird.f32 %v4389_v42  ;;  %vm3869_vm13 = vmor %vm3867_vm11, %vm3868_vm9  ;;  %vm3906_vm2 = vweird.f32 %v7156_v31  ;;  %v4016_v54 = vld [vmem:[%s7234_s5 + $0xa0] sm:$0xff] }
 0x5b9   :  { %v3864_v17 = vsub.f32 1.0, %v3863_v43  ;;  %vm3888_vm14 = vmor %vm3886_vm12, %vm3887_vm10  ;;  %v3910_v61 = vand.u32 2147483647, %v7156_v31  ;;  %v3913_v57 = vor.u32 1.1754944e-38, %v3912_v62  ;;  %4066 = vmatpush.msrb.mxu1 %v4016_v54  ;;  %v4015_v43 = vld [vmem:[%s7234_s5 + $0x98] sm:$0xff] }
 0x5ba   :  { %v3883_v44 = vsub.f32 1.0, %v3882_v16  ;;  %v4014_v16 = vld [vmem:[%s7234_s5 + $0x90] sm:$0xff] }
 0x5bb   :  { %v3865_v23 = vmul.f32 %v4387_v26, %v3864_v17  ;;  %vm3911_vm4 = vcmp.eq.f32.partialorder %v3910_v61, 8.507059e+37  ;;  %4067 = vmatpush.msrb.mxu1 %v4015_v43 }
 0x5bc   :  { %v3884_v30 = vmul.f32 %v4389_v42, %v3883_v44 }
 0x5bd   :  { %v7168_v3 = vpop.eup %4390  ;;  %v3866_v9 = vadd.f32 %v4387_v26, %v3865_v23  ;;  %4068 = vmatpush.msrb.mxu1 %v4014_v16 }
 0x5be   :  { %v3885_v63 = vadd.f32 %v4389_v42, %v3884_v30  ;;  %v3902_v27 = vmul.f32 %v7168_v3, %v7156_v31  ;;  %v4393_v58 = vpop.eup %4392  ;;  %vm3907_vm1 = vweird.f32 %v7168_v3 }
 0x5bf   :  { %v3870_v46 = vsel %vm3869_vm13, %v4387_v26, %v3866_v9  ;;  %vm3908_vm3 = vmor %vm3906_vm2, %vm3907_vm1  ;;  %4069 = vmatpush.msrb.mxu1 %v4013_v60 }
 0x5c0   :  { %v3875_v59 = vsel %vm3872_vm15, %v3874_v48, %v3870_v46  ;;  %v3889_v11 = vsel %vm3888_vm14, %v4389_v42, %v3885_v63  ;;  %v3903_v1 = vsub.f32 1.0, %v3902_v27  ;;  %v3811_v14 = vpop.f32.mrf.mxu1 }
 0x5c1   :  { %v3894_v12 = vsel %vm3891_vm0, %v3893_v5, %v3889_v11  ;;  %v3920_v22 = vmul.f32 %v4393_v58, %v3875_v59  ;;  %v3791_v25 = vpop.f32.mrf.mxu0  ;;  %v3855_v52 = vadd.f32 %v3811_v14, %v3704_v35  ;;  %4070 = vmatpush.msrb.mxu1 %v4012_v24 }
 0x5c2   :  { %v3919_v13 = vmul.f32 %v3917_v10, %v3894_v12  ;;  %v3904_v7 = vmul.f32 %v7168_v3, %v3903_v1  ;;  %v3854_v15 = vadd.f32 %v3791_v25, %v3703_v49 }
 0x5c3   :  { %v4148_v20 = vmul.f32 -1.442695, %v3855_v52 }
 0x5c4   :  { %v3921_v19 = vadd.f32 %v3920_v22, %v3919_v13  ;;  %v3905_v53 = vadd.f32 %v7168_v3, %v3904_v7  ;;  %v4147_v56 = vmul.f32 -1.442695, %v3854_v15  ;;  %v3983_v13 = vrot.slane %v7135_v21, 2 }
 0x5c6   :  { %4394 = vtanh.f32 %v3921_v19  ;;  %v3909_v32 = vsel %vm3908_vm3, %v7168_v3, %v3905_v53 }
 0x5c7   :  { %4396 = vpow2.f32 %v4147_v56  ;;  %v3914_v4 = vsel %vm3911_vm4, %v3913_v57, %v3909_v32  ;;  %v3831_v17 = vpop.f32.mrf.mxu2  ;;  %v3995_v32 = vld [vmem:[#allocation3] sm:$0xff] }
 0x5c8   :  { %4398 = vpow2.f32 %v4148_v20  ;;  %v3851_v37 = vpop.f32.mrf.mxu3  ;;  %v3856_v50 = vadd.f32 %v3831_v17, %v3705_v29 }
 0x5c9   :  { %v3857_v40 = vadd.f32 %v3851_v37, %v3706_v33  ;;  %v4155_v33 = vld [vmem:[%s7235_s6] ss:$0 sm:$0xff]  ;;  %v4049_v37 = vpop.f32.mrf.mxu0 }
 0x5ca   :  { %v4050_v57 = vadd.f32 %v4155_v33, %v4049_v37 }
 0x5cb   :  { %v4149_v0 = vmul.f32 -1.442695, %v3857_v40 }
 0x5cc   :  { %v4395_v8 = vpop.eup %4394 }
 0x5cd   :  { %v4397_v39 = vpop.eup %4396  ;;  %v3923_v41 = vmul.f32 %v4395_v8, %v3914_v4  ;;  %4400 = vpow2.f32 %v4149_v0 }
 0x5ce   :  { %v4399_v31 = vpop.eup %4398  ;;  %v3927_v26 = vadd.f32 1.0, %v4397_v39 }
 0x5cf   :  { %3990 = vst [vmem:[#allocation3 + $0x10] sm:$0xc0] %v3923_v41  ;;  %v3946_v42 = vadd.f32 1.0, %v4399_v31 }
 0x5d0   :  { %4402 = vrcp.f32 %v3927_v26  ;;  %v3939_v63 = vand.u32 2147483648, %v3927_v26  ;;  %v3937_v10 = vand.u32 2147483647, %v3927_v26  ;;  %vm3933_vm7 = vweird.f32 %v3927_v26 }
 0x5d1   :  { %4404 = vrcp.f32 %v3946_v42  ;;  %v3958_v27 = vand.u32 2147483648, %v3946_v42  ;;  %v3956_v46 = vand.u32 2147483647, %v3946_v42  ;;  %vm3952_vm8 = vweird.f32 %v3946_v42 }
 0x5d2   :  { %v3940_v11 = vor.u32 1.1754944e-38, %v3939_v63  ;;  %vm3938_vm11 = vcmp.eq.f32.partialorder %v3937_v10, 8.507059e+37 }
 0x5d3   :  { %v4401_v44 = vpop.eup %4400  ;;  %v3959_v12 = vor.u32 1.1754944e-38, %v3958_v27  ;;  %vm3957_vm12 = vcmp.eq.f32.partialorder %v3956_v46, 8.507059e+37 }
 0x5d4   :  { %v3966_v38 = vadd.f32 1.0, %v4401_v44 }
 0x5d6   :  { %v4403_v23 = vpop.eup %4402  ;;  %v3994_v30 = vld [vmem:[#allocation3 + $0x10] sm:$0xff]  ;;  %4406 = vrcp.f32 %v3966_v38  ;;  %v3978_v53 = vand.u32 2147483648, %v3966_v38  ;;  %vm3972_vm14 = vweird.f32 %v3966_v38  ;;  %v3976_v56 = vand.u32 2147483647, %v3966_v38 }
 0x5d7   :  { %v4405_v51 = vpop.eup %4404  ;;  %v3929_v36 = vmul.f32 %v4403_v23, %v3927_v26  ;;  %4051 = vmatmul.f32.gmra.mxu0 %v3994_v30  ;;  %4408 = vtanh.f32 %v3856_v50  ;;  %vm3934_vm5 = vweird.f32 %v4403_v23 }
 0x5d8   :  { %v3948_v3 = vmul.f32 %v4405_v51, %v3946_v42  ;;  %vm3953_vm6 = vweird.f32 %v4405_v51  ;;  %vm3935_vm9 = vmor %vm3933_vm7, %vm3934_vm5  ;;  %v3979_v62 = vor.u32 1.1754944e-38, %v3978_v53  ;;  %vm3977_vm0 = vcmp.eq.f32.partialorder %v3976_v56, 8.507059e+37 }
 0x5d9   :  { %v3930_v9 = vsub.f32 1.0, %v3929_v36  ;;  %vm3954_vm10 = vmor %vm3952_vm8, %vm3953_vm6 }
 0x5da   :  { %v3949_v48 = vsub.f32 1.0, %v3948_v3 }
 0x5db   :  { %v3931_v28 = vmul.f32 %v4403_v23, %v3930_v9 }
 0x5dc   :  { %v3950_v5 = vmul.f32 %v4405_v51, %v3949_v48  ;;  %v4407_v58 = vpop.eup %4406 }
 0x5dd   :  { %v3932_v59 = vadd.f32 %v4403_v23, %v3931_v28  ;;  %v3968_v2 = vmul.f32 %v4407_v58, %v3966_v38  ;;  %v4409_v7 = vpop.eup %4408  ;;  %vm3973_vm13 = vweird.f32 %v4407_v58 }
 0x5de   :  { %v3951_v1 = vadd.f32 %v4405_v51, %v3950_v5  ;;  %vm3974_vm15 = vmor %vm3972_vm14, %vm3973_vm13 }
 0x5df   :  { %v3936_v22 = vsel %vm3935_vm9, %v4403_v23, %v3932_v59  ;;  %v3969_v35 = vsub.f32 1.0, %v3968_v2 }
 0x5e0   :  { %v3941_v49 = vsel %vm3938_vm11, %v3940_v11, %v3936_v22  ;;  %v3955_v25 = vsel %vm3954_vm10, %v4405_v51, %v3951_v1 }
 0x5e1   :  { %v3960_v14 = vsel %vm3957_vm12, %v3959_v12, %v3955_v25  ;;  %v3986_v45 = vmul.f32 %v4409_v7, %v3941_v49  ;;  %v3970_v52 = vmul.f32 %v4407_v58, %v3969_v35 }
 0x5e2   :  { %v3985_v15 = vmul.f32 %v3983_v13, %v3960_v14 }
 0x5e3   :  { %v3971_v18 = vadd.f32 %v4407_v58, %v3970_v52 }
 0x5e4   :  { %v3987_v19 = vadd.f32 %v3986_v45, %v3985_v15 }
 0x5e5   :  { %v3975_v20 = vsel %vm3974_vm15, %v4407_v58, %v3971_v18 }
 0x5e6   :  { %4410 = vtanh.f32 %v3987_v19  ;;  %v3980_v47 = vsel %vm3977_vm0, %v3979_v62, %v3975_v20 }
 0x5ec   :  { %v4411_v21 = vpop.eup %4410 }
 0x5ed   :  { %v3989_v61 = vmul.f32 %v4411_v21, %v3980_v47 }
 0x5ef   :  { %3991 = vst [vmem:[#allocation3 + $0x8] sm:$0x3] %v3989_v61 }
 0x5f6   :  { %v3993_v55 = vld [vmem:[#allocation3 + $0x8] sm:$0xff] }
 0x5f7   :  { %4071 = vmatmul.f32.vlgmr.msrb.gmra.mxu1 %v3993_v55 }
 0x5ff   :  { %4074 = vmatmul.f32.gmra.mxu1 %v3995_v32 }
 0x654   :  { %v4052_v8 = vpop.f32.mrf.mxu0 }
 0x655   :  { %v4053_v4 = vadd.f32 %v4155_v33, %v4052_v8 }
 0x674   :  { %v4072_v40 = vpop.f32.mrf.mxu1 }
 0x675   :  { %v4073_v6 = vadd.f32 %v4072_v40, %v4050_v57 }
 0x677   :  { %4078 = vst [vmem:[%s7236_s7] sm:$0xff] %v4073_v6 }
 0x67c   :  { %v4075_v0 = vpop.f32.mrf.mxu1 }
 0x67d   :  { %v4076_v34 = vadd.f32 %v4075_v0, %v4053_v4 }
 0x67f   :  { %4079 = vst [vmem:[%s7236_s7 + $0x8] sm:$0xff] %v4076_v34 }
 0x680   :  { %4084 = vsyncpa [#allocation5], 1 }
 0x681   :  { %4085 = vsyncpa [#allocation7], 1 }

</bundles_post_ra>
